<compile_context>
chip_gen: v7x
topology: tpu7x:2x2x1
jax: 0.10.0
libtpu: 0.0.40
codegen_flags: <defaults>
</compile_context>

<pallas_src>
import functools

import jax
import jax.numpy as jnp
from jax import lax
from jax.experimental import pallas as pl
from jax.experimental.pallas import tpu as pltpu

HIDDEN = 128  # self.nhidden in Net


# ----------------------------------------------------------------------------
# In-kernel LSTM cell (gate columns pre-permuted to [i, f, o, g]).
# ----------------------------------------------------------------------------
def _lstm_cell(gates, c):
    """gates: (B, 4H) f32, column order [i, f, o, g]; c: (B, H) f32."""
    H = c.shape[-1]
    sig = jax.nn.sigmoid(gates[:, 0:3 * H])      # one EUP pass for i, f, o
    g = jnp.tanh(gates[:, 3 * H:4 * H])          # one EUP pass for g
    i = sig[:, 0:H]
    f = sig[:, H:2 * H]
    o = sig[:, 2 * H:3 * H]
    c_new = f * c + i * g
    h_new = o * jnp.tanh(c_new)
    return h_new, c_new


# ----------------------------------------------------------------------------
# Fused whole-network kernel: encoder BiLSTM -> decoder BiLSTM -> heads.
# ----------------------------------------------------------------------------
def _net_kernel(x_ref, ewih_ref, ewhh_ref, eb_ref,
                dwih_ref, dwhh_ref, db_ref,
                w1_ref, b1_ref, wf2_ref, bf2_ref, wa2_ref, ba2_ref,
                dec_ref, cat_ref, fut_ref, aux_ref,
                xg_sc, enc_sc,
                *, hidden, seq_len, batch):
    H, S, B = hidden, seq_len, batch

    # ---------------- Encoder bidirectional LSTM (zero initial state) ----------------
    # Hoisted input projection for BOTH directions in one MXU matmul:
    # (S*B, D) x (D, 8H) -> (S*B, 8H), columns = [forward 4H | backward 4H].
    xg_sc[...] = (jnp.dot(x_ref[...], ewih_ref[...],
                          preferred_element_type=jnp.float32) + eb_ref[...])

    ewhh = ewhh_ref[...]                          # (H, 8H) bf16, loop-invariant
    hf = jnp.zeros((B, H), jnp.float32)
    cf = jnp.zeros((B, H), jnp.float32)
    hb = jnp.zeros((B, H), jnp.float32)
    cb = jnp.zeros((B, H), jnp.float32)

    # TODO(synk): switch to lax.fori_loop(..., unroll=k) if S grows beyond ~16
    # (static Python unroll does not bound live ranges at larger sequence lengths).
    for t in range(S):                            # forward + backward interleaved per step
        tb = S - 1 - t                            # backward-direction timestep
        gf = xg_sc[t * B:(t + 1) * B, 0:4 * H] + jnp.dot(
            hf.astype(jnp.bfloat16), ewhh[:, 0:4 * H],
            preferred_element_type=jnp.float32)
        gb = xg_sc[tb * B:(tb + 1) * B, 4 * H:8 * H] + jnp.dot(
            hb.astype(jnp.bfloat16), ewhh[:, 4 * H:8 * H],
            preferred_element_type=jnp.float32)
        hf, cf = _lstm_cell(gf, cf)
        hb, cb = _lstm_cell(gb, cb)
        enc_sc[t * B:(t + 1) * B, 0:H] = hf       # encoder output stays in VMEM
        enc_sc[tb * B:(tb + 1) * B, H:2 * H] = hb

    # ---------------- Decoder bidirectional LSTM ----------------
    # DecoderRNN: x = relu(x); LSTM seeded with encoder final (hidden, cell_state).
    dec_in = jnp.maximum(enc_sc[...], 0.0).astype(jnp.bfloat16)
    xg_sc[...] = (jnp.dot(dec_in, dwih_ref[...],
                          preferred_element_type=jnp.float32) + db_ref[...])

    dwhh = dwhh_ref[...]                          # (H, 8H) bf16
    dhf, dcf, dhb, dcb = hf, cf, hb, cb
    for t in range(S):
        tb = S - 1 - t
        gf = xg_sc[t * B:(t + 1) * B, 0:4 * H] + jnp.dot(
            dhf.astype(jnp.bfloat16), dwhh[:, 0:4 * H],
            preferred_element_type=jnp.float32)
        gb = xg_sc[tb * B:(tb + 1) * B, 4 * H:8 * H] + jnp.dot(
            dhb.astype(jnp.bfloat16), dwhh[:, 4 * H:8 * H],
            preferred_element_type=jnp.float32)
        dhf, dcf = _lstm_cell(gf, dcf)
        dhb, dcb = _lstm_cell(gb, dcb)
        dec_ref[t * B:(t + 1) * B, 0:H] = dhf
        dec_ref[tb * B:(tb + 1) * B, H:2 * H] = dhb

    # ---------------- cat_hidden + FC heads (BN folded, Dropout = identity) ----------------
    # cat_hidden = torch.cat([h for h in hidden], dim=-1)  (encoder final hidden)
    cat_ref[:, 0:H] = hf
    cat_ref[:, H:2 * H] = hb

    cat_bf = jnp.concatenate([hf, hb], axis=-1).astype(jnp.bfloat16)     # (B, 2H)
    # Shared first layer for both heads: w1 columns = [FuturePredFc nh | AuxFc nh].
    z = (jnp.dot(cat_bf, w1_ref[...], preferred_element_type=jnp.float32)
         + b1_ref[...])                                                  # (B, 2*nh)
    z_bf = z.astype(jnp.bfloat16)
    nh = wf2_ref.shape[0]
    # FuturePredFc: Linear -> Sigmoid
    fut_ref[...] = jax.nn.sigmoid(
        jnp.dot(z_bf[:, 0:nh], wf2_ref[...],
                preferred_element_type=jnp.float32) + bf2_ref[...])
    # AuxFc: Linear (raw logits)
    aux_ref[...] = (jnp.dot(z_bf[:, nh:2 * nh], wa2_ref[...],
                            preferred_element_type=jnp.float32) + ba2_ref[...])


# ----------------------------------------------------------------------------
# Parameter init (synthetic; no checkpoint load) + prep (permute/stack/fold/cast)
# ----------------------------------------------------------------------------
def _permute_gates(w):
    """PyTorch LSTM gate column order (i, f, g, o) -> kernel order (i, f, o, g)."""
    i, f, g, o = jnp.split(w, 4, axis=-1)
    return jnp.concatenate([i, f, o, g], axis=-1)


def _init_lstm_dir(key, in_dim, hidden):
    k1, k2, k3 = jax.random.split(key, 3)
    w_ih = 0.1 * jax.random.normal(k1, (in_dim, 4 * hidden), jnp.float32)
    w_hh = 0.1 * jax.random.normal(k2, (hidden, 4 * hidden), jnp.float32)
    b = 0.01 * jax.random.normal(k3, (1, 4 * hidden), jnp.float32)   # b_ih + b_hh folded
    return w_ih, w_hh, b


def make_bilstm_params(key, in_dim, hidden):
    kf, kb = jax.random.split(key)
    wf_ih, wf_hh, bf = [_permute_gates(w) for w in _init_lstm_dir(kf, in_dim, hidden)]
    wb_ih, wb_hh, bb = [_permute_gates(w) for w in _init_lstm_dir(kb, in_dim, hidden)]
    return {
        "wih": jnp.concatenate([wf_ih, wb_ih], axis=-1).astype(jnp.bfloat16),  # (D, 8H)
        "whh": jnp.concatenate([wf_hh, wb_hh], axis=-1).astype(jnp.bfloat16),  # (H, 8H)
        "b": jnp.concatenate([bf, bb], axis=-1),                               # (1, 8H) f32
    }


def _init_head_raw(key, idim, odim, nhidden=128):
    k1, k2, k3, k4 = jax.random.split(key, 4)
    w1 = 0.1 * jax.random.normal(k1, (idim, nhidden), jnp.float32)
    b1 = 0.01 * jax.random.normal(k2, (1, nhidden), jnp.float32)
    gamma = jnp.ones((1, nhidden), jnp.float32)
    beta = jnp.zeros((1, nhidden), jnp.float32)
    mean = jnp.zeros((1, nhidden), jnp.float32)
    var = jnp.ones((1, nhidden), jnp.float32)
    w2 = 0.1 * jax.random.normal(k3, (nhidden, odim), jnp.float32)
    b2 = 0.01 * jax.random.normal(k4, (1, odim), jnp.float32)
    return w1, b1, gamma, beta, mean, var, w2, b2


def _fold_bn(w1, b1, gamma, beta, mean, var, eps=1e-5):
    scale = gamma * lax.rsqrt(var + eps)
    return w1 * scale, (b1 - mean) * scale + beta


def make_head_params(key_future, key_aux, idim, num_variables, num_aux_tasks):
    fw1, fb1, fg, fbt, fm, fv, fw2, fb2 = _init_head_raw(key_future, idim, num_variables)
    aw1, ab1, ag, abt, am, av, aw2, ab2 = _init_head_raw(key_aux, idim, num_aux_tasks)
    fw1, fb1 = _fold_bn(fw1, fb1, fg, fbt, fm, fv)   # BN(eval) folded into Linear1
    aw1, ab1 = _fold_bn(aw1, ab1, ag, abt, am, av)
    return {
        "w1": jnp.concatenate([fw1, aw1], axis=1).astype(jnp.bfloat16),  # (2H, 2*nh)
        "b1": jnp.concatenate([fb1, ab1], axis=1),                       # (1, 2*nh) f32
        "wf2": fw2.astype(jnp.bfloat16), "bf2": fb2,                     # FuturePredFc L2
        "wa2": aw2.astype(jnp.bfloat16), "ba2": ab2,                     # AuxFc L2
    }


# ----------------------------------------------------------------------------
# Net.forward
# ----------------------------------------------------------------------------
def net_forward(x, params):
    """x: (B, T, 3*num_variables).  Returns (cat_hidden, y, aux_pred_dict)."""
    B, T, _ = x.shape
    H = HIDDEN

    # TODO(synk): SingleChannelInterp / CrossChannelInterp source not provided in the
    # module listing; treated as identity on the pre-interpolated input.
    interp_x = jnp.transpose(x, (1, 0, 2))            # .permute(1, 0, 2) -> (T, B, F)

    # Pad batch to the 8-row sublane tile; padded rows are independent and sliced off.
    B_pad = ((B + 7) // 8) * 8
    if B_pad != B:
        interp_x = jnp.pad(interp_x, ((0, 0), (0, B_pad - B), (0, 0)))
    D = interp_x.shape[-1]
    x2d = interp_x.reshape(T * B_pad, D).astype(jnp.bfloat16)   # cast once, in the wrapper

    enc, dec, hd = params["enc"], params["dec"], params["heads"]
    V = hd["wf2"].shape[1]
    A = hd["wa2"].shape[1]

    kernel = functools.partial(_net_kernel, hidden=H, seq_len=T, batch=B_pad)
    vmem_spec = pl.BlockSpec(memory_space=pltpu.MemorySpace.VMEM)

    # TODO(synk): at production T/B re-derive VMEM residency (x, xg_sc, enc_out,
    # dec_out all live at once) against v7x's 64 MiB and chunk the input projection
    # over time if needed.  At these shapes total footprint is ~1 MB.
    dec_out2d, cat_p, fut_p, aux_p = pl.pallas_call(
        kernel,
        in_specs=[vmem_spec] * 13,
        out_specs=[vmem_spec] * 4,
        out_shape=[
            jax.ShapeDtypeStruct((T * B_pad, 2 * H), jnp.float32),   # decoder out_seq
            jax.ShapeDtypeStruct((B_pad, 2 * H), jnp.float32),       # cat_hidden
            jax.ShapeDtypeStruct((B_pad, V), jnp.float32),           # future_vital
            jax.ShapeDtypeStruct((B_pad, A), jnp.float32),           # aux logits
        ],
        scratch_shapes=[
            pltpu.VMEM((T * B_pad, 8 * H), jnp.float32),   # gate pre-activations (enc/dec)
            pltpu.VMEM((T * B_pad, 2 * H), jnp.float32),   # encoder output, VMEM resident
        ],
    )(x2d, enc["wih"], enc["whh"], enc["b"],
      dec["wih"], dec["whh"], dec["b"],
      hd["w1"], hd["b1"], hd["wf2"], hd["bf2"], hd["wa2"], hd["ba2"])

    cat_hidden = cat_p[:B]
    # TODO(synk): RBF module source not provided; returning the decoder output pre-RBF.
    y = jnp.transpose(dec_out2d.reshape(T, B_pad, 2 * H)[:, :B, :], (1, 2, 0))  # (B,2H,T)
    aux_pred_dict = {
        "future_vital": fut_p[:B],     # FuturePredFc: Linear->BN->Dropout->Linear->Sigmoid
        "mortality": aux_p[:B, 0],     # AuxFc: single remaining aux task
    }
    # TODO(synk): fake_detection branch disabled (args.fake_detection=False); a
    # log_softmax FakeDetFc head would follow the same fused-head pattern.
    return cat_hidden, y, aux_pred_dict


# ----------------------------------------------------------------------------
if __name__ == "__main__":
    # Small shapes consistent with the module:
    #   batch=2, num_variables=4, num_timestamps=8, LSTM input = 3*num_variables = 12
    B, V, T = 2, 4, 8
    D_IN = 3 * V

    x = jax.random.normal(jax.random.PRNGKey(0), (B, T, D_IN), jnp.float32)

    pkeys = jax.random.split(jax.random.PRNGKey(42), 4)
    params = dict(
        enc=make_bilstm_params(pkeys[0], D_IN, HIDDEN),
        dec=make_bilstm_params(pkeys[1], 2 * HIDDEN, HIDDEN),
        heads=make_head_params(pkeys[2], pkeys[3], 2 * HIDDEN, V, 1),
    )

    cat_hidden, y, aux_pred = jax.jit(net_forward)(x, params)
    jax.block_until_ready((cat_hidden, y, aux_pred))

    assert cat_hidden.shape == (B, 2 * HIDDEN)
    assert y.shape == (B, 2 * HIDDEN, T)
    assert aux_pred["future_vital"].shape == (B, V)
    assert aux_pred["mortality"].shape == (B,)
    print("KERNEL_OK")
</pallas_src>

<mosaic_0001>
module attributes {stable_mosaic.version = 11 : i64} {
  func.func @_net_kernel(%arg0: memref<64x12xbf16, #tpu.memory_space<vmem>>, %arg1: memref<12x1024xbf16, #tpu.memory_space<vmem>>, %arg2: memref<128x1024xbf16, #tpu.memory_space<vmem>>, %arg3: memref<1x1024xf32, #tpu.memory_space<vmem>>, %arg4: memref<256x1024xbf16, #tpu.memory_space<vmem>>, %arg5: memref<128x1024xbf16, #tpu.memory_space<vmem>>, %arg6: memref<1x1024xf32, #tpu.memory_space<vmem>>, %arg7: memref<256x256xbf16, #tpu.memory_space<vmem>>, %arg8: memref<1x256xf32, #tpu.memory_space<vmem>>, %arg9: memref<128x4xbf16, #tpu.memory_space<vmem>>, %arg10: memref<1x4xf32, #tpu.memory_space<vmem>>, %arg11: memref<128x1xbf16, #tpu.memory_space<vmem>>, %arg12: memref<1x1xf32, #tpu.memory_space<vmem>>, %arg13: memref<64x256xf32, #tpu.memory_space<vmem>>, %arg14: memref<8x256xf32, #tpu.memory_space<vmem>>, %arg15: memref<8x4xf32, #tpu.memory_space<vmem>>, %arg16: memref<8x1xf32, #tpu.memory_space<vmem>>, %arg17: memref<64x1024xf32, #tpu.memory_space<vmem>>, %arg18: memref<64x256xf32, #tpu.memory_space<vmem>>) attributes {dimension_semantics = [], scalar_prefetch = 0 : i64, scratch_operands = 2 : i64, tpu.core_type = #tpu.core_type<tc>} {
    %c0 = arith.constant 0 : index
    %c0_0 = arith.constant 0 : index
    %0 = vector.load %arg0[%c0, %c0_0] : memref<64x12xbf16, #tpu.memory_space<vmem>>, vector<64x12xbf16>
    %c0_1 = arith.constant 0 : index
    %c0_2 = arith.constant 0 : index
    %1 = vector.load %arg1[%c0_1, %c0_2] : memref<12x1024xbf16, #tpu.memory_space<vmem>>, vector<12x1024xbf16>
    %cst = arith.constant dense<0.000000e+00> : vector<64x1024xf32>
    %2 = tpu.matmul %0, %1, %cst {dimension_numbers = #tpu.dot_dimension_numbers<[1], [0], [0], [1], [0, 0, 1, 1], [], []>} : vector<64x12xbf16>, vector<12x1024xbf16>, vector<64x1024xf32> -> vector<64x1024xf32>
    %c0_3 = arith.constant 0 : index
    %c0_4 = arith.constant 0 : index
    %3 = vector.load %arg3[%c0_3, %c0_4] : memref<1x1024xf32, #tpu.memory_space<vmem>>, vector<1x1024xf32>
    %4 = vector.broadcast %3 : vector<1x1024xf32> to vector<64x1024xf32>
    %5 = arith.addf %2, %4 : vector<64x1024xf32>
    %c0_5 = arith.constant 0 : index
    %c0_6 = arith.constant 0 : index
    %6 = vector.load %arg17[%c0_5, %c0_6] : memref<64x1024xf32, #tpu.memory_space<vmem>>, vector<64x1024xf32>
    tpu.vector_store %arg17[%c0_5, %c0_6], %5 {strides = array<i32>} : memref<64x1024xf32, #tpu.memory_space<vmem>>, vector<64x1024xf32>,
    %c0_7 = arith.constant 0 : index
    %c0_8 = arith.constant 0 : index
    %7 = vector.load %arg2[%c0_7, %c0_8] : memref<128x1024xbf16, #tpu.memory_space<vmem>>, vector<128x1024xbf16>
    %cst_9 = arith.constant 0.000000e+00 : f32
    %8 = vector.broadcast %cst_9 : f32 to vector<8x128xf32>
    %cst_10 = arith.constant 0.000000e+00 : f32
    %9 = vector.broadcast %cst_10 : f32 to vector<8x128xf32>
    %cst_11 = arith.constant 0.000000e+00 : f32
    %10 = vector.broadcast %cst_11 : f32 to vector<8x128xf32>
    %cst_12 = arith.constant 0.000000e+00 : f32
    %11 = vector.broadcast %cst_12 : f32 to vector<8x128xf32>
    %c0_13 = arith.constant 0 : index
    %c0_14 = arith.constant 0 : index
    %12 = vector.load %arg17[%c0_13, %c0_14] : memref<64x1024xf32, #tpu.memory_space<vmem>>, vector<8x512xf32>
    %13 = arith.truncf %8 : vector<8x128xf32> to vector<8x128xbf16>
    %14 = vector.extract_strided_slice %7 {offsets = [0, 0], sizes = [128, 512], strides = [1, 1]} : vector<128x1024xbf16> to vector<128x512xbf16>
    %cst_15 = arith.constant dense<0.000000e+00> : vector<8x512xf32>
    %15 = tpu.matmul %13, %14, %cst_15 {dimension_numbers = #tpu.dot_dimension_numbers<[1], [0], [0], [1], [0, 0, 1, 1], [], []>} : vector<8x128xbf16>, vector<128x512xbf16>, vector<8x512xf32> -> vector<8x512xf32>
    %16 = arith.addf %12, %15 : vector<8x512xf32>
    %c56 = arith.constant 56 : index
    %c512 = arith.constant 512 : index
    %17 = vector.load %arg17[%c56, %c512] : memref<64x1024xf32, #tpu.memory_space<vmem>>, vector<8x512xf32>
    %18 = arith.truncf %10 : vector<8x128xf32> to vector<8x128xbf16>
    %19 = vector.extract_strided_slice %7 {offsets = [0, 512], sizes = [128, 512], strides = [1, 1]} : vector<128x1024xbf16> to vector<128x512xbf16>
    %cst_16 = arith.constant dense<0.000000e+00> : vector<8x512xf32>
    %20 = tpu.matmul %18, %19, %cst_16 {dimension_numbers = #tpu.dot_dimension_numbers<[1], [0], [0], [1], [0, 0, 1, 1], [], []>} : vector<8x128xbf16>, vector<128x512xbf16>, vector<8x512xf32> -> vector<8x512xf32>
    %21 = arith.addf %17, %20 : vector<8x512xf32>
    %22 = vector.extract_strided_slice %16 {offsets = [0, 0], sizes = [8, 384], strides = [1, 1]} : vector<8x512xf32> to vector<8x384xf32>
    %23 = arith.negf %22 : vector<8x384xf32>
    %24 = math.exp %23 : vector<8x384xf32>
    %cst_17 = arith.constant 1.000000e+00 : f32
    %25 = vector.broadcast %cst_17 : f32 to vector<8x384xf32>
    %26 = arith.addf %25, %24 : vector<8x384xf32>
    %27 = arith.divf %25, %26 : vector<8x384xf32>
    %28 = vector.extract_strided_slice %16 {offsets = [0, 384], sizes = [8, 128], strides = [1, 1]} : vector<8x512xf32> to vector<8x128xf32>
    %29 = math.tanh %28 : vector<8x128xf32>
    %30 = vector.extract_strided_slice %27 {offsets = [0, 0], sizes = [8, 128], strides = [1, 1]} : vector<8x384xf32> to vector<8x128xf32>
    %31 = vector.extract_strided_slice %27 {offsets = [0, 128], sizes = [8, 128], strides = [1, 1]} : vector<8x384xf32> to vector<8x128xf32>
    %32 = vector.extract_strided_slice %27 {offsets = [0, 256], sizes = [8, 128], strides = [1, 1]} : vector<8x384xf32> to vector<8x128xf32>
    %33 = arith.mulf %31, %9 : vector<8x128xf32>
    %34 = arith.mulf %30, %29 : vector<8x128xf32>
    %35 = arith.addf %33, %34 : vector<8x128xf32>
    %36 = math.tanh %35 : vector<8x128xf32>
    %37 = arith.mulf %32, %36 : vector<8x128xf32>
    %38 = vector.extract_strided_slice %21 {offsets = [0, 0], sizes = [8, 384], strides = [1, 1]} : vector<8x512xf32> to vector<8x384xf32>
    %39 = arith.negf %38 : vector<8x384xf32>
    %40 = math.exp %39 : vector<8x384xf32>
    %cst_18 = arith.constant 1.000000e+00 : f32
    %41 = vector.broadcast %cst_18 : f32 to vector<8x384xf32>
    %42 = arith.addf %41, %40 : vector<8x384xf32>
    %43 = arith.divf %41, %42 : vector<8x384xf32>
    %44 = vector.extract_strided_slice %21 {offsets = [0, 384], sizes = [8, 128], strides = [1, 1]} : vector<8x512xf32> to vector<8x128xf32>
    %45 = math.tanh %44 : vector<8x128xf32>
    %46 = vector.extract_strided_slice %43 {offsets = [0, 0], sizes = [8, 128], strides = [1, 1]} : vector<8x384xf32> to vector<8x128xf32>
    %47 = vector.extract_strided_slice %43 {offsets = [0, 128], sizes = [8, 128], strides = [1, 1]} : vector<8x384xf32> to vector<8x128xf32>
    %48 = vector.extract_strided_slice %43 {offsets = [0, 256], sizes = [8, 128], strides = [1, 1]} : vector<8x384xf32> to vector<8x128xf32>
    %49 = arith.mulf %47, %11 : vector<8x128xf32>
    %50 = arith.mulf %46, %45 : vector<8x128xf32>
    %51 = arith.addf %49, %50 : vector<8x128xf32>
    %52 = math.tanh %51 : vector<8x128xf32>
    %53 = arith.mulf %48, %52 : vector<8x128xf32>
    %c0_19 = arith.constant 0 : index
    %c0_20 = arith.constant 0 : index
    %54 = vector.load %arg18[%c0_19, %c0_20] : memref<64x256xf32, #tpu.memory_space<vmem>>, vector<8x128xf32>
    tpu.vector_store %arg18[%c0_19, %c0_20], %37 {strides = array<i32>} : memref<64x256xf32, #tpu.memory_space<vmem>>, vector<8x128xf32>,
    %c56_21 = arith.constant 56 : index
    %c128 = arith.constant 128 : index
    %55 = vector.load %arg18[%c56_21, %c128] : memref<64x256xf32, #tpu.memory_space<vmem>>, vector<8x128xf32>
    tpu.vector_store %arg18[%c56_21, %c128], %53 {strides = array<i32>} : memref<64x256xf32, #tpu.memory_space<vmem>>, vector<8x128xf32>,
    %c8 = arith.constant 8 : index
    %c0_22 = arith.constant 0 : index
    %56 = vector.load %arg17[%c8, %c0_22] : memref<64x1024xf32, #tpu.memory_space<vmem>>, vector<8x512xf32>
    %57 = arith.truncf %37 : vector<8x128xf32> to vector<8x128xbf16>
    %58 = vector.extract_strided_slice %7 {offsets = [0, 0], sizes = [128, 512], strides = [1, 1]} : vector<128x1024xbf16> to vector<128x512xbf16>
    %cst_23 = arith.constant dense<0.000000e+00> : vector<8x512xf32>
    %59 = tpu.matmul %57, %58, %cst_23 {dimension_numbers = #tpu.dot_dimension_numbers<[1], [0], [0], [1], [0, 0, 1, 1], [], []>} : vector<8x128xbf16>, vector<128x512xbf16>, vector<8x512xf32> -> vector<8x512xf32>
    %60 = arith.addf %56, %59 : vector<8x512xf32>
    %c48 = arith.constant 48 : index
    %c512_24 = arith.constant 512 : index
    %61 = vector.load %arg17[%c48, %c512_24] : memref<64x1024xf32, #tpu.memory_space<vmem>>, vector<8x512xf32>
    %62 = arith.truncf %53 : vector<8x128xf32> to vector<8x128xbf16>
    %63 = vector.extract_strided_slice %7 {offsets = [0, 512], sizes = [128, 512], strides = [1, 1]} : vector<128x1024xbf16> to vector<128x512xbf16>
    %cst_25 = arith.constant dense<0.000000e+00> : vector<8x512xf32>
    %64 = tpu.matmul %62, %63, %cst_25 {dimension_numbers = #tpu.dot_dimension_numbers<[1], [0], [0], [1], [0, 0, 1, 1], [], []>} : vector<8x128xbf16>, vector<128x512xbf16>, vector<8x512xf32> -> vector<8x512xf32>
    %65 = arith.addf %61, %64 : vector<8x512xf32>
    %66 = vector.extract_strided_slice %60 {offsets = [0, 0], sizes = [8, 384], strides = [1, 1]} : vector<8x512xf32> to vector<8x384xf32>
    %67 = arith.negf %66 : vector<8x384xf32>
    %68 = math.exp %67 : vector<8x384xf32>
    %cst_26 = arith.constant 1.000000e+00 : f32
    %69 = vector.broadcast %cst_26 : f32 to vector<8x384xf32>
    %70 = arith.addf %69, %68 : vector<8x384xf32>
    %71 = arith.divf %69, %70 : vector<8x384xf32>
    %72 = vector.extract_strided_slice %60 {offsets = [0, 384], sizes = [8, 128], strides = [1, 1]} : vector<8x512xf32> to vector<8x128xf32>
    %73 = math.tanh %72 : vector<8x128xf32>
    %74 = vector.extract_strided_slice %71 {offsets = [0, 0], sizes = [8, 128], strides = [1, 1]} : vector<8x384xf32> to vector<8x128xf32>
    %75 = vector.extract_strided_slice %71 {offsets = [0, 128], sizes = [8, 128], strides = [1, 1]} : vector<8x384xf32> to vector<8x128xf32>
    %76 = vector.extract_strided_slice %71 {offsets = [0, 256], sizes = [8, 128], strides = [1, 1]} : vector<8x384xf32> to vector<8x128xf32>
    %77 = arith.mulf %75, %35 : vector<8x128xf32>
    %78 = arith.mulf %74, %73 : vector<8x128xf32>
    %79 = arith.addf %77, %78 : vector<8x128xf32>
    %80 = math.tanh %79 : vector<8x128xf32>
    %81 = arith.mulf %76, %80 : vector<8x128xf32>
    %82 = vector.extract_strided_slice %65 {offsets = [0, 0], sizes = [8, 384], strides = [1, 1]} : vector<8x512xf32> to vector<8x384xf32>
    %83 = arith.negf %82 : vector<8x384xf32>
    %84 = math.exp %83 : vector<8x384xf32>
    %cst_27 = arith.constant 1.000000e+00 : f32
    %85 = vector.broadcast %cst_27 : f32 to vector<8x384xf32>
    %86 = arith.addf %85, %84 : vector<8x384xf32>
    %87 = arith.divf %85, %86 : vector<8x384xf32>
    %88 = vector.extract_strided_slice %65 {offsets = [0, 384], sizes = [8, 128], strides = [1, 1]} : vector<8x512xf32> to vector<8x128xf32>
    %89 = math.tanh %88 : vector<8x128xf32>
    %90 = vector.extract_strided_slice %87 {offsets = [0, 0], sizes = [8, 128], strides = [1, 1]} : vector<8x384xf32> to vector<8x128xf32>
    %91 = vector.extract_strided_slice %87 {offsets = [0, 128], sizes = [8, 128], strides = [1, 1]} : vector<8x384xf32> to vector<8x128xf32>
    %92 = vector.extract_strided_slice %87 {offsets = [0, 256], sizes = [8, 128], strides = [1, 1]} : vector<8x384xf32> to vector<8x128xf32>
    %93 = arith.mulf %91, %51 : vector<8x128xf32>
    %94 = arith.mulf %90, %89 : vector<8x128xf32>
    %95 = arith.addf %93, %94 : vector<8x128xf32>
    %96 = math.tanh %95 : vector<8x128xf32>
    %97 = arith.mulf %92, %96 : vector<8x128xf32>
    %c8_28 = arith.constant 8 : index
    %c0_29 = arith.constant 0 : index
    %98 = vector.load %arg18[%c8_28, %c0_29] : memref<64x256xf32, #tpu.memory_space<vmem>>, vector<8x128xf32>
    tpu.vector_store %arg18[%c8_28, %c0_29], %81 {strides = array<i32>} : memref<64x256xf32, #tpu.memory_space<vmem>>, vector<8x128xf32>,
    %c48_30 = arith.constant 48 : index
    %c128_31 = arith.constant 128 : index
    %99 = vector.load %arg18[%c48_30, %c128_31] : memref<64x256xf32, #tpu.memory_space<vmem>>, vector<8x128xf32>
    tpu.vector_store %arg18[%c48_30, %c128_31], %97 {strides = array<i32>} : memref<64x256xf32, #tpu.memory_space<vmem>>, vector<8x128xf32>,
    %c16 = arith.constant 16 : index
    %c0_32 = arith.constant 0 : index
    %100 = vector.load %arg17[%c16, %c0_32] : memref<64x1024xf32, #tpu.memory_space<vmem>>, vector<8x512xf32>
    %101 = arith.truncf %81 : vector<8x128xf32> to vector<8x128xbf16>
    %102 = vector.extract_strided_slice %7 {offsets = [0, 0], sizes = [128, 512], strides = [1, 1]} : vector<128x1024xbf16> to vector<128x512xbf16>
    %cst_33 = arith.constant dense<0.000000e+00> : vector<8x512xf32>
    %103 = tpu.matmul %101, %102, %cst_33 {dimension_numbers = #tpu.dot_dimension_numbers<[1], [0], [0], [1], [0, 0, 1, 1], [], []>} : vector<8x128xbf16>, vector<128x512xbf16>, vector<8x512xf32> -> vector<8x512xf32>
    %104 = arith.addf %100, %103 : vector<8x512xf32>
    %c40 = arith.constant 40 : index
    %c512_34 = arith.constant 512 : index
    %105 = vector.load %arg17[%c40, %c512_34] : memref<64x1024xf32, #tpu.memory_space<vmem>>, vector<8x512xf32>
    %106 = arith.truncf %97 : vector<8x128xf32> to vector<8x128xbf16>
    %107 = vector.extract_strided_slice %7 {offsets = [0, 512], sizes = [128, 512], strides = [1, 1]} : vector<128x1024xbf16> to vector<128x512xbf16>
    %cst_35 = arith.constant dense<0.000000e+00> : vector<8x512xf32>
    %108 = tpu.matmul %106, %107, %cst_35 {dimension_numbers = #tpu.dot_dimension_numbers<[1], [0], [0], [1], [0, 0, 1, 1], [], []>} : vector<8x128xbf16>, vector<128x512xbf16>, vector<8x512xf32> -> vector<8x512xf32>
    %109 = arith.addf %105, %108 : vector<8x512xf32>
    %110 = vector.extract_strided_slice %104 {offsets = [0, 0], sizes = [8, 384], strides = [1, 1]} : vector<8x512xf32> to vector<8x384xf32>
    %111 = arith.negf %110 : vector<8x384xf32>
    %112 = math.exp %111 : vector<8x384xf32>
    %cst_36 = arith.constant 1.000000e+00 : f32
    %113 = vector.broadcast %cst_36 : f32 to vector<8x384xf32>
    %114 = arith.addf %113, %112 : vector<8x384xf32>
    %115 = arith.divf %113, %114 : vector<8x384xf32>
    %116 = vector.extract_strided_slice %104 {offsets = [0, 384], sizes = [8, 128], strides = [1, 1]} : vector<8x512xf32> to vector<8x128xf32>
    %117 = math.tanh %116 : vector<8x128xf32>
    %118 = vector.extract_strided_slice %115 {offsets = [0, 0], sizes = [8, 128], strides = [1, 1]} : vector<8x384xf32> to vector<8x128xf32>
    %119 = vector.extract_strided_slice %115 {offsets = [0, 128], sizes = [8, 128], strides = [1, 1]} : vector<8x384xf32> to vector<8x128xf32>
    %120 = vector.extract_strided_slice %115 {offsets = [0, 256], sizes = [8, 128], strides = [1, 1]} : vector<8x384xf32> to vector<8x128xf32>
    %121 = arith.mulf %119, %79 : vector<8x128xf32>
    %122 = arith.mulf %118, %117 : vector<8x128xf32>
    %123 = arith.addf %121, %122 : vector<8x128xf32>
    %124 = math.tanh %123 : vector<8x128xf32>
    %125 = arith.mulf %120, %124 : vector<8x128xf32>
    %126 = vector.extract_strided_slice %109 {offsets = [0, 0], sizes = [8, 384], strides = [1, 1]} : vector<8x512xf32> to vector<8x384xf32>
    %127 = arith.negf %126 : vector<8x384xf32>
    %128 = math.exp %127 : vector<8x384xf32>
    %cst_37 = arith.constant 1.000000e+00 : f32
    %129 = vector.broadcast %cst_37 : f32 to vector<8x384xf32>
    %130 = arith.addf %129, %128 : vector<8x384xf32>
    %131 = arith.divf %129, %130 : vector<8x384xf32>
    %132 = vector.extract_strided_slice %109 {offsets = [0, 384], sizes = [8, 128], strides = [1, 1]} : vector<8x512xf32> to vector<8x128xf32>
    %133 = math.tanh %132 : vector<8x128xf32>
    %134 = vector.extract_strided_slice %131 {offsets = [0, 0], sizes = [8, 128], strides = [1, 1]} : vector<8x384xf32> to vector<8x128xf32>
    %135 = vector.extract_strided_slice %131 {offsets = [0, 128], sizes = [8, 128], strides = [1, 1]} : vector<8x384xf32> to vector<8x128xf32>
    %136 = vector.extract_strided_slice %131 {offsets = [0, 256], sizes = [8, 128], strides = [1, 1]} : vector<8x384xf32> to vector<8x128xf32>
    %137 = arith.mulf %135, %95 : vector<8x128xf32>
    %138 = arith.mulf %134, %133 : vector<8x128xf32>
    %139 = arith.addf %137, %138 : vector<8x128xf32>
    %140 = math.tanh %139 : vector<8x128xf32>
    %141 = arith.mulf %136, %140 : vector<8x128xf32>
    %c16_38 = arith.constant 16 : index
    %c0_39 = arith.constant 0 : index
    %142 = vector.load %arg18[%c16_38, %c0_39] : memref<64x256xf32, #tpu.memory_space<vmem>>, vector<8x128xf32>
    tpu.vector_store %arg18[%c16_38, %c0_39], %125 {strides = array<i32>} : memref<64x256xf32, #tpu.memory_space<vmem>>, vector<8x128xf32>,
    %c40_40 = arith.constant 40 : index
    %c128_41 = arith.constant 128 : index
    %143 = vector.load %arg18[%c40_40, %c128_41] : memref<64x256xf32, #tpu.memory_space<vmem>>, vector<8x128xf32>
    tpu.vector_store %arg18[%c40_40, %c128_41], %141 {strides = array<i32>} : memref<64x256xf32, #tpu.memory_space<vmem>>, vector<8x128xf32>,
    %c24 = arith.constant 24 : index
    %c0_42 = arith.constant 0 : index
    %144 = vector.load %arg17[%c24, %c0_42] : memref<64x1024xf32, #tpu.memory_space<vmem>>, vector<8x512xf32>
    %145 = arith.truncf %125 : vector<8x128xf32> to vector<8x128xbf16>
    %146 = vector.extract_strided_slice %7 {offsets = [0, 0], sizes = [128, 512], strides = [1, 1]} : vector<128x1024xbf16> to vector<128x512xbf16>
    %cst_43 = arith.constant dense<0.000000e+00> : vector<8x512xf32>
    %147 = tpu.matmul %145, %146, %cst_43 {dimension_numbers = #tpu.dot_dimension_numbers<[1], [0], [0], [1], [0, 0, 1, 1], [], []>} : vector<8x128xbf16>, vector<128x512xbf16>, vector<8x512xf32> -> vector<8x512xf32>
    %148 = arith.addf %144, %147 : vector<8x512xf32>
    %c32 = arith.constant 32 : index
    %c512_44 = arith.constant 512 : index
    %149 = vector.load %arg17[%c32, %c512_44] : memref<64x1024xf32, #tpu.memory_space<vmem>>, vector<8x512xf32>
    %150 = arith.truncf %141 : vector<8x128xf32> to vector<8x128xbf16>
    %151 = vector.extract_strided_slice %7 {offsets = [0, 512], sizes = [128, 512], strides = [1, 1]} : vector<128x1024xbf16> to vector<128x512xbf16>
    %cst_45 = arith.constant dense<0.000000e+00> : vector<8x512xf32>
    %152 = tpu.matmul %150, %151, %cst_45 {dimension_numbers = #tpu.dot_dimension_numbers<[1], [0], [0], [1], [0, 0, 1, 1], [], []>} : vector<8x128xbf16>, vector<128x512xbf16>, vector<8x512xf32> -> vector<8x512xf32>
    %153 = arith.addf %149, %152 : vector<8x512xf32>
    %154 = vector.extract_strided_slice %148 {offsets = [0, 0], sizes = [8, 384], strides = [1, 1]} : vector<8x512xf32> to vector<8x384xf32>
    %155 = arith.negf %154 : vector<8x384xf32>
    %156 = math.exp %155 : vector<8x384xf32>
    %cst_46 = arith.constant 1.000000e+00 : f32
    %157 = vector.broadcast %cst_46 : f32 to vector<8x384xf32>
    %158 = arith.addf %157, %156 : vector<8x384xf32>
    %159 = arith.divf %157, %158 : vector<8x384xf32>
    %160 = vector.extract_strided_slice %148 {offsets = [0, 384], sizes = [8, 128], strides = [1, 1]} : vector<8x512xf32> to vector<8x128xf32>
    %161 = math.tanh %160 : vector<8x128xf32>
    %162 = vector.extract_strided_slice %159 {offsets = [0, 0], sizes = [8, 128], strides = [1, 1]} : vector<8x384xf32> to vector<8x128xf32>
    %163 = vector.extract_strided_slice %159 {offsets = [0, 128], sizes = [8, 128], strides = [1, 1]} : vector<8x384xf32> to vector<8x128xf32>
    %164 = vector.extract_strided_slice %159 {offsets = [0, 256], sizes = [8, 128], strides = [1, 1]} : vector<8x384xf32> to vector<8x128xf32>
    %165 = arith.mulf %163, %123 : vector<8x128xf32>
    %166 = arith.mulf %162, %161 : vector<8x128xf32>
    %167 = arith.addf %165, %166 : vector<8x128xf32>
    %168 = math.tanh %167 : vector<8x128xf32>
    %169 = arith.mulf %164, %168 : vector<8x128xf32>
    %170 = vector.extract_strided_slice %153 {offsets = [0, 0], sizes = [8, 384], strides = [1, 1]} : vector<8x512xf32> to vector<8x384xf32>
    %171 = arith.negf %170 : vector<8x384xf32>
    %172 = math.exp %171 : vector<8x384xf32>
    %cst_47 = arith.constant 1.000000e+00 : f32
    %173 = vector.broadcast %cst_47 : f32 to vector<8x384xf32>
    %174 = arith.addf %173, %172 : vector<8x384xf32>
    %175 = arith.divf %173, %174 : vector<8x384xf32>
    %176 = vector.extract_strided_slice %153 {offsets = [0, 384], sizes = [8, 128], strides = [1, 1]} : vector<8x512xf32> to vector<8x128xf32>
    %177 = math.tanh %176 : vector<8x128xf32>
    %178 = vector.extract_strided_slice %175 {offsets = [0, 0], sizes = [8, 128], strides = [1, 1]} : vector<8x384xf32> to vector<8x128xf32>
    %179 = vector.extract_strided_slice %175 {offsets = [0, 128], sizes = [8, 128], strides = [1, 1]} : vector<8x384xf32> to vector<8x128xf32>
    %180 = vector.extract_strided_slice %175 {offsets = [0, 256], sizes = [8, 128], strides = [1, 1]} : vector<8x384xf32> to vector<8x128xf32>
    %181 = arith.mulf %179, %139 : vector<8x128xf32>
    %182 = arith.mulf %178, %177 : vector<8x128xf32>
    %183 = arith.addf %181, %182 : vector<8x128xf32>
    %184 = math.tanh %183 : vector<8x128xf32>
    %185 = arith.mulf %180, %184 : vector<8x128xf32>
    %c24_48 = arith.constant 24 : index
    %c0_49 = arith.constant 0 : index
    %186 = vector.load %arg18[%c24_48, %c0_49] : memref<64x256xf32, #tpu.memory_space<vmem>>, vector<8x128xf32>
    tpu.vector_store %arg18[%c24_48, %c0_49], %169 {strides = array<i32>} : memref<64x256xf32, #tpu.memory_space<vmem>>, vector<8x128xf32>,
    %c32_50 = arith.constant 32 : index
    %c128_51 = arith.constant 128 : index
    %187 = vector.load %arg18[%c32_50, %c128_51] : memref<64x256xf32, #tpu.memory_space<vmem>>, vector<8x128xf32>
    tpu.vector_store %arg18[%c32_50, %c128_51], %185 {strides = array<i32>} : memref<64x256xf32, #tpu.memory_space<vmem>>, vector<8x128xf32>,
    %c32_52 = arith.constant 32 : index
    %c0_53 = arith.constant 0 : index
    %188 = vector.load %arg17[%c32_52, %c0_53] : memref<64x1024xf32, #tpu.memory_space<vmem>>, vector<8x512xf32>
    %189 = arith.truncf %169 : vector<8x128xf32> to vector<8x128xbf16>
    %190 = vector.extract_strided_slice %7 {offsets = [0, 0], sizes = [128, 512], strides = [1, 1]} : vector<128x1024xbf16> to vector<128x512xbf16>
    %cst_54 = arith.constant dense<0.000000e+00> : vector<8x512xf32>
    %191 = tpu.matmul %189, %190, %cst_54 {dimension_numbers = #tpu.dot_dimension_numbers<[1], [0], [0], [1], [0, 0, 1, 1], [], []>} : vector<8x128xbf16>, vector<128x512xbf16>, vector<8x512xf32> -> vector<8x512xf32>
    %192 = arith.addf %188, %191 : vector<8x512xf32>
    %c24_55 = arith.constant 24 : index
    %c512_56 = arith.constant 512 : index
    %193 = vector.load %arg17[%c24_55, %c512_56] : memref<64x1024xf32, #tpu.memory_space<vmem>>, vector<8x512xf32>
    %194 = arith.truncf %185 : vector<8x128xf32> to vector<8x128xbf16>
    %195 = vector.extract_strided_slice %7 {offsets = [0, 512], sizes = [128, 512], strides = [1, 1]} : vector<128x1024xbf16> to vector<128x512xbf16>
    %cst_57 = arith.constant dense<0.000000e+00> : vector<8x512xf32>
    %196 = tpu.matmul %194, %195, %cst_57 {dimension_numbers = #tpu.dot_dimension_numbers<[1], [0], [0], [1], [0, 0, 1, 1], [], []>} : vector<8x128xbf16>, vector<128x512xbf16>, vector<8x512xf32> -> vector<8x512xf32>
    %197 = arith.addf %193, %196 : vector<8x512xf32>
    %198 = vector.extract_strided_slice %192 {offsets = [0, 0], sizes = [8, 384], strides = [1, 1]} : vector<8x512xf32> to vector<8x384xf32>
    %199 = arith.negf %198 : vector<8x384xf32>
    %200 = math.exp %199 : vector<8x384xf32>
    %cst_58 = arith.constant 1.000000e+00 : f32
    %201 = vector.broadcast %cst_58 : f32 to vector<8x384xf32>
    %202 = arith.addf %201, %200 : vector<8x384xf32>
    %203 = arith.divf %201, %202 : vector<8x384xf32>
    %204 = vector.extract_strided_slice %192 {offsets = [0, 384], sizes = [8, 128], strides = [1, 1]} : vector<8x512xf32> to vector<8x128xf32>
    %205 = math.tanh %204 : vector<8x128xf32>
    %206 = vector.extract_strided_slice %203 {offsets = [0, 0], sizes = [8, 128], strides = [1, 1]} : vector<8x384xf32> to vector<8x128xf32>
    %207 = vector.extract_strided_slice %203 {offsets = [0, 128], sizes = [8, 128], strides = [1, 1]} : vector<8x384xf32> to vector<8x128xf32>
    %208 = vector.extract_strided_slice %203 {offsets = [0, 256], sizes = [8, 128], strides = [1, 1]} : vector<8x384xf32> to vector<8x128xf32>
    %209 = arith.mulf %207, %167 : vector<8x128xf32>
    %210 = arith.mulf %206, %205 : vector<8x128xf32>
    %211 = arith.addf %209, %210 : vector<8x128xf32>
    %212 = math.tanh %211 : vector<8x128xf32>
    %213 = arith.mulf %208, %212 : vector<8x128xf32>
    %214 = vector.extract_strided_slice %197 {offsets = [0, 0], sizes = [8, 384], strides = [1, 1]} : vector<8x512xf32> to vector<8x384xf32>
    %215 = arith.negf %214 : vector<8x384xf32>
    %216 = math.exp %215 : vector<8x384xf32>
    %cst_59 = arith.constant 1.000000e+00 : f32
    %217 = vector.broadcast %cst_59 : f32 to vector<8x384xf32>
    %218 = arith.addf %217, %216 : vector<8x384xf32>
    %219 = arith.divf %217, %218 : vector<8x384xf32>
    %220 = vector.extract_strided_slice %197 {offsets = [0, 384], sizes = [8, 128], strides = [1, 1]} : vector<8x512xf32> to vector<8x128xf32>
    %221 = math.tanh %220 : vector<8x128xf32>
    %222 = vector.extract_strided_slice %219 {offsets = [0, 0], sizes = [8, 128], strides = [1, 1]} : vector<8x384xf32> to vector<8x128xf32>
    %223 = vector.extract_strided_slice %219 {offsets = [0, 128], sizes = [8, 128], strides = [1, 1]} : vector<8x384xf32> to vector<8x128xf32>
    %224 = vector.extract_strided_slice %219 {offsets = [0, 256], sizes = [8, 128], strides = [1, 1]} : vector<8x384xf32> to vector<8x128xf32>
    %225 = arith.mulf %223, %183 : vector<8x128xf32>
    %226 = arith.mulf %222, %221 : vector<8x128xf32>
    %227 = arith.addf %225, %226 : vector<8x128xf32>
    %228 = math.tanh %227 : vector<8x128xf32>
    %229 = arith.mulf %224, %228 : vector<8x128xf32>
    %c32_60 = arith.constant 32 : index
    %c0_61 = arith.constant 0 : index
    %230 = vector.load %arg18[%c32_60, %c0_61] : memref<64x256xf32, #tpu.memory_space<vmem>>, vector<8x128xf32>
    tpu.vector_store %arg18[%c32_60, %c0_61], %213 {strides = array<i32>} : memref<64x256xf32, #tpu.memory_space<vmem>>, vector<8x128xf32>,
    %c24_62 = arith.constant 24 : index
    %c128_63 = arith.constant 128 : index
    %231 = vector.load %arg18[%c24_62, %c128_63] : memref<64x256xf32, #tpu.memory_space<vmem>>, vector<8x128xf32>
    tpu.vector_store %arg18[%c24_62, %c128_63], %229 {strides = array<i32>} : memref<64x256xf32, #tpu.memory_space<vmem>>, vector<8x128xf32>,
    %c40_64 = arith.constant 40 : index
    %c0_65 = arith.constant 0 : index
    %232 = vector.load %arg17[%c40_64, %c0_65] : memref<64x1024xf32, #tpu.memory_space<vmem>>, vector<8x512xf32>
    %233 = arith.truncf %213 : vector<8x128xf32> to vector<8x128xbf16>
    %234 = vector.extract_strided_slice %7 {offsets = [0, 0], sizes = [128, 512], strides = [1, 1]} : vector<128x1024xbf16> to vector<128x512xbf16>
    %cst_66 = arith.constant dense<0.000000e+00> : vector<8x512xf32>
    %235 = tpu.matmul %233, %234, %cst_66 {dimension_numbers = #tpu.dot_dimension_numbers<[1], [0], [0], [1], [0, 0, 1, 1], [], []>} : vector<8x128xbf16>, vector<128x512xbf16>, vector<8x512xf32> -> vector<8x512xf32>
    %236 = arith.addf %232, %235 : vector<8x512xf32>
    %c16_67 = arith.constant 16 : index
    %c512_68 = arith.constant 512 : index
    %237 = vector.load %arg17[%c16_67, %c512_68] : memref<64x1024xf32, #tpu.memory_space<vmem>>, vector<8x512xf32>
    %238 = arith.truncf %229 : vector<8x128xf32> to vector<8x128xbf16>
    %239 = vector.extract_strided_slice %7 {offsets = [0, 512], sizes = [128, 512], strides = [1, 1]} : vector<128x1024xbf16> to vector<128x512xbf16>
    %cst_69 = arith.constant dense<0.000000e+00> : vector<8x512xf32>
    %240 = tpu.matmul %238, %239, %cst_69 {dimension_numbers = #tpu.dot_dimension_numbers<[1], [0], [0], [1], [0, 0, 1, 1], [], []>} : vector<8x128xbf16>, vector<128x512xbf16>, vector<8x512xf32> -> vector<8x512xf32>
    %241 = arith.addf %237, %240 : vector<8x512xf32>
    %242 = vector.extract_strided_slice %236 {offsets = [0, 0], sizes = [8, 384], strides = [1, 1]} : vector<8x512xf32> to vector<8x384xf32>
    %243 = arith.negf %242 : vector<8x384xf32>
    %244 = math.exp %243 : vector<8x384xf32>
    %cst_70 = arith.constant 1.000000e+00 : f32
    %245 = vector.broadcast %cst_70 : f32 to vector<8x384xf32>
    %246 = arith.addf %245, %244 : vector<8x384xf32>
    %247 = arith.divf %245, %246 : vector<8x384xf32>
    %248 = vector.extract_strided_slice %236 {offsets = [0, 384], sizes = [8, 128], strides = [1, 1]} : vector<8x512xf32> to vector<8x128xf32>
    %249 = math.tanh %248 : vector<8x128xf32>
    %250 = vector.extract_strided_slice %247 {offsets = [0, 0], sizes = [8, 128], strides = [1, 1]} : vector<8x384xf32> to vector<8x128xf32>
    %251 = vector.extract_strided_slice %247 {offsets = [0, 128], sizes = [8, 128], strides = [1, 1]} : vector<8x384xf32> to vector<8x128xf32>
    %252 = vector.extract_strided_slice %247 {offsets = [0, 256], sizes = [8, 128], strides = [1, 1]} : vector<8x384xf32> to vector<8x128xf32>
    %253 = arith.mulf %251, %211 : vector<8x128xf32>
    %254 = arith.mulf %250, %249 : vector<8x128xf32>
    %255 = arith.addf %253, %254 : vector<8x128xf32>
    %256 = math.tanh %255 : vector<8x128xf32>
    %257 = arith.mulf %252, %256 : vector<8x128xf32>
    %258 = vector.extract_strided_slice %241 {offsets = [0, 0], sizes = [8, 384], strides = [1, 1]} : vector<8x512xf32> to vector<8x384xf32>
    %259 = arith.negf %258 : vector<8x384xf32>
    %260 = math.exp %259 : vector<8x384xf32>
    %cst_71 = arith.constant 1.000000e+00 : f32
    %261 = vector.broadcast %cst_71 : f32 to vector<8x384xf32>
    %262 = arith.addf %261, %260 : vector<8x384xf32>
    %263 = arith.divf %261, %262 : vector<8x384xf32>
    %264 = vector.extract_strided_slice %241 {offsets = [0, 384], sizes = [8, 128], strides = [1, 1]} : vector<8x512xf32> to vector<8x128xf32>
    %265 = math.tanh %264 : vector<8x128xf32>
    %266 = vector.extract_strided_slice %263 {offsets = [0, 0], sizes = [8, 128], strides = [1, 1]} : vector<8x384xf32> to vector<8x128xf32>
    %267 = vector.extract_strided_slice %263 {offsets = [0, 128], sizes = [8, 128], strides = [1, 1]} : vector<8x384xf32> to vector<8x128xf32>
    %268 = vector.extract_strided_slice %263 {offsets = [0, 256], sizes = [8, 128], strides = [1, 1]} : vector<8x384xf32> to vector<8x128xf32>
    %269 = arith.mulf %267, %227 : vector<8x128xf32>
    %270 = arith.mulf %266, %265 : vector<8x128xf32>
    %271 = arith.addf %269, %270 : vector<8x128xf32>
    %272 = math.tanh %271 : vector<8x128xf32>
    %273 = arith.mulf %268, %272 : vector<8x128xf32>
    %c40_72 = arith.constant 40 : index
    %c0_73 = arith.constant 0 : index
    %274 = vector.load %arg18[%c40_72, %c0_73] : memref<64x256xf32, #tpu.memory_space<vmem>>, vector<8x128xf32>
    tpu.vector_store %arg18[%c40_72, %c0_73], %257 {strides = array<i32>} : memref<64x256xf32, #tpu.memory_space<vmem>>, vector<8x128xf32>,
    %c16_74 = arith.constant 16 : index
    %c128_75 = arith.constant 128 : index
    %275 = vector.load %arg18[%c16_74, %c128_75] : memref<64x256xf32, #tpu.memory_space<vmem>>, vector<8x128xf32>
    tpu.vector_store %arg18[%c16_74, %c128_75], %273 {strides = array<i32>} : memref<64x256xf32, #tpu.memory_space<vmem>>, vector<8x128xf32>,
    %c48_76 = arith.constant 48 : index
    %c0_77 = arith.constant 0 : index
    %276 = vector.load %arg17[%c48_76, %c0_77] : memref<64x1024xf32, #tpu.memory_space<vmem>>, vector<8x512xf32>
    %277 = arith.truncf %257 : vector<8x128xf32> to vector<8x128xbf16>
    %278 = vector.extract_strided_slice %7 {offsets = [0, 0], sizes = [128, 512], strides = [1, 1]} : vector<128x1024xbf16> to vector<128x512xbf16>
    %cst_78 = arith.constant dense<0.000000e+00> : vector<8x512xf32>
    %279 = tpu.matmul %277, %278, %cst_78 {dimension_numbers = #tpu.dot_dimension_numbers<[1], [0], [0], [1], [0, 0, 1, 1], [], []>} : vector<8x128xbf16>, vector<128x512xbf16>, vector<8x512xf32> -> vector<8x512xf32>
    %280 = arith.addf %276, %279 : vector<8x512xf32>
    %c8_79 = arith.constant 8 : index
    %c512_80 = arith.constant 512 : index
    %281 = vector.load %arg17[%c8_79, %c512_80] : memref<64x1024xf32, #tpu.memory_space<vmem>>, vector<8x512xf32>
    %282 = arith.truncf %273 : vector<8x128xf32> to vector<8x128xbf16>
    %283 = vector.extract_strided_slice %7 {offsets = [0, 512], sizes = [128, 512], strides = [1, 1]} : vector<128x1024xbf16> to vector<128x512xbf16>
    %cst_81 = arith.constant dense<0.000000e+00> : vector<8x512xf32>
    %284 = tpu.matmul %282, %283, %cst_81 {dimension_numbers = #tpu.dot_dimension_numbers<[1], [0], [0], [1], [0, 0, 1, 1], [], []>} : vector<8x128xbf16>, vector<128x512xbf16>, vector<8x512xf32> -> vector<8x512xf32>
    %285 = arith.addf %281, %284 : vector<8x512xf32>
    %286 = vector.extract_strided_slice %280 {offsets = [0, 0], sizes = [8, 384], strides = [1, 1]} : vector<8x512xf32> to vector<8x384xf32>
    %287 = arith.negf %286 : vector<8x384xf32>
    %288 = math.exp %287 : vector<8x384xf32>
    %cst_82 = arith.constant 1.000000e+00 : f32
    %289 = vector.broadcast %cst_82 : f32 to vector<8x384xf32>
    %290 = arith.addf %289, %288 : vector<8x384xf32>
    %291 = arith.divf %289, %290 : vector<8x384xf32>
    %292 = vector.extract_strided_slice %280 {offsets = [0, 384], sizes = [8, 128], strides = [1, 1]} : vector<8x512xf32> to vector<8x128xf32>
    %293 = math.tanh %292 : vector<8x128xf32>
    %294 = vector.extract_strided_slice %291 {offsets = [0, 0], sizes = [8, 128], strides = [1, 1]} : vector<8x384xf32> to vector<8x128xf32>
    %295 = vector.extract_strided_slice %291 {offsets = [0, 128], sizes = [8, 128], strides = [1, 1]} : vector<8x384xf32> to vector<8x128xf32>
    %296 = vector.extract_strided_slice %291 {offsets = [0, 256], sizes = [8, 128], strides = [1, 1]} : vector<8x384xf32> to vector<8x128xf32>
    %297 = arith.mulf %295, %255 : vector<8x128xf32>
    %298 = arith.mulf %294, %293 : vector<8x128xf32>
    %299 = arith.addf %297, %298 : vector<8x128xf32>
    %300 = math.tanh %299 : vector<8x128xf32>
    %301 = arith.mulf %296, %300 : vector<8x128xf32>
    %302 = vector.extract_strided_slice %285 {offsets = [0, 0], sizes = [8, 384], strides = [1, 1]} : vector<8x512xf32> to vector<8x384xf32>
    %303 = arith.negf %302 : vector<8x384xf32>
    %304 = math.exp %303 : vector<8x384xf32>
    %cst_83 = arith.constant 1.000000e+00 : f32
    %305 = vector.broadcast %cst_83 : f32 to vector<8x384xf32>
    %306 = arith.addf %305, %304 : vector<8x384xf32>
    %307 = arith.divf %305, %306 : vector<8x384xf32>
    %308 = vector.extract_strided_slice %285 {offsets = [0, 384], sizes = [8, 128], strides = [1, 1]} : vector<8x512xf32> to vector<8x128xf32>
    %309 = math.tanh %308 : vector<8x128xf32>
    %310 = vector.extract_strided_slice %307 {offsets = [0, 0], sizes = [8, 128], strides = [1, 1]} : vector<8x384xf32> to vector<8x128xf32>
    %311 = vector.extract_strided_slice %307 {offsets = [0, 128], sizes = [8, 128], strides = [1, 1]} : vector<8x384xf32> to vector<8x128xf32>
    %312 = vector.extract_strided_slice %307 {offsets = [0, 256], sizes = [8, 128], strides = [1, 1]} : vector<8x384xf32> to vector<8x128xf32>
    %313 = arith.mulf %311, %271 : vector<8x128xf32>
    %314 = arith.mulf %310, %309 : vector<8x128xf32>
    %315 = arith.addf %313, %314 : vector<8x128xf32>
    %316 = math.tanh %315 : vector<8x128xf32>
    %317 = arith.mulf %312, %316 : vector<8x128xf32>
    %c48_84 = arith.constant 48 : index
    %c0_85 = arith.constant 0 : index
    %318 = vector.load %arg18[%c48_84, %c0_85] : memref<64x256xf32, #tpu.memory_space<vmem>>, vector<8x128xf32>
    tpu.vector_store %arg18[%c48_84, %c0_85], %301 {strides = array<i32>} : memref<64x256xf32, #tpu.memory_space<vmem>>, vector<8x128xf32>,
    %c8_86 = arith.constant 8 : index
    %c128_87 = arith.constant 128 : index
    %319 = vector.load %arg18[%c8_86, %c128_87] : memref<64x256xf32, #tpu.memory_space<vmem>>, vector<8x128xf32>
    tpu.vector_store %arg18[%c8_86, %c128_87], %317 {strides = array<i32>} : memref<64x256xf32, #tpu.memory_space<vmem>>, vector<8x128xf32>,
    %c56_88 = arith.constant 56 : index
    %c0_89 = arith.constant 0 : index
    %320 = vector.load %arg17[%c56_88, %c0_89] : memref<64x1024xf32, #tpu.memory_space<vmem>>, vector<8x512xf32>
    %321 = arith.truncf %301 : vector<8x128xf32> to vector<8x128xbf16>
    %322 = vector.extract_strided_slice %7 {offsets = [0, 0], sizes = [128, 512], strides = [1, 1]} : vector<128x1024xbf16> to vector<128x512xbf16>
    %cst_90 = arith.constant dense<0.000000e+00> : vector<8x512xf32>
    %323 = tpu.matmul %321, %322, %cst_90 {dimension_numbers = #tpu.dot_dimension_numbers<[1], [0], [0], [1], [0, 0, 1, 1], [], []>} : vector<8x128xbf16>, vector<128x512xbf16>, vector<8x512xf32> -> vector<8x512xf32>
    %324 = arith.addf %320, %323 : vector<8x512xf32>
    %c0_91 = arith.constant 0 : index
    %c512_92 = arith.constant 512 : index
    %325 = vector.load %arg17[%c0_91, %c512_92] : memref<64x1024xf32, #tpu.memory_space<vmem>>, vector<8x512xf32>
    %326 = arith.truncf %317 : vector<8x128xf32> to vector<8x128xbf16>
    %327 = vector.extract_strided_slice %7 {offsets = [0, 512], sizes = [128, 512], strides = [1, 1]} : vector<128x1024xbf16> to vector<128x512xbf16>
    %cst_93 = arith.constant dense<0.000000e+00> : vector<8x512xf32>
    %328 = tpu.matmul %326, %327, %cst_93 {dimension_numbers = #tpu.dot_dimension_numbers<[1], [0], [0], [1], [0, 0, 1, 1], [], []>} : vector<8x128xbf16>, vector<128x512xbf16>, vector<8x512xf32> -> vector<8x512xf32>
    %329 = arith.addf %325, %328 : vector<8x512xf32>
    %330 = vector.extract_strided_slice %324 {offsets = [0, 0], sizes = [8, 384], strides = [1, 1]} : vector<8x512xf32> to vector<8x384xf32>
    %331 = arith.negf %330 : vector<8x384xf32>
    %332 = math.exp %331 : vector<8x384xf32>
    %cst_94 = arith.constant 1.000000e+00 : f32
    %333 = vector.broadcast %cst_94 : f32 to vector<8x384xf32>
    %334 = arith.addf %333, %332 : vector<8x384xf32>
    %335 = arith.divf %333, %334 : vector<8x384xf32>
    %336 = vector.extract_strided_slice %324 {offsets = [0, 384], sizes = [8, 128], strides = [1, 1]} : vector<8x512xf32> to vector<8x128xf32>
    %337 = math.tanh %336 : vector<8x128xf32>
    %338 = vector.extract_strided_slice %335 {offsets = [0, 0], sizes = [8, 128], strides = [1, 1]} : vector<8x384xf32> to vector<8x128xf32>
    %339 = vector.extract_strided_slice %335 {offsets = [0, 128], sizes = [8, 128], strides = [1, 1]} : vector<8x384xf32> to vector<8x128xf32>
    %340 = vector.extract_strided_slice %335 {offsets = [0, 256], sizes = [8, 128], strides = [1, 1]} : vector<8x384xf32> to vector<8x128xf32>
    %341 = arith.mulf %339, %299 : vector<8x128xf32>
    %342 = arith.mulf %338, %337 : vector<8x128xf32>
    %343 = arith.addf %341, %342 : vector<8x128xf32>
    %344 = math.tanh %343 : vector<8x128xf32>
    %345 = arith.mulf %340, %344 : vector<8x128xf32>
    %346 = vector.extract_strided_slice %329 {offsets = [0, 0], sizes = [8, 384], strides = [1, 1]} : vector<8x512xf32> to vector<8x384xf32>
    %347 = arith.negf %346 : vector<8x384xf32>
    %348 = math.exp %347 : vector<8x384xf32>
    %cst_95 = arith.constant 1.000000e+00 : f32
    %349 = vector.broadcast %cst_95 : f32 to vector<8x384xf32>
    %350 = arith.addf %349, %348 : vector<8x384xf32>
    %351 = arith.divf %349, %350 : vector<8x384xf32>
    %352 = vector.extract_strided_slice %329 {offsets = [0, 384], sizes = [8, 128], strides = [1, 1]} : vector<8x512xf32> to vector<8x128xf32>
    %353 = math.tanh %352 : vector<8x128xf32>
    %354 = vector.extract_strided_slice %351 {offsets = [0, 0], sizes = [8, 128], strides = [1, 1]} : vector<8x384xf32> to vector<8x128xf32>
    %355 = vector.extract_strided_slice %351 {offsets = [0, 128], sizes = [8, 128], strides = [1, 1]} : vector<8x384xf32> to vector<8x128xf32>
    %356 = vector.extract_strided_slice %351 {offsets = [0, 256], sizes = [8, 128], strides = [1, 1]} : vector<8x384xf32> to vector<8x128xf32>
    %357 = arith.mulf %355, %315 : vector<8x128xf32>
    %358 = arith.mulf %354, %353 : vector<8x128xf32>
    %359 = arith.addf %357, %358 : vector<8x128xf32>
    %360 = math.tanh %359 : vector<8x128xf32>
    %361 = arith.mulf %356, %360 : vector<8x128xf32>
    %c56_96 = arith.constant 56 : index
    %c0_97 = arith.constant 0 : index
    %362 = vector.load %arg18[%c56_96, %c0_97] : memref<64x256xf32, #tpu.memory_space<vmem>>, vector<8x128xf32>
    tpu.vector_store %arg18[%c56_96, %c0_97], %345 {strides = array<i32>} : memref<64x256xf32, #tpu.memory_space<vmem>>, vector<8x128xf32>,
    %c0_98 = arith.constant 0 : index
    %c128_99 = arith.constant 128 : index
    %363 = vector.load %arg18[%c0_98, %c128_99] : memref<64x256xf32, #tpu.memory_space<vmem>>, vector<8x128xf32>
    tpu.vector_store %arg18[%c0_98, %c128_99], %361 {strides = array<i32>} : memref<64x256xf32, #tpu.memory_space<vmem>>, vector<8x128xf32>,
    %c0_100 = arith.constant 0 : index
    %c0_101 = arith.constant 0 : index
    %364 = vector.load %arg18[%c0_100, %c0_101] : memref<64x256xf32, #tpu.memory_space<vmem>>, vector<64x256xf32>
    %cst_102 = arith.constant 0.000000e+00 : f32
    %365 = vector.broadcast %cst_102 : f32 to vector<64x256xf32>
    %366 = arith.maximumf %364, %365 : vector<64x256xf32>
    %367 = arith.truncf %366 : vector<64x256xf32> to vector<64x256xbf16>
    %c0_103 = arith.constant 0 : index
    %c0_104 = arith.constant 0 : index
    %368 = vector.load %arg4[%c0_103, %c0_104] : memref<256x1024xbf16, #tpu.memory_space<vmem>>, vector<256x1024xbf16>
    %cst_105 = arith.constant dense<0.000000e+00> : vector<64x1024xf32>
    %369 = tpu.matmul %367, %368, %cst_105 {dimension_numbers = #tpu.dot_dimension_numbers<[1], [0], [0], [1], [0, 0, 1, 1], [], []>} : vector<64x256xbf16>, vector<256x1024xbf16>, vector<64x1024xf32> -> vector<64x1024xf32>
    %c0_106 = arith.constant 0 : index
    %c0_107 = arith.constant 0 : index
    %370 = vector.load %arg6[%c0_106, %c0_107] : memref<1x1024xf32, #tpu.memory_space<vmem>>, vector<1x1024xf32>
    %371 = vector.broadcast %370 : vector<1x1024xf32> to vector<64x1024xf32>
    %372 = arith.addf %369, %371 : vector<64x1024xf32>
    %c0_108 = arith.constant 0 : index
    %c0_109 = arith.constant 0 : index
    %373 = vector.load %arg17[%c0_108, %c0_109] : memref<64x1024xf32, #tpu.memory_space<vmem>>, vector<64x1024xf32>
    tpu.vector_store %arg17[%c0_108, %c0_109], %372 {strides = array<i32>} : memref<64x1024xf32, #tpu.memory_space<vmem>>, vector<64x1024xf32>,
    %c0_110 = arith.constant 0 : index
    %c0_111 = arith.constant 0 : index
    %374 = vector.load %arg5[%c0_110, %c0_111] : memref<128x1024xbf16, #tpu.memory_space<vmem>>, vector<128x1024xbf16>
    %c0_112 = arith.constant 0 : index
    %c0_113 = arith.constant 0 : index
    %375 = vector.load %arg17[%c0_112, %c0_113] : memref<64x1024xf32, #tpu.memory_space<vmem>>, vector<8x512xf32>
    %376 = arith.truncf %345 : vector<8x128xf32> to vector<8x128xbf16>
    %377 = vector.extract_strided_slice %374 {offsets = [0, 0], sizes = [128, 512], strides = [1, 1]} : vector<128x1024xbf16> to vector<128x512xbf16>
    %cst_114 = arith.constant dense<0.000000e+00> : vector<8x512xf32>
    %378 = tpu.matmul %376, %377, %cst_114 {dimension_numbers = #tpu.dot_dimension_numbers<[1], [0], [0], [1], [0, 0, 1, 1], [], []>} : vector<8x128xbf16>, vector<128x512xbf16>, vector<8x512xf32> -> vector<8x512xf32>
    %379 = arith.addf %375, %378 : vector<8x512xf32>
    %c56_115 = arith.constant 56 : index
    %c512_116 = arith.constant 512 : index
    %380 = vector.load %arg17[%c56_115, %c512_116] : memref<64x1024xf32, #tpu.memory_space<vmem>>, vector<8x512xf32>
    %381 = arith.truncf %361 : vector<8x128xf32> to vector<8x128xbf16>
    %382 = vector.extract_strided_slice %374 {offsets = [0, 512], sizes = [128, 512], strides = [1, 1]} : vector<128x1024xbf16> to vector<128x512xbf16>
    %cst_117 = arith.constant dense<0.000000e+00> : vector<8x512xf32>
    %383 = tpu.matmul %381, %382, %cst_117 {dimension_numbers = #tpu.dot_dimension_numbers<[1], [0], [0], [1], [0, 0, 1, 1], [], []>} : vector<8x128xbf16>, vector<128x512xbf16>, vector<8x512xf32> -> vector<8x512xf32>
    %384 = arith.addf %380, %383 : vector<8x512xf32>
    %385 = vector.extract_strided_slice %379 {offsets = [0, 0], sizes = [8, 384], strides = [1, 1]} : vector<8x512xf32> to vector<8x384xf32>
    %386 = arith.negf %385 : vector<8x384xf32>
    %387 = math.exp %386 : vector<8x384xf32>
    %cst_118 = arith.constant 1.000000e+00 : f32
    %388 = vector.broadcast %cst_118 : f32 to vector<8x384xf32>
    %389 = arith.addf %388, %387 : vector<8x384xf32>
    %390 = arith.divf %388, %389 : vector<8x384xf32>
    %391 = vector.extract_strided_slice %379 {offsets = [0, 384], sizes = [8, 128], strides = [1, 1]} : vector<8x512xf32> to vector<8x128xf32>
    %392 = math.tanh %391 : vector<8x128xf32>
    %393 = vector.extract_strided_slice %390 {offsets = [0, 0], sizes = [8, 128], strides = [1, 1]} : vector<8x384xf32> to vector<8x128xf32>
    %394 = vector.extract_strided_slice %390 {offsets = [0, 128], sizes = [8, 128], strides = [1, 1]} : vector<8x384xf32> to vector<8x128xf32>
    %395 = vector.extract_strided_slice %390 {offsets = [0, 256], sizes = [8, 128], strides = [1, 1]} : vector<8x384xf32> to vector<8x128xf32>
    %396 = arith.mulf %394, %343 : vector<8x128xf32>
    %397 = arith.mulf %393, %392 : vector<8x128xf32>
    %398 = arith.addf %396, %397 : vector<8x128xf32>
    %399 = math.tanh %398 : vector<8x128xf32>
    %400 = arith.mulf %395, %399 : vector<8x128xf32>
    %401 = vector.extract_strided_slice %384 {offsets = [0, 0], sizes = [8, 384], strides = [1, 1]} : vector<8x512xf32> to vector<8x384xf32>
    %402 = arith.negf %401 : vector<8x384xf32>
    %403 = math.exp %402 : vector<8x384xf32>
    %cst_119 = arith.constant 1.000000e+00 : f32
    %404 = vector.broadcast %cst_119 : f32 to vector<8x384xf32>
    %405 = arith.addf %404, %403 : vector<8x384xf32>
    %406 = arith.divf %404, %405 : vector<8x384xf32>
    %407 = vector.extract_strided_slice %384 {offsets = [0, 384], sizes = [8, 128], strides = [1, 1]} : vector<8x512xf32> to vector<8x128xf32>
    %408 = math.tanh %407 : vector<8x128xf32>
    %409 = vector.extract_strided_slice %406 {offsets = [0, 0], sizes = [8, 128], strides = [1, 1]} : vector<8x384xf32> to vector<8x128xf32>
    %410 = vector.extract_strided_slice %406 {offsets = [0, 128], sizes = [8, 128], strides = [1, 1]} : vector<8x384xf32> to vector<8x128xf32>
    %411 = vector.extract_strided_slice %406 {offsets = [0, 256], sizes = [8, 128], strides = [1, 1]} : vector<8x384xf32> to vector<8x128xf32>
    %412 = arith.mulf %410, %359 : vector<8x128xf32>
    %413 = arith.mulf %409, %408 : vector<8x128xf32>
    %414 = arith.addf %412, %413 : vector<8x128xf32>
    %415 = math.tanh %414 : vector<8x128xf32>
    %416 = arith.mulf %411, %415 : vector<8x128xf32>
    %c0_120 = arith.constant 0 : index
    %c0_121 = arith.constant 0 : index
    %417 = vector.load %arg13[%c0_120, %c0_121] : memref<64x256xf32, #tpu.memory_space<vmem>>, vector<8x128xf32>
    tpu.vector_store %arg13[%c0_120, %c0_121], %400 {strides = array<i32>} : memref<64x256xf32, #tpu.memory_space<vmem>>, vector<8x128xf32>,
    %c56_122 = arith.constant 56 : index
    %c128_123 = arith.constant 128 : index
    %418 = vector.load %arg13[%c56_122, %c128_123] : memref<64x256xf32, #tpu.memory_space<vmem>>, vector<8x128xf32>
    tpu.vector_store %arg13[%c56_122, %c128_123], %416 {strides = array<i32>} : memref<64x256xf32, #tpu.memory_space<vmem>>, vector<8x128xf32>,
    %c8_124 = arith.constant 8 : index
    %c0_125 = arith.constant 0 : index
    %419 = vector.load %arg17[%c8_124, %c0_125] : memref<64x1024xf32, #tpu.memory_space<vmem>>, vector<8x512xf32>
    %420 = arith.truncf %400 : vector<8x128xf32> to vector<8x128xbf16>
    %421 = vector.extract_strided_slice %374 {offsets = [0, 0], sizes = [128, 512], strides = [1, 1]} : vector<128x1024xbf16> to vector<128x512xbf16>
    %cst_126 = arith.constant dense<0.000000e+00> : vector<8x512xf32>
    %422 = tpu.matmul %420, %421, %cst_126 {dimension_numbers = #tpu.dot_dimension_numbers<[1], [0], [0], [1], [0, 0, 1, 1], [], []>} : vector<8x128xbf16>, vector<128x512xbf16>, vector<8x512xf32> -> vector<8x512xf32>
    %423 = arith.addf %419, %422 : vector<8x512xf32>
    %c48_127 = arith.constant 48 : index
    %c512_128 = arith.constant 512 : index
    %424 = vector.load %arg17[%c48_127, %c512_128] : memref<64x1024xf32, #tpu.memory_space<vmem>>, vector<8x512xf32>
    %425 = arith.truncf %416 : vector<8x128xf32> to vector<8x128xbf16>
    %426 = vector.extract_strided_slice %374 {offsets = [0, 512], sizes = [128, 512], strides = [1, 1]} : vector<128x1024xbf16> to vector<128x512xbf16>
    %cst_129 = arith.constant dense<0.000000e+00> : vector<8x512xf32>
    %427 = tpu.matmul %425, %426, %cst_129 {dimension_numbers = #tpu.dot_dimension_numbers<[1], [0], [0], [1], [0, 0, 1, 1], [], []>} : vector<8x128xbf16>, vector<128x512xbf16>, vector<8x512xf32> -> vector<8x512xf32>
    %428 = arith.addf %424, %427 : vector<8x512xf32>
    %429 = vector.extract_strided_slice %423 {offsets = [0, 0], sizes = [8, 384], strides = [1, 1]} : vector<8x512xf32> to vector<8x384xf32>
    %430 = arith.negf %429 : vector<8x384xf32>
    %431 = math.exp %430 : vector<8x384xf32>
    %cst_130 = arith.constant 1.000000e+00 : f32
    %432 = vector.broadcast %cst_130 : f32 to vector<8x384xf32>
    %433 = arith.addf %432, %431 : vector<8x384xf32>
    %434 = arith.divf %432, %433 : vector<8x384xf32>
    %435 = vector.extract_strided_slice %423 {offsets = [0, 384], sizes = [8, 128], strides = [1, 1]} : vector<8x512xf32> to vector<8x128xf32>
    %436 = math.tanh %435 : vector<8x128xf32>
    %437 = vector.extract_strided_slice %434 {offsets = [0, 0], sizes = [8, 128], strides = [1, 1]} : vector<8x384xf32> to vector<8x128xf32>
    %438 = vector.extract_strided_slice %434 {offsets = [0, 128], sizes = [8, 128], strides = [1, 1]} : vector<8x384xf32> to vector<8x128xf32>
    %439 = vector.extract_strided_slice %434 {offsets = [0, 256], sizes = [8, 128], strides = [1, 1]} : vector<8x384xf32> to vector<8x128xf32>
    %440 = arith.mulf %438, %398 : vector<8x128xf32>
    %441 = arith.mulf %437, %436 : vector<8x128xf32>
    %442 = arith.addf %440, %441 : vector<8x128xf32>
    %443 = math.tanh %442 : vector<8x128xf32>
    %444 = arith.mulf %439, %443 : vector<8x128xf32>
    %445 = vector.extract_strided_slice %428 {offsets = [0, 0], sizes = [8, 384], strides = [1, 1]} : vector<8x512xf32> to vector<8x384xf32>
    %446 = arith.negf %445 : vector<8x384xf32>
    %447 = math.exp %446 : vector<8x384xf32>
    %cst_131 = arith.constant 1.000000e+00 : f32
    %448 = vector.broadcast %cst_131 : f32 to vector<8x384xf32>
    %449 = arith.addf %448, %447 : vector<8x384xf32>
    %450 = arith.divf %448, %449 : vector<8x384xf32>
    %451 = vector.extract_strided_slice %428 {offsets = [0, 384], sizes = [8, 128], strides = [1, 1]} : vector<8x512xf32> to vector<8x128xf32>
    %452 = math.tanh %451 : vector<8x128xf32>
    %453 = vector.extract_strided_slice %450 {offsets = [0, 0], sizes = [8, 128], strides = [1, 1]} : vector<8x384xf32> to vector<8x128xf32>
    %454 = vector.extract_strided_slice %450 {offsets = [0, 128], sizes = [8, 128], strides = [1, 1]} : vector<8x384xf32> to vector<8x128xf32>
    %455 = vector.extract_strided_slice %450 {offsets = [0, 256], sizes = [8, 128], strides = [1, 1]} : vector<8x384xf32> to vector<8x128xf32>
    %456 = arith.mulf %454, %414 : vector<8x128xf32>
    %457 = arith.mulf %453, %452 : vector<8x128xf32>
    %458 = arith.addf %456, %457 : vector<8x128xf32>
    %459 = math.tanh %458 : vector<8x128xf32>
    %460 = arith.mulf %455, %459 : vector<8x128xf32>
    %c8_132 = arith.constant 8 : index
    %c0_133 = arith.constant 0 : index
    %461 = vector.load %arg13[%c8_132, %c0_133] : memref<64x256xf32, #tpu.memory_space<vmem>>, vector<8x128xf32>
    tpu.vector_store %arg13[%c8_132, %c0_133], %444 {strides = array<i32>} : memref<64x256xf32, #tpu.memory_space<vmem>>, vector<8x128xf32>,
    %c48_134 = arith.constant 48 : index
    %c128_135 = arith.constant 128 : index
    %462 = vector.load %arg13[%c48_134, %c128_135] : memref<64x256xf32, #tpu.memory_space<vmem>>, vector<8x128xf32>
    tpu.vector_store %arg13[%c48_134, %c128_135], %460 {strides = array<i32>} : memref<64x256xf32, #tpu.memory_space<vmem>>, vector<8x128xf32>,
    %c16_136 = arith.constant 16 : index
    %c0_137 = arith.constant 0 : index
    %463 = vector.load %arg17[%c16_136, %c0_137] : memref<64x1024xf32, #tpu.memory_space<vmem>>, vector<8x512xf32>
    %464 = arith.truncf %444 : vector<8x128xf32> to vector<8x128xbf16>
    %465 = vector.extract_strided_slice %374 {offsets = [0, 0], sizes = [128, 512], strides = [1, 1]} : vector<128x1024xbf16> to vector<128x512xbf16>
    %cst_138 = arith.constant dense<0.000000e+00> : vector<8x512xf32>
    %466 = tpu.matmul %464, %465, %cst_138 {dimension_numbers = #tpu.dot_dimension_numbers<[1], [0], [0], [1], [0, 0, 1, 1], [], []>} : vector<8x128xbf16>, vector<128x512xbf16>, vector<8x512xf32> -> vector<8x512xf32>
    %467 = arith.addf %463, %466 : vector<8x512xf32>
    %c40_139 = arith.constant 40 : index
    %c512_140 = arith.constant 512 : index
    %468 = vector.load %arg17[%c40_139, %c512_140] : memref<64x1024xf32, #tpu.memory_space<vmem>>, vector<8x512xf32>
    %469 = arith.truncf %460 : vector<8x128xf32> to vector<8x128xbf16>
    %470 = vector.extract_strided_slice %374 {offsets = [0, 512], sizes = [128, 512], strides = [1, 1]} : vector<128x1024xbf16> to vector<128x512xbf16>
    %cst_141 = arith.constant dense<0.000000e+00> : vector<8x512xf32>
    %471 = tpu.matmul %469, %470, %cst_141 {dimension_numbers = #tpu.dot_dimension_numbers<[1], [0], [0], [1], [0, 0, 1, 1], [], []>} : vector<8x128xbf16>, vector<128x512xbf16>, vector<8x512xf32> -> vector<8x512xf32>
    %472 = arith.addf %468, %471 : vector<8x512xf32>
    %473 = vector.extract_strided_slice %467 {offsets = [0, 0], sizes = [8, 384], strides = [1, 1]} : vector<8x512xf32> to vector<8x384xf32>
    %474 = arith.negf %473 : vector<8x384xf32>
    %475 = math.exp %474 : vector<8x384xf32>
    %cst_142 = arith.constant 1.000000e+00 : f32
    %476 = vector.broadcast %cst_142 : f32 to vector<8x384xf32>
    %477 = arith.addf %476, %475 : vector<8x384xf32>
    %478 = arith.divf %476, %477 : vector<8x384xf32>
    %479 = vector.extract_strided_slice %467 {offsets = [0, 384], sizes = [8, 128], strides = [1, 1]} : vector<8x512xf32> to vector<8x128xf32>
    %480 = math.tanh %479 : vector<8x128xf32>
    %481 = vector.extract_strided_slice %478 {offsets = [0, 0], sizes = [8, 128], strides = [1, 1]} : vector<8x384xf32> to vector<8x128xf32>
    %482 = vector.extract_strided_slice %478 {offsets = [0, 128], sizes = [8, 128], strides = [1, 1]} : vector<8x384xf32> to vector<8x128xf32>
    %483 = vector.extract_strided_slice %478 {offsets = [0, 256], sizes = [8, 128], strides = [1, 1]} : vector<8x384xf32> to vector<8x128xf32>
    %484 = arith.mulf %482, %442 : vector<8x128xf32>
    %485 = arith.mulf %481, %480 : vector<8x128xf32>
    %486 = arith.addf %484, %485 : vector<8x128xf32>
    %487 = math.tanh %486 : vector<8x128xf32>
    %488 = arith.mulf %483, %487 : vector<8x128xf32>
    %489 = vector.extract_strided_slice %472 {offsets = [0, 0], sizes = [8, 384], strides = [1, 1]} : vector<8x512xf32> to vector<8x384xf32>
    %490 = arith.negf %489 : vector<8x384xf32>
    %491 = math.exp %490 : vector<8x384xf32>
    %cst_143 = arith.constant 1.000000e+00 : f32
    %492 = vector.broadcast %cst_143 : f32 to vector<8x384xf32>
    %493 = arith.addf %492, %491 : vector<8x384xf32>
    %494 = arith.divf %492, %493 : vector<8x384xf32>
    %495 = vector.extract_strided_slice %472 {offsets = [0, 384], sizes = [8, 128], strides = [1, 1]} : vector<8x512xf32> to vector<8x128xf32>
    %496 = math.tanh %495 : vector<8x128xf32>
    %497 = vector.extract_strided_slice %494 {offsets = [0, 0], sizes = [8, 128], strides = [1, 1]} : vector<8x384xf32> to vector<8x128xf32>
    %498 = vector.extract_strided_slice %494 {offsets = [0, 128], sizes = [8, 128], strides = [1, 1]} : vector<8x384xf32> to vector<8x128xf32>
    %499 = vector.extract_strided_slice %494 {offsets = [0, 256], sizes = [8, 128], strides = [1, 1]} : vector<8x384xf32> to vector<8x128xf32>
    %500 = arith.mulf %498, %458 : vector<8x128xf32>
    %501 = arith.mulf %497, %496 : vector<8x128xf32>
    %502 = arith.addf %500, %501 : vector<8x128xf32>
    %503 = math.tanh %502 : vector<8x128xf32>
    %504 = arith.mulf %499, %503 : vector<8x128xf32>
    %c16_144 = arith.constant 16 : index
    %c0_145 = arith.constant 0 : index
    %505 = vector.load %arg13[%c16_144, %c0_145] : memref<64x256xf32, #tpu.memory_space<vmem>>, vector<8x128xf32>
    tpu.vector_store %arg13[%c16_144, %c0_145], %488 {strides = array<i32>} : memref<64x256xf32, #tpu.memory_space<vmem>>, vector<8x128xf32>,
    %c40_146 = arith.constant 40 : index
    %c128_147 = arith.constant 128 : index
    %506 = vector.load %arg13[%c40_146, %c128_147] : memref<64x256xf32, #tpu.memory_space<vmem>>, vector<8x128xf32>
    tpu.vector_store %arg13[%c40_146, %c128_147], %504 {strides = array<i32>} : memref<64x256xf32, #tpu.memory_space<vmem>>, vector<8x128xf32>,
    %c24_148 = arith.constant 24 : index
    %c0_149 = arith.constant 0 : index
    %507 = vector.load %arg17[%c24_148, %c0_149] : memref<64x1024xf32, #tpu.memory_space<vmem>>, vector<8x512xf32>
    %508 = arith.truncf %488 : vector<8x128xf32> to vector<8x128xbf16>
    %509 = vector.extract_strided_slice %374 {offsets = [0, 0], sizes = [128, 512], strides = [1, 1]} : vector<128x1024xbf16> to vector<128x512xbf16>
    %cst_150 = arith.constant dense<0.000000e+00> : vector<8x512xf32>
    %510 = tpu.matmul %508, %509, %cst_150 {dimension_numbers = #tpu.dot_dimension_numbers<[1], [0], [0], [1], [0, 0, 1, 1], [], []>} : vector<8x128xbf16>, vector<128x512xbf16>, vector<8x512xf32> -> vector<8x512xf32>
    %511 = arith.addf %507, %510 : vector<8x512xf32>
    %c32_151 = arith.constant 32 : index
    %c512_152 = arith.constant 512 : index
    %512 = vector.load %arg17[%c32_151, %c512_152] : memref<64x1024xf32, #tpu.memory_space<vmem>>, vector<8x512xf32>
    %513 = arith.truncf %504 : vector<8x128xf32> to vector<8x128xbf16>
    %514 = vector.extract_strided_slice %374 {offsets = [0, 512], sizes = [128, 512], strides = [1, 1]} : vector<128x1024xbf16> to vector<128x512xbf16>
    %cst_153 = arith.constant dense<0.000000e+00> : vector<8x512xf32>
    %515 = tpu.matmul %513, %514, %cst_153 {dimension_numbers = #tpu.dot_dimension_numbers<[1], [0], [0], [1], [0, 0, 1, 1], [], []>} : vector<8x128xbf16>, vector<128x512xbf16>, vector<8x512xf32> -> vector<8x512xf32>
    %516 = arith.addf %512, %515 : vector<8x512xf32>
    %517 = vector.extract_strided_slice %511 {offsets = [0, 0], sizes = [8, 384], strides = [1, 1]} : vector<8x512xf32> to vector<8x384xf32>
    %518 = arith.negf %517 : vector<8x384xf32>
    %519 = math.exp %518 : vector<8x384xf32>
    %cst_154 = arith.constant 1.000000e+00 : f32
    %520 = vector.broadcast %cst_154 : f32 to vector<8x384xf32>
    %521 = arith.addf %520, %519 : vector<8x384xf32>
    %522 = arith.divf %520, %521 : vector<8x384xf32>
    %523 = vector.extract_strided_slice %511 {offsets = [0, 384], sizes = [8, 128], strides = [1, 1]} : vector<8x512xf32> to vector<8x128xf32>
    %524 = math.tanh %523 : vector<8x128xf32>
    %525 = vector.extract_strided_slice %522 {offsets = [0, 0], sizes = [8, 128], strides = [1, 1]} : vector<8x384xf32> to vector<8x128xf32>
    %526 = vector.extract_strided_slice %522 {offsets = [0, 128], sizes = [8, 128], strides = [1, 1]} : vector<8x384xf32> to vector<8x128xf32>
    %527 = vector.extract_strided_slice %522 {offsets = [0, 256], sizes = [8, 128], strides = [1, 1]} : vector<8x384xf32> to vector<8x128xf32>
    %528 = arith.mulf %526, %486 : vector<8x128xf32>
    %529 = arith.mulf %525, %524 : vector<8x128xf32>
    %530 = arith.addf %528, %529 : vector<8x128xf32>
    %531 = math.tanh %530 : vector<8x128xf32>
    %532 = arith.mulf %527, %531 : vector<8x128xf32>
    %533 = vector.extract_strided_slice %516 {offsets = [0, 0], sizes = [8, 384], strides = [1, 1]} : vector<8x512xf32> to vector<8x384xf32>
    %534 = arith.negf %533 : vector<8x384xf32>
    %535 = math.exp %534 : vector<8x384xf32>
    %cst_155 = arith.constant 1.000000e+00 : f32
    %536 = vector.broadcast %cst_155 : f32 to vector<8x384xf32>
    %537 = arith.addf %536, %535 : vector<8x384xf32>
    %538 = arith.divf %536, %537 : vector<8x384xf32>
    %539 = vector.extract_strided_slice %516 {offsets = [0, 384], sizes = [8, 128], strides = [1, 1]} : vector<8x512xf32> to vector<8x128xf32>
    %540 = math.tanh %539 : vector<8x128xf32>
    %541 = vector.extract_strided_slice %538 {offsets = [0, 0], sizes = [8, 128], strides = [1, 1]} : vector<8x384xf32> to vector<8x128xf32>
    %542 = vector.extract_strided_slice %538 {offsets = [0, 128], sizes = [8, 128], strides = [1, 1]} : vector<8x384xf32> to vector<8x128xf32>
    %543 = vector.extract_strided_slice %538 {offsets = [0, 256], sizes = [8, 128], strides = [1, 1]} : vector<8x384xf32> to vector<8x128xf32>
    %544 = arith.mulf %542, %502 : vector<8x128xf32>
    %545 = arith.mulf %541, %540 : vector<8x128xf32>
    %546 = arith.addf %544, %545 : vector<8x128xf32>
    %547 = math.tanh %546 : vector<8x128xf32>
    %548 = arith.mulf %543, %547 : vector<8x128xf32>
    %c24_156 = arith.constant 24 : index
    %c0_157 = arith.constant 0 : index
    %549 = vector.load %arg13[%c24_156, %c0_157] : memref<64x256xf32, #tpu.memory_space<vmem>>, vector<8x128xf32>
    tpu.vector_store %arg13[%c24_156, %c0_157], %532 {strides = array<i32>} : memref<64x256xf32, #tpu.memory_space<vmem>>, vector<8x128xf32>,
    %c32_158 = arith.constant 32 : index
    %c128_159 = arith.constant 128 : index
    %550 = vector.load %arg13[%c32_158, %c128_159] : memref<64x256xf32, #tpu.memory_space<vmem>>, vector<8x128xf32>
    tpu.vector_store %arg13[%c32_158, %c128_159], %548 {strides = array<i32>} : memref<64x256xf32, #tpu.memory_space<vmem>>, vector<8x128xf32>,
    %c32_160 = arith.constant 32 : index
    %c0_161 = arith.constant 0 : index
    %551 = vector.load %arg17[%c32_160, %c0_161] : memref<64x1024xf32, #tpu.memory_space<vmem>>, vector<8x512xf32>
    %552 = arith.truncf %532 : vector<8x128xf32> to vector<8x128xbf16>
    %553 = vector.extract_strided_slice %374 {offsets = [0, 0], sizes = [128, 512], strides = [1, 1]} : vector<128x1024xbf16> to vector<128x512xbf16>
    %cst_162 = arith.constant dense<0.000000e+00> : vector<8x512xf32>
    %554 = tpu.matmul %552, %553, %cst_162 {dimension_numbers = #tpu.dot_dimension_numbers<[1], [0], [0], [1], [0, 0, 1, 1], [], []>} : vector<8x128xbf16>, vector<128x512xbf16>, vector<8x512xf32> -> vector<8x512xf32>
    %555 = arith.addf %551, %554 : vector<8x512xf32>
    %c24_163 = arith.constant 24 : index
    %c512_164 = arith.constant 512 : index
    %556 = vector.load %arg17[%c24_163, %c512_164] : memref<64x1024xf32, #tpu.memory_space<vmem>>, vector<8x512xf32>
    %557 = arith.truncf %548 : vector<8x128xf32> to vector<8x128xbf16>
    %558 = vector.extract_strided_slice %374 {offsets = [0, 512], sizes = [128, 512], strides = [1, 1]} : vector<128x1024xbf16> to vector<128x512xbf16>
    %cst_165 = arith.constant dense<0.000000e+00> : vector<8x512xf32>
    %559 = tpu.matmul %557, %558, %cst_165 {dimension_numbers = #tpu.dot_dimension_numbers<[1], [0], [0], [1], [0, 0, 1, 1], [], []>} : vector<8x128xbf16>, vector<128x512xbf16>, vector<8x512xf32> -> vector<8x512xf32>
    %560 = arith.addf %556, %559 : vector<8x512xf32>
    %561 = vector.extract_strided_slice %555 {offsets = [0, 0], sizes = [8, 384], strides = [1, 1]} : vector<8x512xf32> to vector<8x384xf32>
    %562 = arith.negf %561 : vector<8x384xf32>
    %563 = math.exp %562 : vector<8x384xf32>
    %cst_166 = arith.constant 1.000000e+00 : f32
    %564 = vector.broadcast %cst_166 : f32 to vector<8x384xf32>
    %565 = arith.addf %564, %563 : vector<8x384xf32>
    %566 = arith.divf %564, %565 : vector<8x384xf32>
    %567 = vector.extract_strided_slice %555 {offsets = [0, 384], sizes = [8, 128], strides = [1, 1]} : vector<8x512xf32> to vector<8x128xf32>
    %568 = math.tanh %567 : vector<8x128xf32>
    %569 = vector.extract_strided_slice %566 {offsets = [0, 0], sizes = [8, 128], strides = [1, 1]} : vector<8x384xf32> to vector<8x128xf32>
    %570 = vector.extract_strided_slice %566 {offsets = [0, 128], sizes = [8, 128], strides = [1, 1]} : vector<8x384xf32> to vector<8x128xf32>
    %571 = vector.extract_strided_slice %566 {offsets = [0, 256], sizes = [8, 128], strides = [1, 1]} : vector<8x384xf32> to vector<8x128xf32>
    %572 = arith.mulf %570, %530 : vector<8x128xf32>
    %573 = arith.mulf %569, %568 : vector<8x128xf32>
    %574 = arith.addf %572, %573 : vector<8x128xf32>
    %575 = math.tanh %574 : vector<8x128xf32>
    %576 = arith.mulf %571, %575 : vector<8x128xf32>
    %577 = vector.extract_strided_slice %560 {offsets = [0, 0], sizes = [8, 384], strides = [1, 1]} : vector<8x512xf32> to vector<8x384xf32>
    %578 = arith.negf %577 : vector<8x384xf32>
    %579 = math.exp %578 : vector<8x384xf32>
    %cst_167 = arith.constant 1.000000e+00 : f32
    %580 = vector.broadcast %cst_167 : f32 to vector<8x384xf32>
    %581 = arith.addf %580, %579 : vector<8x384xf32>
    %582 = arith.divf %580, %581 : vector<8x384xf32>
    %583 = vector.extract_strided_slice %560 {offsets = [0, 384], sizes = [8, 128], strides = [1, 1]} : vector<8x512xf32> to vector<8x128xf32>
    %584 = math.tanh %583 : vector<8x128xf32>
    %585 = vector.extract_strided_slice %582 {offsets = [0, 0], sizes = [8, 128], strides = [1, 1]} : vector<8x384xf32> to vector<8x128xf32>
    %586 = vector.extract_strided_slice %582 {offsets = [0, 128], sizes = [8, 128], strides = [1, 1]} : vector<8x384xf32> to vector<8x128xf32>
    %587 = vector.extract_strided_slice %582 {offsets = [0, 256], sizes = [8, 128], strides = [1, 1]} : vector<8x384xf32> to vector<8x128xf32>
    %588 = arith.mulf %586, %546 : vector<8x128xf32>
    %589 = arith.mulf %585, %584 : vector<8x128xf32>
    %590 = arith.addf %588, %589 : vector<8x128xf32>
    %591 = math.tanh %590 : vector<8x128xf32>
    %592 = arith.mulf %587, %591 : vector<8x128xf32>
    %c32_168 = arith.constant 32 : index
    %c0_169 = arith.constant 0 : index
    %593 = vector.load %arg13[%c32_168, %c0_169] : memref<64x256xf32, #tpu.memory_space<vmem>>, vector<8x128xf32>
    tpu.vector_store %arg13[%c32_168, %c0_169], %576 {strides = array<i32>} : memref<64x256xf32, #tpu.memory_space<vmem>>, vector<8x128xf32>,
    %c24_170 = arith.constant 24 : index
    %c128_171 = arith.constant 128 : index
    %594 = vector.load %arg13[%c24_170, %c128_171] : memref<64x256xf32, #tpu.memory_space<vmem>>, vector<8x128xf32>
    tpu.vector_store %arg13[%c24_170, %c128_171], %592 {strides = array<i32>} : memref<64x256xf32, #tpu.memory_space<vmem>>, vector<8x128xf32>,
    %c40_172 = arith.constant 40 : index
    %c0_173 = arith.constant 0 : index
    %595 = vector.load %arg17[%c40_172, %c0_173] : memref<64x1024xf32, #tpu.memory_space<vmem>>, vector<8x512xf32>
    %596 = arith.truncf %576 : vector<8x128xf32> to vector<8x128xbf16>
    %597 = vector.extract_strided_slice %374 {offsets = [0, 0], sizes = [128, 512], strides = [1, 1]} : vector<128x1024xbf16> to vector<128x512xbf16>
    %cst_174 = arith.constant dense<0.000000e+00> : vector<8x512xf32>
    %598 = tpu.matmul %596, %597, %cst_174 {dimension_numbers = #tpu.dot_dimension_numbers<[1], [0], [0], [1], [0, 0, 1, 1], [], []>} : vector<8x128xbf16>, vector<128x512xbf16>, vector<8x512xf32> -> vector<8x512xf32>
    %599 = arith.addf %595, %598 : vector<8x512xf32>
    %c16_175 = arith.constant 16 : index
    %c512_176 = arith.constant 512 : index
    %600 = vector.load %arg17[%c16_175, %c512_176] : memref<64x1024xf32, #tpu.memory_space<vmem>>, vector<8x512xf32>
    %601 = arith.truncf %592 : vector<8x128xf32> to vector<8x128xbf16>
    %602 = vector.extract_strided_slice %374 {offsets = [0, 512], sizes = [128, 512], strides = [1, 1]} : vector<128x1024xbf16> to vector<128x512xbf16>
    %cst_177 = arith.constant dense<0.000000e+00> : vector<8x512xf32>
    %603 = tpu.matmul %601, %602, %cst_177 {dimension_numbers = #tpu.dot_dimension_numbers<[1], [0], [0], [1], [0, 0, 1, 1], [], []>} : vector<8x128xbf16>, vector<128x512xbf16>, vector<8x512xf32> -> vector<8x512xf32>
    %604 = arith.addf %600, %603 : vector<8x512xf32>
    %605 = vector.extract_strided_slice %599 {offsets = [0, 0], sizes = [8, 384], strides = [1, 1]} : vector<8x512xf32> to vector<8x384xf32>
    %606 = arith.negf %605 : vector<8x384xf32>
    %607 = math.exp %606 : vector<8x384xf32>
    %cst_178 = arith.constant 1.000000e+00 : f32
    %608 = vector.broadcast %cst_178 : f32 to vector<8x384xf32>
    %609 = arith.addf %608, %607 : vector<8x384xf32>
    %610 = arith.divf %608, %609 : vector<8x384xf32>
    %611 = vector.extract_strided_slice %599 {offsets = [0, 384], sizes = [8, 128], strides = [1, 1]} : vector<8x512xf32> to vector<8x128xf32>
    %612 = math.tanh %611 : vector<8x128xf32>
    %613 = vector.extract_strided_slice %610 {offsets = [0, 0], sizes = [8, 128], strides = [1, 1]} : vector<8x384xf32> to vector<8x128xf32>
    %614 = vector.extract_strided_slice %610 {offsets = [0, 128], sizes = [8, 128], strides = [1, 1]} : vector<8x384xf32> to vector<8x128xf32>
    %615 = vector.extract_strided_slice %610 {offsets = [0, 256], sizes = [8, 128], strides = [1, 1]} : vector<8x384xf32> to vector<8x128xf32>
    %616 = arith.mulf %614, %574 : vector<8x128xf32>
    %617 = arith.mulf %613, %612 : vector<8x128xf32>
    %618 = arith.addf %616, %617 : vector<8x128xf32>
    %619 = math.tanh %618 : vector<8x128xf32>
    %620 = arith.mulf %615, %619 : vector<8x128xf32>
    %621 = vector.extract_strided_slice %604 {offsets = [0, 0], sizes = [8, 384], strides = [1, 1]} : vector<8x512xf32> to vector<8x384xf32>
    %622 = arith.negf %621 : vector<8x384xf32>
    %623 = math.exp %622 : vector<8x384xf32>
    %cst_179 = arith.constant 1.000000e+00 : f32
    %624 = vector.broadcast %cst_179 : f32 to vector<8x384xf32>
    %625 = arith.addf %624, %623 : vector<8x384xf32>
    %626 = arith.divf %624, %625 : vector<8x384xf32>
    %627 = vector.extract_strided_slice %604 {offsets = [0, 384], sizes = [8, 128], strides = [1, 1]} : vector<8x512xf32> to vector<8x128xf32>
    %628 = math.tanh %627 : vector<8x128xf32>
    %629 = vector.extract_strided_slice %626 {offsets = [0, 0], sizes = [8, 128], strides = [1, 1]} : vector<8x384xf32> to vector<8x128xf32>
    %630 = vector.extract_strided_slice %626 {offsets = [0, 128], sizes = [8, 128], strides = [1, 1]} : vector<8x384xf32> to vector<8x128xf32>
    %631 = vector.extract_strided_slice %626 {offsets = [0, 256], sizes = [8, 128], strides = [1, 1]} : vector<8x384xf32> to vector<8x128xf32>
    %632 = arith.mulf %630, %590 : vector<8x128xf32>
    %633 = arith.mulf %629, %628 : vector<8x128xf32>
    %634 = arith.addf %632, %633 : vector<8x128xf32>
    %635 = math.tanh %634 : vector<8x128xf32>
    %636 = arith.mulf %631, %635 : vector<8x128xf32>
    %c40_180 = arith.constant 40 : index
    %c0_181 = arith.constant 0 : index
    %637 = vector.load %arg13[%c40_180, %c0_181] : memref<64x256xf32, #tpu.memory_space<vmem>>, vector<8x128xf32>
    tpu.vector_store %arg13[%c40_180, %c0_181], %620 {strides = array<i32>} : memref<64x256xf32, #tpu.memory_space<vmem>>, vector<8x128xf32>,
    %c16_182 = arith.constant 16 : index
    %c128_183 = arith.constant 128 : index
    %638 = vector.load %arg13[%c16_182, %c128_183] : memref<64x256xf32, #tpu.memory_space<vmem>>, vector<8x128xf32>
    tpu.vector_store %arg13[%c16_182, %c128_183], %636 {strides = array<i32>} : memref<64x256xf32, #tpu.memory_space<vmem>>, vector<8x128xf32>,
    %c48_184 = arith.constant 48 : index
    %c0_185 = arith.constant 0 : index
    %639 = vector.load %arg17[%c48_184, %c0_185] : memref<64x1024xf32, #tpu.memory_space<vmem>>, vector<8x512xf32>
    %640 = arith.truncf %620 : vector<8x128xf32> to vector<8x128xbf16>
    %641 = vector.extract_strided_slice %374 {offsets = [0, 0], sizes = [128, 512], strides = [1, 1]} : vector<128x1024xbf16> to vector<128x512xbf16>
    %cst_186 = arith.constant dense<0.000000e+00> : vector<8x512xf32>
    %642 = tpu.matmul %640, %641, %cst_186 {dimension_numbers = #tpu.dot_dimension_numbers<[1], [0], [0], [1], [0, 0, 1, 1], [], []>} : vector<8x128xbf16>, vector<128x512xbf16>, vector<8x512xf32> -> vector<8x512xf32>
    %643 = arith.addf %639, %642 : vector<8x512xf32>
    %c8_187 = arith.constant 8 : index
    %c512_188 = arith.constant 512 : index
    %644 = vector.load %arg17[%c8_187, %c512_188] : memref<64x1024xf32, #tpu.memory_space<vmem>>, vector<8x512xf32>
    %645 = arith.truncf %636 : vector<8x128xf32> to vector<8x128xbf16>
    %646 = vector.extract_strided_slice %374 {offsets = [0, 512], sizes = [128, 512], strides = [1, 1]} : vector<128x1024xbf16> to vector<128x512xbf16>
    %cst_189 = arith.constant dense<0.000000e+00> : vector<8x512xf32>
    %647 = tpu.matmul %645, %646, %cst_189 {dimension_numbers = #tpu.dot_dimension_numbers<[1], [0], [0], [1], [0, 0, 1, 1], [], []>} : vector<8x128xbf16>, vector<128x512xbf16>, vector<8x512xf32> -> vector<8x512xf32>
    %648 = arith.addf %644, %647 : vector<8x512xf32>
    %649 = vector.extract_strided_slice %643 {offsets = [0, 0], sizes = [8, 384], strides = [1, 1]} : vector<8x512xf32> to vector<8x384xf32>
    %650 = arith.negf %649 : vector<8x384xf32>
    %651 = math.exp %650 : vector<8x384xf32>
    %cst_190 = arith.constant 1.000000e+00 : f32
    %652 = vector.broadcast %cst_190 : f32 to vector<8x384xf32>
    %653 = arith.addf %652, %651 : vector<8x384xf32>
    %654 = arith.divf %652, %653 : vector<8x384xf32>
    %655 = vector.extract_strided_slice %643 {offsets = [0, 384], sizes = [8, 128], strides = [1, 1]} : vector<8x512xf32> to vector<8x128xf32>
    %656 = math.tanh %655 : vector<8x128xf32>
    %657 = vector.extract_strided_slice %654 {offsets = [0, 0], sizes = [8, 128], strides = [1, 1]} : vector<8x384xf32> to vector<8x128xf32>
    %658 = vector.extract_strided_slice %654 {offsets = [0, 128], sizes = [8, 128], strides = [1, 1]} : vector<8x384xf32> to vector<8x128xf32>
    %659 = vector.extract_strided_slice %654 {offsets = [0, 256], sizes = [8, 128], strides = [1, 1]} : vector<8x384xf32> to vector<8x128xf32>
    %660 = arith.mulf %658, %618 : vector<8x128xf32>
    %661 = arith.mulf %657, %656 : vector<8x128xf32>
    %662 = arith.addf %660, %661 : vector<8x128xf32>
    %663 = math.tanh %662 : vector<8x128xf32>
    %664 = arith.mulf %659, %663 : vector<8x128xf32>
    %665 = vector.extract_strided_slice %648 {offsets = [0, 0], sizes = [8, 384], strides = [1, 1]} : vector<8x512xf32> to vector<8x384xf32>
    %666 = arith.negf %665 : vector<8x384xf32>
    %667 = math.exp %666 : vector<8x384xf32>
    %cst_191 = arith.constant 1.000000e+00 : f32
    %668 = vector.broadcast %cst_191 : f32 to vector<8x384xf32>
    %669 = arith.addf %668, %667 : vector<8x384xf32>
    %670 = arith.divf %668, %669 : vector<8x384xf32>
    %671 = vector.extract_strided_slice %648 {offsets = [0, 384], sizes = [8, 128], strides = [1, 1]} : vector<8x512xf32> to vector<8x128xf32>
    %672 = math.tanh %671 : vector<8x128xf32>
    %673 = vector.extract_strided_slice %670 {offsets = [0, 0], sizes = [8, 128], strides = [1, 1]} : vector<8x384xf32> to vector<8x128xf32>
    %674 = vector.extract_strided_slice %670 {offsets = [0, 128], sizes = [8, 128], strides = [1, 1]} : vector<8x384xf32> to vector<8x128xf32>
    %675 = vector.extract_strided_slice %670 {offsets = [0, 256], sizes = [8, 128], strides = [1, 1]} : vector<8x384xf32> to vector<8x128xf32>
    %676 = arith.mulf %674, %634 : vector<8x128xf32>
    %677 = arith.mulf %673, %672 : vector<8x128xf32>
    %678 = arith.addf %676, %677 : vector<8x128xf32>
    %679 = math.tanh %678 : vector<8x128xf32>
    %680 = arith.mulf %675, %679 : vector<8x128xf32>
    %c48_192 = arith.constant 48 : index
    %c0_193 = arith.constant 0 : index
    %681 = vector.load %arg13[%c48_192, %c0_193] : memref<64x256xf32, #tpu.memory_space<vmem>>, vector<8x128xf32>
    tpu.vector_store %arg13[%c48_192, %c0_193], %664 {strides = array<i32>} : memref<64x256xf32, #tpu.memory_space<vmem>>, vector<8x128xf32>,
    %c8_194 = arith.constant 8 : index
    %c128_195 = arith.constant 128 : index
    %682 = vector.load %arg13[%c8_194, %c128_195] : memref<64x256xf32, #tpu.memory_space<vmem>>, vector<8x128xf32>
    tpu.vector_store %arg13[%c8_194, %c128_195], %680 {strides = array<i32>} : memref<64x256xf32, #tpu.memory_space<vmem>>, vector<8x128xf32>,
    %c56_196 = arith.constant 56 : index
    %c0_197 = arith.constant 0 : index
    %683 = vector.load %arg17[%c56_196, %c0_197] : memref<64x1024xf32, #tpu.memory_space<vmem>>, vector<8x512xf32>
    %684 = arith.truncf %664 : vector<8x128xf32> to vector<8x128xbf16>
    %685 = vector.extract_strided_slice %374 {offsets = [0, 0], sizes = [128, 512], strides = [1, 1]} : vector<128x1024xbf16> to vector<128x512xbf16>
    %cst_198 = arith.constant dense<0.000000e+00> : vector<8x512xf32>
    %686 = tpu.matmul %684, %685, %cst_198 {dimension_numbers = #tpu.dot_dimension_numbers<[1], [0], [0], [1], [0, 0, 1, 1], [], []>} : vector<8x128xbf16>, vector<128x512xbf16>, vector<8x512xf32> -> vector<8x512xf32>
    %687 = arith.addf %683, %686 : vector<8x512xf32>
    %c0_199 = arith.constant 0 : index
    %c512_200 = arith.constant 512 : index
    %688 = vector.load %arg17[%c0_199, %c512_200] : memref<64x1024xf32, #tpu.memory_space<vmem>>, vector<8x512xf32>
    %689 = arith.truncf %680 : vector<8x128xf32> to vector<8x128xbf16>
    %690 = vector.extract_strided_slice %374 {offsets = [0, 512], sizes = [128, 512], strides = [1, 1]} : vector<128x1024xbf16> to vector<128x512xbf16>
    %cst_201 = arith.constant dense<0.000000e+00> : vector<8x512xf32>
    %691 = tpu.matmul %689, %690, %cst_201 {dimension_numbers = #tpu.dot_dimension_numbers<[1], [0], [0], [1], [0, 0, 1, 1], [], []>} : vector<8x128xbf16>, vector<128x512xbf16>, vector<8x512xf32> -> vector<8x512xf32>
    %692 = arith.addf %688, %691 : vector<8x512xf32>
    %693 = vector.extract_strided_slice %687 {offsets = [0, 0], sizes = [8, 384], strides = [1, 1]} : vector<8x512xf32> to vector<8x384xf32>
    %694 = arith.negf %693 : vector<8x384xf32>
    %695 = math.exp %694 : vector<8x384xf32>
    %cst_202 = arith.constant 1.000000e+00 : f32
    %696 = vector.broadcast %cst_202 : f32 to vector<8x384xf32>
    %697 = arith.addf %696, %695 : vector<8x384xf32>
    %698 = arith.divf %696, %697 : vector<8x384xf32>
    %699 = vector.extract_strided_slice %687 {offsets = [0, 384], sizes = [8, 128], strides = [1, 1]} : vector<8x512xf32> to vector<8x128xf32>
    %700 = math.tanh %699 : vector<8x128xf32>
    %701 = vector.extract_strided_slice %698 {offsets = [0, 0], sizes = [8, 128], strides = [1, 1]} : vector<8x384xf32> to vector<8x128xf32>
    %702 = vector.extract_strided_slice %698 {offsets = [0, 128], sizes = [8, 128], strides = [1, 1]} : vector<8x384xf32> to vector<8x128xf32>
    %703 = vector.extract_strided_slice %698 {offsets = [0, 256], sizes = [8, 128], strides = [1, 1]} : vector<8x384xf32> to vector<8x128xf32>
    %704 = arith.mulf %702, %662 : vector<8x128xf32>
    %705 = arith.mulf %701, %700 : vector<8x128xf32>
    %706 = arith.addf %704, %705 : vector<8x128xf32>
    %707 = math.tanh %706 : vector<8x128xf32>
    %708 = arith.mulf %703, %707 : vector<8x128xf32>
    %709 = vector.extract_strided_slice %692 {offsets = [0, 0], sizes = [8, 384], strides = [1, 1]} : vector<8x512xf32> to vector<8x384xf32>
    %710 = arith.negf %709 : vector<8x384xf32>
    %711 = math.exp %710 : vector<8x384xf32>
    %cst_203 = arith.constant 1.000000e+00 : f32
    %712 = vector.broadcast %cst_203 : f32 to vector<8x384xf32>
    %713 = arith.addf %712, %711 : vector<8x384xf32>
    %714 = arith.divf %712, %713 : vector<8x384xf32>
    %715 = vector.extract_strided_slice %692 {offsets = [0, 384], sizes = [8, 128], strides = [1, 1]} : vector<8x512xf32> to vector<8x128xf32>
    %716 = math.tanh %715 : vector<8x128xf32>
    %717 = vector.extract_strided_slice %714 {offsets = [0, 0], sizes = [8, 128], strides = [1, 1]} : vector<8x384xf32> to vector<8x128xf32>
    %718 = vector.extract_strided_slice %714 {offsets = [0, 128], sizes = [8, 128], strides = [1, 1]} : vector<8x384xf32> to vector<8x128xf32>
    %719 = vector.extract_strided_slice %714 {offsets = [0, 256], sizes = [8, 128], strides = [1, 1]} : vector<8x384xf32> to vector<8x128xf32>
    %720 = arith.mulf %718, %678 : vector<8x128xf32>
    %721 = arith.mulf %717, %716 : vector<8x128xf32>
    %722 = arith.addf %720, %721 : vector<8x128xf32>
    %723 = math.tanh %722 : vector<8x128xf32>
    %724 = arith.mulf %719, %723 : vector<8x128xf32>
    %c56_204 = arith.constant 56 : index
    %c0_205 = arith.constant 0 : index
    %725 = vector.load %arg13[%c56_204, %c0_205] : memref<64x256xf32, #tpu.memory_space<vmem>>, vector<8x128xf32>
    tpu.vector_store %arg13[%c56_204, %c0_205], %708 {strides = array<i32>} : memref<64x256xf32, #tpu.memory_space<vmem>>, vector<8x128xf32>,
    %c0_206 = arith.constant 0 : index
    %c128_207 = arith.constant 128 : index
    %726 = vector.load %arg13[%c0_206, %c128_207] : memref<64x256xf32, #tpu.memory_space<vmem>>, vector<8x128xf32>
    tpu.vector_store %arg13[%c0_206, %c128_207], %724 {strides = array<i32>} : memref<64x256xf32, #tpu.memory_space<vmem>>, vector<8x128xf32>,
    %c0_208 = arith.constant 0 : index
    %c0_209 = arith.constant 0 : index
    %727 = vector.load %arg14[%c0_208, %c0_209] : memref<8x256xf32, #tpu.memory_space<vmem>>, vector<8x128xf32>
    tpu.vector_store %arg14[%c0_208, %c0_209], %345 {strides = array<i32>} : memref<8x256xf32, #tpu.memory_space<vmem>>, vector<8x128xf32>,
    %c0_210 = arith.constant 0 : index
    %c128_211 = arith.constant 128 : index
    %728 = vector.load %arg14[%c0_210, %c128_211] : memref<8x256xf32, #tpu.memory_space<vmem>>, vector<8x128xf32>
    tpu.vector_store %arg14[%c0_210, %c128_211], %361 {strides = array<i32>} : memref<8x256xf32, #tpu.memory_space<vmem>>, vector<8x128xf32>,
    %729 = tpu.concatenate %345, %361 in 1 : vector<8x128xf32>, vector<8x128xf32> -> vector<8x256xf32>
    %730 = arith.truncf %729 : vector<8x256xf32> to vector<8x256xbf16>
    %c0_212 = arith.constant 0 : index
    %c0_213 = arith.constant 0 : index
    %731 = vector.load %arg7[%c0_212, %c0_213] : memref<256x256xbf16, #tpu.memory_space<vmem>>, vector<256x256xbf16>
    %cst_214 = arith.constant dense<0.000000e+00> : vector<8x256xf32>
    %732 = tpu.matmul %730, %731, %cst_214 {dimension_numbers = #tpu.dot_dimension_numbers<[1], [0], [0], [1], [0, 0, 1, 1], [], []>} : vector<8x256xbf16>, vector<256x256xbf16>, vector<8x256xf32> -> vector<8x256xf32>
    %c0_215 = arith.constant 0 : index
    %c0_216 = arith.constant 0 : index
    %733 = vector.load %arg8[%c0_215, %c0_216] : memref<1x256xf32, #tpu.memory_space<vmem>>, vector<1x256xf32>
    %734 = vector.broadcast %733 : vector<1x256xf32> to vector<8x256xf32>
    %735 = arith.addf %732, %734 : vector<8x256xf32>
    %736 = arith.truncf %735 : vector<8x256xf32> to vector<8x256xbf16>
    %737 = vector.extract_strided_slice %736 {offsets = [0, 0], sizes = [8, 128], strides = [1, 1]} : vector<8x256xbf16> to vector<8x128xbf16>
    %c0_217 = arith.constant 0 : index
    %c0_218 = arith.constant 0 : index
    %738 = vector.load %arg9[%c0_217, %c0_218] : memref<128x4xbf16, #tpu.memory_space<vmem>>, vector<128x4xbf16>
    %cst_219 = arith.constant dense<0.000000e+00> : vector<8x4xf32>
    %739 = tpu.matmul %737, %738, %cst_219 {dimension_numbers = #tpu.dot_dimension_numbers<[1], [0], [0], [1], [0, 0, 1, 1], [], []>} : vector<8x128xbf16>, vector<128x4xbf16>, vector<8x4xf32> -> vector<8x4xf32>
    %c0_220 = arith.constant 0 : index
    %c0_221 = arith.constant 0 : index
    %740 = vector.load %arg10[%c0_220, %c0_221] : memref<1x4xf32, #tpu.memory_space<vmem>>, vector<1x4xf32>
    %741 = vector.broadcast %740 : vector<1x4xf32> to vector<8x4xf32>
    %742 = arith.addf %739, %741 : vector<8x4xf32>
    %743 = arith.negf %742 : vector<8x4xf32>
    %744 = math.exp %743 : vector<8x4xf32>
    %cst_222 = arith.constant 1.000000e+00 : f32
    %745 = vector.broadcast %cst_222 : f32 to vector<8x4xf32>
    %746 = arith.addf %745, %744 : vector<8x4xf32>
    %747 = arith.divf %745, %746 : vector<8x4xf32>
    %c0_223 = arith.constant 0 : index
    %c0_224 = arith.constant 0 : index
    %748 = vector.load %arg15[%c0_223, %c0_224] : memref<8x4xf32, #tpu.memory_space<vmem>>, vector<8x4xf32>
    tpu.vector_store %arg15[%c0_223, %c0_224], %747 {strides = array<i32>} : memref<8x4xf32, #tpu.memory_space<vmem>>, vector<8x4xf32>,
    %749 = vector.extract_strided_slice %736 {offsets = [0, 128], sizes = [8, 128], strides = [1, 1]} : vector<8x256xbf16> to vector<8x128xbf16>
    %c0_225 = arith.constant 0 : index
    %c0_226 = arith.constant 0 : index
    %750 = vector.load %arg11[%c0_225, %c0_226] : memref<128x1xbf16, #tpu.memory_space<vmem>>, vector<128x1xbf16>
    %cst_227 = arith.constant dense<0.000000e+00> : vector<8x1xf32>
    %751 = tpu.matmul %749, %750, %cst_227 {dimension_numbers = #tpu.dot_dimension_numbers<[1], [0], [0], [1], [0, 0, 1, 1], [], []>} : vector<8x128xbf16>, vector<128x1xbf16>, vector<8x1xf32> -> vector<8x1xf32>
    %c0_228 = arith.constant 0 : index
    %c0_229 = arith.constant 0 : index
    %752 = vector.load %arg12[%c0_228, %c0_229] : memref<1x1xf32, #tpu.memory_space<vmem>>, vector<1x1xf32>
    %753 = vector.broadcast %752 : vector<1x1xf32> to vector<8x1xf32>
    %754 = arith.addf %751, %753 : vector<8x1xf32>
    %c0_230 = arith.constant 0 : index
    %c0_231 = arith.constant 0 : index
    %755 = vector.load %arg16[%c0_230, %c0_231] : memref<8x1xf32, #tpu.memory_space<vmem>>, vector<8x1xf32>
    tpu.vector_store %arg16[%c0_230, %c0_231], %754 {strides = array<i32>} : memref<8x1xf32, #tpu.memory_space<vmem>>, vector<8x1xf32>,
    return
  }
}

</mosaic_0001>

<bundles_post_ra>
// kernel: net_forward.1
= control target key start
LH: loop header
LB: loop body
LE: loop exit
PB: predicated region body
PF: predicated region fallthrough
CT: control target
= control target key end

     0   :  { %s10558_s0 = inlined_call_operand.vmem [shape: bf16[64,12], index: 0, kind: input, shape index: {}]   ;;  %s10559_s1 = inlined_call_operand.vmem [shape: bf16[12,1024], index: 1, kind: input, shape index: {}]   ;;  %s10560_s2 = inlined_call_operand.hbm [shape: bf16[128,1024], index: 2, kind: input, shape index: {}]   ;;  %s10561_s3 = inlined_call_operand.vmem [shape: f32[1,1024], index: 3, kind: input, shape index: {}]   ;;  %s10562_s4 = inlined_call_operand.hbm [shape: bf16[256,1024], index: 4, kind: input, shape index: {}]   ;;  %s10563_s5 = inlined_call_operand.hbm [shape: bf16[128,1024], index: 5, kind: input, shape index: {}]   ;;  %s10564_s6 = inlined_call_operand.vmem [shape: f32[1,1024], index: 6, kind: input, shape index: {}]   ;;  %s10565_s7 = inlined_call_operand.hbm [shape: bf16[256,256], index: 7, kind: input, shape index: {}]   ;;  %s10566_s8 = inlined_call_operand.vmem [shape: f32[1,256], index: 8, kind: input, shape index: {}]   ;;  %s10567_s9 = inlined_call_operand.vmem [shape: bf16[128,4], index: 9, kind: input, shape index: {}]   ;;  %s10568_s10 = inlined_call_operand.vmem [shape: f32[1,4], index: 10, kind: input, shape index: {}]   ;;  %s10569_s11 = inlined_call_operand.vmem [shape: bf16[128,1], index: 11, kind: input, shape index: {}]   ;;  %s10570_s12 = inlined_call_operand.<no memory space> [shape: f32[1,1], index: 12, kind: input, shape index: {}]   ;;  %s10571_s13 = inlined_call_operand.vmem [shape: f32[64,256], index: 13, kind: output, shape index: {0}]   ;;  %s10572_s14 = inlined_call_operand.vmem [shape: f32[8,256], index: 14, kind: output, shape index: {1}]   ;;  %s10573_s15 = inlined_call_operand.vmem [shape: f32[8,4], index: 15, kind: output, shape index: {2}]   ;;  %s10574_s16 = inlined_call_operand.vmem [shape: f32[8,1], index: 16, kind: output, shape index: {3}]  }
   0x1   :  { %10732 = sst [smem:[#allocation111_spill]] %s10558_s0  ;;  %v22_v0 = vstv %s10570_s12 }
   0x2   :  { %23 = vst [vmem:[#allocation4] sm:$0x1] %v22_v0 }
   0x3   :  { %24 = vsyncpa [#allocation6], 0 }
   0x4   :  { %25 = vsyncpa [#allocation8], 0 }
   0x5   :  { %26 = vsyncpa [#allocation11], 0  ;;  %s7976_s23 = smov [#allocation7]   ;;  %s7977_s25 = smov [#allocation5]  }
   0x6   :  { %s50_s24 = sshll.u32 %s7976_s23, 4  ;;  %s36_s26 = sshll.u32 %s7977_s25, 4  ;;  %s51_s24 = int_to_ptr.vmem [resolvable:$true] %s50_s24  ;;  %s8075_s26 = int_to_ptr.vmem [resolvable:$true] %s36_s26 }
   0x7   :  { %s7882_s29 = scalar_lea.hbm %s10562_s4, 16384 }
   0x8   :  { %p7883_p0 = scmp.ne.s32.totalorder %s10562_s4, %s7882_s29  ;;  %p7886_p1 = scmp.lt.u32.totalorder %s7882_s29, %s10562_s4 }
   0xa   :  { %p7888_p2 = pnand %p7886_p1, %p7883_p0 }
   0xc   :  { %7891 = shalt.err (!%p7888_p2)
}
   0xd   :  { %s7892_s18 = scalar_lea.vmem %s51_s24, 16384  ;;  %p7897_p4 = scmp.lt.s32.totalorder %s51_s24, %s51_s24 }
   0xe   :  { %p7893_p3 = scmp.ne.s32.totalorder %s51_s24, %s7892_s18  ;;  %p7898_p5 = scmp.lt.s32.totalorder %s7892_s18, %s7892_s18 }
  0x10   :  { %p7899_p6 = por %p7898_p5, %p7897_p4 }
  0x12   :  { %p7900_p7 = pnand %p7899_p6, %p7893_p3 }
  0x14   :  { %7903 = shalt.err (!%p7900_p7)
}
  0x15   :  { %s7978_s19 = smov 512   ;;  %s7979_s20 = smov 32  }
  0x16   :  { %56 = dma.hbm_to_vmem [thread:$0]  %s10562_s4, 16384, %s51_s24, [#allocation8], %s7978_s19, %s7978_s19, %s7979_s20  }
  0x17   :  { %s7904_s27 = scalar_lea.hbm %s10560_s2, 8192 }
  0x18   :  { %p7905_p8 = scmp.ne.s32.totalorder %s10560_s2, %s7904_s27  ;;  %p7908_p9 = scmp.lt.u32.totalorder %s7904_s27, %s10560_s2 }
  0x1a   :  { %p7910_p10 = pnand %p7908_p9, %p7905_p8 }
  0x1c   :  { %7913 = shalt.err (!%p7910_p10)
}
  0x1d   :  { %s7914_s12 = scalar_lea.vmem %s8075_s26, 8192  ;;  %p7919_p12 = scmp.lt.s32.totalorder %s8075_s26, %s8075_s26 }
  0x1e   :  { %p7915_p11 = scmp.ne.s32.totalorder %s8075_s26, %s7914_s12  ;;  %p7920_p13 = scmp.lt.s32.totalorder %s7914_s12, %s7914_s12 }
  0x20   :  { %p7921_p0 = por %p7920_p13, %p7919_p12 }
  0x22   :  { %p7922_p1 = pnand %p7921_p0, %p7915_p11 }
  0x24   :  { %7925 = shalt.err (!%p7922_p1)
}
  0x25   :  { %42 = dma.hbm_to_vmem [thread:$0]  %s10560_s2, 8192, %s8075_s26, [#allocation6], %s7978_s19, %s7978_s19, %s7979_s20  }
  0x26   :  { %s7980_s17 = smov [#allocation9]   ;;  %s7981_s21 = smov [#allocation10]  }
  0x27   :  { %s62_s18 = sshll.u32 %s7980_s17, 4  ;;  %s76_s22 = sshll.u32 %s7981_s21, 4  ;;  %s63_s18 = int_to_ptr.vmem [resolvable:$true] %s62_s18  ;;  %s8112_s22 = int_to_ptr.vmem [resolvable:$true] %s76_s22 }
  0x28   :  { %s7926_s27 = scalar_lea.hbm %s10563_s5, 8192 }
  0x29   :  { %p7927_p2 = scmp.ne.s32.totalorder %s10563_s5, %s7926_s27  ;;  %p7930_p3 = scmp.lt.u32.totalorder %s7926_s27, %s10563_s5 }
  0x2b   :  { %p7932_p4 = pnand %p7930_p3, %p7927_p2 }
  0x2d   :  { %7935 = shalt.err (!%p7932_p4)
}
  0x2e   :  { %s7936_s2 = scalar_lea.vmem %s63_s18, 8192  ;;  %p7941_p6 = scmp.lt.s32.totalorder %s63_s18, %s63_s18 }
  0x2f   :  { %p7937_p5 = scmp.ne.s32.totalorder %s63_s18, %s7936_s2  ;;  %p7942_p7 = scmp.lt.s32.totalorder %s7936_s2, %s7936_s2 }
  0x31   :  { %p7943_p8 = por %p7942_p7, %p7941_p6 }
  0x33   :  { %p7944_p9 = pnand %p7943_p8, %p7937_p5 }
  0x35   :  { %7947 = shalt.err (!%p7944_p9)
}
  0x36   :  { %68 = dma.hbm_to_vmem [thread:$0]  %s10563_s5, 8192, %s63_s18, [#allocation8], %s7978_s19, %s7978_s19, %s7979_s20  }
  0x37   :  { %s7948_s17 = scalar_lea.hbm %s10565_s7, 4096 }
  0x38   :  { %p7949_p10 = scmp.ne.s32.totalorder %s10565_s7, %s7948_s17  ;;  %p7952_p11 = scmp.lt.u32.totalorder %s7948_s17, %s10565_s7 }
  0x3a   :  { %p7954_p12 = pnand %p7952_p11, %p7949_p10 }
  0x3c   :  { %7957 = shalt.err (!%p7954_p12)
}
  0x3d   :  { %s7958_s28 = scalar_lea.vmem %s8112_s22, 4096  ;;  %p7963_p0 = scmp.lt.s32.totalorder %s8112_s22, %s8112_s22 }
  0x3e   :  { %p7959_p13 = scmp.ne.s32.totalorder %s8112_s22, %s7958_s28  ;;  %p7964_p1 = scmp.lt.s32.totalorder %s7958_s28, %s7958_s28 }
  0x40   :  { %p7965_p2 = por %p7964_p1, %p7963_p0 }
  0x42   :  { %p7966_p3 = pnand %p7965_p2, %p7959_p13 }
  0x44   :  { %7969 = shalt.err (!%p7966_p3)
}
  0x45   :  { %s7982_s5 = smov 128   ;;  %s7983_s19 = smov 8  }
  0x46   :  { %82 = dma.hbm_to_vmem [thread:$0]  %s10565_s7, 4096, %s8112_s22, [#allocation11], %s7982_s5, %s7982_s5, %s7983_s19  }
  0x47   :  { %7970 = dma.done.wait [#allocation6], 8192  }
  0x48   :  { %7971 = vsyncadd [#allocation6], 4294959104 }
  0x49   :  { %7972 = dma.done.wait [#allocation8], 24576  }
  0x4a   :  { %7973 = vsyncadd [#allocation8], 4294942720 }
  0x4b   :  { %7974 = dma.done.wait [#allocation11], 4096  }
  0x4c   :  { %7975 = vsyncadd [#allocation11], 4294963200  ;;  %v10576_v1 = vmov 0   ;;  %v114_v2 = vld [vmem:[%s10559_s1] sm:$0xff]  ;;  %vm229_vm0 = vcmask 1045504   ;;  %v115_v4 = vld [vmem:[%s10559_s1 + $0x8] sm:$0xff] }
  0x4d   :  { %286 = vmatprep.mubr.bf16.mxu0 %v10576_v1  ;;  %359 = vmatprep.mubr.bf16.mxu1 %v10576_v1  ;;  %v118_v3 = vld [vmem:[%s10559_s1 + $0x20] sm:$0x33]  ;;  %v119_v6 = vld [vmem:[%s10559_s1 + $0x28] sm:$0x33]  ;;  %vm216_vm1 = vcmask 97280   ;;  %v116_v10 = vld [vmem:[%s10559_s1 + $0x10] sm:$0xff] }
  0x4e   :  { %v6799_v5 = vcombine.high %v114_v2, %v118_v3  ;;  %v6798_v7 = vcombine.low %v114_v2, %v118_v3  ;;  %v6801_v8 = vcombine.high %v115_v4, %v119_v6  ;;  %v6800_v9 = vcombine.low %v115_v4, %v119_v6  ;;  %v120_v11 = vld [vmem:[%s10559_s1 + $0x30] sm:$0x33]  ;;  %s10733_s27 = sld [smem:[#allocation111_spill]]  ;;  %v117_v17 = vld [vmem:[%s10559_s1 + $0x18] sm:$0xff]  ;;  %v610_v22 = vld [vmem:[#allocation5] sm:$0xff] }
  0x4f   :  { %v6803_v14 = vcombine.high %v116_v10, %v120_v11  ;;  %v6802_v15 = vcombine.low %v116_v10, %v120_v11  ;;  %v121_v18 = vld [vmem:[%s10559_s1 + $0x38] sm:$0x33]  ;;  %v614_v24 = vld [vmem:[#allocation5 + $0x20] sm:$0xff]  ;;  %v611_v25 = vld [vmem:[#allocation5 + $0x8] sm:$0xff]  ;;  %vm7986_vm2 = vmmov 0   ;;  %vm6660_vm3 = vcmask 31744  }
  0x50   :  { %6806 = vmatprep.subr.msk.bf16.mxu0 %vm229_vm0, %v6799_v5  ;;  %v231_v12 = vsel %vm229_vm0, %v6798_v7, 0  ;;  %6811 = vmatprep.subr.msk.bf16.mxu1 %vm229_vm0, %v6801_v8  ;;  %v237_v16 = vsel %vm229_vm0, %v6800_v9, 0  ;;  %v6805_v20 = vcombine.high %v117_v17, %v121_v18  ;;  %v6804_v21 = vcombine.low %v117_v17, %v121_v18  ;;  %v615_v26 = vld [vmem:[#allocation5 + $0x28] sm:$0xff]  ;;  %v618_v32 = vld [vmem:[#allocation5 + $0x40] sm:$0xff] }
  0x51   :  { %255 = vmatpush1.bf16.msra.mxu0 %v231_v12  ;;  %328 = vmatpush1.bf16.msra.mxu1 %v237_v16  ;;  %v243_v19 = vsel %vm229_vm0, %v6802_v15, 0  ;;  %v8185_v27 = vcombine.high %v610_v22, %v614_v24  ;;  %v8187_v28 = vcombine.high %v611_v25, %v615_v26  ;;  %v622_v33 = vld [vmem:[#allocation5 + $0x60] sm:$0xff]  ;;  %v619_v34 = vld [vmem:[#allocation5 + $0x48] sm:$0xff]  ;;  %v8222_v36 = vcombine.low %v610_v22, %v614_v24 }
  0x52   :  { %6816 = vmatprep.subr.msk.bf16.mxu0 %vm229_vm0, %v6803_v14  ;;  %6821 = vmatprep.subr.msk.bf16.mxu1 %vm229_vm0, %v6805_v20  ;;  %v249_v23 = vsel %vm229_vm0, %v6804_v21, 0  ;;  %v623_v35 = vld [vmem:[#allocation5 + $0x68] sm:$0xff]  ;;  %v626_v37 = vld [vmem:[#allocation5 + $0x80] sm:$0xff]  ;;  %v8224_v39 = vcombine.low %v611_v25, %v615_v26  ;;  %v8226_v40 = vcombine.high %v618_v32, %v622_v33  ;;  %v8233_v44 = vcombine.low %v618_v32, %v622_v33  ;;  %v612_v25 = vld [vmem:[#allocation5 + $0x10] sm:$0xff] }
  0x53   :  { %v630_v38 = vld [vmem:[#allocation5 + $0xa0] sm:$0xff]  ;;  %v627_v41 = vld [vmem:[#allocation5 + $0x88] sm:$0xff]  ;;  %v8228_v43 = vcombine.high %v619_v34, %v623_v35  ;;  %v8237_v47 = vcombine.low %v619_v34, %v623_v35  ;;  %v616_v26 = vld [vmem:[#allocation5 + $0x30] sm:$0xff]  ;;  %vm6773_vm4 = vcmask 7168  }
  0x54   :  { %v7298_v13 = vld [vmem:[%s10733_s27] sm:$0xff]   ;;  %v7299_v29 = vld [vmem:[%s10733_s27 + $0x8] sm:$0xff]   ;;  %v8203_v30 = vld [vmem:[%s10733_s27 + $0x10] sm:$0xff]   ;;  %v8239_v48 = vcombine.high %v626_v37, %v630_v38  ;;  %v8247_v52 = vcombine.low %v626_v37, %v630_v38  ;;  %v8327_v34 = vcombine.high %v612_v25, %v616_v26 }
  0x55   :  { %6807 = vmatmul.mubr.msk.bf16.vlgmr.msra.gmra.mrb[0].mxu0 %vm216_vm1, %v7298_v13  ;;  %6812 = vmatmul.mubr.msk.bf16.vlgmr.msra.gmra.mrb[0].mxu1 %vm216_vm1, %v7298_v13  ;;  %v8214_v31 = vld [vmem:[%s10733_s27 + $0x18] sm:$0xff]   ;;  %v631_v42 = vld [vmem:[#allocation5 + $0xa8] sm:$0xff]  ;;  %v634_v45 = vld [vmem:[#allocation5 + $0xc0] sm:$0xff] }
  0x56   :  { %401 = vmatpush1.bf16.msra.mxu0 %v243_v19  ;;  %296 = vmatprep.mubr.bf16.mxu0 %v10576_v1  ;;  %v638_v46 = vld [vmem:[#allocation5 + $0xe0] sm:$0xff]  ;;  %10734 = vst [vmem:[#allocation15_spill] sm:$0xff] %v8239_v48  ;;  %v635_v49 = vld [vmem:[#allocation5 + $0xc8] sm:$0xff]  ;;  %v8243_v51 = vcombine.high %v627_v41, %v631_v42  ;;  %10736 = vst [vmem:[#allocation17_spill] sm:$0xff] %v8247_v52  ;;  %v8251_v55 = vcombine.low %v627_v41, %v631_v42 }
  0x57   :  { %369 = vmatprep.mubr.bf16.mxu1 %v10576_v1  ;;  %474 = vmatpush1.bf16.msra.mxu1 %v249_v23  ;;  %v639_v50 = vld [vmem:[#allocation5 + $0xe8] sm:$0xff]  ;;  %v642_v53 = vld [vmem:[#allocation5 + $0x100] sm:$0xff]  ;;  %v8253_v56 = vcombine.high %v634_v45, %v638_v46  ;;  %v8261_v60 = vcombine.low %v634_v45, %v638_v46  ;;  %10758 = vst [vmem:[#allocation39_spill] sm:$0xff] %v8327_v34  ;;  %v620_v37 = vld [vmem:[#allocation5 + $0x50] sm:$0xff] }
  0x58   :  { %838 = vmatprep.subr.bf16.mxu0 %v8185_v27  ;;  %879 = vmatprep.subr.bf16.mxu1 %v8187_v28  ;;  %10735 = vst [vmem:[#allocation16_spill] sm:$0xff] %v8243_v51  ;;  %v646_v54 = vld [vmem:[#allocation5 + $0x120] sm:$0xff]  ;;  %10737 = vst [vmem:[#allocation18_spill] sm:$0xff] %v8251_v55  ;;  %v643_v57 = vld [vmem:[#allocation5 + $0x108] sm:$0xff]  ;;  %v8256_v59 = vcombine.high %v635_v49, %v639_v50  ;;  %v8265_v61 = vcombine.low %v635_v49, %v639_v50 }
  0x59   :  { %10738 = vst [vmem:[#allocation19_spill] sm:$0xff] %v8253_v56  ;;  %v647_v58 = vld [vmem:[#allocation5 + $0x128] sm:$0xff]  ;;  %10740 = vst [vmem:[#allocation21_spill] sm:$0xff] %v8261_v60  ;;  %v8267_v62 = vcombine.high %v642_v53, %v646_v54  ;;  %v650_v0 = vld [vmem:[#allocation5 + $0x140] sm:$0xff]  ;;  %v8275_v5 = vcombine.low %v642_v53, %v646_v54  ;;  %v8335_v42 = vcombine.low %v612_v25, %v616_v26 }
  0x5a   :  { %10739 = vst [vmem:[#allocation20_spill] sm:$0xff] %v8256_v59  ;;  %10741 = vst [vmem:[#allocation22_spill] sm:$0xff] %v8265_v61  ;;  %v8271_v63 = vcombine.high %v643_v57, %v647_v58  ;;  %v654_v2 = vld [vmem:[#allocation5 + $0x160] sm:$0xff]  ;;  %v651_v3 = vld [vmem:[#allocation5 + $0x148] sm:$0xff]  ;;  %v8279_v6 = vcombine.low %v643_v57, %v647_v58 }
  0x5b   :  { %10742 = vst [vmem:[#allocation23_spill] sm:$0xff] %v8267_v62  ;;  %v655_v4 = vld [vmem:[#allocation5 + $0x168] sm:$0xff]  ;;  %10744 = vst [vmem:[#allocation25_spill] sm:$0xff] %v8275_v5  ;;  %v8281_v7 = vcombine.high %v650_v0, %v654_v2  ;;  %v658_v9 = vld [vmem:[#allocation5 + $0x180] sm:$0xff] }
  0x5c   :  { %10743 = vst [vmem:[#allocation24_spill] sm:$0xff] %v8271_v63  ;;  %10745 = vst [vmem:[#allocation26_spill] sm:$0xff] %v8279_v6  ;;  %v8284_v8 = vcombine.high %v651_v3, %v655_v4  ;;  %v662_v10 = vld [vmem:[#allocation5 + $0x1a0] sm:$0xff]  ;;  %v659_v11 = vld [vmem:[#allocation5 + $0x188] sm:$0xff]  ;;  %v8295_v14 = vcombine.low %v651_v3, %v655_v4 }
  0x5d   :  { %6808 = vmatmul.mubr.msk.bf16.gmra.mrb[4].mxu0 %vm216_vm1, %v7299_v29  ;;  %6813 = vmatmul.mubr.msk.bf16.gmra.mrb[4].mxu1 %vm216_vm1, %v7299_v29  ;;  %10746 = vst [vmem:[#allocation27_spill] sm:$0xff] %v8281_v7  ;;  %v663_v12 = vld [vmem:[#allocation5 + $0x1a8] sm:$0xff]  ;;  %v8297_v15 = vcombine.high %v658_v9, %v662_v10  ;;  %v666_v17 = vld [vmem:[#allocation5 + $0x1c0] sm:$0xff]  ;;  %v8305_v21 = vcombine.low %v658_v9, %v662_v10  ;;  %v621_v38 = vld [vmem:[#allocation5 + $0x58] sm:$0xff] }
  0x5e   :  { %306 = vmatprep.mubr.bf16.mxu0 %v10576_v1  ;;  %379 = vmatprep.mubr.bf16.mxu1 %v10576_v1  ;;  %10747 = vst [vmem:[#allocation28_spill] sm:$0xff] %v8284_v8  ;;  %10749 = vst [vmem:[#allocation30_spill] sm:$0xff] %v8295_v14  ;;  %v8301_v16 = vcombine.high %v659_v11, %v663_v12  ;;  %v670_v18 = vld [vmem:[#allocation5 + $0x1e0] sm:$0xff]  ;;  %v667_v19 = vld [vmem:[#allocation5 + $0x1c8] sm:$0xff]  ;;  %v8309_v22 = vcombine.low %v659_v11, %v663_v12 }
  0x5f   :  { %10750 = vst [vmem:[#allocation31_spill] sm:$0xff] %v8297_v15  ;;  %v671_v20 = vld [vmem:[#allocation5 + $0x1e8] sm:$0xff]  ;;  %10752 = vst [vmem:[#allocation33_spill] sm:$0xff] %v8305_v21  ;;  %v8311_v23 = vcombine.high %v666_v17, %v670_v18  ;;  %v8321_v32 = vcombine.low %v666_v17, %v670_v18  ;;  %v625_v41 = vld [vmem:[#allocation5 + $0x78] sm:$0xff] }
  0x60   :  { %10751 = vst [vmem:[#allocation32_spill] sm:$0xff] %v8301_v16  ;;  %10753 = vst [vmem:[#allocation34_spill] sm:$0xff] %v8309_v22  ;;  %v8314_v24 = vcombine.high %v667_v19, %v671_v20  ;;  %v8325_v33 = vcombine.low %v667_v19, %v671_v20  ;;  %v8344_v49 = vcombine.high %v621_v38, %v625_v41  ;;  %v628_v50 = vld [vmem:[#allocation5 + $0x90] sm:$0xff]  ;;  %v629_v54 = vld [vmem:[#allocation5 + $0x98] sm:$0xff] }
  0x61   :  { %10754 = vst [vmem:[#allocation35_spill] sm:$0xff] %v8311_v23  ;;  %10756 = vst [vmem:[#allocation37_spill] sm:$0xff] %v8321_v32  ;;  %v632_v53 = vld [vmem:[#allocation5 + $0xb0] sm:$0xff]  ;;  %v633_v57 = vld [vmem:[#allocation5 + $0xb8] sm:$0xff] }
  0x62   :  { %10755 = vst [vmem:[#allocation36_spill] sm:$0xff] %v8314_v24  ;;  %10757 = vst [vmem:[#allocation38_spill] sm:$0xff] %v8325_v33  ;;  %v8358_v3 = vcombine.high %v629_v54, %v633_v57  ;;  %v636_v4 = vld [vmem:[#allocation5 + $0xd0] sm:$0xff]  ;;  %v637_v10 = vld [vmem:[#allocation5 + $0xd8] sm:$0xff]  ;;  %v8363_v12 = vcombine.low %v628_v50, %v632_v53  ;;  %v8367_v17 = vcombine.low %v629_v54, %v633_v57 }
  0x63   :  { %v640_v9 = vld [vmem:[#allocation5 + $0xf0] sm:$0xff]  ;;  %v641_v11 = vld [vmem:[#allocation5 + $0xf8] sm:$0xff] }
  0x64   :  { %v8369_v18 = vcombine.high %v636_v4, %v640_v9  ;;  %v8372_v19 = vcombine.high %v637_v10, %v641_v11  ;;  %v644_v20 = vld [vmem:[#allocation5 + $0x110] sm:$0xff]  ;;  %v645_v26 = vld [vmem:[#allocation5 + $0x118] sm:$0xff] }
  0x65   :  { %6809 = vmatmul.mubr.msk.bf16.gmra.mrb[8].mxu0 %vm216_vm1, %v8203_v30  ;;  %6814 = vmatmul.mubr.msk.bf16.gmra.mrb[8].mxu1 %vm216_vm1, %v8203_v30  ;;  %v648_v25 = vld [vmem:[#allocation5 + $0x130] sm:$0xff]  ;;  %v657_v54 = vld [vmem:[#allocation5 + $0x178] sm:$0xff] }
  0x66   :  { %316 = vmatprep.mubr.bf16.mxu0 %v10576_v1  ;;  %389 = vmatprep.mubr.bf16.mxu1 %v10576_v1  ;;  %10760 = vst [vmem:[#allocation41_spill] sm:$0xff] %v8369_v18  ;;  %10761 = vst [vmem:[#allocation42_spill] sm:$0xff] %v8372_v19  ;;  %v8387_v57 = vcombine.low %v644_v20, %v648_v25 }
  0x6d   :  { %6810 = vmatmul.mubr.msk.bf16.gmra.mrb[12].mxu0 %vm216_vm1, %v8214_v31  ;;  %6815 = vmatmul.mubr.msk.bf16.gmra.mrb[12].mxu1 %vm216_vm1, %v8214_v31 }
  0x6e   :  { %432 = vmatprep.mubr.bf16.mxu0 %v10576_v1  ;;  %505 = vmatprep.mubr.bf16.mxu1 %v10576_v1 }
  0x75   :  { %6817 = vmatmul.mubr.msk.bf16.vlgmr.msra.gmra.mrb[16].mxu0 %vm216_vm1, %v7298_v13  ;;  %6822 = vmatmul.mubr.msk.bf16.vlgmr.msra.gmra.mrb[16].mxu1 %vm216_vm1, %v7298_v13  ;;  %v8291_v13 = vcombine.low %v650_v0, %v654_v2  ;;  %v8353_v0 = vcombine.low %v621_v38, %v625_v41  ;;  %v8355_v2 = vcombine.high %v628_v50, %v632_v53  ;;  %v652_v41 = vld [vmem:[#allocation5 + $0x150] sm:$0xff]  ;;  %v653_v53 = vld [vmem:[#allocation5 + $0x158] sm:$0xff] }
  0x76   :  { %839 = vmatpush1.bf16.msra.mxu0 %v8222_v36  ;;  %880 = vmatpush1.bf16.msra.mxu1 %v8224_v39  ;;  %v656_v50 = vld [vmem:[#allocation5 + $0x170] sm:$0xff] }
  0x77   :  { %840 = vmatprep.subr.bf16.mxu0 %v8226_v40  ;;  %881 = vmatprep.subr.bf16.mxu1 %v8228_v43  ;;  %10748 = vst [vmem:[#allocation29_spill] sm:$0xff] %v8291_v13 }
  0x78   :  { %442 = vmatprep.mubr.bf16.mxu0 %v10576_v1  ;;  %515 = vmatprep.mubr.bf16.mxu1 %v10576_v1 }
  0x7a   :  { %841 = vmatpush1.bf16.msra.mxu0 %v8233_v44  ;;  %882 = vmatpush1.bf16.msra.mxu1 %v8237_v47 }
  0x7b   :  { %842 = vmatprep.subr.bf16.mxu0 %v8239_v48  ;;  %883 = vmatprep.subr.bf16.mxu1 %v8243_v51 }
  0x7d   :  { %6818 = vmatmul.mubr.msk.bf16.gmra.mrb[20].mxu0 %vm216_vm1, %v7299_v29  ;;  %6823 = vmatmul.mubr.msk.bf16.gmra.mrb[20].mxu1 %vm216_vm1, %v7299_v29  ;;  %v613_v29 = vld [vmem:[#allocation5 + $0x18] sm:$0xff] }
  0x7e   :  { %843 = vmatpush1.bf16.msra.mxu0 %v8247_v52  ;;  %884 = vmatpush1.bf16.msra.mxu1 %v8251_v55 }
  0x7f   :  { %844 = vmatprep.subr.bf16.mxu0 %v8253_v56  ;;  %885 = vmatprep.subr.bf16.mxu1 %v8256_v59 }
  0x80   :  { %452 = vmatprep.mubr.bf16.mxu0 %v10576_v1  ;;  %525 = vmatprep.mubr.bf16.mxu1 %v10576_v1 }
  0x82   :  { %845 = vmatpush1.bf16.msra.mxu0 %v8261_v60  ;;  %886 = vmatpush1.bf16.msra.mxu1 %v8265_v61 }
  0x83   :  { %846 = vmatprep.subr.bf16.mxu0 %v8267_v62  ;;  %887 = vmatprep.subr.bf16.mxu1 %v8271_v63 }
  0x85   :  { %6819 = vmatmul.mubr.msk.bf16.gmra.mrb[24].mxu0 %vm216_vm1, %v8203_v30  ;;  %6824 = vmatmul.mubr.msk.bf16.gmra.mrb[24].mxu1 %vm216_vm1, %v8203_v30  ;;  %v617_v30 = vld [vmem:[#allocation5 + $0x38] sm:$0xff] }
  0x86   :  { %847 = vmatpush1.bf16.msra.mxu0 %v8275_v5  ;;  %888 = vmatpush1.bf16.msra.mxu1 %v8279_v6  ;;  %v8331_v35 = vcombine.high %v613_v29, %v617_v30  ;;  %v8339_v45 = vcombine.low %v613_v29, %v617_v30  ;;  %v649_v29 = vld [vmem:[#allocation5 + $0x138] sm:$0xff]  ;;  %v8375_v30 = vcombine.low %v636_v4, %v640_v9 }
  0x87   :  { %848 = vmatprep.subr.bf16.mxu0 %v8281_v7  ;;  %889 = vmatprep.subr.bf16.mxu1 %v8284_v8  ;;  %v8384_v38 = vcombine.high %v645_v26, %v649_v29  ;;  %v8391_v4 = vcombine.low %v645_v26, %v649_v29  ;;  %v8393_v9 = vcombine.high %v652_v41, %v656_v50 }
  0x88   :  { %462 = vmatprep.mubr.bf16.mxu0 %v10576_v1  ;;  %535 = vmatprep.mubr.bf16.mxu1 %v10576_v1  ;;  %10759 = vst [vmem:[#allocation40_spill] sm:$0xff] %v8331_v35  ;;  %10762 = vst [vmem:[#allocation43_spill] sm:$0xff] %v8375_v30 }
  0x89   :  { %10765 = vst [vmem:[#allocation46_spill] sm:$0xff] %v8384_v38 }
  0x8a   :  { %849 = vmatpush1.bf16.msra.mxu0 %v8291_v13  ;;  %890 = vmatpush1.bf16.msra.mxu1 %v8295_v14 }
  0x8b   :  { %850 = vmatprep.subr.bf16.mxu0 %v8297_v15  ;;  %891 = vmatprep.subr.bf16.mxu1 %v8301_v16 }
  0x8d   :  { %6820 = vmatmul.mubr.msk.bf16.gmra.mrb[28].mxu0 %vm216_vm1, %v8214_v31  ;;  %6825 = vmatmul.mubr.msk.bf16.gmra.mrb[28].mxu1 %vm216_vm1, %v8214_v31  ;;  %v624_v31 = vld [vmem:[#allocation5 + $0x70] sm:$0xff] }
  0x8e   :  { %851 = vmatpush1.bf16.msra.mxu0 %v8305_v21  ;;  %892 = vmatpush1.bf16.msra.mxu1 %v8309_v22  ;;  %v8341_v46 = vcombine.high %v620_v37, %v624_v31  ;;  %v8349_v58 = vcombine.low %v620_v37, %v624_v31  ;;  %v8379_v37 = vcombine.low %v637_v10, %v641_v11  ;;  %v660_v11 = vld [vmem:[#allocation5 + $0x190] sm:$0xff] }
  0x8f   :  { %852 = vmatprep.subr.bf16.mxu0 %v8311_v23  ;;  %893 = vmatprep.subr.bf16.mxu1 %v8314_v24  ;;  %v8381_v31 = vcombine.high %v644_v20, %v648_v25  ;;  %v8396_v10 = vcombine.high %v653_v53, %v657_v54  ;;  %v8399_v20 = vcombine.low %v652_v41, %v656_v50 }
  0x90   :  { %870 = vmatprep.mubr.bf16.mxu0 %v10576_v1  ;;  %911 = vmatprep.mubr.bf16.mxu1 %v10576_v1  ;;  %10763 = vst [vmem:[#allocation44_spill] sm:$0xff] %v8379_v37  ;;  %v8403_v25 = vcombine.low %v653_v53, %v657_v54 }
  0x91   :  { %10764 = vst [vmem:[#allocation45_spill] sm:$0xff] %v8381_v31  ;;  %10766 = vst [vmem:[#allocation47_spill] sm:$0xff] %v8396_v10 }
  0x92   :  { %853 = vmatpush1.bf16.msra.mxu0 %v8321_v32  ;;  %894 = vmatpush1.bf16.msra.mxu1 %v8325_v33 }
  0x93   :  { %1088 = vmatprep.subr.bf16.mxu0 %v8327_v34  ;;  %1129 = vmatprep.subr.bf16.mxu1 %v8331_v35 }
  0x95   :  { %871 = vmatmul.mubr.bf16.vlgmr.msra.gmra.mrb[32].mxu0 %v10576_v1  ;;  %912 = vmatmul.mubr.bf16.vlgmr.msra.gmra.mrb[32].mxu1 %v10576_v1 }
  0x96   :  { %1089 = vmatpush1.bf16.msra.mxu0 %v8335_v42  ;;  %1130 = vmatpush1.bf16.msra.mxu1 %v8339_v45 }
  0x97   :  { %1090 = vmatprep.subr.bf16.mxu0 %v8341_v46  ;;  %1131 = vmatprep.subr.bf16.mxu1 %v8344_v49 }
  0x98   :  { %1120 = vmatprep.mubr.bf16.mxu0 %v10576_v1  ;;  %1161 = vmatprep.mubr.bf16.mxu1 %v10576_v1  ;;  %v664_v1 = vld [vmem:[#allocation5 + $0x1b0] sm:$0xff] }
  0x99   :  { %v8405_v26 = vcombine.high %v660_v11, %v664_v1  ;;  %v8411_v41 = vcombine.low %v660_v11, %v664_v1  ;;  %v8480_v11 = vld [vmem:[%s10561_s3] sm:$0xff] }
  0x9a   :  { %1091 = vmatpush1.bf16.msra.mxu0 %v8349_v58  ;;  %1132 = vmatpush1.bf16.msra.mxu1 %v8353_v0 }
  0x9b   :  { %1092 = vmatprep.subr.bf16.mxu0 %v8355_v2  ;;  %1133 = vmatprep.subr.bf16.mxu1 %v8358_v3 }
  0x9e   :  { %1093 = vmatpush1.bf16.msra.mxu0 %v8363_v12  ;;  %1134 = vmatpush1.bf16.msra.mxu1 %v8367_v17 }
  0x9f   :  { %1094 = vmatprep.subr.bf16.mxu0 %v8369_v18  ;;  %1135 = vmatprep.subr.bf16.mxu1 %v8372_v19  ;;  %v661_v19 = vld [vmem:[#allocation5 + $0x198] sm:$0xff] }
  0xa0   :  { %v665_v18 = vld [vmem:[#allocation5 + $0x1b8] sm:$0xff] }
  0xa1   :  { %v8408_v29 = vcombine.high %v661_v19, %v665_v18  ;;  %v8415_v50 = vcombine.low %v661_v19, %v665_v18  ;;  %v10767_v18 = vmov 0   ;;  %v124_v19 = vlaneseq }
  0xa2   :  { %1095 = vmatpush1.bf16.msra.mxu0 %v8375_v30  ;;  %1136 = vmatpush1.bf16.msra.mxu1 %v8379_v37  ;;  %v669_v37 = vld [vmem:[#allocation5 + $0x1d8] sm:$0xff] }
  0xa3   :  { %1096 = vmatprep.subr.bf16.mxu0 %v8381_v31  ;;  %1137 = vmatprep.subr.bf16.mxu1 %v8384_v38  ;;  %v668_v38 = vld [vmem:[#allocation5 + $0x1d0] sm:$0xff]  ;;  %v673_v30 = vld [vmem:[#allocation5 + $0x1f8] sm:$0xff] }
  0xa4   :  { %v672_v31 = vld [vmem:[#allocation5 + $0x1f0] sm:$0xff]  ;;  %v8420_v54 = vcombine.high %v669_v37, %v673_v30  ;;  %v8427_v1 = vcombine.low %v669_v37, %v673_v30  ;;  %v8470_v30 = vshrl.u32 %v124_v19, 7 }
  0xa5   :  { %v8417_v53 = vcombine.high %v668_v38, %v672_v31 }
  0xa6   :  { %1097 = vmatpush1.bf16.msra.mxu0 %v8387_v57  ;;  %1138 = vmatpush1.bf16.msra.mxu1 %v8391_v4  ;;  %10768 = vst [vmem:[#allocation48_spill] sm:$0xff] %v8470_v30  ;;  %v10608_v37 = vsub.s32 2, %v8470_v30 }
  0xa7   :  { %1098 = vmatprep.subr.bf16.mxu0 %v8393_v9  ;;  %1139 = vmatprep.subr.bf16.mxu1 %v8396_v10  ;;  %v8423_v10 = vcombine.low %v668_v38, %v672_v31  ;;  %v8474_v31 = vsub.s32 0, %v8470_v30 }
  0xa8   :  { %v8490_v19 = vrot.slane %v8480_v11, %v10608_v37 }
  0xa9   :  { %10769 = vst [vmem:[#allocation49_spill] sm:$0xff] %v8474_v31 }
  0xaa   :  { %1099 = vmatpush1.bf16.msra.mxu0 %v8399_v20  ;;  %1140 = vmatpush1.bf16.msra.mxu1 %v8403_v25 }
  0xab   :  { %1100 = vmatprep.subr.bf16.mxu0 %v8405_v26  ;;  %1141 = vmatprep.subr.bf16.mxu1 %v8408_v29 }
  0xae   :  { %1101 = vmatpush1.bf16.msra.mxu0 %v8411_v41  ;;  %1142 = vmatpush1.bf16.msra.mxu1 %v8415_v50 }
  0xaf   :  { %1102 = vmatprep.subr.bf16.mxu0 %v8417_v53  ;;  %1143 = vmatprep.subr.bf16.mxu1 %v8420_v54 }
  0xb2   :  { %1103 = vmatpush1.bf16.msra.mxu0 %v8423_v10  ;;  %1144 = vmatpush1.bf16.msra.mxu1 %v8427_v1 }
  0xb3   :  { %1229 = vmatprep.subr.bf16.mxu0 %v8185_v27  ;;  %1270 = vmatprep.subr.bf16.mxu1 %v8187_v28 }
  0xb5   :  { %1121 = vmatmul.mubr.bf16.vlgmr.msra.gmra.mrb[36].mxu0 %v10767_v18  ;;  %1162 = vmatmul.mubr.bf16.vlgmr.msra.gmra.mrb[36].mxu1 %v10767_v18 }
  0xb6   :  { %1230 = vmatpush1.bf16.msra.mxu0 %v8222_v36  ;;  %1271 = vmatpush1.bf16.msra.mxu1 %v8224_v39 }
  0xb7   :  { %1231 = vmatprep.subr.bf16.mxu0 %v8226_v40  ;;  %1272 = vmatprep.subr.bf16.mxu1 %v8228_v43 }
  0xb8   :  { %1261 = vmatprep.mubr.bf16.mxu0 %v10767_v18  ;;  %1302 = vmatprep.mubr.bf16.mxu1 %v10767_v18 }
  0xba   :  { %1232 = vmatpush1.bf16.msra.mxu0 %v8233_v44  ;;  %1273 = vmatpush1.bf16.msra.mxu1 %v8237_v47 }
  0xbb   :  { %1233 = vmatprep.subr.bf16.mxu0 %v8239_v48  ;;  %1274 = vmatprep.subr.bf16.mxu1 %v8243_v51 }
  0xbe   :  { %1234 = vmatpush1.bf16.msra.mxu0 %v8247_v52  ;;  %1275 = vmatpush1.bf16.msra.mxu1 %v8251_v55 }
  0xbf   :  { %1235 = vmatprep.subr.bf16.mxu0 %v8253_v56  ;;  %1276 = vmatprep.subr.bf16.mxu1 %v8256_v59 }
  0xc2   :  { %1236 = vmatpush1.bf16.msra.mxu0 %v8261_v60  ;;  %1277 = vmatpush1.bf16.msra.mxu1 %v8265_v61 }
  0xc3   :  { %1237 = vmatprep.subr.bf16.mxu0 %v8267_v62  ;;  %1278 = vmatprep.subr.bf16.mxu1 %v8271_v63 }
  0xc6   :  { %1238 = vmatpush1.bf16.msra.mxu0 %v8275_v5  ;;  %1279 = vmatpush1.bf16.msra.mxu1 %v8279_v6 }
  0xc7   :  { %1239 = vmatprep.subr.bf16.mxu0 %v8281_v7  ;;  %1280 = vmatprep.subr.bf16.mxu1 %v8284_v8 }
  0xca   :  { %1240 = vmatpush1.bf16.msra.mxu0 %v8291_v13  ;;  %1281 = vmatpush1.bf16.msra.mxu1 %v8295_v14 }
  0xcb   :  { %1241 = vmatprep.subr.bf16.mxu0 %v8297_v15  ;;  %1282 = vmatprep.subr.bf16.mxu1 %v8301_v16 }
  0xce   :  { %1242 = vmatpush1.bf16.msra.mxu0 %v8305_v21  ;;  %1283 = vmatpush1.bf16.msra.mxu1 %v8309_v22 }
  0xcf   :  { %1243 = vmatprep.subr.bf16.mxu0 %v8311_v23  ;;  %1284 = vmatprep.subr.bf16.mxu1 %v8314_v24  ;;  %v10771_v24 = vsub.s32 3, %v8470_v30 }
  0xd1   :  { %v8503_v23 = vrot.slane %v8480_v11, %v10771_v24 }
  0xd2   :  { %1244 = vmatpush1.bf16.msra.mxu0 %v8321_v32  ;;  %1285 = vmatpush1.bf16.msra.mxu1 %v8325_v33  ;;  %v8483_v33 = vsub.s32 1, %v8470_v30 }
  0xd3   :  { %1320 = vmatprep.subr.bf16.mxu0 %v8327_v34  ;;  %1361 = vmatprep.subr.bf16.mxu1 %v8331_v35  ;;  %v8494_v35 = vrot.slane %v8480_v11, %v8474_v31 }
  0xd4   :  { %10770 = vst [vmem:[#allocation50_spill] sm:$0xff] %v8483_v33  ;;  %v8507_v22 = vrot.slane %v8480_v11, %v8483_v33 }
 0x128   :  { %v8485_v34 = vpop.f32.mrb[0].mxu0  ;;  %v8498_v32 = vpop.f32.mrb[0].mxu1 }
 0x129   :  { %v8496_v38 = vpop.f32.mrb[1].mxu0  ;;  %v8509_v37 = vpop.f32.mrb[1].mxu1 }
 0x12a   :  { %v292_v21 = vpop.f32.mrb[2].mxu0  ;;  %v365_v15 = vpop.f32.mrb[2].mxu1 }
 0x12b   :  { %v8512_v16 = vadd.f32 %v292_v21, %v8494_v35  ;;  %v294_v31 = vpop.f32.mrb[3].mxu0  ;;  %v8518_v13 = vadd.f32 %v365_v15, %v8490_v19  ;;  %v367_v24 = vpop.f32.mrb[3].mxu1 }
 0x12c   :  { %v8515_v14 = vadd.f32 %v294_v31, %v8507_v22  ;;  %v8521_v8 = vadd.f32 %v367_v24, %v8503_v23 }
 0x12d   :  { %10772 = vst [vmem:[#allocation51_spill] sm:$0xff] %v8512_v16  ;;  %10774 = vst [vmem:[#allocation53_spill] sm:$0xff] %v8518_v13 }
 0x12e   :  { %10773 = vst [vmem:[#allocation52_spill] sm:$0xff] %v8515_v14  ;;  %10775 = vst [vmem:[#allocation54_spill] sm:$0xff] %v8521_v8 }
 0x130   :  { %v298_v33 = vpop.f32.mrb[4].mxu0  ;;  %v371_v5 = vpop.f32.mrb[4].mxu1 }
 0x131   :  { %v8524_v7 = vadd.f32 %v298_v33, %v8494_v35  ;;  %v300_v6 = vpop.f32.mrb[5].mxu0  ;;  %v8530_v31 = vadd.f32 %v371_v5, %v8490_v19  ;;  %v373_v14 = vpop.f32.mrb[5].mxu1 }
 0x132   :  { %v8527_v21 = vadd.f32 %v300_v6, %v8507_v22  ;;  %v302_v16 = vpop.f32.mrb[6].mxu0  ;;  %v8536_v24 = vadd.f32 %v373_v14, %v8503_v23  ;;  %v375_v8 = vpop.f32.mrb[6].mxu1 }
 0x133   :  { %10776 = vst [vmem:[#allocation55_spill] sm:$0xff] %v8524_v7  ;;  %10778 = vst [vmem:[#allocation57_spill] sm:$0xff] %v8530_v31  ;;  %v8533_v15 = vadd.f32 %v302_v16, %v8494_v35  ;;  %v304_v13 = vpop.f32.mrb[7].mxu0  ;;  %v8542_v7 = vadd.f32 %v375_v8, %v8490_v19  ;;  %v377_v6 = vpop.f32.mrb[7].mxu1 }
 0x134   :  { %10777 = vst [vmem:[#allocation56_spill] sm:$0xff] %v8527_v21  ;;  %10780 = vst [vmem:[#allocation59_spill] sm:$0xff] %v8536_v24  ;;  %v8539_v33 = vadd.f32 %v304_v13, %v8507_v22  ;;  %v8545_v21 = vadd.f32 %v377_v6, %v8503_v23 }
 0x135   :  { %10779 = vst [vmem:[#allocation58_spill] sm:$0xff] %v8533_v15  ;;  %10782 = vst [vmem:[#allocation61_spill] sm:$0xff] %v8542_v7 }
 0x136   :  { %10781 = vst [vmem:[#allocation60_spill] sm:$0xff] %v8539_v33  ;;  %10783 = vst [vmem:[#allocation62_spill] sm:$0xff] %v8545_v21 }
 0x138   :  { %v308_v5 = vpop.f32.mrb[8].mxu0  ;;  %v381_v15 = vpop.f32.mrb[8].mxu1 }
 0x139   :  { %v8548_v31 = vadd.f32 %v308_v5, %v8494_v35  ;;  %v310_v16 = vpop.f32.mrb[9].mxu0  ;;  %v8554_v13 = vadd.f32 %v381_v15, %v8490_v19  ;;  %v383_v33 = vpop.f32.mrb[9].mxu1 }
 0x13a   :  { %v8551_v14 = vadd.f32 %v310_v16, %v8507_v22  ;;  %v312_v24 = vpop.f32.mrb[10].mxu0  ;;  %v8560_v6 = vadd.f32 %v383_v33, %v8503_v23  ;;  %v385_v21 = vpop.f32.mrb[10].mxu1 }
 0x13b   :  { %10784 = vst [vmem:[#allocation63_spill] sm:$0xff] %v8548_v31  ;;  %10786 = vst [vmem:[#allocation65_spill] sm:$0xff] %v8554_v13  ;;  %v8557_v8 = vadd.f32 %v312_v24, %v8494_v35  ;;  %v314_v7 = vpop.f32.mrb[11].mxu0  ;;  %v8566_v31 = vadd.f32 %v385_v21, %v8490_v19  ;;  %v387_v16 = vpop.f32.mrb[11].mxu1 }
 0x13c   :  { %10785 = vst [vmem:[#allocation64_spill] sm:$0xff] %v8551_v14  ;;  %10788 = vst [vmem:[#allocation67_spill] sm:$0xff] %v8560_v6  ;;  %v8563_v5 = vadd.f32 %v314_v7, %v8507_v22  ;;  %v8569_v14 = vadd.f32 %v387_v16, %v8503_v23 }
 0x13d   :  { %10787 = vst [vmem:[#allocation66_spill] sm:$0xff] %v8557_v8  ;;  %10790 = vst [vmem:[#allocation69_spill] sm:$0xff] %v8566_v31 }
 0x13e   :  { %10789 = vst [vmem:[#allocation68_spill] sm:$0xff] %v8563_v5  ;;  %10791 = vst [vmem:[#allocation70_spill] sm:$0xff] %v8569_v14 }
 0x140   :  { %v318_v15 = vpop.f32.mrb[12].mxu0  ;;  %v391_v33 = vpop.f32.mrb[12].mxu1 }
 0x141   :  { %v8572_v13 = vadd.f32 %v318_v15, %v8494_v35  ;;  %v320_v24 = vpop.f32.mrb[13].mxu0  ;;  %v8580_v21 = vadd.f32 %v391_v33, %v8490_v19  ;;  %v393_v31 = vpop.f32.mrb[13].mxu1 }
 0x142   :  { %v8576_v6 = vadd.f32 %v320_v24, %v8507_v22  ;;  %v322_v7 = vpop.f32.mrb[14].mxu0  ;;  %v395_v8 = vpop.f32.mrb[14].mxu1 }
 0x143   :  { %10792 = vst [vmem:[#allocation71_spill] sm:$0xff] %v8572_v13  ;;  %10794 = vst [vmem:[#allocation73_spill] sm:$0xff] %v8580_v21  ;;  %v8584_v14 = vadd.f32 %v322_v7, %v8494_v35  ;;  %v324_v15 = vpop.f32.mrb[15].mxu0  ;;  %v8587_v13 = vadd.f32 %v393_v31, %v8503_v23  ;;  %v8594_v5 = vadd.f32 %v395_v8, %v8490_v19  ;;  %v397_v33 = vpop.f32.mrb[15].mxu1  ;;  %v10799_v21 = vsub.s32 4, %v8470_v30 }
 0x144   :  { %10793 = vst [vmem:[#allocation72_spill] sm:$0xff] %v8576_v6  ;;  %v8591_v6 = vadd.f32 %v324_v15, %v8507_v22  ;;  %v8602_v7 = vadd.f32 %v397_v33, %v8503_v23  ;;  %v10801_v31 = vsub.s32 5, %v8470_v30  ;;  %v10802_v15 = vsub.s32 6, %v8470_v30 }
 0x145   :  { %10795 = vst [vmem:[#allocation74_spill] sm:$0xff] %v8584_v14  ;;  %10796 = vst [vmem:[#allocation75_spill] sm:$0xff] %v8587_v13  ;;  %v8599_v16 = vrot.slane %v8480_v11, %v10799_v21  ;;  %v10803_v8 = vsub.s32 7, %v8470_v30 }
 0x146   :  { %10797 = vst [vmem:[#allocation76_spill] sm:$0xff] %v8591_v6  ;;  %10798 = vst [vmem:[#allocation77_spill] sm:$0xff] %v8594_v5  ;;  %v8607_v14 = vrot.slane %v8480_v11, %v10801_v31  ;;  %v8612_v24 = vrot.slane %v8480_v11, %v10802_v15 }
 0x147   :  { %10800 = vst [vmem:[#allocation78_spill] sm:$0xff] %v8602_v7  ;;  %v8617_v6 = vrot.slane %v8480_v11, %v10803_v8 }
 0x148   :  { %v434_v21 = vpop.f32.mrb[16].mxu0  ;;  %v507_v7 = vpop.f32.mrb[16].mxu1 }
 0x149   :  { %v8620_v5 = vadd.f32 %v434_v21, %v8599_v16  ;;  %v436_v33 = vpop.f32.mrb[17].mxu0  ;;  %v8626_v63 = vadd.f32 %v507_v7, %v8612_v24  ;;  %v509_v15 = vpop.f32.mrb[17].mxu1 }
 0x14a   :  { %v8623_v13 = vadd.f32 %v436_v33, %v8607_v14  ;;  %v438_v31 = vpop.f32.mrb[18].mxu0  ;;  %v8632_v11 = vadd.f32 %v509_v15, %v8617_v6  ;;  %v511_v8 = vpop.f32.mrb[18].mxu1 }
 0x14b   :  { %10804 = vst [vmem:[#allocation79_spill] sm:$0xff] %v8620_v5  ;;  %10806 = vst [vmem:[#allocation81_spill] sm:$0xff] %v8626_v63  ;;  %v8629_v62 = vadd.f32 %v438_v31, %v8599_v16  ;;  %v440_v30 = vpop.f32.mrb[19].mxu0  ;;  %v8638_v5 = vadd.f32 %v511_v8, %v8612_v24  ;;  %v513_v33 = vpop.f32.mrb[19].mxu1 }
 0x14c   :  { %10805 = vst [vmem:[#allocation80_spill] sm:$0xff] %v8623_v13  ;;  %10808 = vst [vmem:[#allocation83_spill] sm:$0xff] %v8632_v11  ;;  %v8635_v21 = vadd.f32 %v440_v30, %v8607_v14  ;;  %v8641_v13 = vadd.f32 %v513_v33, %v8617_v6 }
 0x14d   :  { %10807 = vst [vmem:[#allocation82_spill] sm:$0xff] %v8629_v62  ;;  %10810 = vst [vmem:[#allocation85_spill] sm:$0xff] %v8638_v5 }
 0x14e   :  { %10809 = vst [vmem:[#allocation84_spill] sm:$0xff] %v8635_v21  ;;  %10811 = vst [vmem:[#allocation86_spill] sm:$0xff] %v8641_v13 }
 0x150   :  { %v444_v7 = vpop.f32.mrb[20].mxu0  ;;  %v517_v62 = vpop.f32.mrb[20].mxu1 }
 0x151   :  { %v8644_v63 = vadd.f32 %v444_v7, %v8599_v16  ;;  %v446_v31 = vpop.f32.mrb[21].mxu0  ;;  %v8650_v30 = vadd.f32 %v517_v62, %v8612_v24  ;;  %v519_v21 = vpop.f32.mrb[21].mxu1 }
 0x152   :  { %v8647_v15 = vadd.f32 %v446_v31, %v8607_v14  ;;  %v448_v11 = vpop.f32.mrb[22].mxu0  ;;  %v8656_v33 = vadd.f32 %v519_v21, %v8617_v6  ;;  %v521_v13 = vpop.f32.mrb[22].mxu1 }
 0x153   :  { %10812 = vst [vmem:[#allocation87_spill] sm:$0xff] %v8644_v63  ;;  %10814 = vst [vmem:[#allocation89_spill] sm:$0xff] %v8650_v30  ;;  %v8653_v8 = vadd.f32 %v448_v11, %v8599_v16  ;;  %v450_v5 = vpop.f32.mrb[23].mxu0  ;;  %v8662_v63 = vadd.f32 %v521_v13, %v8612_v24  ;;  %v523_v31 = vpop.f32.mrb[23].mxu1 }
 0x154   :  { %10813 = vst [vmem:[#allocation88_spill] sm:$0xff] %v8647_v15  ;;  %10816 = vst [vmem:[#allocation91_spill] sm:$0xff] %v8656_v33  ;;  %v8659_v7 = vadd.f32 %v450_v5, %v8607_v14  ;;  %v8665_v15 = vadd.f32 %v523_v31, %v8617_v6 }
 0x155   :  { %10815 = vst [vmem:[#allocation90_spill] sm:$0xff] %v8653_v8  ;;  %10818 = vst [vmem:[#allocation93_spill] sm:$0xff] %v8662_v63 }
 0x156   :  { %10817 = vst [vmem:[#allocation92_spill] sm:$0xff] %v8659_v7  ;;  %10819 = vst [vmem:[#allocation94_spill] sm:$0xff] %v8665_v15 }
 0x158   :  { %v454_v62 = vpop.f32.mrb[24].mxu0  ;;  %v527_v8 = vpop.f32.mrb[24].mxu1 }
 0x159   :  { %v8668_v30 = vadd.f32 %v454_v62, %v8599_v16  ;;  %v456_v11 = vpop.f32.mrb[25].mxu0  ;;  %v8674_v5 = vadd.f32 %v527_v8, %v8612_v24  ;;  %v529_v7 = vpop.f32.mrb[25].mxu1 }
 0x15a   :  { %v8671_v21 = vadd.f32 %v456_v11, %v8607_v14  ;;  %v458_v33 = vpop.f32.mrb[26].mxu0  ;;  %v8680_v31 = vadd.f32 %v529_v7, %v8617_v6  ;;  %v531_v15 = vpop.f32.mrb[26].mxu1 }
 0x15b   :  { %10820 = vst [vmem:[#allocation95_spill] sm:$0xff] %v8668_v30  ;;  %10822 = vst [vmem:[#allocation97_spill] sm:$0xff] %v8674_v5  ;;  %v8677_v13 = vadd.f32 %v458_v33, %v8599_v16  ;;  %v460_v63 = vpop.f32.mrb[27].mxu0  ;;  %v8686_v30 = vadd.f32 %v531_v15, %v8612_v24  ;;  %v533_v11 = vpop.f32.mrb[27].mxu1 }
 0x15c   :  { %10821 = vst [vmem:[#allocation96_spill] sm:$0xff] %v8671_v21  ;;  %10824 = vst [vmem:[#allocation99_spill] sm:$0xff] %v8680_v31  ;;  %v8683_v62 = vadd.f32 %v460_v63, %v8607_v14  ;;  %v8689_v21 = vadd.f32 %v533_v11, %v8617_v6 }
 0x15d   :  { %10823 = vst [vmem:[#allocation98_spill] sm:$0xff] %v8677_v13  ;;  %10826 = vst [vmem:[#allocation101_spill] sm:$0xff] %v8686_v30 }
 0x15e   :  { %10825 = vst [vmem:[#allocation100_spill] sm:$0xff] %v8683_v62  ;;  %10827 = vst [vmem:[#allocation102_spill] sm:$0xff] %v8689_v21 }
 0x160   :  { %v464_v8 = vpop.f32.mrb[28].mxu0  ;;  %v537_v13 = vpop.f32.mrb[28].mxu1 }
 0x161   :  { %v8692_v5 = vadd.f32 %v464_v8, %v8599_v16  ;;  %v466_v33 = vpop.f32.mrb[29].mxu0  ;;  %v8698_v63 = vadd.f32 %v537_v13, %v8612_v24  ;;  %v539_v62 = vpop.f32.mrb[29].mxu1  ;;  %v289_v8 = vadd.f32 %v8485_v34, %v8494_v35  ;;  %v364_v13 = vadd.f32 %v8509_v37, %v8503_v23 }
 0x162   :  { %v8695_v7 = vadd.f32 %v466_v33, %v8607_v14  ;;  %v468_v31 = vpop.f32.mrb[30].mxu0  ;;  %v8701_v30 = vadd.f32 %v539_v62, %v8617_v6  ;;  %v541_v11 = vpop.f32.mrb[30].mxu1  ;;  %v362_v33 = vadd.f32 %v8498_v32, %v8490_v19 }
 0x163   :  { %10828 = vst [vmem:[#allocation103_spill] sm:$0xff] %v8692_v5  ;;  %10830 = vst [vmem:[#allocation105_spill] sm:$0xff] %v8698_v63  ;;  %v470_v15 = vpop.f32.mrb[31].mxu0  ;;  %v543_v21 = vpop.f32.mrb[31].mxu1  ;;  %v291_v5 = vadd.f32 %v8496_v38, %v8507_v22 }
 0x164   :  { %10829 = vst [vmem:[#allocation104_spill] sm:$0xff] %v8695_v7  ;;  %10831 = vst [vmem:[#allocation106_spill] sm:$0xff] %v8701_v30 }
 0x168   :  { %v872_v7 = vpop.f32.mrb[32].mxu0  ;;  %v913_v61 = vpop.f32.mrb[32].mxu1 }
 0x169   :  { %v920_v63 = vadd.f32 %v872_v7, %v289_v8  ;;  %v874_v60 = vpop.f32.mrb[33].mxu0  ;;  %v922_v62 = vadd.f32 %v913_v61, %v362_v33  ;;  %v915_v59 = vpop.f32.mrb[33].mxu1  ;;  %v544_v33 = vadd.f32 %v543_v21, %v8617_v6 }
 0x16a   :  { %v921_v30 = vadd.f32 %v874_v60, %v291_v5  ;;  %v876_v56 = vpop.f32.mrb[34].mxu0  ;;  %v923_v52 = vadd.f32 %v915_v59, %v364_v13  ;;  %v917_v35 = vpop.f32.mrb[34].mxu1 }
 0x16b   :  { %v6890_v55 = vmul.f32 -1.442695, %v920_v63  ;;  %v877_v34 = vpop.f32.mrb[35].mxu0  ;;  %v918_v22 = vpop.f32.mrb[35].mxu1  ;;  %v6892_v32 = vmul.f32 -1.442695, %v922_v62 }
 0x16c   :  { %v6891_v51 = vmul.f32 -1.442695, %v921_v30  ;;  %v469_v30 = vadd.f32 %v468_v31, %v8599_v16 }
 0x16d   :  { %7366 = vpow2.f32 %v6890_v55  ;;  %v542_v55 = vadd.f32 %v541_v11, %v8612_v24 }
 0x16e   :  { %7368 = vpow2.f32 %v6891_v51  ;;  %v471_v51 = vadd.f32 %v470_v15, %v8607_v14 }
 0x16f   :  { %7370 = vpow2.f32 %v6892_v32 }
 0x170   :  { %7372 = vtanh.f32 %v923_v52 }
 0x177   :  { %v7367_v38 = vpop.eup %7366 }
 0x178   :  { %v1183_v19 = vadd.f32 1.0, %v7367_v38  ;;  %v7369_v23 = vpop.eup %7368 }
 0x179   :  { %v1184_v37 = vadd.f32 1.0, %v7369_v23  ;;  %v7371_v60 = vpop.eup %7370 }
 0x17a   :  { %7374 = vrcp.f32 %v1183_v19  ;;  %v7373_v61 = vpop.eup %7372  ;;  %v1185_v7 = vadd.f32 1.0, %v7371_v60 }
 0x17b   :  { %7376 = vrcp.f32 %v1184_v37 }
 0x17c   :  { %7378 = vrcp.f32 %v1185_v7 }
 0x184   :  { %v7375_v56 = vpop.eup %7374 }
 0x185   :  { %v1194_v5 = vmul.f32 %v7375_v56, %v7373_v61  ;;  %v7377_v59 = vpop.eup %7376 }
 0x186   :  { %v1193_v63 = vmul.f32 0.0, %v7377_v59  ;;  %v7379_v6 = vpop.eup %7378 }
 0x188   :  { %v1122_v8 = vpop.f32.mrb[36].mxu0  ;;  %v8715_v52 = vadd.f32 %v1194_v5, %v1193_v63  ;;  %v1163_v62 = vpop.f32.mrb[36].mxu1  ;;  %v10832_v63 = vld [vmem:[#allocation41_spill] sm:$0xff] }
 0x189   :  { %v1170_v13 = vadd.f32 %v1122_v8, %v469_v30  ;;  %v1124_v34 = vpop.f32.mrb[37].mxu0  ;;  %v1172_v35 = vadd.f32 %v1163_v62, %v542_v55  ;;  %v1165_v32 = vpop.f32.mrb[37].mxu1  ;;  %v10834_v62 = vld [vmem:[#allocation43_spill] sm:$0xff] }
 0x18a   :  { %v1171_v22 = vadd.f32 %v1124_v34, %v471_v51  ;;  %v1126_v38 = vpop.f32.mrb[38].mxu0  ;;  %7380 = vtanh.f32 %v8715_v52  ;;  %v1173_v31 = vadd.f32 %v1165_v32, %v544_v33  ;;  %v1167_v15 = vpop.f32.mrb[38].mxu1  ;;  %v10833_v51 = vld [vmem:[#allocation42_spill] sm:$0xff]  ;;  %v10835_v34 = vld [vmem:[#allocation44_spill] sm:$0xff] }
 0x18b   :  { %v6893_v16 = vmul.f32 -1.442695, %v1170_v13  ;;  %v1127_v14 = vpop.f32.mrb[39].mxu0  ;;  %v1168_v11 = vpop.f32.mrb[39].mxu1  ;;  %v6895_v21 = vmul.f32 -1.442695, %v1172_v35 }
 0x18c   :  { %v6894_v24 = vmul.f32 -1.442695, %v1171_v22  ;;  %v10836_v35 = vld [vmem:[#allocation45_spill] sm:$0xff]  ;;  %v10837_v22 = vld [vmem:[#allocation46_spill] sm:$0xff]  ;;  %v10838_v38 = vld [vmem:[#allocation47_spill] sm:$0xff] }
 0x18d   :  { %7382 = vpow2.f32 %v6893_v16  ;;  %v10840_v11 = vld [vmem:[#allocation17_spill] sm:$0xff] }
 0x18e   :  { %7384 = vpow2.f32 %v6894_v24  ;;  %v10839_v24 = vld [vmem:[#allocation16_spill] sm:$0xff] }
 0x18f   :  { %7386 = vpow2.f32 %v6895_v21  ;;  %v10842_v21 = vld [vmem:[#allocation19_spill] sm:$0xff] }
 0x190   :  { %7388 = vtanh.f32 %v1173_v31 }
 0x194   :  { %v7381_v19 = vpop.eup %7380 }
 0x195   :  { %v8718_v23 = vmul.f32 %v7381_v19, %v7379_v6  ;;  %v10841_v6 = vld [vmem:[#allocation18_spill] sm:$0xff]  ;;  %v10843_v19 = vld [vmem:[#allocation20_spill] sm:$0xff] }
 0x197   :  { %v7383_v37 = vpop.eup %7382  ;;  %v1228_v61 = vpack.c.bf16 %v8718_v23, %v8718_v23 }
 0x198   :  { %v1207_v60 = vadd.f32 1.0, %v7383_v37  ;;  %v7385_v56 = vpop.eup %7384  ;;  %v10844_v37 = vld [vmem:[#allocation21_spill] sm:$0xff] }
 0x199   :  { %v1208_v5 = vadd.f32 1.0, %v7385_v56  ;;  %1262 = vmatmul.mubr.bf16.vlgmr.msra.gmra.mrb[40].mxu0 %v1228_v61  ;;  %1303 = vmatmul.mubr.bf16.vlgmr.msra.gmra.mrb[40].mxu1 %v1228_v61  ;;  %v7387_v59 = vpop.eup %7386  ;;  %v10846_v61 = vld [vmem:[#allocation23_spill] sm:$0xff]  ;;  %v10847_v56 = vld [vmem:[#allocation24_spill] sm:$0xff] }
 0x19a   :  { %7390 = vrcp.f32 %v1207_v60  ;;  %1321 = vmatpush1.bf16.msra.mxu0 %v8335_v42  ;;  %1362 = vmatpush1.bf16.msra.mxu1 %v8339_v45  ;;  %v7389_v7 = vpop.eup %7388  ;;  %v1209_v33 = vadd.f32 1.0, %v7387_v59  ;;  %v10845_v60 = vld [vmem:[#allocation22_spill] sm:$0xff] }
 0x19b   :  { %7392 = vrcp.f32 %v1208_v5  ;;  %1322 = vmatprep.subr.bf16.mxu0 %v8341_v46  ;;  %1363 = vmatprep.subr.bf16.mxu1 %v8344_v49  ;;  %v10848_v5 = vld [vmem:[#allocation25_spill] sm:$0xff]  ;;  %v10849_v59 = vld [vmem:[#allocation26_spill] sm:$0xff] }
 0x19c   :  { %1352 = vmatprep.mubr.bf16.mxu0 %v10767_v18  ;;  %1393 = vmatprep.mubr.bf16.mxu1 %v10767_v18  ;;  %7394 = vrcp.f32 %v1209_v33  ;;  %v10854_v33 = vld [vmem:[#allocation31_spill] sm:$0xff] }
 0x19e   :  { %1323 = vmatpush1.bf16.msra.mxu0 %v8349_v58  ;;  %1364 = vmatpush1.bf16.msra.mxu1 %v8353_v0 }
 0x19f   :  { %1324 = vmatprep.subr.bf16.mxu0 %v8355_v2  ;;  %1365 = vmatprep.subr.bf16.mxu1 %v8358_v3 }
 0x1a2   :  { %1325 = vmatpush1.bf16.msra.mxu0 %v8363_v12  ;;  %1366 = vmatpush1.bf16.msra.mxu1 %v8367_v17 }
 0x1a3   :  { %1326 = vmatprep.subr.bf16.mxu0 %v10832_v63  ;;  %1367 = vmatprep.subr.bf16.mxu1 %v10833_v51 }
 0x1a4   :  { %v7391_v30 = vpop.eup %7390 }
 0x1a5   :  { %v1218_v55 = vmul.f32 %v7391_v30, %v7389_v7  ;;  %v7393_v8 = vpop.eup %7392  ;;  %v10850_v7 = vld [vmem:[#allocation27_spill] sm:$0xff]  ;;  %v10851_v30 = vld [vmem:[#allocation28_spill] sm:$0xff] }
 0x1a6   :  { %v1217_v13 = vmul.f32 0.0, %v7393_v8  ;;  %1327 = vmatpush1.bf16.msra.mxu0 %v10834_v62  ;;  %1368 = vmatpush1.bf16.msra.mxu1 %v10835_v34  ;;  %v7395_v16 = vpop.eup %7394  ;;  %v10853_v8 = vld [vmem:[#allocation30_spill] sm:$0xff] }
 0x1a7   :  { %1328 = vmatprep.subr.bf16.mxu0 %v10836_v35  ;;  %1369 = vmatprep.subr.bf16.mxu1 %v10837_v22 }
 0x1a8   :  { %v8740_v32 = vadd.f32 %v1218_v55, %v1217_v13  ;;  %v10852_v55 = vld [vmem:[#allocation29_spill] sm:$0xff]  ;;  %v10855_v13 = vld [vmem:[#allocation32_spill] sm:$0xff] }
 0x1aa   :  { %7396 = vtanh.f32 %v8740_v32  ;;  %1329 = vmatpush1.bf16.msra.mxu0 %v8387_v57  ;;  %1370 = vmatpush1.bf16.msra.mxu1 %v8391_v4 }
 0x1ab   :  { %1330 = vmatprep.subr.bf16.mxu0 %v8393_v9  ;;  %1371 = vmatprep.subr.bf16.mxu1 %v10838_v38 }
 0x1ae   :  { %1331 = vmatpush1.bf16.msra.mxu0 %v8399_v20  ;;  %1372 = vmatpush1.bf16.msra.mxu1 %v8403_v25 }
 0x1af   :  { %1332 = vmatprep.subr.bf16.mxu0 %v8405_v26  ;;  %1373 = vmatprep.subr.bf16.mxu1 %v8408_v29 }
 0x1b2   :  { %1333 = vmatpush1.bf16.msra.mxu0 %v8411_v41  ;;  %1374 = vmatpush1.bf16.msra.mxu1 %v8415_v50 }
 0x1b3   :  { %1334 = vmatprep.subr.bf16.mxu0 %v8417_v53  ;;  %1375 = vmatprep.subr.bf16.mxu1 %v8420_v54 }
 0x1b4   :  { %v7397_v31 = vpop.eup %7396 }
 0x1b5   :  { %v8755_v14 = vmul.f32 %v7397_v31, %v7395_v16  ;;  %v10856_v16 = vld [vmem:[#allocation33_spill] sm:$0xff]  ;;  %v10857_v31 = vld [vmem:[#allocation34_spill] sm:$0xff] }
 0x1b6   :  { %1335 = vmatpush1.bf16.msra.mxu0 %v8423_v10  ;;  %1376 = vmatpush1.bf16.msra.mxu1 %v8427_v1 }
 0x1b7   :  { %v1319_v15 = vpack.c.bf16 %v8755_v14, %v8755_v14  ;;  %1461 = vmatprep.subr.bf16.mxu0 %v8185_v27  ;;  %1502 = vmatprep.subr.bf16.mxu1 %v8187_v28 }
 0x1b9   :  { %1353 = vmatmul.mubr.bf16.vlgmr.msra.gmra.mrb[44].mxu0 %v1319_v15  ;;  %1394 = vmatmul.mubr.bf16.vlgmr.msra.gmra.mrb[44].mxu1 %v1319_v15  ;;  %v10858_v15 = vld [vmem:[#allocation35_spill] sm:$0xff] }
 0x1ba   :  { %1462 = vmatpush1.bf16.msra.mxu0 %v8222_v36  ;;  %1503 = vmatpush1.bf16.msra.mxu1 %v8224_v39 }
 0x1bb   :  { %1463 = vmatprep.subr.bf16.mxu0 %v8226_v40  ;;  %1504 = vmatprep.subr.bf16.mxu1 %v8228_v43 }
 0x1bc   :  { %1493 = vmatprep.mubr.bf16.mxu0 %v10767_v18  ;;  %1534 = vmatprep.mubr.bf16.mxu1 %v10767_v18 }
 0x1be   :  { %1464 = vmatpush1.bf16.msra.mxu0 %v8233_v44  ;;  %1505 = vmatpush1.bf16.msra.mxu1 %v8237_v47 }
 0x1bf   :  { %1465 = vmatprep.subr.bf16.mxu0 %v8239_v48  ;;  %1506 = vmatprep.subr.bf16.mxu1 %v10839_v24 }
 0x1c2   :  { %1466 = vmatpush1.bf16.msra.mxu0 %v10840_v11  ;;  %1507 = vmatpush1.bf16.msra.mxu1 %v10841_v6 }
 0x1c3   :  { %1467 = vmatprep.subr.bf16.mxu0 %v10842_v21  ;;  %1508 = vmatprep.subr.bf16.mxu1 %v10843_v19  ;;  %v10867_v19 = vld [vmem:[#allocation54_spill] sm:$0xff] }
 0x1c6   :  { %1468 = vmatpush1.bf16.msra.mxu0 %v10844_v37  ;;  %1509 = vmatpush1.bf16.msra.mxu1 %v10845_v60  ;;  %v10866_v37 = vld [vmem:[#allocation52_spill] sm:$0xff] }
 0x1c7   :  { %1469 = vmatprep.subr.bf16.mxu0 %v10846_v61  ;;  %1510 = vmatprep.subr.bf16.mxu1 %v10847_v56  ;;  %v10864_v56 = vld [vmem:[#allocation51_spill] sm:$0xff]  ;;  %v10865_v61 = vld [vmem:[#allocation53_spill] sm:$0xff] }
 0x1ca   :  { %1470 = vmatpush1.bf16.msra.mxu0 %v10848_v5  ;;  %1511 = vmatpush1.bf16.msra.mxu1 %v10849_v59  ;;  %v10859_v5 = vld [vmem:[#allocation36_spill] sm:$0xff]  ;;  %v10860_v59 = vld [vmem:[#allocation37_spill] sm:$0xff] }
 0x1cb   :  { %1471 = vmatprep.subr.bf16.mxu0 %v10850_v7  ;;  %1512 = vmatprep.subr.bf16.mxu1 %v10851_v30  ;;  %v10861_v7 = vld [vmem:[#allocation38_spill] sm:$0xff]  ;;  %v10862_v30 = vld [vmem:[#allocation39_spill] sm:$0xff] }
 0x1ce   :  { %1472 = vmatpush1.bf16.msra.mxu0 %v10852_v55  ;;  %1513 = vmatpush1.bf16.msra.mxu1 %v10853_v8  ;;  %v10863_v55 = vld [vmem:[#allocation40_spill] sm:$0xff] }
 0x1cf   :  { %1473 = vmatprep.subr.bf16.mxu0 %v10854_v33  ;;  %1514 = vmatprep.subr.bf16.mxu1 %v10855_v13 }
 0x1d2   :  { %1474 = vmatpush1.bf16.msra.mxu0 %v10856_v16  ;;  %1515 = vmatpush1.bf16.msra.mxu1 %v10857_v31 }
 0x1d3   :  { %1475 = vmatprep.subr.bf16.mxu0 %v10858_v15  ;;  %1516 = vmatprep.subr.bf16.mxu1 %v10859_v5 }
 0x1d6   :  { %1476 = vmatpush1.bf16.msra.mxu0 %v10860_v59  ;;  %1517 = vmatpush1.bf16.msra.mxu1 %v10861_v7 }
 0x1d7   :  { %1552 = vmatprep.subr.bf16.mxu0 %v10862_v30  ;;  %1593 = vmatprep.subr.bf16.mxu1 %v10863_v55 }
 0x26c   :  { %v1263_v8 = vpop.f32.mrb[40].mxu0  ;;  %v1304_v33 = vpop.f32.mrb[40].mxu1 }
 0x26d   :  { %v1311_v13 = vadd.f32 %v1263_v8, %v10864_v56  ;;  %v1313_v16 = vadd.f32 %v1304_v33, %v10865_v61  ;;  %v1265_v60 = vpop.f32.mrb[41].mxu0  ;;  %v1306_v31 = vpop.f32.mrb[41].mxu1  ;;  %v10868_v33 = vld [vmem:[#allocation103_spill] sm:$0xff] }
 0x26e   :  { %v1312_v15 = vadd.f32 %v1265_v60, %v10866_v37  ;;  %v1314_v5 = vadd.f32 %v1306_v31, %v10867_v19  ;;  %v1267_v21 = vpop.f32.mrb[42].mxu0  ;;  %v1308_v59 = vpop.f32.mrb[42].mxu1 }
 0x26f   :  { %v6896_v6 = vmul.f32 -1.442695, %v1311_v13  ;;  %v1268_v7 = vpop.f32.mrb[43].mxu0  ;;  %v1309_v11 = vpop.f32.mrb[43].mxu1  ;;  %v6898_v55 = vmul.f32 -1.442695, %v1313_v16 }
 0x270   :  { %v6897_v30 = vmul.f32 -1.442695, %v1312_v15  ;;  %v10870_v16 = vld [vmem:[#allocation104_spill] sm:$0xff]  ;;  %v10871_v15 = vld [vmem:[#allocation106_spill] sm:$0xff] }
 0x271   :  { %7398 = vpow2.f32 %v6896_v6 }
 0x272   :  { %7400 = vpow2.f32 %v6897_v30 }
 0x273   :  { %7402 = vtanh.f32 %v1314_v5  ;;  %v10869_v5 = vld [vmem:[#allocation105_spill] sm:$0xff] }
 0x274   :  { %7404 = vpow2.f32 %v6898_v55 }
 0x27b   :  { %v7399_v24 = vpop.eup %7398 }
 0x27c   :  { %v1415_v48 = vadd.f32 1.0, %v7399_v24  ;;  %v7401_v56 = vpop.eup %7400 }
 0x27d   :  { %v1416_v61 = vadd.f32 1.0, %v7401_v56  ;;  %v7403_v37 = vpop.eup %7402 }
 0x27e   :  { %7406 = vrcp.f32 %v1415_v48  ;;  %v7405_v60 = vpop.eup %7404 }
 0x27f   :  { %7408 = vrcp.f32 %v1416_v61  ;;  %v1417_v8 = vadd.f32 1.0, %v7405_v60 }
 0x281   :  { %7410 = vrcp.f32 %v1417_v8  ;;  %v2864_v8 = vmax.f32 %v8718_v23, 0.0 }
 0x288   :  { %v7407_v19 = vpop.eup %7406 }
 0x289   :  { %v1426_v21 = vmul.f32 %v7407_v19, %v7403_v37  ;;  %v7409_v59 = vpop.eup %7408 }
 0x28a   :  { %v1425_v11 = vmul.f32 %v7409_v59, %v8715_v52 }
 0x28b   :  { %v7411_v59 = vpop.eup %7410 }
 0x28c   :  { %v1354_v7 = vpop.f32.mrb[44].mxu0  ;;  %v1395_v6 = vpop.f32.mrb[44].mxu1  ;;  %v8802_v30 = vadd.f32 %v1426_v21, %v1425_v11 }
 0x28d   :  { %v1402_v24 = vadd.f32 %v1354_v7, %v10868_v33  ;;  %v1404_v13 = vadd.f32 %v1395_v6, %v10869_v5  ;;  %v1356_v55 = vpop.f32.mrb[45].mxu0  ;;  %v1397_v48 = vpop.f32.mrb[45].mxu1 }
 0x28e   :  { %v1403_v31 = vadd.f32 %v1356_v55, %v10870_v16  ;;  %v1405_v56 = vadd.f32 %v1397_v48, %v10871_v15  ;;  %v1358_v61 = vpop.f32.mrb[46].mxu0  ;;  %v1399_v37 = vpop.f32.mrb[46].mxu1  ;;  %7412 = vtanh.f32 %v8802_v30 }
 0x28f   :  { %v6899_v52 = vmul.f32 -1.442695, %v1402_v24  ;;  %v1359_v60 = vpop.f32.mrb[47].mxu0  ;;  %v1400_v19 = vpop.f32.mrb[47].mxu1  ;;  %v6901_v7 = vmul.f32 -1.442695, %v1404_v13 }
 0x290   :  { %v6900_v21 = vmul.f32 -1.442695, %v1403_v31 }
 0x291   :  { %7414 = vpow2.f32 %v6899_v52 }
 0x292   :  { %7416 = vpow2.f32 %v6900_v21 }
 0x293   :  { %7418 = vtanh.f32 %v1405_v56 }
 0x294   :  { %7420 = vpow2.f32 %v6901_v7  ;;  %v2879_v7 = vmax.f32 %v8755_v14, 0.0  ;;  %v10874_v14 = vld [vmem:[#allocation15_spill] sm:$0xff] }
 0x298   :  { %v7413_v11 = vpop.eup %7412 }
 0x299   :  { %v1429_v6 = vmul.f32 %v7413_v11, %v7411_v59 }
 0x29b   :  { %v7415_v33 = vpop.eup %7414  ;;  %v1460_v55 = vpack.c.bf16 %v1429_v6, %v1429_v6  ;;  %v2866_v48 = vmax.f32 %v1429_v6, 0.0 }
 0x29c   :  { %v1439_v5 = vadd.f32 1.0, %v7415_v33  ;;  %v7417_v16 = vpop.eup %7416  ;;  %v10875_v33 = vld [vmem:[#allocation16_spill] sm:$0xff] }
 0x29d   :  { %v1440_v24 = vadd.f32 1.0, %v7417_v16  ;;  %1494 = vmatmul.mubr.bf16.vlgmr.msra.gmra.mrb[48].mxu0 %v1460_v55  ;;  %1535 = vmatmul.mubr.bf16.vlgmr.msra.gmra.mrb[48].mxu1 %v1460_v55  ;;  %v8810_v31 = vpack.c.bf16 %v2866_v48, %v2864_v8  ;;  %v7419_v23 = vpop.eup %7418  ;;  %v10876_v8 = vld [vmem:[#allocation17_spill] sm:$0xff]  ;;  %v10878_v55 = vld [vmem:[#allocation19_spill] sm:$0xff]  ;;  %v10879_v48 = vld [vmem:[#allocation20_spill] sm:$0xff] }
 0x29e   :  { %7422 = vrcp.f32 %v1439_v5  ;;  %1553 = vmatpush1.bf16.msra.mxu0 %v8335_v42  ;;  %1594 = vmatpush1.bf16.msra.mxu1 %v8339_v45  ;;  %v7421_v13 = vpop.eup %7420  ;;  %v10877_v5 = vld [vmem:[#allocation18_spill] sm:$0xff]  ;;  %v10880_v16 = vld [vmem:[#allocation21_spill] sm:$0xff] }
 0x29f   :  { %10872 = vst [vmem:[#allocation41_spill] sm:$0xff] %v8810_v31  ;;  %7424 = vrcp.f32 %v1440_v24  ;;  %1554 = vmatprep.subr.bf16.mxu0 %v8341_v46  ;;  %1595 = vmatprep.subr.bf16.mxu1 %v8344_v49  ;;  %v1441_v37 = vadd.f32 1.0, %v7421_v13  ;;  %v10881_v24 = vld [vmem:[#allocation22_spill] sm:$0xff]  ;;  %v10883_v13 = vld [vmem:[#allocation24_spill] sm:$0xff]  ;;  %v10896_v31 = vld [vmem:[#allocation37_spill] sm:$0xff] }
 0x2a0   :  { %1584 = vmatprep.mubr.bf16.mxu0 %v10767_v18  ;;  %1625 = vmatprep.mubr.bf16.mxu1 %v10767_v18 }
 0x2a1   :  { %7426 = vrcp.f32 %v1441_v37  ;;  %v10887_v37 = vld [vmem:[#allocation28_spill] sm:$0xff] }
 0x2a2   :  { %1555 = vmatpush1.bf16.msra.mxu0 %v8349_v58  ;;  %1596 = vmatpush1.bf16.msra.mxu1 %v8353_v0 }
 0x2a3   :  { %1556 = vmatprep.subr.bf16.mxu0 %v8355_v2  ;;  %1597 = vmatprep.subr.bf16.mxu1 %v8358_v3 }
 0x2a6   :  { %1557 = vmatpush1.bf16.msra.mxu0 %v8363_v12  ;;  %1598 = vmatpush1.bf16.msra.mxu1 %v8367_v17 }
 0x2a7   :  { %1558 = vmatprep.subr.bf16.mxu0 %v10832_v63  ;;  %1599 = vmatprep.subr.bf16.mxu1 %v10833_v51 }
 0x2a8   :  { %v7423_v15 = vpop.eup %7422 }
 0x2a9   :  { %v1450_v56 = vmul.f32 %v7423_v15, %v7419_v23  ;;  %v7425_v61 = vpop.eup %7424  ;;  %v10882_v23 = vld [vmem:[#allocation23_spill] sm:$0xff]  ;;  %v10884_v15 = vld [vmem:[#allocation25_spill] sm:$0xff] }
 0x2aa   :  { %v1449_v52 = vmul.f32 %v7425_v61, %v8740_v32  ;;  %1559 = vmatpush1.bf16.msra.mxu0 %v10834_v62  ;;  %1600 = vmatpush1.bf16.msra.mxu1 %v10835_v34  ;;  %v10886_v61 = vld [vmem:[#allocation27_spill] sm:$0xff] }
 0x2ab   :  { %1560 = vmatprep.subr.bf16.mxu0 %v10836_v35  ;;  %1601 = vmatprep.subr.bf16.mxu1 %v10837_v22  ;;  %v7427_v32 = vpop.eup %7426 }
 0x2ac   :  { %v8831_v60 = vadd.f32 %v1450_v56, %v1449_v52  ;;  %v10885_v56 = vld [vmem:[#allocation26_spill] sm:$0xff]  ;;  %v10888_v52 = vld [vmem:[#allocation29_spill] sm:$0xff] }
 0x2ae   :  { %7428 = vtanh.f32 %v8831_v60  ;;  %1561 = vmatpush1.bf16.msra.mxu0 %v8387_v57  ;;  %1602 = vmatpush1.bf16.msra.mxu1 %v8391_v4 }
 0x2af   :  { %1562 = vmatprep.subr.bf16.mxu0 %v8393_v9  ;;  %1603 = vmatprep.subr.bf16.mxu1 %v10838_v38 }
 0x2b2   :  { %1563 = vmatpush1.bf16.msra.mxu0 %v8399_v20  ;;  %1604 = vmatpush1.bf16.msra.mxu1 %v8403_v25 }
 0x2b3   :  { %1564 = vmatprep.subr.bf16.mxu0 %v8405_v26  ;;  %1605 = vmatprep.subr.bf16.mxu1 %v8408_v29 }
 0x2b6   :  { %1565 = vmatpush1.bf16.msra.mxu0 %v8411_v41  ;;  %1606 = vmatpush1.bf16.msra.mxu1 %v8415_v50 }
 0x2b7   :  { %1566 = vmatprep.subr.bf16.mxu0 %v8417_v53  ;;  %1607 = vmatprep.subr.bf16.mxu1 %v8420_v54 }
 0x2b8   :  { %v7429_v19 = vpop.eup %7428 }
 0x2b9   :  { %v1453_v21 = vmul.f32 %v7429_v19, %v7427_v32  ;;  %v10889_v32 = vld [vmem:[#allocation30_spill] sm:$0xff]  ;;  %v10890_v19 = vld [vmem:[#allocation31_spill] sm:$0xff] }
 0x2ba   :  { %1567 = vmatpush1.bf16.msra.mxu0 %v8423_v10  ;;  %1608 = vmatpush1.bf16.msra.mxu1 %v8427_v1 }
 0x2bb   :  { %v1551_v59 = vpack.c.bf16 %v1453_v21, %v1453_v21  ;;  %1693 = vmatprep.subr.bf16.mxu0 %v8185_v27  ;;  %1734 = vmatprep.subr.bf16.mxu1 %v8187_v28  ;;  %v2877_v11 = vmax.f32 %v1453_v21, 0.0  ;;  %v10891_v21 = vld [vmem:[#allocation32_spill] sm:$0xff] }
 0x2bd   :  { %1585 = vmatmul.mubr.bf16.vlgmr.msra.gmra.mrb[52].mxu0 %v1551_v59  ;;  %1626 = vmatmul.mubr.bf16.vlgmr.msra.gmra.mrb[52].mxu1 %v1551_v59  ;;  %v8851_v6 = vpack.c.bf16 %v2879_v7, %v2877_v11  ;;  %v10892_v59 = vld [vmem:[#allocation33_spill] sm:$0xff]  ;;  %v10893_v11 = vld [vmem:[#allocation34_spill] sm:$0xff]  ;;  %v10894_v7 = vld [vmem:[#allocation35_spill] sm:$0xff] }
 0x2be   :  { %1694 = vmatpush1.bf16.msra.mxu0 %v8222_v36  ;;  %1735 = vmatpush1.bf16.msra.mxu1 %v8224_v39 }
 0x2bf   :  { %10873 = vst [vmem:[#allocation42_spill] sm:$0xff] %v8851_v6  ;;  %1695 = vmatprep.subr.bf16.mxu0 %v8226_v40  ;;  %1736 = vmatprep.subr.bf16.mxu1 %v8228_v43  ;;  %v10895_v6 = vld [vmem:[#allocation36_spill] sm:$0xff] }
 0x2c0   :  { %1725 = vmatprep.mubr.bf16.mxu0 %v10767_v18  ;;  %1766 = vmatprep.mubr.bf16.mxu1 %v10767_v18 }
 0x2c2   :  { %1696 = vmatpush1.bf16.msra.mxu0 %v8233_v44  ;;  %1737 = vmatpush1.bf16.msra.mxu1 %v8237_v47 }
 0x2c3   :  { %1697 = vmatprep.subr.bf16.mxu0 %v10874_v14  ;;  %1738 = vmatprep.subr.bf16.mxu1 %v10875_v33 }
 0x2c6   :  { %1698 = vmatpush1.bf16.msra.mxu0 %v10876_v8  ;;  %1739 = vmatpush1.bf16.msra.mxu1 %v10877_v5 }
 0x2c7   :  { %1699 = vmatprep.subr.bf16.mxu0 %v10878_v55  ;;  %1740 = vmatprep.subr.bf16.mxu1 %v10879_v48 }
 0x2ca   :  { %1700 = vmatpush1.bf16.msra.mxu0 %v10880_v16  ;;  %1741 = vmatpush1.bf16.msra.mxu1 %v10881_v24  ;;  %v10903_v24 = vld [vmem:[#allocation59_spill] sm:$0xff] }
 0x2cb   :  { %1701 = vmatprep.subr.bf16.mxu0 %v10882_v23  ;;  %1742 = vmatprep.subr.bf16.mxu1 %v10883_v13  ;;  %v10902_v23 = vld [vmem:[#allocation56_spill] sm:$0xff] }
 0x2ce   :  { %1702 = vmatpush1.bf16.msra.mxu0 %v10884_v15  ;;  %1743 = vmatpush1.bf16.msra.mxu1 %v10885_v56  ;;  %v10900_v56 = vld [vmem:[#allocation55_spill] sm:$0xff]  ;;  %v10901_v15 = vld [vmem:[#allocation57_spill] sm:$0xff] }
 0x2cf   :  { %1703 = vmatprep.subr.bf16.mxu0 %v10886_v61  ;;  %1744 = vmatprep.subr.bf16.mxu1 %v10887_v37  ;;  %v10897_v61 = vld [vmem:[#allocation38_spill] sm:$0xff]  ;;  %v10898_v37 = vld [vmem:[#allocation39_spill] sm:$0xff] }
 0x2d2   :  { %1704 = vmatpush1.bf16.msra.mxu0 %v10888_v52  ;;  %1745 = vmatpush1.bf16.msra.mxu1 %v10889_v32  ;;  %v10899_v52 = vld [vmem:[#allocation40_spill] sm:$0xff] }
 0x2d3   :  { %1705 = vmatprep.subr.bf16.mxu0 %v10890_v19  ;;  %1746 = vmatprep.subr.bf16.mxu1 %v10891_v21 }
 0x2d6   :  { %1706 = vmatpush1.bf16.msra.mxu0 %v10892_v59  ;;  %1747 = vmatpush1.bf16.msra.mxu1 %v10893_v11 }
 0x2d7   :  { %1707 = vmatprep.subr.bf16.mxu0 %v10894_v7  ;;  %1748 = vmatprep.subr.bf16.mxu1 %v10895_v6 }
 0x2da   :  { %1708 = vmatpush1.bf16.msra.mxu0 %v10896_v31  ;;  %1749 = vmatpush1.bf16.msra.mxu1 %v10897_v61 }
 0x2db   :  { %1784 = vmatprep.subr.bf16.mxu0 %v10898_v37  ;;  %1825 = vmatprep.subr.bf16.mxu1 %v10899_v52 }
 0x370   :  { %v1495_v32 = vpop.f32.mrb[48].mxu0  ;;  %v1536_v19 = vpop.f32.mrb[48].mxu1 }
 0x371   :  { %v1543_v21 = vadd.f32 %v1495_v32, %v10900_v56  ;;  %v1545_v59 = vadd.f32 %v1536_v19, %v10901_v15  ;;  %v1497_v13 = vpop.f32.mrb[49].mxu0  ;;  %v1538_v11 = vpop.f32.mrb[49].mxu1  ;;  %v10904_v19 = vld [vmem:[#allocation98_spill] sm:$0xff] }
 0x372   :  { %v1544_v7 = vadd.f32 %v1497_v13, %v10902_v23  ;;  %v1546_v6 = vadd.f32 %v1538_v11, %v10903_v24  ;;  %v1499_v16 = vpop.f32.mrb[50].mxu0  ;;  %v1540_v31 = vpop.f32.mrb[50].mxu1 }
 0x373   :  { %v6902_v48 = vmul.f32 -1.442695, %v1543_v21  ;;  %v1500_v61 = vpop.f32.mrb[51].mxu0  ;;  %v1541_v55 = vpop.f32.mrb[51].mxu1  ;;  %v6904_v52 = vmul.f32 -1.442695, %v1545_v59 }
 0x374   :  { %v6903_v37 = vmul.f32 -1.442695, %v1544_v7  ;;  %v10906_v59 = vld [vmem:[#allocation100_spill] sm:$0xff]  ;;  %v10907_v7 = vld [vmem:[#allocation102_spill] sm:$0xff] }
 0x375   :  { %7430 = vpow2.f32 %v6902_v48 }
 0x376   :  { %7432 = vpow2.f32 %v6903_v37 }
 0x377   :  { %7434 = vtanh.f32 %v1546_v6  ;;  %v10905_v6 = vld [vmem:[#allocation101_spill] sm:$0xff] }
 0x378   :  { %7436 = vpow2.f32 %v6904_v52 }
 0x37f   :  { %v7431_v5 = vpop.eup %7430 }
 0x380   :  { %v1647_v8 = vadd.f32 1.0, %v7431_v5  ;;  %v7433_v56 = vpop.eup %7432 }
 0x381   :  { %v1648_v15 = vadd.f32 1.0, %v7433_v56  ;;  %v7435_v23 = vpop.eup %7434 }
 0x382   :  { %7438 = vrcp.f32 %v1647_v8  ;;  %v7437_v13 = vpop.eup %7436 }
 0x383   :  { %7440 = vrcp.f32 %v1648_v15  ;;  %v1649_v32 = vadd.f32 1.0, %v7437_v13 }
 0x385   :  { %7442 = vrcp.f32 %v1649_v32 }
 0x38c   :  { %v7439_v24 = vpop.eup %7438 }
 0x38d   :  { %v1658_v16 = vmul.f32 %v7439_v24, %v7435_v23  ;;  %v7441_v31 = vpop.eup %7440 }
 0x38e   :  { %v1657_v55 = vmul.f32 %v7441_v31, %v8802_v30 }
 0x38f   :  { %v7443_v31 = vpop.eup %7442 }
 0x390   :  { %v1586_v61 = vpop.f32.mrb[52].mxu0  ;;  %v1627_v48 = vpop.f32.mrb[52].mxu1  ;;  %v8892_v37 = vadd.f32 %v1658_v16, %v1657_v55 }
 0x391   :  { %v1634_v5 = vadd.f32 %v1586_v61, %v10904_v19  ;;  %v1636_v21 = vadd.f32 %v1627_v48, %v10905_v6  ;;  %v1588_v52 = vpop.f32.mrb[53].mxu0  ;;  %v1629_v8 = vpop.f32.mrb[53].mxu1 }
 0x392   :  { %v1635_v11 = vadd.f32 %v1588_v52, %v10906_v59  ;;  %v1637_v56 = vadd.f32 %v1629_v8, %v10907_v7  ;;  %v1590_v15 = vpop.f32.mrb[54].mxu0  ;;  %v1631_v23 = vpop.f32.mrb[54].mxu1  ;;  %7444 = vtanh.f32 %v8892_v37 }
 0x393   :  { %v6905_v30 = vmul.f32 -1.442695, %v1634_v5  ;;  %v1591_v13 = vpop.f32.mrb[55].mxu0  ;;  %v1632_v24 = vpop.f32.mrb[55].mxu1  ;;  %v6907_v61 = vmul.f32 -1.442695, %v1636_v21 }
 0x394   :  { %v6906_v16 = vmul.f32 -1.442695, %v1635_v11 }
 0x395   :  { %7446 = vpow2.f32 %v6905_v30 }
 0x396   :  { %7448 = vpow2.f32 %v6906_v16  ;;  %v10908_v16 = vld [vmem:[#allocation17_spill] sm:$0xff] }
 0x397   :  { %7450 = vtanh.f32 %v1637_v56 }
 0x398   :  { %7452 = vpow2.f32 %v6907_v61  ;;  %v10911_v61 = vld [vmem:[#allocation20_spill] sm:$0xff] }
 0x39c   :  { %v7445_v55 = vpop.eup %7444 }
 0x39d   :  { %v8899_v48 = vmul.f32 %v7445_v55, %v7443_v31  ;;  %v10909_v31 = vld [vmem:[#allocation18_spill] sm:$0xff]  ;;  %v10910_v55 = vld [vmem:[#allocation19_spill] sm:$0xff] }
 0x39f   :  { %v7447_v32 = vpop.eup %7446  ;;  %v1692_v6 = vpack.c.bf16 %v8899_v48, %v8899_v48 }
 0x3a0   :  { %v1671_v19 = vadd.f32 1.0, %v7447_v32  ;;  %v7449_v52 = vpop.eup %7448  ;;  %v10912_v32 = vld [vmem:[#allocation21_spill] sm:$0xff] }
 0x3a1   :  { %v1672_v5 = vadd.f32 1.0, %v7449_v52  ;;  %1726 = vmatmul.mubr.bf16.vlgmr.msra.gmra.mrb[56].mxu0 %v1692_v6  ;;  %1767 = vmatmul.mubr.bf16.vlgmr.msra.gmra.mrb[56].mxu1 %v1692_v6  ;;  %v7451_v21 = vpop.eup %7450  ;;  %v10914_v6 = vld [vmem:[#allocation23_spill] sm:$0xff]  ;;  %v10915_v52 = vld [vmem:[#allocation24_spill] sm:$0xff] }
 0x3a2   :  { %7454 = vrcp.f32 %v1671_v19  ;;  %1785 = vmatpush1.bf16.msra.mxu0 %v8335_v42  ;;  %1826 = vmatpush1.bf16.msra.mxu1 %v8339_v45  ;;  %v7453_v8 = vpop.eup %7452  ;;  %v10913_v19 = vld [vmem:[#allocation22_spill] sm:$0xff] }
 0x3a3   :  { %7456 = vrcp.f32 %v1672_v5  ;;  %1786 = vmatprep.subr.bf16.mxu0 %v8341_v46  ;;  %1827 = vmatprep.subr.bf16.mxu1 %v8344_v49  ;;  %v1673_v56 = vadd.f32 1.0, %v7453_v8  ;;  %v10916_v5 = vld [vmem:[#allocation25_spill] sm:$0xff]  ;;  %v10918_v8 = vld [vmem:[#allocation27_spill] sm:$0xff] }
 0x3a4   :  { %1816 = vmatprep.mubr.bf16.mxu0 %v10767_v18  ;;  %1857 = vmatprep.mubr.bf16.mxu1 %v10767_v18 }
 0x3a5   :  { %7458 = vrcp.f32 %v1673_v56  ;;  %v10922_v56 = vld [vmem:[#allocation31_spill] sm:$0xff] }
 0x3a6   :  { %1787 = vmatpush1.bf16.msra.mxu0 %v8349_v58  ;;  %1828 = vmatpush1.bf16.msra.mxu1 %v8353_v0 }
 0x3a7   :  { %1788 = vmatprep.subr.bf16.mxu0 %v8355_v2  ;;  %1829 = vmatprep.subr.bf16.mxu1 %v8358_v3 }
 0x3aa   :  { %1789 = vmatpush1.bf16.msra.mxu0 %v8363_v12  ;;  %1830 = vmatpush1.bf16.msra.mxu1 %v8367_v17 }
 0x3ab   :  { %1790 = vmatprep.subr.bf16.mxu0 %v10832_v63  ;;  %1831 = vmatprep.subr.bf16.mxu1 %v10833_v51 }
 0x3ac   :  { %v7455_v59 = vpop.eup %7454 }
 0x3ad   :  { %v1682_v11 = vmul.f32 %v7455_v59, %v7451_v21  ;;  %v7457_v7 = vpop.eup %7456  ;;  %v10917_v21 = vld [vmem:[#allocation26_spill] sm:$0xff]  ;;  %v10919_v59 = vld [vmem:[#allocation28_spill] sm:$0xff] }
 0x3ae   :  { %v1681_v15 = vmul.f32 %v7457_v7, %v8831_v60  ;;  %1791 = vmatpush1.bf16.msra.mxu0 %v10834_v62  ;;  %1832 = vmatpush1.bf16.msra.mxu1 %v10835_v34  ;;  %v10921_v7 = vld [vmem:[#allocation30_spill] sm:$0xff] }
 0x3af   :  { %1792 = vmatprep.subr.bf16.mxu0 %v10836_v35  ;;  %1833 = vmatprep.subr.bf16.mxu1 %v10837_v22  ;;  %v7459_v60 = vpop.eup %7458 }
 0x3b0   :  { %v8922_v23 = vadd.f32 %v1682_v11, %v1681_v15  ;;  %v10920_v11 = vld [vmem:[#allocation29_spill] sm:$0xff]  ;;  %v10923_v15 = vld [vmem:[#allocation32_spill] sm:$0xff] }
 0x3b2   :  { %7460 = vtanh.f32 %v8922_v23  ;;  %1793 = vmatpush1.bf16.msra.mxu0 %v8387_v57  ;;  %1834 = vmatpush1.bf16.msra.mxu1 %v8391_v4 }
 0x3b3   :  { %1794 = vmatprep.subr.bf16.mxu0 %v8393_v9  ;;  %1835 = vmatprep.subr.bf16.mxu1 %v10838_v38 }
 0x3b6   :  { %1795 = vmatpush1.bf16.msra.mxu0 %v8399_v20  ;;  %1836 = vmatpush1.bf16.msra.mxu1 %v8403_v25 }
 0x3b7   :  { %1796 = vmatprep.subr.bf16.mxu0 %v8405_v26  ;;  %1837 = vmatprep.subr.bf16.mxu1 %v8408_v29 }
 0x3ba   :  { %1797 = vmatpush1.bf16.msra.mxu0 %v8411_v41  ;;  %1838 = vmatpush1.bf16.msra.mxu1 %v8415_v50 }
 0x3bb   :  { %1798 = vmatprep.subr.bf16.mxu0 %v8417_v53  ;;  %1839 = vmatprep.subr.bf16.mxu1 %v8420_v54 }
 0x3bc   :  { %v7461_v30 = vpop.eup %7460 }
 0x3bd   :  { %v8937_v13 = vmul.f32 %v7461_v30, %v7459_v60  ;;  %v10924_v60 = vld [vmem:[#allocation33_spill] sm:$0xff]  ;;  %v10925_v30 = vld [vmem:[#allocation34_spill] sm:$0xff] }
 0x3be   :  { %1799 = vmatpush1.bf16.msra.mxu0 %v8423_v10  ;;  %1840 = vmatpush1.bf16.msra.mxu1 %v8427_v1 }
 0x3bf   :  { %v1783_v24 = vpack.c.bf16 %v8937_v13, %v8937_v13  ;;  %1925 = vmatprep.subr.bf16.mxu0 %v8185_v27  ;;  %1966 = vmatprep.subr.bf16.mxu1 %v8187_v28 }
 0x3c1   :  { %1817 = vmatmul.mubr.bf16.vlgmr.msra.gmra.mrb[60].mxu0 %v1783_v24  ;;  %1858 = vmatmul.mubr.bf16.vlgmr.msra.gmra.mrb[60].mxu1 %v1783_v24  ;;  %v10926_v24 = vld [vmem:[#allocation35_spill] sm:$0xff] }
 0x3c2   :  { %1926 = vmatpush1.bf16.msra.mxu0 %v8222_v36  ;;  %1967 = vmatpush1.bf16.msra.mxu1 %v8224_v39 }
 0x3c3   :  { %1927 = vmatprep.subr.bf16.mxu0 %v8226_v40  ;;  %1968 = vmatprep.subr.bf16.mxu1 %v8228_v43 }
 0x3c4   :  { %1957 = vmatprep.mubr.bf16.mxu0 %v10767_v18  ;;  %1998 = vmatprep.mubr.bf16.mxu1 %v10767_v18 }
 0x3c6   :  { %1928 = vmatpush1.bf16.msra.mxu0 %v8233_v44  ;;  %1969 = vmatpush1.bf16.msra.mxu1 %v8237_v47 }
 0x3c7   :  { %1929 = vmatprep.subr.bf16.mxu0 %v10874_v14  ;;  %1970 = vmatprep.subr.bf16.mxu1 %v10875_v33 }
 0x3ca   :  { %1930 = vmatpush1.bf16.msra.mxu0 %v10908_v16  ;;  %1971 = vmatpush1.bf16.msra.mxu1 %v10909_v31 }
 0x3cb   :  { %1931 = vmatprep.subr.bf16.mxu0 %v10910_v55  ;;  %1972 = vmatprep.subr.bf16.mxu1 %v10911_v61  ;;  %v10935_v61 = vld [vmem:[#allocation62_spill] sm:$0xff] }
 0x3ce   :  { %1932 = vmatpush1.bf16.msra.mxu0 %v10912_v32  ;;  %1973 = vmatpush1.bf16.msra.mxu1 %v10913_v19  ;;  %v10934_v32 = vld [vmem:[#allocation60_spill] sm:$0xff] }
 0x3cf   :  { %1933 = vmatprep.subr.bf16.mxu0 %v10914_v6  ;;  %1974 = vmatprep.subr.bf16.mxu1 %v10915_v52  ;;  %v10932_v52 = vld [vmem:[#allocation58_spill] sm:$0xff]  ;;  %v10933_v6 = vld [vmem:[#allocation61_spill] sm:$0xff] }
 0x3d2   :  { %1934 = vmatpush1.bf16.msra.mxu0 %v10916_v5  ;;  %1975 = vmatpush1.bf16.msra.mxu1 %v10917_v21  ;;  %v10927_v5 = vld [vmem:[#allocation36_spill] sm:$0xff]  ;;  %v10928_v21 = vld [vmem:[#allocation37_spill] sm:$0xff] }
 0x3d3   :  { %1935 = vmatprep.subr.bf16.mxu0 %v10918_v8  ;;  %1976 = vmatprep.subr.bf16.mxu1 %v10919_v59  ;;  %v10929_v8 = vld [vmem:[#allocation38_spill] sm:$0xff]  ;;  %v10930_v59 = vld [vmem:[#allocation39_spill] sm:$0xff] }
 0x3d6   :  { %1936 = vmatpush1.bf16.msra.mxu0 %v10920_v11  ;;  %1977 = vmatpush1.bf16.msra.mxu1 %v10921_v7  ;;  %v10931_v11 = vld [vmem:[#allocation40_spill] sm:$0xff] }
 0x3d7   :  { %1937 = vmatprep.subr.bf16.mxu0 %v10922_v56  ;;  %1978 = vmatprep.subr.bf16.mxu1 %v10923_v15 }
 0x3da   :  { %1938 = vmatpush1.bf16.msra.mxu0 %v10924_v60  ;;  %1979 = vmatpush1.bf16.msra.mxu1 %v10925_v30 }
 0x3db   :  { %1939 = vmatprep.subr.bf16.mxu0 %v10926_v24  ;;  %1980 = vmatprep.subr.bf16.mxu1 %v10927_v5 }
 0x3de   :  { %1940 = vmatpush1.bf16.msra.mxu0 %v10928_v21  ;;  %1981 = vmatpush1.bf16.msra.mxu1 %v10929_v8 }
 0x3df   :  { %2016 = vmatprep.subr.bf16.mxu0 %v10930_v59  ;;  %2057 = vmatprep.subr.bf16.mxu1 %v10931_v11 }
 0x474   :  { %v1727_v7 = vpop.f32.mrb[56].mxu0  ;;  %v1768_v56 = vpop.f32.mrb[56].mxu1 }
 0x475   :  { %v1775_v15 = vadd.f32 %v1727_v7, %v10932_v52  ;;  %v1777_v60 = vadd.f32 %v1768_v56, %v10933_v6  ;;  %v1729_v19 = vpop.f32.mrb[57].mxu0  ;;  %v1770_v30 = vpop.f32.mrb[57].mxu1  ;;  %v10936_v56 = vld [vmem:[#allocation95_spill] sm:$0xff] }
 0x476   :  { %v1776_v24 = vadd.f32 %v1729_v19, %v10934_v32  ;;  %v1778_v5 = vadd.f32 %v1770_v30, %v10935_v61  ;;  %v1731_v55 = vpop.f32.mrb[58].mxu0  ;;  %v1772_v21 = vpop.f32.mrb[58].mxu1 }
 0x477   :  { %v6908_v31 = vmul.f32 -1.442695, %v1775_v15  ;;  %v1732_v8 = vpop.f32.mrb[59].mxu0  ;;  %v1773_v16 = vpop.f32.mrb[59].mxu1  ;;  %v6910_v11 = vmul.f32 -1.442695, %v1777_v60 }
 0x478   :  { %v6909_v59 = vmul.f32 -1.442695, %v1776_v24  ;;  %v10938_v60 = vld [vmem:[#allocation96_spill] sm:$0xff]  ;;  %v10939_v24 = vld [vmem:[#allocation99_spill] sm:$0xff] }
 0x479   :  { %7462 = vpow2.f32 %v6908_v31 }
 0x47a   :  { %7464 = vpow2.f32 %v6909_v59 }
 0x47b   :  { %7466 = vtanh.f32 %v1778_v5  ;;  %v10937_v5 = vld [vmem:[#allocation97_spill] sm:$0xff] }
 0x47c   :  { %7468 = vpow2.f32 %v6910_v11 }
 0x483   :  { %v7463_v33 = vpop.eup %7462 }
 0x484   :  { %v1879_v14 = vadd.f32 1.0, %v7463_v33  ;;  %v7465_v52 = vpop.eup %7464 }
 0x485   :  { %v1880_v6 = vadd.f32 1.0, %v7465_v52  ;;  %v7467_v32 = vpop.eup %7466 }
 0x486   :  { %7470 = vrcp.f32 %v1879_v14  ;;  %v7469_v19 = vpop.eup %7468 }
 0x487   :  { %7472 = vrcp.f32 %v1880_v6  ;;  %v1881_v7 = vadd.f32 1.0, %v7469_v19 }
 0x489   :  { %7474 = vrcp.f32 %v1881_v7  ;;  %v2868_v7 = vmax.f32 %v8899_v48, 0.0 }
 0x490   :  { %v7471_v61 = vpop.eup %7470 }
 0x491   :  { %v1890_v55 = vmul.f32 %v7471_v61, %v7467_v32  ;;  %v7473_v21 = vpop.eup %7472 }
 0x492   :  { %v1889_v16 = vmul.f32 %v7473_v21, %v8892_v37 }
 0x493   :  { %v7475_v21 = vpop.eup %7474 }
 0x494   :  { %v1818_v8 = vpop.f32.mrb[60].mxu0  ;;  %v1859_v31 = vpop.f32.mrb[60].mxu1  ;;  %v8984_v59 = vadd.f32 %v1890_v55, %v1889_v16 }
 0x495   :  { %v1866_v33 = vadd.f32 %v1818_v8, %v10936_v56  ;;  %v1868_v15 = vadd.f32 %v1859_v31, %v10937_v5  ;;  %v1820_v11 = vpop.f32.mrb[61].mxu0  ;;  %v1861_v14 = vpop.f32.mrb[61].mxu1 }
 0x496   :  { %v1867_v30 = vadd.f32 %v1820_v11, %v10938_v60  ;;  %v1869_v52 = vadd.f32 %v1861_v14, %v10939_v24  ;;  %v1822_v6 = vpop.f32.mrb[62].mxu0  ;;  %v1863_v32 = vpop.f32.mrb[62].mxu1  ;;  %7476 = vtanh.f32 %v8984_v59 }
 0x497   :  { %v6911_v37 = vmul.f32 -1.442695, %v1866_v33  ;;  %v1823_v19 = vpop.f32.mrb[63].mxu0  ;;  %v1864_v61 = vpop.f32.mrb[63].mxu1  ;;  %v6913_v8 = vmul.f32 -1.442695, %v1868_v15 }
 0x498   :  { %v6912_v55 = vmul.f32 -1.442695, %v1867_v30 }
 0x499   :  { %7478 = vpow2.f32 %v6911_v37 }
 0x49a   :  { %7480 = vpow2.f32 %v6912_v55 }
 0x49b   :  { %7482 = vtanh.f32 %v1869_v52 }
 0x49c   :  { %7484 = vpow2.f32 %v6913_v8  ;;  %v2875_v8 = vmax.f32 %v8937_v13, 0.0  ;;  %v10942_v13 = vld [vmem:[#allocation15_spill] sm:$0xff] }
 0x4a0   :  { %v7477_v16 = vpop.eup %7476 }
 0x4a1   :  { %v1893_v31 = vmul.f32 %v7477_v16, %v7475_v21 }
 0x4a3   :  { %v7479_v56 = vpop.eup %7478  ;;  %v1924_v11 = vpack.c.bf16 %v1893_v31, %v1893_v31  ;;  %v2870_v14 = vmax.f32 %v1893_v31, 0.0 }
 0x4a4   :  { %v1903_v5 = vadd.f32 1.0, %v7479_v56  ;;  %v7481_v60 = vpop.eup %7480  ;;  %v10943_v56 = vld [vmem:[#allocation16_spill] sm:$0xff] }
 0x4a5   :  { %v1904_v33 = vadd.f32 1.0, %v7481_v60  ;;  %1958 = vmatmul.mubr.bf16.vlgmr.msra.gmra.mrb[64].mxu0 %v1924_v11  ;;  %1999 = vmatmul.mubr.bf16.vlgmr.msra.gmra.mrb[64].mxu1 %v1924_v11  ;;  %v8992_v30 = vpack.c.bf16 %v2870_v14, %v2868_v7  ;;  %v7483_v48 = vpop.eup %7482  ;;  %v10944_v7 = vld [vmem:[#allocation17_spill] sm:$0xff]  ;;  %v10946_v11 = vld [vmem:[#allocation19_spill] sm:$0xff]  ;;  %v10947_v14 = vld [vmem:[#allocation20_spill] sm:$0xff] }
 0x4a6   :  { %7486 = vrcp.f32 %v1903_v5  ;;  %2017 = vmatpush1.bf16.msra.mxu0 %v8335_v42  ;;  %2058 = vmatpush1.bf16.msra.mxu1 %v8339_v45  ;;  %v7485_v15 = vpop.eup %7484  ;;  %v10945_v5 = vld [vmem:[#allocation18_spill] sm:$0xff]  ;;  %v10948_v60 = vld [vmem:[#allocation21_spill] sm:$0xff] }
 0x4a7   :  { %10940 = vst [vmem:[#allocation43_spill] sm:$0xff] %v8992_v30  ;;  %7488 = vrcp.f32 %v1904_v33  ;;  %2018 = vmatprep.subr.bf16.mxu0 %v8341_v46  ;;  %2059 = vmatprep.subr.bf16.mxu1 %v8344_v49  ;;  %v1905_v32 = vadd.f32 1.0, %v7485_v15  ;;  %v10949_v33 = vld [vmem:[#allocation22_spill] sm:$0xff]  ;;  %v10951_v15 = vld [vmem:[#allocation24_spill] sm:$0xff]  ;;  %v10964_v30 = vld [vmem:[#allocation37_spill] sm:$0xff] }
 0x4a8   :  { %2048 = vmatprep.mubr.bf16.mxu0 %v10767_v18  ;;  %2089 = vmatprep.mubr.bf16.mxu1 %v10767_v18 }
 0x4a9   :  { %7490 = vrcp.f32 %v1905_v32  ;;  %v10955_v32 = vld [vmem:[#allocation28_spill] sm:$0xff] }
 0x4aa   :  { %2019 = vmatpush1.bf16.msra.mxu0 %v8349_v58  ;;  %2060 = vmatpush1.bf16.msra.mxu1 %v8353_v0 }
 0x4ab   :  { %2020 = vmatprep.subr.bf16.mxu0 %v8355_v2  ;;  %2061 = vmatprep.subr.bf16.mxu1 %v8358_v3 }
 0x4ae   :  { %2021 = vmatpush1.bf16.msra.mxu0 %v8363_v12  ;;  %2062 = vmatpush1.bf16.msra.mxu1 %v8367_v17 }
 0x4af   :  { %2022 = vmatprep.subr.bf16.mxu0 %v10832_v63  ;;  %2063 = vmatprep.subr.bf16.mxu1 %v10833_v51 }
 0x4b0   :  { %v7487_v24 = vpop.eup %7486 }
 0x4b1   :  { %v1914_v52 = vmul.f32 %v7487_v24, %v7483_v48  ;;  %v7489_v6 = vpop.eup %7488  ;;  %v10950_v48 = vld [vmem:[#allocation23_spill] sm:$0xff]  ;;  %v10952_v24 = vld [vmem:[#allocation25_spill] sm:$0xff] }
 0x4b2   :  { %v1913_v37 = vmul.f32 %v7489_v6, %v8922_v23  ;;  %2023 = vmatpush1.bf16.msra.mxu0 %v10834_v62  ;;  %2064 = vmatpush1.bf16.msra.mxu1 %v10835_v34  ;;  %v10954_v6 = vld [vmem:[#allocation27_spill] sm:$0xff] }
 0x4b3   :  { %2024 = vmatprep.subr.bf16.mxu0 %v10836_v35  ;;  %2065 = vmatprep.subr.bf16.mxu1 %v10837_v22  ;;  %v7491_v23 = vpop.eup %7490 }
 0x4b4   :  { %v9013_v19 = vadd.f32 %v1914_v52, %v1913_v37  ;;  %v10953_v52 = vld [vmem:[#allocation26_spill] sm:$0xff]  ;;  %v10956_v37 = vld [vmem:[#allocation29_spill] sm:$0xff] }
 0x4b6   :  { %7492 = vtanh.f32 %v9013_v19  ;;  %2025 = vmatpush1.bf16.msra.mxu0 %v8387_v57  ;;  %2066 = vmatpush1.bf16.msra.mxu1 %v8391_v4 }
 0x4b7   :  { %2026 = vmatprep.subr.bf16.mxu0 %v8393_v9  ;;  %2067 = vmatprep.subr.bf16.mxu1 %v10838_v38 }
 0x4ba   :  { %2027 = vmatpush1.bf16.msra.mxu0 %v8399_v20  ;;  %2068 = vmatpush1.bf16.msra.mxu1 %v8403_v25 }
 0x4bb   :  { %2028 = vmatprep.subr.bf16.mxu0 %v8405_v26  ;;  %2069 = vmatprep.subr.bf16.mxu1 %v8408_v29 }
 0x4be   :  { %2029 = vmatpush1.bf16.msra.mxu0 %v8411_v41  ;;  %2070 = vmatpush1.bf16.msra.mxu1 %v8415_v50 }
 0x4bf   :  { %2030 = vmatprep.subr.bf16.mxu0 %v8417_v53  ;;  %2071 = vmatprep.subr.bf16.mxu1 %v8420_v54 }
 0x4c0   :  { %v7493_v61 = vpop.eup %7492 }
 0x4c1   :  { %v1917_v55 = vmul.f32 %v7493_v61, %v7491_v23  ;;  %v10957_v23 = vld [vmem:[#allocation30_spill] sm:$0xff]  ;;  %v10958_v61 = vld [vmem:[#allocation31_spill] sm:$0xff] }
 0x4c2   :  { %2031 = vmatpush1.bf16.msra.mxu0 %v8423_v10  ;;  %2072 = vmatpush1.bf16.msra.mxu1 %v8427_v1 }
 0x4c3   :  { %v2015_v21 = vpack.c.bf16 %v1917_v55, %v1917_v55  ;;  %2157 = vmatprep.subr.bf16.mxu0 %v8185_v27  ;;  %2198 = vmatprep.subr.bf16.mxu1 %v8187_v28  ;;  %v2873_v16 = vmax.f32 %v1917_v55, 0.0  ;;  %v10959_v55 = vld [vmem:[#allocation32_spill] sm:$0xff] }
 0x4c5   :  { %2049 = vmatmul.mubr.bf16.vlgmr.msra.gmra.mrb[68].mxu0 %v2015_v21  ;;  %2090 = vmatmul.mubr.bf16.vlgmr.msra.gmra.mrb[68].mxu1 %v2015_v21  ;;  %v9033_v31 = vpack.c.bf16 %v2875_v8, %v2873_v16  ;;  %v10960_v21 = vld [vmem:[#allocation33_spill] sm:$0xff]  ;;  %v10961_v16 = vld [vmem:[#allocation34_spill] sm:$0xff]  ;;  %v10962_v8 = vld [vmem:[#allocation35_spill] sm:$0xff] }
 0x4c6   :  { %2158 = vmatpush1.bf16.msra.mxu0 %v8222_v36  ;;  %2199 = vmatpush1.bf16.msra.mxu1 %v8224_v39 }
 0x4c7   :  { %10941 = vst [vmem:[#allocation44_spill] sm:$0xff] %v9033_v31  ;;  %2159 = vmatprep.subr.bf16.mxu0 %v8226_v40  ;;  %2200 = vmatprep.subr.bf16.mxu1 %v8228_v43  ;;  %v10963_v31 = vld [vmem:[#allocation36_spill] sm:$0xff] }
 0x4c8   :  { %2189 = vmatprep.mubr.bf16.mxu0 %v10767_v18  ;;  %2230 = vmatprep.mubr.bf16.mxu1 %v10767_v18 }
 0x4ca   :  { %2160 = vmatpush1.bf16.msra.mxu0 %v8233_v44  ;;  %2201 = vmatpush1.bf16.msra.mxu1 %v8237_v47 }
 0x4cb   :  { %2161 = vmatprep.subr.bf16.mxu0 %v10942_v13  ;;  %2202 = vmatprep.subr.bf16.mxu1 %v10943_v56 }
 0x4ce   :  { %2162 = vmatpush1.bf16.msra.mxu0 %v10944_v7  ;;  %2203 = vmatpush1.bf16.msra.mxu1 %v10945_v5 }
 0x4cf   :  { %2163 = vmatprep.subr.bf16.mxu0 %v10946_v11  ;;  %2204 = vmatprep.subr.bf16.mxu1 %v10947_v14 }
 0x4d2   :  { %2164 = vmatpush1.bf16.msra.mxu0 %v10948_v60  ;;  %2205 = vmatpush1.bf16.msra.mxu1 %v10949_v33  ;;  %v10971_v33 = vld [vmem:[#allocation67_spill] sm:$0xff] }
 0x4d3   :  { %2165 = vmatprep.subr.bf16.mxu0 %v10950_v48  ;;  %2206 = vmatprep.subr.bf16.mxu1 %v10951_v15  ;;  %v10970_v48 = vld [vmem:[#allocation64_spill] sm:$0xff] }
 0x4d6   :  { %2166 = vmatpush1.bf16.msra.mxu0 %v10952_v24  ;;  %2207 = vmatpush1.bf16.msra.mxu1 %v10953_v52  ;;  %v10968_v52 = vld [vmem:[#allocation63_spill] sm:$0xff]  ;;  %v10969_v24 = vld [vmem:[#allocation65_spill] sm:$0xff] }
 0x4d7   :  { %2167 = vmatprep.subr.bf16.mxu0 %v10954_v6  ;;  %2208 = vmatprep.subr.bf16.mxu1 %v10955_v32  ;;  %v10965_v6 = vld [vmem:[#allocation38_spill] sm:$0xff]  ;;  %v10966_v32 = vld [vmem:[#allocation39_spill] sm:$0xff] }
 0x4da   :  { %2168 = vmatpush1.bf16.msra.mxu0 %v10956_v37  ;;  %2209 = vmatpush1.bf16.msra.mxu1 %v10957_v23  ;;  %v10967_v37 = vld [vmem:[#allocation40_spill] sm:$0xff] }
 0x4db   :  { %2169 = vmatprep.subr.bf16.mxu0 %v10958_v61  ;;  %2210 = vmatprep.subr.bf16.mxu1 %v10959_v55 }
 0x4de   :  { %2170 = vmatpush1.bf16.msra.mxu0 %v10960_v21  ;;  %2211 = vmatpush1.bf16.msra.mxu1 %v10961_v16 }
 0x4df   :  { %2171 = vmatprep.subr.bf16.mxu0 %v10962_v8  ;;  %2212 = vmatprep.subr.bf16.mxu1 %v10963_v31 }
 0x4e2   :  { %2172 = vmatpush1.bf16.msra.mxu0 %v10964_v30  ;;  %2213 = vmatpush1.bf16.msra.mxu1 %v10965_v6 }
 0x4e3   :  { %2248 = vmatprep.subr.bf16.mxu0 %v10966_v32  ;;  %2289 = vmatprep.subr.bf16.mxu1 %v10967_v37 }
 0x578   :  { %v1959_v23 = vpop.f32.mrb[64].mxu0  ;;  %v2000_v61 = vpop.f32.mrb[64].mxu1 }
 0x579   :  { %v2007_v55 = vadd.f32 %v1959_v23, %v10968_v52  ;;  %v2009_v21 = vadd.f32 %v2000_v61, %v10969_v24  ;;  %v1961_v15 = vpop.f32.mrb[65].mxu0  ;;  %v2002_v16 = vpop.f32.mrb[65].mxu1  ;;  %v10972_v61 = vld [vmem:[#allocation90_spill] sm:$0xff] }
 0x57a   :  { %v2008_v8 = vadd.f32 %v1961_v15, %v10970_v48  ;;  %v2010_v31 = vadd.f32 %v2002_v16, %v10971_v33  ;;  %v1963_v60 = vpop.f32.mrb[66].mxu0  ;;  %v2004_v30 = vpop.f32.mrb[66].mxu1 }
 0x57b   :  { %v6914_v14 = vmul.f32 -1.442695, %v2007_v55  ;;  %v1964_v6 = vpop.f32.mrb[67].mxu0  ;;  %v2005_v11 = vpop.f32.mrb[67].mxu1  ;;  %v6916_v37 = vmul.f32 -1.442695, %v2009_v21 }
 0x57c   :  { %v6915_v32 = vmul.f32 -1.442695, %v2008_v8  ;;  %v10974_v21 = vld [vmem:[#allocation92_spill] sm:$0xff]  ;;  %v10975_v8 = vld [vmem:[#allocation94_spill] sm:$0xff] }
 0x57d   :  { %7494 = vpow2.f32 %v6914_v14 }
 0x57e   :  { %7496 = vpow2.f32 %v6915_v32 }
 0x57f   :  { %7498 = vtanh.f32 %v2010_v31  ;;  %v10973_v31 = vld [vmem:[#allocation93_spill] sm:$0xff] }
 0x580   :  { %7500 = vpow2.f32 %v6916_v37 }
 0x587   :  { %v7495_v5 = vpop.eup %7494 }
 0x588   :  { %v2111_v7 = vadd.f32 1.0, %v7495_v5  ;;  %v7497_v52 = vpop.eup %7496 }
 0x589   :  { %v2112_v24 = vadd.f32 1.0, %v7497_v52  ;;  %v7499_v48 = vpop.eup %7498 }
 0x58a   :  { %7502 = vrcp.f32 %v2111_v7  ;;  %v7501_v15 = vpop.eup %7500 }
 0x58b   :  { %7504 = vrcp.f32 %v2112_v24  ;;  %v2113_v23 = vadd.f32 1.0, %v7501_v15 }
 0x58d   :  { %7506 = vrcp.f32 %v2113_v23 }
 0x594   :  { %v7503_v33 = vpop.eup %7502 }
 0x595   :  { %v2122_v60 = vmul.f32 %v7503_v33, %v7499_v48  ;;  %v7505_v30 = vpop.eup %7504 }
 0x596   :  { %v2121_v11 = vmul.f32 %v7505_v30, %v8984_v59 }
 0x597   :  { %v7507_v30 = vpop.eup %7506 }
 0x598   :  { %v2050_v6 = vpop.f32.mrb[68].mxu0  ;;  %v2091_v14 = vpop.f32.mrb[68].mxu1  ;;  %v9074_v32 = vadd.f32 %v2122_v60, %v2121_v11 }
 0x599   :  { %v2098_v5 = vadd.f32 %v2050_v6, %v10972_v61  ;;  %v2100_v55 = vadd.f32 %v2091_v14, %v10973_v31  ;;  %v2052_v37 = vpop.f32.mrb[69].mxu0  ;;  %v2093_v7 = vpop.f32.mrb[69].mxu1 }
 0x59a   :  { %v2099_v16 = vadd.f32 %v2052_v37, %v10974_v21  ;;  %v2101_v52 = vadd.f32 %v2093_v7, %v10975_v8  ;;  %v2054_v24 = vpop.f32.mrb[70].mxu0  ;;  %v2095_v48 = vpop.f32.mrb[70].mxu1  ;;  %7508 = vtanh.f32 %v9074_v32 }
 0x59b   :  { %v6917_v59 = vmul.f32 -1.442695, %v2098_v5  ;;  %v2055_v15 = vpop.f32.mrb[71].mxu0  ;;  %v2096_v33 = vpop.f32.mrb[71].mxu1  ;;  %v6919_v6 = vmul.f32 -1.442695, %v2100_v55 }
 0x59c   :  { %v6918_v60 = vmul.f32 -1.442695, %v2099_v16 }
 0x59d   :  { %7510 = vpow2.f32 %v6917_v59 }
 0x59e   :  { %7512 = vpow2.f32 %v6918_v60  ;;  %v10976_v60 = vld [vmem:[#allocation17_spill] sm:$0xff] }
 0x59f   :  { %7514 = vtanh.f32 %v2101_v52 }
 0x5a0   :  { %7516 = vpow2.f32 %v6919_v6  ;;  %v10979_v6 = vld [vmem:[#allocation20_spill] sm:$0xff] }
 0x5a4   :  { %v7509_v11 = vpop.eup %7508 }
 0x5a5   :  { %v9081_v14 = vmul.f32 %v7509_v11, %v7507_v30  ;;  %v10977_v30 = vld [vmem:[#allocation18_spill] sm:$0xff]  ;;  %v10978_v11 = vld [vmem:[#allocation19_spill] sm:$0xff] }
 0x5a7   :  { %v7511_v23 = vpop.eup %7510  ;;  %v2156_v31 = vpack.c.bf16 %v9081_v14, %v9081_v14 }
 0x5a8   :  { %v2135_v61 = vadd.f32 1.0, %v7511_v23  ;;  %v7513_v37 = vpop.eup %7512  ;;  %v10980_v23 = vld [vmem:[#allocation21_spill] sm:$0xff] }
 0x5a9   :  { %v2136_v5 = vadd.f32 1.0, %v7513_v37  ;;  %2190 = vmatmul.mubr.bf16.vlgmr.msra.gmra.mrb[72].mxu0 %v2156_v31  ;;  %2231 = vmatmul.mubr.bf16.vlgmr.msra.gmra.mrb[72].mxu1 %v2156_v31  ;;  %v7515_v55 = vpop.eup %7514  ;;  %v10982_v31 = vld [vmem:[#allocation23_spill] sm:$0xff]  ;;  %v10983_v37 = vld [vmem:[#allocation24_spill] sm:$0xff] }
 0x5aa   :  { %7518 = vrcp.f32 %v2135_v61  ;;  %2249 = vmatpush1.bf16.msra.mxu0 %v8335_v42  ;;  %2290 = vmatpush1.bf16.msra.mxu1 %v8339_v45  ;;  %v7517_v7 = vpop.eup %7516  ;;  %v10981_v61 = vld [vmem:[#allocation22_spill] sm:$0xff] }
 0x5ab   :  { %7520 = vrcp.f32 %v2136_v5  ;;  %2250 = vmatprep.subr.bf16.mxu0 %v8341_v46  ;;  %2291 = vmatprep.subr.bf16.mxu1 %v8344_v49  ;;  %v2137_v52 = vadd.f32 1.0, %v7517_v7  ;;  %v10984_v5 = vld [vmem:[#allocation25_spill] sm:$0xff]  ;;  %v10986_v7 = vld [vmem:[#allocation27_spill] sm:$0xff] }
 0x5ac   :  { %2280 = vmatprep.mubr.bf16.mxu0 %v10767_v18  ;;  %2321 = vmatprep.mubr.bf16.mxu1 %v10767_v18 }
 0x5ad   :  { %7522 = vrcp.f32 %v2137_v52  ;;  %v10990_v52 = vld [vmem:[#allocation31_spill] sm:$0xff] }
 0x5ae   :  { %2251 = vmatpush1.bf16.msra.mxu0 %v8349_v58  ;;  %2292 = vmatpush1.bf16.msra.mxu1 %v8353_v0 }
 0x5af   :  { %2252 = vmatprep.subr.bf16.mxu0 %v8355_v2  ;;  %2293 = vmatprep.subr.bf16.mxu1 %v8358_v3 }
 0x5b2   :  { %2253 = vmatpush1.bf16.msra.mxu0 %v8363_v12  ;;  %2294 = vmatpush1.bf16.msra.mxu1 %v8367_v17 }
 0x5b3   :  { %2254 = vmatprep.subr.bf16.mxu0 %v10832_v63  ;;  %2295 = vmatprep.subr.bf16.mxu1 %v10833_v51 }
 0x5b4   :  { %v7519_v21 = vpop.eup %7518 }
 0x5b5   :  { %v2146_v16 = vmul.f32 %v7519_v21, %v7515_v55  ;;  %v7521_v8 = vpop.eup %7520  ;;  %v10985_v55 = vld [vmem:[#allocation26_spill] sm:$0xff]  ;;  %v10987_v21 = vld [vmem:[#allocation28_spill] sm:$0xff] }
 0x5b6   :  { %v2145_v24 = vmul.f32 %v7521_v8, %v9013_v19  ;;  %2255 = vmatpush1.bf16.msra.mxu0 %v10834_v62  ;;  %2296 = vmatpush1.bf16.msra.mxu1 %v10835_v34  ;;  %v10989_v8 = vld [vmem:[#allocation30_spill] sm:$0xff] }
 0x5b7   :  { %2256 = vmatprep.subr.bf16.mxu0 %v10836_v35  ;;  %2297 = vmatprep.subr.bf16.mxu1 %v10837_v22  ;;  %v7523_v19 = vpop.eup %7522 }
 0x5b8   :  { %v9104_v48 = vadd.f32 %v2146_v16, %v2145_v24  ;;  %v10988_v16 = vld [vmem:[#allocation29_spill] sm:$0xff]  ;;  %v10991_v24 = vld [vmem:[#allocation32_spill] sm:$0xff] }
 0x5ba   :  { %7524 = vtanh.f32 %v9104_v48  ;;  %2257 = vmatpush1.bf16.msra.mxu0 %v8387_v57  ;;  %2298 = vmatpush1.bf16.msra.mxu1 %v8391_v4 }
 0x5bb   :  { %2258 = vmatprep.subr.bf16.mxu0 %v8393_v9  ;;  %2299 = vmatprep.subr.bf16.mxu1 %v10838_v38 }
 0x5be   :  { %2259 = vmatpush1.bf16.msra.mxu0 %v8399_v20  ;;  %2300 = vmatpush1.bf16.msra.mxu1 %v8403_v25 }
 0x5bf   :  { %2260 = vmatprep.subr.bf16.mxu0 %v8405_v26  ;;  %2301 = vmatprep.subr.bf16.mxu1 %v8408_v29 }
 0x5c2   :  { %2261 = vmatpush1.bf16.msra.mxu0 %v8411_v41  ;;  %2302 = vmatpush1.bf16.msra.mxu1 %v8415_v50 }
 0x5c3   :  { %2262 = vmatprep.subr.bf16.mxu0 %v8417_v53  ;;  %2303 = vmatprep.subr.bf16.mxu1 %v8420_v54 }
 0x5c4   :  { %v7525_v59 = vpop.eup %7524 }
 0x5c5   :  { %v9119_v15 = vmul.f32 %v7525_v59, %v7523_v19  ;;  %v10992_v19 = vld [vmem:[#allocation33_spill] sm:$0xff]  ;;  %v10993_v59 = vld [vmem:[#allocation34_spill] sm:$0xff] }
 0x5c6   :  { %2263 = vmatpush1.bf16.msra.mxu0 %v8423_v10  ;;  %2304 = vmatpush1.bf16.msra.mxu1 %v8427_v1 }
 0x5c7   :  { %v2247_v33 = vpack.c.bf16 %v9119_v15, %v9119_v15  ;;  %2389 = vmatprep.subr.bf16.mxu0 %v8185_v27  ;;  %2430 = vmatprep.subr.bf16.mxu1 %v8187_v28 }
 0x5c9   :  { %2281 = vmatmul.mubr.bf16.vlgmr.msra.gmra.mrb[76].mxu0 %v2247_v33  ;;  %2322 = vmatmul.mubr.bf16.vlgmr.msra.gmra.mrb[76].mxu1 %v2247_v33  ;;  %v10994_v33 = vld [vmem:[#allocation35_spill] sm:$0xff] }
 0x5ca   :  { %2390 = vmatpush1.bf16.msra.mxu0 %v8222_v36  ;;  %2431 = vmatpush1.bf16.msra.mxu1 %v8224_v39 }
 0x5cb   :  { %2391 = vmatprep.subr.bf16.mxu0 %v8226_v40  ;;  %2432 = vmatprep.subr.bf16.mxu1 %v8228_v43 }
 0x5cc   :  { %2421 = vmatprep.mubr.bf16.mxu0 %v10767_v18  ;;  %2462 = vmatprep.mubr.bf16.mxu1 %v10767_v18 }
 0x5ce   :  { %2392 = vmatpush1.bf16.msra.mxu0 %v8233_v44  ;;  %2433 = vmatpush1.bf16.msra.mxu1 %v8237_v47 }
 0x5cf   :  { %2393 = vmatprep.subr.bf16.mxu0 %v10942_v13  ;;  %2434 = vmatprep.subr.bf16.mxu1 %v10943_v56 }
 0x5d2   :  { %2394 = vmatpush1.bf16.msra.mxu0 %v10976_v60  ;;  %2435 = vmatpush1.bf16.msra.mxu1 %v10977_v30 }
 0x5d3   :  { %2395 = vmatprep.subr.bf16.mxu0 %v10978_v11  ;;  %2436 = vmatprep.subr.bf16.mxu1 %v10979_v6  ;;  %v11003_v6 = vld [vmem:[#allocation70_spill] sm:$0xff] }
 0x5d6   :  { %2396 = vmatpush1.bf16.msra.mxu0 %v10980_v23  ;;  %2437 = vmatpush1.bf16.msra.mxu1 %v10981_v61  ;;  %v11002_v23 = vld [vmem:[#allocation68_spill] sm:$0xff] }
 0x5d7   :  { %2397 = vmatprep.subr.bf16.mxu0 %v10982_v31  ;;  %2438 = vmatprep.subr.bf16.mxu1 %v10983_v37  ;;  %v11000_v37 = vld [vmem:[#allocation66_spill] sm:$0xff]  ;;  %v11001_v31 = vld [vmem:[#allocation69_spill] sm:$0xff] }
 0x5da   :  { %2398 = vmatpush1.bf16.msra.mxu0 %v10984_v5  ;;  %2439 = vmatpush1.bf16.msra.mxu1 %v10985_v55  ;;  %v10995_v5 = vld [vmem:[#allocation36_spill] sm:$0xff]  ;;  %v10996_v55 = vld [vmem:[#allocation37_spill] sm:$0xff] }
 0x5db   :  { %2399 = vmatprep.subr.bf16.mxu0 %v10986_v7  ;;  %2440 = vmatprep.subr.bf16.mxu1 %v10987_v21  ;;  %v10997_v7 = vld [vmem:[#allocation38_spill] sm:$0xff]  ;;  %v10998_v21 = vld [vmem:[#allocation39_spill] sm:$0xff] }
 0x5de   :  { %2400 = vmatpush1.bf16.msra.mxu0 %v10988_v16  ;;  %2441 = vmatpush1.bf16.msra.mxu1 %v10989_v8  ;;  %v10999_v16 = vld [vmem:[#allocation40_spill] sm:$0xff] }
 0x5df   :  { %2401 = vmatprep.subr.bf16.mxu0 %v10990_v52  ;;  %2442 = vmatprep.subr.bf16.mxu1 %v10991_v24 }
 0x5e2   :  { %2402 = vmatpush1.bf16.msra.mxu0 %v10992_v19  ;;  %2443 = vmatpush1.bf16.msra.mxu1 %v10993_v59 }
 0x5e3   :  { %2403 = vmatprep.subr.bf16.mxu0 %v10994_v33  ;;  %2444 = vmatprep.subr.bf16.mxu1 %v10995_v5 }
 0x5e6   :  { %2404 = vmatpush1.bf16.msra.mxu0 %v10996_v55  ;;  %2445 = vmatpush1.bf16.msra.mxu1 %v10997_v7 }
 0x5e7   :  { %2480 = vmatprep.subr.bf16.mxu0 %v10998_v21  ;;  %2521 = vmatprep.subr.bf16.mxu1 %v10999_v16 }
 0x67c   :  { %v2191_v8 = vpop.f32.mrb[72].mxu0  ;;  %v2232_v52 = vpop.f32.mrb[72].mxu1 }
 0x67d   :  { %v2239_v24 = vadd.f32 %v2191_v8, %v11000_v37  ;;  %v2241_v19 = vadd.f32 %v2232_v52, %v11001_v31  ;;  %v2193_v61 = vpop.f32.mrb[73].mxu0  ;;  %v2234_v59 = vpop.f32.mrb[73].mxu1  ;;  %v11004_v52 = vld [vmem:[#allocation87_spill] sm:$0xff] }
 0x67e   :  { %v2240_v33 = vadd.f32 %v2193_v61, %v11002_v23  ;;  %v2242_v5 = vadd.f32 %v2234_v59, %v11003_v6  ;;  %v2195_v11 = vpop.f32.mrb[74].mxu0  ;;  %v2236_v55 = vpop.f32.mrb[74].mxu1 }
 0x67f   :  { %v6920_v30 = vmul.f32 -1.442695, %v2239_v24  ;;  %v2196_v7 = vpop.f32.mrb[75].mxu0  ;;  %v2237_v60 = vpop.f32.mrb[75].mxu1  ;;  %v6922_v16 = vmul.f32 -1.442695, %v2241_v19 }
 0x680   :  { %v6921_v21 = vmul.f32 -1.442695, %v2240_v33  ;;  %v11006_v19 = vld [vmem:[#allocation88_spill] sm:$0xff]  ;;  %v11007_v33 = vld [vmem:[#allocation91_spill] sm:$0xff] }
 0x681   :  { %7526 = vpow2.f32 %v6920_v30 }
 0x682   :  { %7528 = vpow2.f32 %v6921_v21 }
 0x683   :  { %7530 = vtanh.f32 %v2242_v5  ;;  %v11005_v5 = vld [vmem:[#allocation89_spill] sm:$0xff] }
 0x684   :  { %7532 = vpow2.f32 %v6922_v16 }
 0x68b   :  { %v7527_v56 = vpop.eup %7526 }
 0x68c   :  { %v2343_v13 = vadd.f32 1.0, %v7527_v56  ;;  %v7529_v37 = vpop.eup %7528 }
 0x68d   :  { %v2344_v31 = vadd.f32 1.0, %v7529_v37  ;;  %v7531_v23 = vpop.eup %7530 }
 0x68e   :  { %7534 = vrcp.f32 %v2343_v13  ;;  %v7533_v61 = vpop.eup %7532 }
 0x68f   :  { %7536 = vrcp.f32 %v2344_v31  ;;  %v2345_v8 = vadd.f32 1.0, %v7533_v61 }
 0x691   :  { %7538 = vrcp.f32 %v2345_v8  ;;  %v2872_v8 = vmax.f32 %v9081_v14, 0.0 }
 0x698   :  { %v7535_v6 = vpop.eup %7534 }
 0x699   :  { %v2354_v11 = vmul.f32 %v7535_v6, %v7531_v23  ;;  %v7537_v55 = vpop.eup %7536 }
 0x69a   :  { %v2353_v60 = vmul.f32 %v7537_v55, %v9074_v32 }
 0x69b   :  { %v7539_v55 = vpop.eup %7538 }
 0x69c   :  { %v2282_v7 = vpop.f32.mrb[76].mxu0  ;;  %v2323_v30 = vpop.f32.mrb[76].mxu1  ;;  %v9166_v21 = vadd.f32 %v2354_v11, %v2353_v60 }
 0x69d   :  { %v2330_v56 = vadd.f32 %v2282_v7, %v11004_v52  ;;  %v2332_v24 = vadd.f32 %v2323_v30, %v11005_v5  ;;  %v2284_v16 = vpop.f32.mrb[77].mxu0  ;;  %v2325_v13 = vpop.f32.mrb[77].mxu1 }
 0x69e   :  { %v2331_v59 = vadd.f32 %v2284_v16, %v11006_v19  ;;  %v2333_v37 = vadd.f32 %v2325_v13, %v11007_v33  ;;  %v2286_v31 = vpop.f32.mrb[78].mxu0  ;;  %v2327_v23 = vpop.f32.mrb[78].mxu1  ;;  %7540 = vtanh.f32 %v9166_v21 }
 0x69f   :  { %v6923_v32 = vmul.f32 -1.442695, %v2330_v56  ;;  %v2287_v61 = vpop.f32.mrb[79].mxu0  ;;  %v2328_v6 = vpop.f32.mrb[79].mxu1  ;;  %v6925_v7 = vmul.f32 -1.442695, %v2332_v24 }
 0x6a0   :  { %v6924_v11 = vmul.f32 -1.442695, %v2331_v59 }
 0x6a1   :  { %7542 = vpow2.f32 %v6923_v32 }
 0x6a2   :  { %7544 = vpow2.f32 %v6924_v11 }
 0x6a3   :  { %7546 = vtanh.f32 %v2333_v37 }
 0x6a4   :  { %7548 = vpow2.f32 %v6925_v7  ;;  %v2871_v7 = vmax.f32 %v9119_v15, 0.0  ;;  %v11010_v15 = vld [vmem:[#allocation17_spill] sm:$0xff] }
 0x6a8   :  { %v7541_v60 = vpop.eup %7540 }
 0x6a9   :  { %v2357_v30 = vmul.f32 %v7541_v60, %v7539_v55 }
 0x6ab   :  { %v7543_v52 = vpop.eup %7542  ;;  %v2388_v16 = vpack.c.bf16 %v2357_v30, %v2357_v30  ;;  %v2874_v13 = vmax.f32 %v2357_v30, 0.0 }
 0x6ac   :  { %v2367_v5 = vadd.f32 1.0, %v7543_v52  ;;  %v7545_v19 = vpop.eup %7544  ;;  %v11015_v52 = vld [vmem:[#allocation22_spill] sm:$0xff] }
 0x6ad   :  { %v2368_v56 = vadd.f32 1.0, %v7545_v19  ;;  %2422 = vmatmul.mubr.bf16.vlgmr.msra.gmra.mrb[80].mxu0 %v2388_v16  ;;  %2463 = vmatmul.mubr.bf16.vlgmr.msra.gmra.mrb[80].mxu1 %v2388_v16  ;;  %v9174_v59 = vpack.c.bf16 %v2874_v13, %v2872_v8  ;;  %v7547_v14 = vpop.eup %7546  ;;  %v11016_v8 = vld [vmem:[#allocation23_spill] sm:$0xff]  ;;  %v11021_v13 = vld [vmem:[#allocation28_spill] sm:$0xff]  ;;  %v11022_v19 = vld [vmem:[#allocation29_spill] sm:$0xff] }
 0x6ae   :  { %7550 = vrcp.f32 %v2367_v5  ;;  %2481 = vmatpush1.bf16.msra.mxu0 %v8335_v42  ;;  %2522 = vmatpush1.bf16.msra.mxu1 %v8339_v45  ;;  %v7549_v24 = vpop.eup %7548  ;;  %v11019_v5 = vld [vmem:[#allocation26_spill] sm:$0xff]  ;;  %v11020_v16 = vld [vmem:[#allocation27_spill] sm:$0xff] }
 0x6af   :  { %7552 = vrcp.f32 %v2368_v56  ;;  %2482 = vmatprep.subr.bf16.mxu0 %v8341_v46  ;;  %2523 = vmatprep.subr.bf16.mxu1 %v8344_v49  ;;  %v2369_v23 = vadd.f32 1.0, %v7549_v24  ;;  %v11023_v56 = vld [vmem:[#allocation30_spill] sm:$0xff]  ;;  %v11025_v24 = vld [vmem:[#allocation32_spill] sm:$0xff] }
 0x6b0   :  { %2512 = vmatprep.mubr.bf16.mxu0 %v10767_v18  ;;  %2553 = vmatprep.mubr.bf16.mxu1 %v10767_v18 }
 0x6b1   :  { %7554 = vrcp.f32 %v2369_v23  ;;  %v11029_v23 = vld [vmem:[#allocation36_spill] sm:$0xff] }
 0x6b2   :  { %2483 = vmatpush1.bf16.msra.mxu0 %v8349_v58  ;;  %2524 = vmatpush1.bf16.msra.mxu1 %v8353_v0 }
 0x6b3   :  { %2484 = vmatprep.subr.bf16.mxu0 %v8355_v2  ;;  %2525 = vmatprep.subr.bf16.mxu1 %v8358_v3 }
 0x6b6   :  { %2485 = vmatpush1.bf16.msra.mxu0 %v8363_v12  ;;  %2526 = vmatpush1.bf16.msra.mxu1 %v8367_v17 }
 0x6b7   :  { %2486 = vmatprep.subr.bf16.mxu0 %v10832_v63  ;;  %2527 = vmatprep.subr.bf16.mxu1 %v10833_v51 }
 0x6b8   :  { %v7551_v33 = vpop.eup %7550 }
 0x6b9   :  { %v2378_v37 = vmul.f32 %v7551_v33, %v7547_v14  ;;  %v7553_v31 = vpop.eup %7552  ;;  %v11024_v14 = vld [vmem:[#allocation31_spill] sm:$0xff]  ;;  %v11026_v33 = vld [vmem:[#allocation33_spill] sm:$0xff] }
 0x6ba   :  { %v2377_v32 = vmul.f32 %v7553_v31, %v9104_v48  ;;  %2487 = vmatpush1.bf16.msra.mxu0 %v10834_v62  ;;  %2528 = vmatpush1.bf16.msra.mxu1 %v10835_v34  ;;  %v11028_v31 = vld [vmem:[#allocation35_spill] sm:$0xff] }
 0x6bb   :  { %2488 = vmatprep.subr.bf16.mxu0 %v10836_v35  ;;  %2529 = vmatprep.subr.bf16.mxu1 %v10837_v22  ;;  %v7555_v48 = vpop.eup %7554 }
 0x6bc   :  { %v9195_v61 = vadd.f32 %v2378_v37, %v2377_v32  ;;  %v11027_v37 = vld [vmem:[#allocation34_spill] sm:$0xff]  ;;  %v11030_v32 = vld [vmem:[#allocation37_spill] sm:$0xff] }
 0x6be   :  { %7556 = vtanh.f32 %v9195_v61  ;;  %2489 = vmatpush1.bf16.msra.mxu0 %v8387_v57  ;;  %2530 = vmatpush1.bf16.msra.mxu1 %v8391_v4 }
 0x6bf   :  { %2490 = vmatprep.subr.bf16.mxu0 %v8393_v9  ;;  %2531 = vmatprep.subr.bf16.mxu1 %v10838_v38 }
 0x6c2   :  { %2491 = vmatpush1.bf16.msra.mxu0 %v8399_v20  ;;  %2532 = vmatpush1.bf16.msra.mxu1 %v8403_v25 }
 0x6c3   :  { %2492 = vmatprep.subr.bf16.mxu0 %v8405_v26  ;;  %2533 = vmatprep.subr.bf16.mxu1 %v8408_v29 }
 0x6c6   :  { %2493 = vmatpush1.bf16.msra.mxu0 %v8411_v41  ;;  %2534 = vmatpush1.bf16.msra.mxu1 %v8415_v50 }
 0x6c7   :  { %2494 = vmatprep.subr.bf16.mxu0 %v8417_v53  ;;  %2535 = vmatprep.subr.bf16.mxu1 %v8420_v54 }
 0x6c8   :  { %v7557_v6 = vpop.eup %7556 }
 0x6c9   :  { %v2381_v11 = vmul.f32 %v7557_v6, %v7555_v48  ;;  %v11031_v48 = vld [vmem:[#allocation38_spill] sm:$0xff]  ;;  %v11032_v6 = vld [vmem:[#allocation39_spill] sm:$0xff] }
 0x6ca   :  { %2495 = vmatpush1.bf16.msra.mxu0 %v8423_v10  ;;  %2536 = vmatpush1.bf16.msra.mxu1 %v8427_v1 }
 0x6cb   :  { %v2479_v55 = vpack.c.bf16 %v2381_v11, %v2381_v11  ;;  %2621 = vmatprep.subr.bf16.mxu0 %v8185_v27  ;;  %2662 = vmatprep.subr.bf16.mxu1 %v8187_v28  ;;  %v2869_v60 = vmax.f32 %v2381_v11, 0.0  ;;  %v11008_v27 = vld [vmem:[#allocation15_spill] sm:$0xff]  ;;  %v11009_v28 = vld [vmem:[#allocation16_spill] sm:$0xff] }
 0x6cc   :  { %v11033_v11 = vld [vmem:[#allocation40_spill] sm:$0xff] }
 0x6cd   :  { %2513 = vmatmul.mubr.bf16.vlgmr.msra.gmra.mrb[84].mxu0 %v2479_v55  ;;  %2554 = vmatmul.mubr.bf16.vlgmr.msra.gmra.mrb[84].mxu1 %v2479_v55  ;;  %v9215_v30 = vpack.c.bf16 %v2871_v7, %v2869_v60  ;;  %v11034_v7 = vld [vmem:[#allocation71_spill] sm:$0xff] }
 0x6ce   :  { %2622 = vmatpush1.bf16.msra.mxu0 %v8222_v36  ;;  %2663 = vmatpush1.bf16.msra.mxu1 %v8224_v39  ;;  %v11011_v36 = vld [vmem:[#allocation18_spill] sm:$0xff]  ;;  %v11012_v39 = vld [vmem:[#allocation19_spill] sm:$0xff] }
 0x6cf   :  { %2623 = vmatprep.subr.bf16.mxu0 %v8226_v40  ;;  %2664 = vmatprep.subr.bf16.mxu1 %v8228_v43  ;;  %v11013_v40 = vld [vmem:[#allocation20_spill] sm:$0xff]  ;;  %v11014_v43 = vld [vmem:[#allocation21_spill] sm:$0xff] }
 0x6d0   :  { %2653 = vmatprep.mubr.bf16.mxu0 %v10767_v18  ;;  %2694 = vmatprep.mubr.bf16.mxu1 %v10767_v18 }
 0x6d2   :  { %2624 = vmatpush1.bf16.msra.mxu0 %v8233_v44  ;;  %2665 = vmatpush1.bf16.msra.mxu1 %v8237_v47  ;;  %v11017_v44 = vld [vmem:[#allocation24_spill] sm:$0xff]  ;;  %v11018_v47 = vld [vmem:[#allocation25_spill] sm:$0xff] }
 0x6d3   :  { %2625 = vmatprep.subr.bf16.mxu0 %v11008_v27  ;;  %2666 = vmatprep.subr.bf16.mxu1 %v11009_v28  ;;  %v11035_v28 = vld [vmem:[#allocation73_spill] sm:$0xff] }
 0x6d6   :  { %2626 = vmatpush1.bf16.msra.mxu0 %v11010_v15  ;;  %2667 = vmatpush1.bf16.msra.mxu1 %v11011_v36 }
 0x6d7   :  { %2627 = vmatprep.subr.bf16.mxu0 %v11012_v39  ;;  %2668 = vmatprep.subr.bf16.mxu1 %v11013_v40  ;;  %v11036_v40 = vld [vmem:[#allocation72_spill] sm:$0xff] }
 0x6da   :  { %2628 = vmatpush1.bf16.msra.mxu0 %v11014_v43  ;;  %2669 = vmatpush1.bf16.msra.mxu1 %v11015_v52  ;;  %v11037_v52 = vld [vmem:[#allocation75_spill] sm:$0xff] }
 0x6db   :  { %2629 = vmatprep.subr.bf16.mxu0 %v11016_v8  ;;  %2670 = vmatprep.subr.bf16.mxu1 %v11017_v44 }
 0x6de   :  { %2630 = vmatpush1.bf16.msra.mxu0 %v11018_v47  ;;  %2671 = vmatpush1.bf16.msra.mxu1 %v11019_v5 }
 0x6df   :  { %2631 = vmatprep.subr.bf16.mxu0 %v11020_v16  ;;  %2672 = vmatprep.subr.bf16.mxu1 %v11021_v13 }
 0x6e2   :  { %2632 = vmatpush1.bf16.msra.mxu0 %v11022_v19  ;;  %2673 = vmatpush1.bf16.msra.mxu1 %v11023_v56 }
 0x6e3   :  { %2633 = vmatprep.subr.bf16.mxu0 %v11024_v14  ;;  %2674 = vmatprep.subr.bf16.mxu1 %v11025_v24 }
 0x6e6   :  { %2634 = vmatpush1.bf16.msra.mxu0 %v11026_v33  ;;  %2675 = vmatpush1.bf16.msra.mxu1 %v11027_v37 }
 0x6e7   :  { %2635 = vmatprep.subr.bf16.mxu0 %v11028_v31  ;;  %2676 = vmatprep.subr.bf16.mxu1 %v11029_v23 }
 0x6ea   :  { %2636 = vmatpush1.bf16.msra.mxu0 %v11030_v32  ;;  %2677 = vmatpush1.bf16.msra.mxu1 %v11031_v48 }
 0x6eb   :  { %2712 = vmatprep.subr.bf16.mxu0 %v11032_v6  ;;  %2753 = vmatprep.subr.bf16.mxu1 %v11033_v11 }
 0x780   :  { %v2423_v55 = vpop.f32.mrb[80].mxu0  ;;  %v2464_v60 = vpop.f32.mrb[80].mxu1 }
 0x781   :  { %v2471_v27 = vadd.f32 %v2423_v55, %v11034_v7  ;;  %v2473_v15 = vadd.f32 %v2464_v60, %v11035_v28  ;;  %v2425_v36 = vpop.f32.mrb[81].mxu0  ;;  %v2466_v39 = vpop.f32.mrb[81].mxu1  ;;  %v11038_v28 = vld [vmem:[#allocation82_spill] sm:$0xff] }
 0x782   :  { %v2472_v43 = vadd.f32 %v2425_v36, %v11036_v40  ;;  %v2474_v8 = vadd.f32 %v2466_v39, %v11037_v52  ;;  %v2427_v44 = vpop.f32.mrb[82].mxu0  ;;  %v2468_v47 = vpop.f32.mrb[82].mxu1  ;;  %v11039_v36 = vld [vmem:[#allocation85_spill] sm:$0xff]  ;;  %v11040_v52 = vld [vmem:[#allocation84_spill] sm:$0xff] }
 0x783   :  { %v6926_v5 = vmul.f32 -1.442695, %v2471_v27  ;;  %v2428_v16 = vpop.f32.mrb[83].mxu0  ;;  %v2469_v13 = vpop.f32.mrb[83].mxu1  ;;  %v6928_v56 = vmul.f32 -1.442695, %v2473_v15 }
 0x784   :  { %v6927_v19 = vmul.f32 -1.442695, %v2472_v43  ;;  %v11041_v44 = vld [vmem:[#allocation86_spill] sm:$0xff] }
 0x785   :  { %7558 = vpow2.f32 %v6926_v5 }
 0x786   :  { %7560 = vpow2.f32 %v6927_v19 }
 0x787   :  { %7562 = vtanh.f32 %v2474_v8 }
 0x788   :  { %7564 = vpow2.f32 %v6928_v56 }
 0x78f   :  { %v7559_v14 = vpop.eup %7558 }
 0x790   :  { %v2575_v24 = vadd.f32 1.0, %v7559_v14  ;;  %v7561_v33 = vpop.eup %7560 }
 0x791   :  { %v2576_v37 = vadd.f32 1.0, %v7561_v33  ;;  %v7563_v31 = vpop.eup %7562 }
 0x792   :  { %7566 = vrcp.f32 %v2575_v24  ;;  %v7565_v23 = vpop.eup %7564 }
 0x793   :  { %7568 = vrcp.f32 %v2576_v37  ;;  %v2577_v11 = vadd.f32 1.0, %v7565_v23 }
 0x795   :  { %7570 = vrcp.f32 %v2577_v11 }
 0x79c   :  { %v7567_v32 = vpop.eup %7566 }
 0x79d   :  { %v2586_v48 = vmul.f32 %v7567_v32, %v7563_v31  ;;  %v7569_v6 = vpop.eup %7568 }
 0x79e   :  { %v2585_v55 = vmul.f32 %v7569_v6, %v9166_v21 }
 0x79f   :  { %v7571_v14 = vpop.eup %7570 }
 0x7a0   :  { %v2514_v60 = vpop.f32.mrb[84].mxu0  ;;  %v2555_v7 = vpop.f32.mrb[84].mxu1  ;;  %v9256_v27 = vadd.f32 %v2586_v48, %v2585_v55  ;;  %v2909_v55 = vld [vmem:[#allocation7 + $0xa8] sm:$0xff] }
 0x7a1   :  { %v2562_v15 = vadd.f32 %v2514_v60, %v11038_v28  ;;  %v2564_v39 = vadd.f32 %v2555_v7, %v11039_v36  ;;  %v2516_v40 = vpop.f32.mrb[85].mxu0  ;;  %v2557_v43 = vpop.f32.mrb[85].mxu1  ;;  %v2916_v36 = vld [vmem:[#allocation7 + $0xe0] sm:$0xff] }
 0x7a2   :  { %v2563_v8 = vadd.f32 %v2516_v40, %v11040_v52  ;;  %v2565_v47 = vadd.f32 %v2557_v43, %v11041_v44  ;;  %v2518_v5 = vpop.f32.mrb[86].mxu0  ;;  %v2559_v16 = vpop.f32.mrb[86].mxu1  ;;  %7572 = vtanh.f32 %v9256_v27  ;;  %v2917_v43 = vld [vmem:[#allocation7 + $0xe8] sm:$0xff] }
 0x7a3   :  { %v6929_v21 = vmul.f32 -1.442695, %v2562_v15  ;;  %v2519_v13 = vpop.f32.mrb[87].mxu0  ;;  %v2560_v19 = vpop.f32.mrb[87].mxu1  ;;  %v6931_v33 = vmul.f32 -1.442695, %v2564_v39 }
 0x7a4   :  { %v6930_v56 = vmul.f32 -1.442695, %v2563_v8  ;;  %v2912_v15 = vld [vmem:[#allocation7 + $0xc0] sm:$0xff]  ;;  %v2913_v39 = vld [vmem:[#allocation7 + $0xc8] sm:$0xff] }
 0x7a5   :  { %7574 = vpow2.f32 %v6929_v21  ;;  %v6963_v40 = vcombine.high %v2912_v15, %v2916_v36  ;;  %v6962_v52 = vcombine.low %v2912_v15, %v2916_v36  ;;  %v6964_v8 = vcombine.low %v2913_v39, %v2917_v43  ;;  %v2924_v5 = vld [vmem:[#allocation7 + $0x120] sm:$0xff]  ;;  %v2921_v16 = vld [vmem:[#allocation7 + $0x108] sm:$0xff] }
 0x7a6   :  { %7576 = vpow2.f32 %v6930_v56  ;;  %v6965_v44 = vcombine.high %v2913_v39, %v2917_v43  ;;  %v2925_v13 = vld [vmem:[#allocation7 + $0x128] sm:$0xff]  ;;  %v2972_v15 = vld [vmem:[#allocation7 + $0x2a0] sm:$0xff] }
 0x7a7   :  { %7578 = vtanh.f32 %v2565_v47  ;;  %v2920_v47 = vld [vmem:[#allocation7 + $0x100] sm:$0xff]  ;;  %v6972_v56 = vcombine.low %v2921_v16, %v2925_v13  ;;  %v2969_v36 = vld [vmem:[#allocation7 + $0x288] sm:$0xff] }
 0x7a8   :  { %7580 = vpow2.f32 %v6931_v33  ;;  %v6971_v21 = vcombine.high %v2920_v47, %v2924_v5  ;;  %v6970_v19 = vcombine.low %v2920_v47, %v2924_v5  ;;  %v2932_v33 = vld [vmem:[#allocation7 + $0x160] sm:$0xff]  ;;  %v2977_v5 = vld [vmem:[#allocation7 + $0x2c8] sm:$0xff] }
 0x7a9   :  { %v2980_v47 = vld [vmem:[#allocation7 + $0x2e0] sm:$0xff] }
 0x7ac   :  { %v7573_v24 = vpop.eup %7572 }
 0x7ad   :  { %v9263_v37 = vmul.f32 %v7573_v24, %v7571_v14  ;;  %v6973_v14 = vcombine.high %v2921_v16, %v2925_v13  ;;  %v2928_v24 = vld [vmem:[#allocation7 + $0x140] sm:$0xff] }
 0x7af   :  { %v7575_v31 = vpop.eup %7574  ;;  %v2620_v32 = vpack.c.bf16 %v9263_v37, %v9263_v37 }
 0x7b0   :  { %v2599_v23 = vadd.f32 1.0, %v7575_v31  ;;  %v7577_v48 = vpop.eup %7576  ;;  %v2929_v31 = vld [vmem:[#allocation7 + $0x148] sm:$0xff] }
 0x7b1   :  { %v2600_v6 = vadd.f32 1.0, %v7577_v48  ;;  %2654 = vmatmul.mubr.bf16.vlgmr.msra.gmra.mrb[88].mxu0 %v2620_v32  ;;  %2695 = vmatmul.mubr.bf16.vlgmr.msra.gmra.mrb[88].mxu1 %v2620_v32  ;;  %v2933_v32 = vld [vmem:[#allocation7 + $0x168] sm:$0xff]  ;;  %v6978_v48 = vcombine.low %v2928_v24, %v2932_v33 }
 0x7b2   :  { %7582 = vrcp.f32 %v2599_v23  ;;  %2713 = vmatpush1.bf16.msra.mxu0 %v8335_v42  ;;  %2754 = vmatpush1.bf16.msra.mxu1 %v8339_v45  ;;  %v7579_v42 = vpop.eup %7578  ;;  %v6979_v23 = vcombine.high %v2928_v24, %v2932_v33  ;;  %v2988_v24 = vld [vmem:[#allocation7 + $0x320] sm:$0xff]  ;;  %v2985_v33 = vld [vmem:[#allocation7 + $0x308] sm:$0xff] }
 0x7b3   :  { %7584 = vrcp.f32 %v2600_v6  ;;  %2714 = vmatprep.subr.bf16.mxu0 %v8341_v46  ;;  %2755 = vmatprep.subr.bf16.mxu1 %v8344_v49  ;;  %v7581_v11 = vpop.eup %7580  ;;  %v6980_v6 = vcombine.low %v2929_v31, %v2933_v32 }
 0x7b4   :  { %2744 = vmatprep.mubr.bf16.mxu0 %v10767_v18  ;;  %2785 = vmatprep.mubr.bf16.mxu1 %v10767_v18 }
 0x7b6   :  { %2715 = vmatpush1.bf16.msra.mxu0 %v8349_v58  ;;  %2756 = vmatpush1.bf16.msra.mxu1 %v8353_v0  ;;  %v2601_v58 = vadd.f32 1.0, %v7581_v11  ;;  %v2936_v11 = vld [vmem:[#allocation7 + $0x180] sm:$0xff] }
 0x7b7   :  { %2716 = vmatprep.subr.bf16.mxu0 %v8355_v2  ;;  %2757 = vmatprep.subr.bf16.mxu1 %v8358_v3 }
 0x7b8   :  { %7586 = vrcp.f32 %v2601_v58  ;;  %v2941_v58 = vld [vmem:[#allocation7 + $0x1a8] sm:$0xff] }
 0x7ba   :  { %2717 = vmatpush1.bf16.msra.mxu0 %v8363_v12  ;;  %2758 = vmatpush1.bf16.msra.mxu1 %v8367_v17 }
 0x7bb   :  { %2718 = vmatprep.subr.bf16.mxu0 %v10832_v63  ;;  %2759 = vmatprep.subr.bf16.mxu1 %v10833_v51  ;;  %v2901_v63 = vld [vmem:[#allocation7 + $0x68] sm:$0xff] }
 0x7bc   :  { %v7583_v45 = vpop.eup %7582 }
 0x7bd   :  { %v2610_v46 = vmul.f32 %v7583_v45, %v7579_v42  ;;  %v7585_v49 = vpop.eup %7584  ;;  %v6981_v42 = vcombine.high %v2929_v31, %v2933_v32  ;;  %v2940_v45 = vld [vmem:[#allocation7 + $0x1a0] sm:$0xff] }
 0x7be   :  { %v2609_v0 = vmul.f32 %v7585_v49, %v9195_v61  ;;  %2719 = vmatpush1.bf16.msra.mxu0 %v10834_v62  ;;  %2760 = vmatpush1.bf16.msra.mxu1 %v10835_v34  ;;  %v6987_v49 = vcombine.high %v2936_v11, %v2940_v45 }
 0x7bf   :  { %2720 = vmatprep.subr.bf16.mxu0 %v10836_v35  ;;  %2761 = vmatprep.subr.bf16.mxu1 %v10837_v22  ;;  %v2904_v35 = vld [vmem:[#allocation7 + $0x80] sm:$0xff] }
 0x7c0   :  { %v9286_v2 = vadd.f32 %v2610_v46, %v2609_v0  ;;  %v2908_v22 = vld [vmem:[#allocation7 + $0xa0] sm:$0xff]  ;;  %v2937_v46 = vld [vmem:[#allocation7 + $0x188] sm:$0xff]  ;;  %v6986_v0 = vcombine.low %v2936_v11, %v2940_v45 }
 0x7c1   :  { %v6955_v61 = vcombine.high %v2904_v35, %v2908_v22  ;;  %v6954_v60 = vcombine.low %v2904_v35, %v2908_v22  ;;  %v2964_v35 = vld [vmem:[#allocation7 + $0x260] sm:$0xff]  ;;  %v2961_v22 = vld [vmem:[#allocation7 + $0x248] sm:$0xff] }
 0x7c2   :  { %7588 = vtanh.f32 %v9286_v2  ;;  %2721 = vmatpush1.bf16.msra.mxu0 %v8387_v57  ;;  %2762 = vmatpush1.bf16.msra.mxu1 %v8391_v4  ;;  %v7587_v3 = vpop.eup %7586  ;;  %v2888_v4 = vld [vmem:[#allocation7] sm:$0xff]  ;;  %v2993_v45 = vld [vmem:[#allocation7 + $0x348] sm:$0xff] }
 0x7c3   :  { %2722 = vmatprep.subr.bf16.mxu0 %v8393_v9  ;;  %2763 = vmatprep.subr.bf16.mxu1 %v10838_v38  ;;  %v2892_v9 = vld [vmem:[#allocation7 + $0x20] sm:$0xff]  ;;  %v2905_v38 = vld [vmem:[#allocation7 + $0x88] sm:$0xff] }
 0x7c4   :  { %v6956_v7 = vcombine.low %v2905_v38, %v2909_v55  ;;  %v6957_v28 = vcombine.high %v2905_v38, %v2909_v55  ;;  %v2996_v11 = vld [vmem:[#allocation7 + $0x360] sm:$0xff] }
 0x7c6   :  { %2723 = vmatpush1.bf16.msra.mxu0 %v8399_v20  ;;  %2764 = vmatpush1.bf16.msra.mxu1 %v8403_v25  ;;  %v2889_v20 = vld [vmem:[#allocation7 + $0x8] sm:$0xff]  ;;  %v6939_v25 = vcombine.high %v2888_v4, %v2892_v9 }
 0x7c7   :  { %2724 = vmatprep.subr.bf16.mxu0 %v8405_v26  ;;  %2765 = vmatprep.subr.bf16.mxu1 %v8408_v29  ;;  %v2893_v26 = vld [vmem:[#allocation7 + $0x28] sm:$0xff]  ;;  %v6938_v29 = vcombine.low %v2888_v4, %v2892_v9  ;;  %v2948_v4 = vld [vmem:[#allocation7 + $0x1e0] sm:$0xff] }
 0x7c8   :  { %v2945_v9 = vld [vmem:[#allocation7 + $0x1c8] sm:$0xff] }
 0x7ca   :  { %2725 = vmatpush1.bf16.msra.mxu0 %v8411_v41  ;;  %2766 = vmatpush1.bf16.msra.mxu1 %v8415_v50  ;;  %v6940_v41 = vcombine.low %v2889_v20, %v2893_v26  ;;  %v6941_v50 = vcombine.high %v2889_v20, %v2893_v26 }
 0x7cb   :  { %2726 = vmatprep.subr.bf16.mxu0 %v8417_v53  ;;  %2767 = vmatprep.subr.bf16.mxu1 %v8420_v54  ;;  %v2896_v53 = vld [vmem:[#allocation7 + $0x40] sm:$0xff]  ;;  %v2897_v54 = vld [vmem:[#allocation7 + $0x48] sm:$0xff] }
 0x7cc   :  { %v7589_v12 = vpop.eup %7588  ;;  %v6948_v62 = vcombine.low %v2897_v54, %v2901_v63  ;;  %v6949_v34 = vcombine.high %v2897_v54, %v2901_v63 }
 0x7cd   :  { %v9301_v17 = vmul.f32 %v7589_v12, %v7587_v3  ;;  %v6988_v3 = vcombine.low %v2937_v46, %v2941_v58  ;;  %v6989_v12 = vcombine.high %v2937_v46, %v2941_v58  ;;  %v3000_v58 = vld [vmem:[#allocation7 + $0x380] sm:$0xff] }
 0x7ce   :  { %2727 = vmatpush1.bf16.msra.mxu0 %v8423_v10  ;;  %2768 = vmatpush1.bf16.msra.mxu1 %v8427_v1  ;;  %v2900_v10 = vld [vmem:[#allocation7 + $0x60] sm:$0xff] }
 0x7cf   :  { %v2711_v57 = vpack.c.bf16 %v9301_v17, %v9301_v17  ;;  %3698 = vmatprep.subr.bf16.mxu0 %v6939_v25  ;;  %3771 = vmatprep.subr.bf16.mxu1 %v6941_v50  ;;  %v6947_v1 = vcombine.high %v2896_v53, %v2900_v10  ;;  %v6946_v51 = vcombine.low %v2896_v53, %v2900_v10  ;;  %v2949_v25 = vld [vmem:[#allocation7 + $0x1e8] sm:$0xff]  ;;  %v2952_v50 = vld [vmem:[#allocation7 + $0x200] sm:$0xff] }
 0x7d0   :  { %v2956_v53 = vld [vmem:[#allocation7 + $0x220] sm:$0xff]  ;;  %v2953_v10 = vld [vmem:[#allocation7 + $0x208] sm:$0xff] }
 0x7d1   :  { %2745 = vmatmul.mubr.bf16.vlgmr.msra.gmra.mrb[92].mxu0 %v2711_v57  ;;  %2786 = vmatmul.mubr.bf16.vlgmr.msra.gmra.mrb[92].mxu1 %v2711_v57  ;;  %v2944_v57 = vld [vmem:[#allocation7 + $0x1c0] sm:$0xff]  ;;  %v7003_v54 = vcombine.high %v2952_v50, %v2956_v53  ;;  %v7002_v63 = vcombine.low %v2952_v50, %v2956_v53  ;;  %v3013_v50 = vld [vmem:[#allocation7 + $0x3e8] sm:$0xff] }
 0x7d2   :  { %3699 = vmatpush1.bf16.msra.mxu0 %v6938_v29  ;;  %3772 = vmatpush1.bf16.msra.mxu1 %v6940_v41  ;;  %v6995_v20 = vcombine.high %v2944_v57, %v2948_v4  ;;  %v6994_v26 = vcombine.low %v2944_v57, %v2948_v4  ;;  %v6996_v29 = vcombine.low %v2945_v9, %v2949_v25  ;;  %v3001_v57 = vld [vmem:[#allocation7 + $0x388] sm:$0xff] }
 0x7d3   :  { %3700 = vmatprep.subr.bf16.mxu0 %v6947_v1  ;;  %3773 = vmatprep.subr.bf16.mxu1 %v6949_v34  ;;  %v6997_v41 = vcombine.high %v2945_v9, %v2949_v25  ;;  %v2957_v1 = vld [vmem:[#allocation7 + $0x228] sm:$0xff]  ;;  %v2960_v34 = vld [vmem:[#allocation7 + $0x240] sm:$0xff] }
 0x7d4   :  { %v7011_v38 = vcombine.high %v2960_v34, %v2964_v35  ;;  %v7010_v55 = vcombine.low %v2960_v34, %v2964_v35  ;;  %v3005_v4 = vld [vmem:[#allocation7 + $0x3a8] sm:$0xff]  ;;  %v9309_v34 = vld [vmem:[#allocation7 + $0x30] sm:$0xff]  ;;  %v9311_v35 = vld [vmem:[#allocation7 + $0x18] sm:$0xff] }
 0x7d5   :  { %v7053_v25 = vcombine.high %v3001_v57, %v3005_v4 }
 0x7d6   :  { %3701 = vmatpush1.bf16.msra.mxu0 %v6946_v51  ;;  %3774 = vmatpush1.bf16.msra.mxu1 %v6948_v62  ;;  %v7004_v51 = vcombine.low %v2953_v10, %v2957_v1  ;;  %v7005_v62 = vcombine.high %v2953_v10, %v2957_v1  ;;  %v7052_v10 = vcombine.low %v3001_v57, %v3005_v4  ;;  %v11047_v4 = vld [vmem:[#allocation81_spill] sm:$0xff] }
 0x7d7   :  { %3702 = vmatprep.subr.bf16.mxu0 %v6955_v61  ;;  %3775 = vmatprep.subr.bf16.mxu1 %v6957_v28  ;;  %v2965_v61 = vld [vmem:[#allocation7 + $0x268] sm:$0xff]  ;;  %v2968_v28 = vld [vmem:[#allocation7 + $0x280] sm:$0xff] }
 0x7d8   :  { %v7019_v39 = vcombine.high %v2968_v28, %v2972_v15  ;;  %v7018_v43 = vcombine.low %v2968_v28, %v2972_v15  ;;  %v11042_v15 = vld [vmem:[#allocation74_spill] sm:$0xff] }
 0x7da   :  { %3703 = vmatpush1.bf16.msra.mxu0 %v6954_v60  ;;  %3776 = vmatpush1.bf16.msra.mxu1 %v6956_v7  ;;  %v7012_v60 = vcombine.low %v2961_v22, %v2965_v61  ;;  %v7013_v7 = vcombine.high %v2961_v22, %v2965_v61 }
 0x7db   :  { %3704 = vmatprep.subr.bf16.mxu0 %v6963_v40  ;;  %3777 = vmatprep.subr.bf16.mxu1 %v6965_v44  ;;  %v2973_v40 = vld [vmem:[#allocation7 + $0x2a8] sm:$0xff]  ;;  %v2976_v44 = vld [vmem:[#allocation7 + $0x2c0] sm:$0xff] }
 0x7dc   :  { %v7027_v16 = vcombine.high %v2976_v44, %v2980_v47  ;;  %v7026_v13 = vcombine.low %v2976_v44, %v2980_v47  ;;  %v11045_v47 = vld [vmem:[#allocation78_spill] sm:$0xff] }
 0x7de   :  { %3705 = vmatpush1.bf16.msra.mxu0 %v6962_v52  ;;  %3778 = vmatpush1.bf16.msra.mxu1 %v6964_v8  ;;  %v7020_v52 = vcombine.low %v2969_v36, %v2973_v40  ;;  %v7021_v8 = vcombine.high %v2969_v36, %v2973_v40 }
 0x7df   :  { %3706 = vmatprep.subr.bf16.mxu0 %v6971_v21  ;;  %3779 = vmatprep.subr.bf16.mxu1 %v6973_v14  ;;  %v2981_v21 = vld [vmem:[#allocation7 + $0x2e8] sm:$0xff]  ;;  %v2984_v14 = vld [vmem:[#allocation7 + $0x300] sm:$0xff] }
 0x7e0   :  { %v7035_v31 = vcombine.high %v2984_v14, %v2988_v24  ;;  %v7034_v32 = vcombine.low %v2984_v14, %v2988_v24 }
 0x7e2   :  { %3707 = vmatpush1.bf16.msra.mxu0 %v6970_v19  ;;  %3780 = vmatpush1.bf16.msra.mxu1 %v6972_v56  ;;  %v7028_v19 = vcombine.low %v2977_v5, %v2981_v21  ;;  %v7029_v56 = vcombine.high %v2977_v5, %v2981_v21 }
 0x7e3   :  { %3708 = vmatprep.subr.bf16.mxu0 %v6979_v23  ;;  %3781 = vmatprep.subr.bf16.mxu1 %v6981_v42  ;;  %v2989_v23 = vld [vmem:[#allocation7 + $0x328] sm:$0xff]  ;;  %v2992_v42 = vld [vmem:[#allocation7 + $0x340] sm:$0xff] }
 0x7e4   :  { %v7043_v46 = vcombine.high %v2992_v42, %v2996_v11 }
 0x7e6   :  { %3709 = vmatpush1.bf16.msra.mxu0 %v6978_v48  ;;  %3782 = vmatpush1.bf16.msra.mxu1 %v6980_v6  ;;  %v7036_v48 = vcombine.low %v2985_v33, %v2989_v23  ;;  %v7037_v6 = vcombine.high %v2985_v33, %v2989_v23 }
 0x7e7   :  { %3710 = vmatprep.subr.bf16.mxu0 %v6987_v49  ;;  %3783 = vmatprep.subr.bf16.mxu1 %v6989_v12  ;;  %v2997_v49 = vld [vmem:[#allocation7 + $0x368] sm:$0xff] }
 0x7e8   :  { %v7045_v12 = vcombine.high %v2993_v45, %v2997_v49  ;;  %v7044_v9 = vcombine.low %v2993_v45, %v2997_v49 }
 0x7ea   :  { %3711 = vmatpush1.bf16.msra.mxu0 %v6986_v0  ;;  %3784 = vmatpush1.bf16.msra.mxu1 %v6988_v3  ;;  %v3004_v0 = vld [vmem:[#allocation7 + $0x3a0] sm:$0xff]  ;;  %v7042_v3 = vcombine.low %v2992_v42, %v2996_v11 }
 0x7eb   :  { %3712 = vmatprep.subr.bf16.mxu0 %v6995_v20  ;;  %3785 = vmatprep.subr.bf16.mxu1 %v6997_v41  ;;  %v7051_v20 = vcombine.high %v3000_v58, %v3004_v0  ;;  %v3009_v41 = vld [vmem:[#allocation7 + $0x3c8] sm:$0xff]  ;;  %v7050_v53 = vcombine.low %v3000_v58, %v3004_v0 }
 0x7ec   :  { %v7061_v1 = vcombine.high %v3009_v41, %v3013_v50 }
 0x7ee   :  { %3713 = vmatpush1.bf16.msra.mxu0 %v6994_v26  ;;  %3786 = vmatpush1.bf16.msra.mxu1 %v6996_v29  ;;  %v3008_v26 = vld [vmem:[#allocation7 + $0x3c0] sm:$0xff] }
 0x7ef   :  { %3714 = vmatprep.subr.bf16.mxu0 %v7003_v54  ;;  %3787 = vmatprep.subr.bf16.mxu1 %v7005_v62  ;;  %v3012_v29 = vld [vmem:[#allocation7 + $0x3e0] sm:$0xff]  ;;  %v9307_v62 = vld [vmem:[#allocation7 + $0x10] sm:$0xff] }
 0x7f0   :  { %v7059_v54 = vcombine.high %v3008_v26, %v3012_v29  ;;  %v6943_v22 = vcombine.high %v9307_v62, %v9309_v34  ;;  %v6942_v61 = vcombine.low %v9307_v62, %v9309_v34 }
 0x7f2   :  { %3715 = vmatpush1.bf16.msra.mxu0 %v7002_v63  ;;  %3788 = vmatpush1.bf16.msra.mxu1 %v7004_v51  ;;  %v7058_v63 = vcombine.low %v3008_v26, %v3012_v29  ;;  %v7060_v51 = vcombine.low %v3009_v41, %v3013_v50  ;;  %v11048_v26 = vld [vmem:[#allocation80_spill] sm:$0xff]  ;;  %v11049_v41 = vld [vmem:[#allocation83_spill] sm:$0xff] }
 0x7f3   :  { %3716 = vmatprep.subr.bf16.mxu0 %v7011_v38  ;;  %3789 = vmatprep.subr.bf16.mxu1 %v7013_v7  ;;  %v9315_v38 = vld [vmem:[#allocation7 + $0x38] sm:$0xff] }
 0x7f6   :  { %3717 = vmatpush1.bf16.msra.mxu0 %v7010_v55  ;;  %3790 = vmatpush1.bf16.msra.mxu1 %v7012_v60  ;;  %v6944_v55 = vcombine.low %v9311_v35, %v9315_v38  ;;  %v6945_v60 = vcombine.high %v9311_v35, %v9315_v38  ;;  %v2922_v35 = vld [vmem:[#allocation7 + $0x110] sm:$0xff] }
 0x7f7   :  { %3718 = vmatprep.subr.bf16.mxu0 %v7019_v39  ;;  %3791 = vmatprep.subr.bf16.mxu1 %v7021_v8  ;;  %v11043_v39 = vld [vmem:[#allocation77_spill] sm:$0xff]  ;;  %v11044_v8 = vld [vmem:[#allocation76_spill] sm:$0xff] }
 0x7fa   :  { %3719 = vmatpush1.bf16.msra.mxu0 %v7018_v43  ;;  %3792 = vmatpush1.bf16.msra.mxu1 %v7020_v52 }
 0x7fb   :  { %3720 = vmatprep.subr.bf16.mxu0 %v7027_v16  ;;  %3793 = vmatprep.subr.bf16.mxu1 %v7029_v56 }
 0x7fe   :  { %3721 = vmatpush1.bf16.msra.mxu0 %v7026_v13  ;;  %3794 = vmatpush1.bf16.msra.mxu1 %v7028_v19 }
 0x7ff   :  { %3722 = vmatprep.subr.bf16.mxu0 %v7035_v31  ;;  %3795 = vmatprep.subr.bf16.mxu1 %v7037_v6 }
 0x802   :  { %3723 = vmatpush1.bf16.msra.mxu0 %v7034_v32  ;;  %3796 = vmatpush1.bf16.msra.mxu1 %v7036_v48 }
 0x803   :  { %3724 = vmatprep.subr.bf16.mxu0 %v7043_v46  ;;  %3797 = vmatprep.subr.bf16.mxu1 %v7045_v12  ;;  %v11046_v12 = vld [vmem:[#allocation79_spill] sm:$0xff] }
 0x806   :  { %3725 = vmatpush1.bf16.msra.mxu0 %v7042_v3  ;;  %3798 = vmatpush1.bf16.msra.mxu1 %v7044_v9 }
 0x807   :  { %3726 = vmatprep.subr.bf16.mxu0 %v7051_v20  ;;  %3799 = vmatprep.subr.bf16.mxu1 %v7053_v25 }
 0x80a   :  { %3727 = vmatpush1.bf16.msra.mxu0 %v7050_v53  ;;  %3800 = vmatpush1.bf16.msra.mxu1 %v7052_v10 }
 0x80b   :  { %3728 = vmatprep.subr.bf16.mxu0 %v7059_v54  ;;  %3801 = vmatprep.subr.bf16.mxu1 %v7061_v1 }
 0x80e   :  { %3729 = vmatpush1.bf16.msra.mxu0 %v7058_v63  ;;  %3802 = vmatpush1.bf16.msra.mxu1 %v7060_v51 }
 0x80f   :  { %3844 = vmatprep.subr.bf16.mxu0 %v6943_v22  ;;  %3917 = vmatprep.subr.bf16.mxu1 %v6945_v60 }
 0x884   :  { %v2655_v7 = vpop.f32.mrb[88].mxu0  ;;  %v2696_v28 = vpop.f32.mrb[88].mxu1 }
 0x885   :  { %v2703_v36 = vadd.f32 %v2655_v7, %v11042_v15  ;;  %v2705_v40 = vadd.f32 %v2696_v28, %v11043_v39  ;;  %v2657_v43 = vpop.f32.mrb[89].mxu0  ;;  %v2698_v52 = vpop.f32.mrb[89].mxu1 }
 0x886   :  { %v2704_v44 = vadd.f32 %v2657_v43, %v11044_v8  ;;  %v2706_v5 = vadd.f32 %v2698_v52, %v11045_v47  ;;  %v2659_v16 = vpop.f32.mrb[90].mxu0  ;;  %v2700_v21 = vpop.f32.mrb[90].mxu1 }
 0x887   :  { %v6932_v13 = vmul.f32 -1.442695, %v2703_v36  ;;  %v2660_v19 = vpop.f32.mrb[91].mxu0  ;;  %v2701_v56 = vpop.f32.mrb[91].mxu1  ;;  %v6934_v24 = vmul.f32 -1.442695, %v2705_v40 }
 0x888   :  { %v6933_v14 = vmul.f32 -1.442695, %v2704_v44  ;;  %v2876_v36 = vmax.f32 %v9263_v37, 0.0 }
 0x889   :  { %7590 = vpow2.f32 %v6932_v13 }
 0x88a   :  { %7592 = vpow2.f32 %v6933_v14 }
 0x88b   :  { %7594 = vtanh.f32 %v2706_v5 }
 0x88c   :  { %7596 = vpow2.f32 %v6934_v24 }
 0x893   :  { %v7591_v33 = vpop.eup %7590 }
 0x894   :  { %v2807_v31 = vadd.f32 1.0, %v7591_v33  ;;  %v7593_v23 = vpop.eup %7592  ;;  %v2867_v33 = vmax.f32 %v9301_v17, 0.0  ;;  %v2907_v17 = vld [vmem:[#allocation7 + $0x98] sm:$0xff] }
 0x895   :  { %v2808_v32 = vadd.f32 1.0, %v7593_v23  ;;  %v7595_v48 = vpop.eup %7594  ;;  %v2899_v23 = vld [vmem:[#allocation7 + $0x58] sm:$0xff] }
 0x896   :  { %7598 = vrcp.f32 %v2807_v31  ;;  %v7597_v6 = vpop.eup %7596  ;;  %v2898_v31 = vld [vmem:[#allocation7 + $0x50] sm:$0xff] }
 0x897   :  { %7600 = vrcp.f32 %v2808_v32  ;;  %v2809_v46 = vadd.f32 1.0, %v7597_v6  ;;  %v2903_v32 = vld [vmem:[#allocation7 + $0x78] sm:$0xff]  ;;  %v2906_v6 = vld [vmem:[#allocation7 + $0x90] sm:$0xff] }
 0x899   :  { %7602 = vrcp.f32 %v2809_v46  ;;  %v2911_v46 = vld [vmem:[#allocation7 + $0xb8] sm:$0xff] }
 0x89a   :  { %v6960_v34 = vcombine.low %v2907_v17, %v2911_v46 }
 0x8a0   :  { %v7599_v42 = vpop.eup %7598 }
 0x8a1   :  { %v2818_v11 = vmul.f32 %v7599_v42, %v7595_v48  ;;  %v7601_v45 = vpop.eup %7600 }
 0x8a2   :  { %v2817_v49 = vmul.f32 %v7601_v45, %v9256_v27  ;;  %v2910_v45 = vld [vmem:[#allocation7 + $0xb0] sm:$0xff] }
 0x8a3   :  { %v7603_v51 = vpop.eup %7602  ;;  %v6958_v62 = vcombine.low %v2906_v6, %v2910_v45 }
 0x8a4   :  { %v2746_v58 = vpop.f32.mrb[92].mxu0  ;;  %v2787_v0 = vpop.f32.mrb[92].mxu1  ;;  %v9328_v3 = vadd.f32 %v2818_v11, %v2817_v49  ;;  %v6953_v11 = vcombine.high %v2899_v23, %v2903_v32  ;;  %v11051_v49 = vld [vmem:[#allocation41_spill] sm:$0xff] }
 0x8a5   :  { %v2794_v57 = vadd.f32 %v2746_v58, %v11046_v12  ;;  %v2796_v9 = vadd.f32 %v2787_v0, %v11047_v4  ;;  %v2748_v20 = vpop.f32.mrb[93].mxu0  ;;  %v2789_v25 = vpop.f32.mrb[93].mxu1  ;;  %v6952_v0 = vcombine.low %v2899_v23, %v2903_v32  ;;  %v6959_v12 = vcombine.high %v2906_v6, %v2910_v45  ;;  %v2914_v4 = vld [vmem:[#allocation7 + $0xd0] sm:$0xff] }
 0x8a6   :  { %v2795_v29 = vadd.f32 %v2748_v20, %v11048_v26  ;;  %v2797_v50 = vadd.f32 %v2789_v25, %v11049_v41  ;;  %v2750_v53 = vpop.f32.mrb[94].mxu0  ;;  %v2791_v10 = vpop.f32.mrb[94].mxu1  ;;  %7604 = vtanh.f32 %v9328_v3  ;;  %v2915_v20 = vld [vmem:[#allocation7 + $0xd8] sm:$0xff]  ;;  %v11052_v41 = vld [vmem:[#allocation43_spill] sm:$0xff]  ;;  %v2958_v6 = vld [vmem:[#allocation7 + $0x230] sm:$0xff] }
 0x8a7   :  { %v6935_v27 = vmul.f32 -1.442695, %v2794_v57  ;;  %v2751_v54 = vpop.f32.mrb[95].mxu0  ;;  %v2792_v1 = vpop.f32.mrb[95].mxu1  ;;  %v6937_v60 = vmul.f32 -1.442695, %v2796_v9  ;;  %v6961_v57 = vcombine.high %v2907_v17, %v2911_v46 }
 0x8a8   :  { %v6936_v63 = vmul.f32 -1.442695, %v2795_v29  ;;  %v2918_v9 = vld [vmem:[#allocation7 + $0xf0] sm:$0xff]  ;;  %v2919_v25 = vld [vmem:[#allocation7 + $0xf8] sm:$0xff]  ;;  %v11053_v10 = vld [vmem:[#allocation44_spill] sm:$0xff] }
 0x8a9   :  { %7606 = vpow2.f32 %v6935_v27  ;;  %v6967_v38 = vcombine.high %v2914_v4, %v2918_v9  ;;  %v2923_v26 = vld [vmem:[#allocation7 + $0x118] sm:$0xff]  ;;  %v6968_v53 = vcombine.low %v2915_v20, %v2919_v25  ;;  %v2930_v1 = vld [vmem:[#allocation7 + $0x150] sm:$0xff] }
 0x8aa   :  { %7608 = vpow2.f32 %v6936_v63  ;;  %v2927_v29 = vld [vmem:[#allocation7 + $0x138] sm:$0xff]  ;;  %v2934_v63 = vld [vmem:[#allocation7 + $0x170] sm:$0xff] }
 0x8ab   :  { %7610 = vtanh.f32 %v2797_v50  ;;  %v6966_v50 = vcombine.low %v2914_v4, %v2918_v9  ;;  %v6977_v54 = vcombine.high %v2923_v26, %v2927_v29  ;;  %v2967_v4 = vld [vmem:[#allocation7 + $0x278] sm:$0xff] }
 0x8ac   :  { %7612 = vpow2.f32 %v6937_v60 }
 0x8b0   :  { %v7605_v22 = vpop.eup %7604 }
 0x8b1   :  { %v9335_v7 = vmul.f32 %v7605_v22, %v7603_v51  ;;  %v2931_v51 = vld [vmem:[#allocation7 + $0x158] sm:$0xff] }
 0x8b2   :  { %v2935_v22 = vld [vmem:[#allocation7 + $0x178] sm:$0xff] }
 0x8b3   :  { %v7607_v28 = vpop.eup %7606  ;;  %v2878_v39 = vmax.f32 %v9335_v7, 0.0  ;;  %6294 = vst [vmem:[%s10572_s14] sm:$0xff] %v9335_v7 }
 0x8b4   :  { %v2831_v15 = vadd.f32 1.0, %v7607_v28  ;;  %v7609_v40 = vpop.eup %7608  ;;  %v6976_v28 = vcombine.low %v2923_v26, %v2927_v29 }
 0x8b5   :  { %v2832_v43 = vadd.f32 1.0, %v7609_v40  ;;  %v9343_v52 = vpack.c.bf16 %v2878_v39, %v2876_v36  ;;  %v7611_v8 = vpop.eup %7610  ;;  %v6983_v36 = vcombine.high %v2930_v1, %v2934_v63  ;;  %v6985_v39 = vcombine.high %v2931_v51, %v2935_v22  ;;  %v2942_v40 = vld [vmem:[#allocation7 + $0x1b0] sm:$0xff] }
 0x8b6   :  { %7614 = vrcp.f32 %v2831_v15  ;;  %v7613_v44 = vpop.eup %7612  ;;  %v2938_v15 = vld [vmem:[#allocation7 + $0x190] sm:$0xff] }
 0x8b7   :  { %7616 = vrcp.f32 %v2832_v43  ;;  %v2833_v37 = vadd.f32 1.0, %v7613_v44  ;;  %v2939_v43 = vld [vmem:[#allocation7 + $0x198] sm:$0xff]  ;;  %v6982_v44 = vcombine.low %v2930_v1, %v2934_v63 }
 0x8b9   :  { %7618 = vrcp.f32 %v2833_v37 }
 0x8c0   :  { %v7615_v47 = vpop.eup %7614 }
 0x8c1   :  { %v2842_v5 = vmul.f32 %v7615_v47, %v7611_v8  ;;  %v7617_v16 = vpop.eup %7616  ;;  %v2943_v8 = vld [vmem:[#allocation7 + $0x1b8] sm:$0xff]  ;;  %v6984_v47 = vcombine.low %v2931_v51, %v2935_v22 }
 0x8c2   :  { %v2841_v21 = vmul.f32 %v7617_v16, %v9286_v2  ;;  %v2902_v2 = vld [vmem:[#allocation7 + $0x70] sm:$0xff]  ;;  %v6991_v16 = vcombine.high %v2938_v15, %v2942_v40  ;;  %v6993_v37 = vcombine.high %v2939_v43, %v2943_v8 }
 0x8c3   :  { %v7619_v19 = vpop.eup %7618  ;;  %v6951_v42 = vcombine.high %v2898_v31, %v2902_v2  ;;  %v6950_v58 = vcombine.low %v2898_v31, %v2902_v2  ;;  %v6992_v31 = vcombine.low %v2939_v43, %v2943_v8  ;;  %v2954_v2 = vld [vmem:[#allocation7 + $0x210] sm:$0xff] }
 0x8c4   :  { %v9346_v13 = vadd.f32 %v2842_v5, %v2841_v21  ;;  %v11054_v5 = vld [vmem:[#allocation42_spill] sm:$0xff]  ;;  %v2946_v21 = vld [vmem:[#allocation7 + $0x1d0] sm:$0xff]  ;;  %v7007_v46 = vcombine.high %v2954_v2, %v2958_v6  ;;  %v7006_v9 = vcombine.low %v2954_v2, %v2958_v6 }
 0x8c5   :  { %v3003_v2 = vld [vmem:[#allocation7 + $0x398] sm:$0xff] }
 0x8c6   :  { %11050 = vst [vmem:[#allocation45_spill] sm:$0xff] %v9346_v13  ;;  %7620 = vtanh.f32 %v9346_v13  ;;  %v4097_v13 = vld [vmem:[#allocation9 + $0x158] sm:$0xff] }
 0x8d0   :  { %v7621_v56 = vpop.eup %7620 }
 0x8d1   :  { %v9349_v14 = vmul.f32 %v7621_v56, %v7619_v19  ;;  %v2950_v19 = vld [vmem:[#allocation7 + $0x1f0] sm:$0xff]  ;;  %v2947_v56 = vld [vmem:[#allocation7 + $0x1d8] sm:$0xff] }
 0x8d2   :  { %v6999_v23 = vcombine.high %v2946_v21, %v2950_v19  ;;  %v6998_v45 = vcombine.low %v2946_v21, %v2950_v19 }
 0x8d3   :  { %v2865_v24 = vmax.f32 %v9349_v14, 0.0  ;;  %6295 = vst [vmem:[%s10572_s14 + $0x8] sm:$0xff] %v9349_v14 }
 0x8d5   :  { %v9357_v48 = vpack.c.bf16 %v2867_v33, %v2865_v24  ;;  %v2951_v24 = vld [vmem:[#allocation7 + $0x1f8] sm:$0xff]  ;;  %v6990_v33 = vcombine.low %v2938_v15, %v2942_v40 }
 0x8d6   :  { %v7001_v32 = vcombine.high %v2947_v56, %v2951_v24  ;;  %v7000_v17 = vcombine.low %v2947_v56, %v2951_v24  ;;  %v2987_v15 = vld [vmem:[#allocation7 + $0x318] sm:$0xff] }
 0x8d7   :  { %3730 = vmatprep.mubr.bf16.mxu0 %v9357_v48  ;;  %3803 = vmatprep.mubr.bf16.mxu1 %v9357_v48 }
 0x8d8   :  { %3731 = vmatmul.mubr.bf16.vlgmr.msra.gmra.mrb[96].mxu0 %v11051_v49  ;;  %3804 = vmatmul.mubr.bf16.vlgmr.msra.gmra.mrb[96].mxu1 %v11051_v49 }
 0x8d9   :  { %3845 = vmatpush1.bf16.msra.mxu0 %v6942_v61  ;;  %3918 = vmatpush1.bf16.msra.mxu1 %v6944_v55  ;;  %v6969_v61 = vcombine.high %v2915_v20, %v2919_v25  ;;  %v2926_v55 = vld [vmem:[#allocation7 + $0x130] sm:$0xff] }
 0x8da   :  { %3740 = vmatprep.mubr.bf16.mxu0 %v9215_v30  ;;  %3813 = vmatprep.mubr.bf16.mxu1 %v9215_v30  ;;  %v6975_v27 = vcombine.high %v2922_v35, %v2926_v55  ;;  %v6974_v60 = vcombine.low %v2922_v35, %v2926_v55  ;;  %v2974_v35 = vld [vmem:[#allocation7 + $0x2b0] sm:$0xff] }
 0x8db   :  { %3846 = vmatprep.subr.bf16.mxu0 %v6951_v42  ;;  %3919 = vmatprep.subr.bf16.mxu1 %v6953_v11  ;;  %v2955_v42 = vld [vmem:[#allocation7 + $0x218] sm:$0xff] }
 0x8dc   :  { %v2959_v11 = vld [vmem:[#allocation7 + $0x238] sm:$0xff] }
 0x8dd   :  { %3847 = vmatpush1.bf16.msra.mxu0 %v6950_v58  ;;  %3920 = vmatpush1.bf16.msra.mxu1 %v6952_v0  ;;  %v7009_v58 = vcombine.high %v2955_v42, %v2959_v11  ;;  %v2962_v0 = vld [vmem:[#allocation7 + $0x250] sm:$0xff]  ;;  %v7008_v20 = vcombine.low %v2955_v42, %v2959_v11 }
 0x8de   :  { %3848 = vmatprep.subr.bf16.mxu0 %v6959_v12  ;;  %3921 = vmatprep.subr.bf16.mxu1 %v6961_v57  ;;  %v2966_v12 = vld [vmem:[#allocation7 + $0x270] sm:$0xff]  ;;  %v2963_v57 = vld [vmem:[#allocation7 + $0x258] sm:$0xff] }
 0x8df   :  { %v7015_v25 = vcombine.high %v2962_v0, %v2966_v12  ;;  %v7016_v55 = vcombine.low %v2963_v57, %v2967_v4 }
 0x8e0   :  { %3741 = vmatmul.mubr.bf16.gmra.mrb[100].mxu0 %v11052_v41  ;;  %3814 = vmatmul.mubr.bf16.gmra.mrb[100].mxu1 %v11052_v41 }
 0x8e1   :  { %3849 = vmatpush1.bf16.msra.mxu0 %v6958_v62  ;;  %3922 = vmatpush1.bf16.msra.mxu1 %v6960_v34  ;;  %v7017_v62 = vcombine.high %v2963_v57, %v2967_v4  ;;  %v2970_v34 = vld [vmem:[#allocation7 + $0x290] sm:$0xff] }
 0x8e2   :  { %3750 = vmatprep.mubr.bf16.mxu0 %v11053_v10  ;;  %3823 = vmatprep.mubr.bf16.mxu1 %v11053_v10  ;;  %v7023_v26 = vcombine.high %v2970_v34, %v2974_v35  ;;  %v7022_v1 = vcombine.low %v2970_v34, %v2974_v35 }
 0x8e3   :  { %3850 = vmatprep.subr.bf16.mxu0 %v6967_v38  ;;  %3923 = vmatprep.subr.bf16.mxu1 %v6969_v61  ;;  %v2971_v38 = vld [vmem:[#allocation7 + $0x298] sm:$0xff]  ;;  %v7014_v61 = vcombine.low %v2962_v0, %v2966_v12 }
 0x8e5   :  { %3851 = vmatpush1.bf16.msra.mxu0 %v6966_v50  ;;  %3924 = vmatpush1.bf16.msra.mxu1 %v6968_v53  ;;  %v2978_v50 = vld [vmem:[#allocation7 + $0x2d0] sm:$0xff] }
 0x8e6   :  { %3852 = vmatprep.subr.bf16.mxu0 %v6975_v27  ;;  %3925 = vmatprep.subr.bf16.mxu1 %v6977_v54  ;;  %v2982_v53 = vld [vmem:[#allocation7 + $0x2f0] sm:$0xff]  ;;  %v2979_v27 = vld [vmem:[#allocation7 + $0x2d8] sm:$0xff] }
 0x8e7   :  { %v2983_v54 = vld [vmem:[#allocation7 + $0x2f8] sm:$0xff]  ;;  %v7031_v51 = vcombine.high %v2978_v50, %v2982_v53 }
 0x8e8   :  { %3751 = vmatmul.mubr.bf16.gmra.mrb[104].mxu0 %v9174_v59  ;;  %3824 = vmatmul.mubr.bf16.gmra.mrb[104].mxu1 %v9174_v59  ;;  %v7033_v22 = vcombine.high %v2979_v27, %v2983_v54  ;;  %v7032_v40 = vcombine.low %v2979_v27, %v2983_v54 }
 0x8e9   :  { %3853 = vmatpush1.bf16.msra.mxu0 %v6974_v60  ;;  %3926 = vmatpush1.bf16.msra.mxu1 %v6976_v28  ;;  %v2986_v60 = vld [vmem:[#allocation7 + $0x310] sm:$0xff] }
 0x8ea   :  { %3760 = vmatprep.mubr.bf16.mxu0 %v11054_v5  ;;  %3833 = vmatprep.mubr.bf16.mxu1 %v11054_v5  ;;  %v2990_v28 = vld [vmem:[#allocation7 + $0x330] sm:$0xff] }
 0x8eb   :  { %3854 = vmatprep.subr.bf16.mxu0 %v6983_v36  ;;  %3927 = vmatprep.subr.bf16.mxu1 %v6985_v39  ;;  %v2991_v36 = vld [vmem:[#allocation7 + $0x338] sm:$0xff]  ;;  %v7030_v39 = vcombine.low %v2978_v50, %v2982_v53  ;;  %v7039_v43 = vcombine.high %v2986_v60, %v2990_v28  ;;  %v7038_v21 = vcombine.low %v2986_v60, %v2990_v28 }
 0x8ec   :  { %v7041_v8 = vcombine.high %v2987_v15, %v2991_v36  ;;  %v7040_v19 = vcombine.low %v2987_v15, %v2991_v36  ;;  %v4078_v36 = vld [vmem:[#allocation9 + $0xc0] sm:$0xff] }
 0x8ed   :  { %3855 = vmatpush1.bf16.msra.mxu0 %v6982_v44  ;;  %3928 = vmatpush1.bf16.msra.mxu1 %v6984_v47  ;;  %v2994_v44 = vld [vmem:[#allocation7 + $0x350] sm:$0xff] }
 0x8ee   :  { %3856 = vmatprep.subr.bf16.mxu0 %v6991_v16  ;;  %3929 = vmatprep.subr.bf16.mxu1 %v6993_v37  ;;  %v2998_v47 = vld [vmem:[#allocation7 + $0x370] sm:$0xff]  ;;  %v2995_v16 = vld [vmem:[#allocation7 + $0x358] sm:$0xff] }
 0x8ef   :  { %v2999_v37 = vld [vmem:[#allocation7 + $0x378] sm:$0xff]  ;;  %v7047_v56 = vcombine.high %v2994_v44, %v2998_v47 }
 0x8f0   :  { %3761 = vmatmul.mubr.bf16.gmra.mrb[108].mxu0 %v9343_v52  ;;  %3834 = vmatmul.mubr.bf16.gmra.mrb[108].mxu1 %v9343_v52  ;;  %v7049_v24 = vcombine.high %v2995_v16, %v2999_v37  ;;  %v7048_v6 = vcombine.low %v2995_v16, %v2999_v37  ;;  %v4086_v16 = vld [vmem:[#allocation9 + $0x100] sm:$0xff] }
 0x8f1   :  { %3857 = vmatpush1.bf16.msra.mxu0 %v6990_v33  ;;  %3930 = vmatpush1.bf16.msra.mxu1 %v6992_v31  ;;  %v3002_v33 = vld [vmem:[#allocation7 + $0x390] sm:$0xff]  ;;  %v4090_v37 = vld [vmem:[#allocation9 + $0x120] sm:$0xff] }
 0x8f2   :  { %3876 = vmatprep.mubr.bf16.mxu0 %v9357_v48  ;;  %3949 = vmatprep.mubr.bf16.mxu1 %v9357_v48  ;;  %v2975_v48 = vld [vmem:[#allocation7 + $0x2b8] sm:$0xff]  ;;  %v3006_v31 = vld [vmem:[#allocation7 + $0x3b0] sm:$0xff] }
 0x8f3   :  { %3858 = vmatprep.subr.bf16.mxu0 %v6999_v23  ;;  %3931 = vmatprep.subr.bf16.mxu1 %v7001_v32  ;;  %v7025_v29 = vcombine.high %v2971_v38, %v2975_v48  ;;  %v7024_v63 = vcombine.low %v2971_v38, %v2975_v48  ;;  %v3007_v23 = vld [vmem:[#allocation7 + $0x3b8] sm:$0xff]  ;;  %v7046_v32 = vcombine.low %v2994_v44, %v2998_v47 }
 0x8f4   :  { %v7055_v42 = vcombine.high %v3002_v33, %v3006_v31  ;;  %v7057_v11 = vcombine.high %v3003_v2, %v3007_v23  ;;  %v7054_v0 = vcombine.low %v3002_v33, %v3006_v31  ;;  %v7056_v12 = vcombine.low %v3003_v2, %v3007_v23  ;;  %v4094_v31 = vld [vmem:[#allocation9 + $0x140] sm:$0xff]  ;;  %v4095_v23 = vld [vmem:[#allocation9 + $0x148] sm:$0xff] }
 0x8f5   :  { %3859 = vmatpush1.bf16.msra.mxu0 %v6998_v45  ;;  %3932 = vmatpush1.bf16.msra.mxu1 %v7000_v17  ;;  %v3010_v45 = vld [vmem:[#allocation7 + $0x3d0] sm:$0xff]  ;;  %v4098_v2 = vld [vmem:[#allocation9 + $0x160] sm:$0xff] }
 0x8f6   :  { %3860 = vmatprep.subr.bf16.mxu0 %v7007_v46  ;;  %3933 = vmatprep.subr.bf16.mxu1 %v7009_v58  ;;  %v3014_v17 = vld [vmem:[#allocation7 + $0x3f0] sm:$0xff]  ;;  %v3011_v46 = vld [vmem:[#allocation7 + $0x3d8] sm:$0xff] }
 0x8f7   :  { %v3015_v58 = vld [vmem:[#allocation7 + $0x3f8] sm:$0xff]  ;;  %v7063_v57 = vcombine.high %v3010_v45, %v3014_v17  ;;  %v7062_v34 = vcombine.low %v3010_v45, %v3014_v17  ;;  %v4102_v45 = vld [vmem:[#allocation9 + $0x180] sm:$0xff] }
 0x8f8   :  { %v7065_v4 = vcombine.high %v3011_v46, %v3015_v58  ;;  %v7064_v35 = vcombine.low %v3011_v46, %v3015_v58  ;;  %v4106_v17 = vld [vmem:[#allocation9 + $0x1a0] sm:$0xff]  ;;  %v4103_v46 = vld [vmem:[#allocation9 + $0x188] sm:$0xff] }
 0x8f9   :  { %3861 = vmatpush1.bf16.msra.mxu0 %v7006_v9  ;;  %3934 = vmatpush1.bf16.msra.mxu1 %v7008_v20  ;;  %v4054_v9 = vld [vmem:[#allocation9] sm:$0xff]  ;;  %v4107_v58 = vld [vmem:[#allocation9 + $0x1a8] sm:$0xff] }
 0x8fa   :  { %3862 = vmatprep.subr.bf16.mxu0 %v7015_v25  ;;  %3935 = vmatprep.subr.bf16.mxu1 %v7017_v62  ;;  %v4058_v20 = vld [vmem:[#allocation9 + $0x20] sm:$0xff]  ;;  %v4055_v25 = vld [vmem:[#allocation9 + $0x8] sm:$0xff] }
 0x8fb   :  { %v4059_v62 = vld [vmem:[#allocation9 + $0x28] sm:$0xff]  ;;  %v9383_v38 = vcombine.high %v4054_v9, %v4058_v20  ;;  %v9389_v50 = vcombine.low %v4054_v9, %v4058_v20  ;;  %v4114_v9 = vld [vmem:[#allocation9 + $0x1e0] sm:$0xff] }
 0x8fc   :  { %v9385_v48 = vcombine.high %v4055_v25, %v4059_v62  ;;  %v9391_v53 = vcombine.low %v4055_v25, %v4059_v62  ;;  %v4111_v20 = vld [vmem:[#allocation9 + $0x1c8] sm:$0xff]  ;;  %v9471_v25 = vcombine.low %v4102_v45, %v4106_v17  ;;  %v9473_v62 = vcombine.low %v4103_v46, %v4107_v58 }
 0x8fd   :  { %3863 = vmatpush1.bf16.msra.mxu0 %v7014_v61  ;;  %3936 = vmatpush1.bf16.msra.mxu1 %v7016_v55  ;;  %v4062_v61 = vld [vmem:[#allocation9 + $0x40] sm:$0xff] }
 0x8fe   :  { %3864 = vmatprep.subr.bf16.mxu0 %v7023_v26  ;;  %3937 = vmatprep.subr.bf16.mxu1 %v7025_v29  ;;  %v4066_v55 = vld [vmem:[#allocation9 + $0x60] sm:$0xff]  ;;  %v4063_v26 = vld [vmem:[#allocation9 + $0x48] sm:$0xff]  ;;  %11071 = vst [vmem:[#allocation100_spill] sm:$0xff] %v9471_v25  ;;  %11072 = vst [vmem:[#allocation102_spill] sm:$0xff] %v9473_v62 }
 0x8ff   :  { %v4067_v29 = vld [vmem:[#allocation9 + $0x68] sm:$0xff]  ;;  %v9393_v27 = vcombine.high %v4062_v61, %v4066_v55  ;;  %v9403_v60 = vcombine.low %v4062_v61, %v4066_v55  ;;  %v4056_v61 = vld [vmem:[#allocation9 + $0x10] sm:$0xff] }
 0x900   :  { %v9395_v54 = vcombine.high %v4063_v26, %v4067_v29  ;;  %v9405_v28 = vcombine.low %v4063_v26, %v4067_v29  ;;  %v4060_v55 = vld [vmem:[#allocation9 + $0x30] sm:$0xff]  ;;  %v4057_v26 = vld [vmem:[#allocation9 + $0x18] sm:$0xff] }
 0x901   :  { %3865 = vmatpush1.bf16.msra.mxu0 %v7022_v1  ;;  %3938 = vmatpush1.bf16.msra.mxu1 %v7024_v63  ;;  %v4070_v1 = vld [vmem:[#allocation9 + $0x80] sm:$0xff]  ;;  %v4061_v29 = vld [vmem:[#allocation9 + $0x38] sm:$0xff] }
 0x902   :  { %3866 = vmatprep.subr.bf16.mxu0 %v7031_v51  ;;  %3939 = vmatprep.subr.bf16.mxu1 %v7033_v22  ;;  %v4074_v63 = vld [vmem:[#allocation9 + $0xa0] sm:$0xff]  ;;  %v4071_v51 = vld [vmem:[#allocation9 + $0x88] sm:$0xff] }
 0x903   :  { %v4075_v22 = vld [vmem:[#allocation9 + $0xa8] sm:$0xff] }
 0x904   :  { %v9411_v15 = vcombine.high %v4071_v51, %v4075_v22 }
 0x905   :  { %3867 = vmatpush1.bf16.msra.mxu0 %v7030_v39  ;;  %3940 = vmatpush1.bf16.msra.mxu1 %v7032_v40  ;;  %v4082_v39 = vld [vmem:[#allocation9 + $0xe0] sm:$0xff]  ;;  %v4079_v40 = vld [vmem:[#allocation9 + $0xc8] sm:$0xff] }
 0x906   :  { %3868 = vmatprep.subr.bf16.mxu0 %v7039_v43  ;;  %3941 = vmatprep.subr.bf16.mxu1 %v7041_v8  ;;  %v9415_v43 = vcombine.low %v4070_v1, %v4074_v63  ;;  %v9417_v8 = vcombine.low %v4071_v51, %v4075_v22  ;;  %v9421_v44 = vcombine.high %v4078_v36, %v4082_v39  ;;  %v4064_v22 = vld [vmem:[#allocation9 + $0x50] sm:$0xff] }
 0x907   :  { %v9495_v51 = vcombine.high %v4057_v26, %v4061_v29 }
 0x908   :  { %11055 = vst [vmem:[#allocation46_spill] sm:$0xff] %v9415_v43  ;;  %11056 = vst [vmem:[#allocation47_spill] sm:$0xff] %v9417_v8 }
 0x909   :  { %3869 = vmatpush1.bf16.msra.mxu0 %v7038_v21  ;;  %3942 = vmatpush1.bf16.msra.mxu1 %v7040_v19  ;;  %11057 = vst [vmem:[#allocation51_spill] sm:$0xff] %v9421_v44  ;;  %v4087_v21 = vld [vmem:[#allocation9 + $0x108] sm:$0xff]  ;;  %11078 = vst [vmem:[#allocation97_spill] sm:$0xff] %v9495_v51 }
 0x90a   :  { %3870 = vmatprep.subr.bf16.mxu0 %v7047_v56  ;;  %3943 = vmatprep.subr.bf16.mxu1 %v7049_v24  ;;  %v4091_v19 = vld [vmem:[#allocation9 + $0x128] sm:$0xff]  ;;  %v9431_v56 = vcombine.low %v4078_v36, %v4082_v39  ;;  %v4068_v36 = vld [vmem:[#allocation9 + $0x70] sm:$0xff]  ;;  %v4065_v39 = vld [vmem:[#allocation9 + $0x58] sm:$0xff] }
 0x90b   :  { %v9439_v33 = vcombine.high %v4087_v21, %v4091_v19 }
 0x90c   :  { %11059 = vst [vmem:[#allocation52_spill] sm:$0xff] %v9431_v56 }
 0x90d   :  { %3871 = vmatpush1.bf16.msra.mxu0 %v7046_v32  ;;  %3944 = vmatpush1.bf16.msra.mxu1 %v7048_v6  ;;  %11062 = vst [vmem:[#allocation105_spill] sm:$0xff] %v9439_v33  ;;  %v9443_v32 = vcombine.low %v4086_v16, %v4090_v37  ;;  %v9445_v6 = vcombine.low %v4087_v21, %v4091_v19 }
 0x90e   :  { %3872 = vmatprep.subr.bf16.mxu0 %v7055_v42  ;;  %3945 = vmatprep.subr.bf16.mxu1 %v7057_v11  ;;  %v9449_v42 = vcombine.high %v4094_v31, %v4098_v2  ;;  %v9509_v21 = vcombine.high %v4064_v22, %v4068_v36 }
 0x90f   :  { %11063 = vst [vmem:[#allocation104_spill] sm:$0xff] %v9443_v32  ;;  %11064 = vst [vmem:[#allocation106_spill] sm:$0xff] %v9445_v6 }
 0x910   :  { %11065 = vst [vmem:[#allocation55_spill] sm:$0xff] %v9449_v42 }
 0x911   :  { %3873 = vmatpush1.bf16.msra.mxu0 %v7054_v0  ;;  %3946 = vmatpush1.bf16.msra.mxu1 %v7056_v12  ;;  %v9459_v0 = vcombine.low %v4094_v31, %v4098_v2  ;;  %v4072_v31 = vld [vmem:[#allocation9 + $0x90] sm:$0xff] }
 0x912   :  { %3874 = vmatprep.subr.bf16.mxu0 %v7063_v57  ;;  %3947 = vmatprep.subr.bf16.mxu1 %v7065_v4  ;;  %v9467_v57 = vcombine.high %v4103_v46, %v4107_v58  ;;  %v4110_v4 = vld [vmem:[#allocation9 + $0x1c0] sm:$0xff]  ;;  %v4076_v2 = vld [vmem:[#allocation9 + $0xb0] sm:$0xff] }
 0x913   :  { %11067 = vst [vmem:[#allocation56_spill] sm:$0xff] %v9459_v0  ;;  %v4080_v58 = vld [vmem:[#allocation9 + $0xd0] sm:$0xff] }
 0x914   :  { %11070 = vst [vmem:[#allocation101_spill] sm:$0xff] %v9467_v57 }
 0x915   :  { %3875 = vmatpush1.bf16.msra.mxu0 %v7062_v34  ;;  %3948 = vmatpush1.bf16.msra.mxu1 %v7064_v35  ;;  %v9477_v34 = vcombine.high %v4110_v4, %v4114_v9 }
 0x916   :  { %4283 = vmatprep.subr.bf16.mxu0 %v9383_v38  ;;  %4324 = vmatprep.subr.bf16.mxu1 %v9385_v48 }
 0x917   :  { %11073 = vst [vmem:[#allocation58_spill] sm:$0xff] %v9477_v34 }
 0x918   :  { %3877 = vmatmul.mubr.bf16.vlgmr.msra.gmra.mrb[112].mxu0 %v11051_v49  ;;  %3950 = vmatmul.mubr.bf16.vlgmr.msra.gmra.mrb[112].mxu1 %v11051_v49  ;;  %v9409_v49 = vcombine.high %v4070_v1, %v4074_v63  ;;  %v9487_v1 = vcombine.low %v4110_v4, %v4114_v9  ;;  %v4084_v4 = vld [vmem:[#allocation9 + $0xf0] sm:$0xff]  ;;  %v4081_v9 = vld [vmem:[#allocation9 + $0xd8] sm:$0xff] }
 0x919   :  { %3886 = vmatprep.mubr.bf16.mxu0 %v9215_v30  ;;  %3959 = vmatprep.mubr.bf16.mxu1 %v9215_v30  ;;  %v4083_v30 = vld [vmem:[#allocation9 + $0xe8] sm:$0xff] }
 0x91a   :  { %4284 = vmatpush1.bf16.msra.mxu0 %v9389_v50  ;;  %4325 = vmatpush1.bf16.msra.mxu1 %v9391_v53  ;;  %v9423_v47 = vcombine.high %v4079_v40, %v4083_v30  ;;  %v9433_v24 = vcombine.low %v4079_v40, %v4083_v30  ;;  %11075 = vst [vmem:[#allocation60_spill] sm:$0xff] %v9487_v1  ;;  %v4069_v40 = vld [vmem:[#allocation9 + $0x78] sm:$0xff] }
 0x91b   :  { %4285 = vmatprep.subr.bf16.mxu0 %v9393_v27  ;;  %4326 = vmatprep.subr.bf16.mxu1 %v9395_v54  ;;  %v9499_v30 = vcombine.low %v4056_v61, %v4060_v55  ;;  %v9511_v19 = vcombine.high %v4065_v39, %v4069_v40 }
 0x91c   :  { %11058 = vst [vmem:[#allocation53_spill] sm:$0xff] %v9423_v47  ;;  %11060 = vst [vmem:[#allocation54_spill] sm:$0xff] %v9433_v24 }
 0x91e   :  { %4286 = vmatpush1.bf16.msra.mxu0 %v9403_v60  ;;  %4327 = vmatpush1.bf16.msra.mxu1 %v9405_v28 }
 0x91f   :  { %4287 = vmatprep.subr.bf16.mxu0 %v9409_v49  ;;  %4328 = vmatprep.subr.bf16.mxu1 %v9411_v15 }
 0x920   :  { %3887 = vmatmul.mubr.bf16.gmra.mrb[116].mxu0 %v11052_v41  ;;  %3960 = vmatmul.mubr.bf16.gmra.mrb[116].mxu1 %v11052_v41  ;;  %v9437_v41 = vcombine.high %v4086_v16, %v4090_v37  ;;  %v9501_v16 = vcombine.low %v4057_v26, %v4061_v29  ;;  %v9505_v37 = vpack.c.bf16 %v9335_v7, %v9335_v7  ;;  %v4088_v29 = vld [vmem:[#allocation9 + $0x110] sm:$0xff] }
 0x921   :  { %3896 = vmatprep.mubr.bf16.mxu0 %v11053_v10  ;;  %3969 = vmatprep.mubr.bf16.mxu1 %v11053_v10  ;;  %v4099_v10 = vld [vmem:[#allocation9 + $0x168] sm:$0xff]  ;;  %v9517_v7 = vcombine.low %v4064_v22, %v4068_v36  ;;  %v4092_v22 = vld [vmem:[#allocation9 + $0x130] sm:$0xff]  ;;  %v4089_v36 = vld [vmem:[#allocation9 + $0x118] sm:$0xff] }
 0x922   :  { %4288 = vmatpush1.bf16.msra.mxu0 %v9415_v43  ;;  %4329 = vmatpush1.bf16.msra.mxu1 %v9417_v8  ;;  %11061 = vst [vmem:[#allocation103_spill] sm:$0xff] %v9437_v41  ;;  %v9451_v11 = vcombine.high %v4095_v23, %v4099_v10  ;;  %v9461_v12 = vcombine.low %v4095_v23, %v4099_v10  ;;  %11079 = vst [vmem:[#allocation96_spill] sm:$0xff] %v9505_v37  ;;  %v4073_v23 = vld [vmem:[#allocation9 + $0x98] sm:$0xff] }
 0x923   :  { %4289 = vmatprep.subr.bf16.mxu0 %v9421_v44  ;;  %4330 = vmatprep.subr.bf16.mxu1 %v9423_v47  ;;  %v4077_v10 = vld [vmem:[#allocation9 + $0xb8] sm:$0xff] }
 0x924   :  { %11066 = vst [vmem:[#allocation57_spill] sm:$0xff] %v9451_v11  ;;  %11068 = vst [vmem:[#allocation59_spill] sm:$0xff] %v9461_v12  ;;  %v9525_v46 = vcombine.high %v4073_v23, %v4077_v10 }
 0x926   :  { %4290 = vmatpush1.bf16.msra.mxu0 %v9431_v56  ;;  %4331 = vmatpush1.bf16.msra.mxu1 %v9433_v24  ;;  %11080 = vst [vmem:[#allocation99_spill] sm:$0xff] %v9525_v46 }
 0x927   :  { %4291 = vmatprep.subr.bf16.mxu0 %v9437_v41  ;;  %4332 = vmatprep.subr.bf16.mxu1 %v9439_v33 }
 0x928   :  { %3897 = vmatmul.mubr.bf16.gmra.mrb[120].mxu0 %v9174_v59  ;;  %3970 = vmatmul.mubr.bf16.gmra.mrb[120].mxu1 %v9174_v59  ;;  %v9465_v59 = vcombine.high %v4102_v45, %v4106_v17  ;;  %v9519_v45 = vcombine.low %v4065_v39, %v4069_v40  ;;  %v9523_v17 = vcombine.high %v4072_v31, %v4076_v2  ;;  %v4093_v39 = vld [vmem:[#allocation9 + $0x138] sm:$0xff] }
 0x929   :  { %3906 = vmatprep.mubr.bf16.mxu0 %v11054_v5  ;;  %3979 = vmatprep.mubr.bf16.mxu1 %v11054_v5  ;;  %v4115_v5 = vld [vmem:[#allocation9 + $0x1e8] sm:$0xff]  ;;  %v9543_v40 = vcombine.low %v4080_v58, %v4084_v4 }
 0x92a   :  { %4292 = vmatpush1.bf16.msra.mxu0 %v9443_v32  ;;  %4333 = vmatpush1.bf16.msra.mxu1 %v9445_v6  ;;  %11069 = vst [vmem:[#allocation98_spill] sm:$0xff] %v9465_v59  ;;  %v9479_v35 = vcombine.high %v4111_v20, %v4115_v5  ;;  %v9489_v63 = vcombine.low %v4111_v20, %v4115_v5  ;;  %v4085_v20 = vld [vmem:[#allocation9 + $0xf8] sm:$0xff] }
 0x92b   :  { %4293 = vmatprep.subr.bf16.mxu0 %v9449_v42  ;;  %4334 = vmatprep.subr.bf16.mxu1 %v9451_v11  ;;  %v9531_v5 = vcombine.low %v4072_v31, %v4076_v2  ;;  %v9539_v26 = vcombine.high %v4081_v9, %v4085_v20  ;;  %11085 = vst [vmem:[#allocation90_spill] sm:$0xff] %v9543_v40 }
 0x92c   :  { %11074 = vst [vmem:[#allocation61_spill] sm:$0xff] %v9479_v35  ;;  %11076 = vst [vmem:[#allocation62_spill] sm:$0xff] %v9489_v63  ;;  %v9545_v31 = vcombine.low %v4081_v9, %v4085_v20  ;;  %v9549_v2 = vcombine.high %v4088_v29, %v4092_v22 }
 0x92d   :  { %11081 = vst [vmem:[#allocation63_spill] sm:$0xff] %v9531_v5  ;;  %11084 = vst [vmem:[#allocation67_spill] sm:$0xff] %v9539_v26 }
 0x92e   :  { %4294 = vmatpush1.bf16.msra.mxu0 %v9459_v0  ;;  %4335 = vmatpush1.bf16.msra.mxu1 %v9461_v12  ;;  %11086 = vst [vmem:[#allocation93_spill] sm:$0xff] %v9545_v31  ;;  %11087 = vst [vmem:[#allocation92_spill] sm:$0xff] %v9549_v2 }
 0x92f   :  { %4295 = vmatprep.subr.bf16.mxu0 %v9465_v59  ;;  %4336 = vmatprep.subr.bf16.mxu1 %v9467_v57 }
 0x930   :  { %3907 = vmatmul.mubr.bf16.gmra.mrb[124].mxu0 %v9343_v52  ;;  %3980 = vmatmul.mubr.bf16.gmra.mrb[124].mxu1 %v9343_v52  ;;  %v9493_v52 = vcombine.high %v4056_v61, %v4060_v55  ;;  %v9533_v61 = vcombine.low %v4073_v23, %v4077_v10  ;;  %v9537_v55 = vcombine.high %v4080_v58, %v4084_v4  ;;  %v4096_v10 = vld [vmem:[#allocation9 + $0x150] sm:$0xff] }
 0x931   :  { %4315 = vmatprep.mubr.bf16.mxu0 %v10767_v18  ;;  %4356 = vmatprep.mubr.bf16.mxu1 %v10767_v18  ;;  %v9551_v23 = vcombine.high %v4089_v36, %v4093_v39  ;;  %v9555_v58 = vcombine.low %v4088_v29, %v4092_v22  ;;  %v9557_v4 = vcombine.low %v4089_v36, %v4093_v39 }
 0x932   :  { %4296 = vmatpush1.bf16.msra.mxu0 %v9471_v25  ;;  %4337 = vmatpush1.bf16.msra.mxu1 %v9473_v62  ;;  %11077 = vst [vmem:[#allocation95_spill] sm:$0xff] %v9493_v52  ;;  %11082 = vst [vmem:[#allocation65_spill] sm:$0xff] %v9533_v61 }
 0x933   :  { %4297 = vmatprep.subr.bf16.mxu0 %v9477_v34  ;;  %4338 = vmatprep.subr.bf16.mxu1 %v9479_v35  ;;  %11083 = vst [vmem:[#allocation64_spill] sm:$0xff] %v9537_v55  ;;  %11088 = vst [vmem:[#allocation94_spill] sm:$0xff] %v9551_v23 }
 0x936   :  { %4298 = vmatpush1.bf16.msra.mxu0 %v9487_v1  ;;  %4339 = vmatpush1.bf16.msra.mxu1 %v9489_v63 }
 0x937   :  { %4534 = vmatprep.subr.bf16.mxu0 %v9493_v52  ;;  %4575 = vmatprep.subr.bf16.mxu1 %v9495_v51 }
 0x939   :  { %4316 = vmatmul.mubr.bf16.vlgmr.msra.gmra.mrb[128].mxu0 %v9505_v37  ;;  %4357 = vmatmul.mubr.bf16.vlgmr.msra.gmra.mrb[128].mxu1 %v9505_v37  ;;  %v4100_v37 = vld [vmem:[#allocation9 + $0x170] sm:$0xff] }
 0x93a   :  { %4535 = vmatpush1.bf16.msra.mxu0 %v9499_v30  ;;  %4576 = vmatpush1.bf16.msra.mxu1 %v9501_v16  ;;  %v9561_v9 = vcombine.high %v4096_v10, %v4100_v37  ;;  %v9567_v29 = vcombine.low %v4096_v10, %v4100_v37 }
 0x93b   :  { %4536 = vmatprep.subr.bf16.mxu0 %v9509_v21  ;;  %4577 = vmatprep.subr.bf16.mxu1 %v9511_v19 }
 0x93c   :  { %4566 = vmatprep.mubr.bf16.mxu0 %v10767_v18  ;;  %4607 = vmatprep.mubr.bf16.mxu1 %v10767_v18  ;;  %11090 = vst [vmem:[#allocation69_spill] sm:$0xff] %v9567_v29 }
 0x93e   :  { %4537 = vmatpush1.bf16.msra.mxu0 %v9517_v7  ;;  %4578 = vmatpush1.bf16.msra.mxu1 %v9519_v45 }
 0x93f   :  { %4538 = vmatprep.subr.bf16.mxu0 %v9523_v17  ;;  %4579 = vmatprep.subr.bf16.mxu1 %v9525_v46  ;;  %v4101_v46 = vld [vmem:[#allocation9 + $0x178] sm:$0xff] }
 0x940   :  { %v9563_v20 = vcombine.high %v4097_v13, %v4101_v46  ;;  %v9569_v22 = vcombine.low %v4097_v13, %v4101_v46 }
 0x942   :  { %4539 = vmatpush1.bf16.msra.mxu0 %v9531_v5  ;;  %4580 = vmatpush1.bf16.msra.mxu1 %v9533_v61  ;;  %11089 = vst [vmem:[#allocation66_spill] sm:$0xff] %v9563_v20  ;;  %v4105_v61 = vld [vmem:[#allocation9 + $0x198] sm:$0xff] }
 0x943   :  { %4540 = vmatprep.subr.bf16.mxu0 %v9537_v55  ;;  %4581 = vmatprep.subr.bf16.mxu1 %v9539_v26  ;;  %v4104_v26 = vld [vmem:[#allocation9 + $0x190] sm:$0xff]  ;;  %v4109_v5 = vld [vmem:[#allocation9 + $0x1b8] sm:$0xff] }
 0x944   :  { %v4108_v55 = vld [vmem:[#allocation9 + $0x1b0] sm:$0xff]  ;;  %v9575_v39 = vcombine.high %v4105_v61, %v4109_v5  ;;  %v9581_v13 = vcombine.low %v4105_v61, %v4109_v5  ;;  %v9601_v5 = vpack.c.bf16 %v9349_v14, %v9349_v14  ;;  %v9644_v14 = vld [vmem:[%s10564_s6] sm:$0xff] }
 0x945   :  { %v9573_v36 = vcombine.high %v4104_v26, %v4108_v55  ;;  %v9579_v37 = vcombine.low %v4104_v26, %v4108_v55  ;;  %v11092_v26 = vld [vmem:[#allocation49_spill] sm:$0xff] }
 0x946   :  { %4541 = vmatpush1.bf16.msra.mxu0 %v9543_v40  ;;  %4582 = vmatpush1.bf16.msra.mxu1 %v9545_v31  ;;  %v4113_v31 = vld [vmem:[#allocation9 + $0x1d8] sm:$0xff]  ;;  %11091 = vst [vmem:[#allocation68_spill] sm:$0xff] %v9601_v5 }
 0x947   :  { %4542 = vmatprep.subr.bf16.mxu0 %v9549_v2  ;;  %4583 = vmatprep.subr.bf16.mxu1 %v9551_v23  ;;  %v4112_v23 = vld [vmem:[#allocation9 + $0x1d0] sm:$0xff]  ;;  %v4117_v40 = vld [vmem:[#allocation9 + $0x1f8] sm:$0xff] }
 0x948   :  { %v4116_v2 = vld [vmem:[#allocation9 + $0x1f0] sm:$0xff]  ;;  %v9587_v10 = vcombine.high %v4113_v31, %v4117_v40 }
 0x949   :  { %v9585_v46 = vcombine.high %v4112_v23, %v4116_v2 }
 0x94a   :  { %4543 = vmatpush1.bf16.msra.mxu0 %v9555_v58  ;;  %4584 = vmatpush1.bf16.msra.mxu1 %v9557_v4 }
 0x94b   :  { %4544 = vmatprep.subr.bf16.mxu0 %v9561_v9  ;;  %4585 = vmatprep.subr.bf16.mxu1 %v9563_v20  ;;  %v9591_v20 = vcombine.low %v4112_v23, %v4116_v2 }
 0x94e   :  { %4545 = vmatpush1.bf16.msra.mxu0 %v9567_v29  ;;  %4586 = vmatpush1.bf16.msra.mxu1 %v9569_v22  ;;  %v9593_v29 = vcombine.low %v4113_v31, %v4117_v40  ;;  %v9652_v40 = vrot.slane %v9644_v14, %v11092_v26  ;;  %v11093_v31 = vld [vmem:[#allocation48_spill] sm:$0xff] }
 0x94f   :  { %4546 = vmatprep.subr.bf16.mxu0 %v9573_v36  ;;  %4587 = vmatprep.subr.bf16.mxu1 %v9575_v39  ;;  %v11094_v2 = vsub.s32 2, %v11093_v31 }
 0x951   :  { %v9657_v23 = vrot.slane %v9644_v14, %v11094_v2 }
 0x952   :  { %4547 = vmatpush1.bf16.msra.mxu0 %v9579_v37  ;;  %4588 = vmatpush1.bf16.msra.mxu1 %v9581_v13 }
 0x953   :  { %4548 = vmatprep.subr.bf16.mxu0 %v9585_v46  ;;  %4589 = vmatprep.subr.bf16.mxu1 %v9587_v10 }
 0x956   :  { %4549 = vmatpush1.bf16.msra.mxu0 %v9591_v20  ;;  %4590 = vmatpush1.bf16.msra.mxu1 %v9593_v29 }
 0x957   :  { %4675 = vmatprep.subr.bf16.mxu0 %v9383_v38  ;;  %4716 = vmatprep.subr.bf16.mxu1 %v9385_v48 }
 0x959   :  { %4567 = vmatmul.mubr.bf16.vlgmr.msra.gmra.mrb[132].mxu0 %v9601_v5  ;;  %4608 = vmatmul.mubr.bf16.vlgmr.msra.gmra.mrb[132].mxu1 %v9601_v5 }
 0x95a   :  { %4676 = vmatpush1.bf16.msra.mxu0 %v9389_v50  ;;  %4717 = vmatpush1.bf16.msra.mxu1 %v9391_v53 }
 0x95b   :  { %4677 = vmatprep.subr.bf16.mxu0 %v9393_v27  ;;  %4718 = vmatprep.subr.bf16.mxu1 %v9395_v54 }
 0x95c   :  { %4707 = vmatprep.mubr.bf16.mxu0 %v10767_v18  ;;  %4748 = vmatprep.mubr.bf16.mxu1 %v10767_v18 }
 0x95e   :  { %4678 = vmatpush1.bf16.msra.mxu0 %v9403_v60  ;;  %4719 = vmatpush1.bf16.msra.mxu1 %v9405_v28 }
 0x95f   :  { %4679 = vmatprep.subr.bf16.mxu0 %v9409_v49  ;;  %4720 = vmatprep.subr.bf16.mxu1 %v9411_v15 }
 0x962   :  { %4680 = vmatpush1.bf16.msra.mxu0 %v9415_v43  ;;  %4721 = vmatpush1.bf16.msra.mxu1 %v9417_v8 }
 0x963   :  { %4681 = vmatprep.subr.bf16.mxu0 %v9421_v44  ;;  %4722 = vmatprep.subr.bf16.mxu1 %v9423_v47 }
 0x966   :  { %4682 = vmatpush1.bf16.msra.mxu0 %v9431_v56  ;;  %4723 = vmatpush1.bf16.msra.mxu1 %v9433_v24 }
 0x967   :  { %4683 = vmatprep.subr.bf16.mxu0 %v9437_v41  ;;  %4724 = vmatprep.subr.bf16.mxu1 %v9439_v33 }
 0x96a   :  { %4684 = vmatpush1.bf16.msra.mxu0 %v9443_v32  ;;  %4725 = vmatpush1.bf16.msra.mxu1 %v9445_v6 }
 0x96b   :  { %4685 = vmatprep.subr.bf16.mxu0 %v9449_v42  ;;  %4726 = vmatprep.subr.bf16.mxu1 %v9451_v11 }
 0x96e   :  { %4686 = vmatpush1.bf16.msra.mxu0 %v9459_v0  ;;  %4727 = vmatpush1.bf16.msra.mxu1 %v9461_v12 }
 0x96f   :  { %4687 = vmatprep.subr.bf16.mxu0 %v9465_v59  ;;  %4728 = vmatprep.subr.bf16.mxu1 %v9467_v57 }
 0x972   :  { %4688 = vmatpush1.bf16.msra.mxu0 %v9471_v25  ;;  %4729 = vmatpush1.bf16.msra.mxu1 %v9473_v62 }
 0x973   :  { %4689 = vmatprep.subr.bf16.mxu0 %v9477_v34  ;;  %4730 = vmatprep.subr.bf16.mxu1 %v9479_v35 }
 0x976   :  { %4690 = vmatpush1.bf16.msra.mxu0 %v9487_v1  ;;  %4731 = vmatpush1.bf16.msra.mxu1 %v9489_v63  ;;  %v11096_v1 = vsub.s32 3, %v11093_v31 }
 0x977   :  { %4766 = vmatprep.subr.bf16.mxu0 %v9493_v52  ;;  %4807 = vmatprep.subr.bf16.mxu1 %v9495_v51  ;;  %v11095_v52 = vld [vmem:[#allocation50_spill] sm:$0xff] }
 0x978   :  { %v9665_v63 = vrot.slane %v9644_v14, %v11095_v52  ;;  %v9670_v35 = vrot.slane %v9644_v14, %v11096_v1 }
 0x9ab   :  { %v9646_v61 = vpop.f32.mrb[96].mxu0  ;;  %v9648_v55 = vpop.f32.mrb[96].mxu1 }
 0x9ac   :  { %v9659_v5 = vpop.f32.mrb[97].mxu0  ;;  %v9661_v51 = vpop.f32.mrb[97].mxu1  ;;  %v3733_v32 = vadd.f32 %v9646_v61, %v9652_v40 }
 0x9ad   :  { %v3736_v26 = vpop.f32.mrb[98].mxu0  ;;  %v3809_v34 = vpop.f32.mrb[98].mxu1 }
 0x9ae   :  { %v9673_v62 = vadd.f32 %v3736_v26, %v9652_v40  ;;  %v9676_v2 = vadd.f32 %v3809_v34, %v9657_v23  ;;  %v3738_v25 = vpop.f32.mrb[99].mxu0  ;;  %v3811_v57 = vpop.f32.mrb[99].mxu1 }
 0x9af   :  { %v9679_v59 = vadd.f32 %v3738_v25, %v9665_v63  ;;  %v9682_v52 = vadd.f32 %v3811_v57, %v9670_v35 }
 0x9b0   :  { %11097 = vst [vmem:[#allocation70_spill] sm:$0xff] %v9673_v62  ;;  %11098 = vst [vmem:[#allocation87_spill] sm:$0xff] %v9676_v2 }
 0x9b1   :  { %11099 = vst [vmem:[#allocation89_spill] sm:$0xff] %v9679_v59  ;;  %11100 = vst [vmem:[#allocation88_spill] sm:$0xff] %v9682_v52 }
 0x9b3   :  { %v3742_v12 = vpop.f32.mrb[100].mxu0  ;;  %v3815_v0 = vpop.f32.mrb[100].mxu1 }
 0x9b4   :  { %v9685_v1 = vadd.f32 %v3742_v12, %v9652_v40  ;;  %v9688_v11 = vadd.f32 %v3815_v0, %v9657_v23  ;;  %v3744_v26 = vpop.f32.mrb[101].mxu0  ;;  %v3817_v62 = vpop.f32.mrb[101].mxu1 }
 0x9b5   :  { %v9691_v34 = vadd.f32 %v3744_v26, %v9665_v63  ;;  %v9694_v2 = vadd.f32 %v3817_v62, %v9670_v35  ;;  %v3746_v25 = vpop.f32.mrb[102].mxu0  ;;  %v3819_v59 = vpop.f32.mrb[102].mxu1 }
 0x9b6   :  { %11101 = vst [vmem:[#allocation91_spill] sm:$0xff] %v9685_v1  ;;  %11102 = vst [vmem:[#allocation15_spill] sm:$0xff] %v9688_v11  ;;  %v9697_v57 = vadd.f32 %v3746_v25, %v9652_v40  ;;  %v9700_v52 = vadd.f32 %v3819_v59, %v9657_v23  ;;  %v3748_v12 = vpop.f32.mrb[103].mxu0  ;;  %v3821_v1 = vpop.f32.mrb[103].mxu1 }
 0x9b7   :  { %11103 = vst [vmem:[#allocation16_spill] sm:$0xff] %v9691_v34  ;;  %11104 = vst [vmem:[#allocation17_spill] sm:$0xff] %v9694_v2  ;;  %v9703_v0 = vadd.f32 %v3748_v12, %v9665_v63  ;;  %v9706_v11 = vadd.f32 %v3821_v1, %v9670_v35 }
 0x9b8   :  { %11105 = vst [vmem:[#allocation18_spill] sm:$0xff] %v9697_v57  ;;  %11106 = vst [vmem:[#allocation19_spill] sm:$0xff] %v9700_v52 }
 0x9b9   :  { %11107 = vst [vmem:[#allocation20_spill] sm:$0xff] %v9703_v0  ;;  %11108 = vst [vmem:[#allocation21_spill] sm:$0xff] %v9706_v11 }
 0x9bb   :  { %v3752_v26 = vpop.f32.mrb[104].mxu0  ;;  %v3825_v34 = vpop.f32.mrb[104].mxu1 }
 0x9bc   :  { %v9709_v62 = vadd.f32 %v3752_v26, %v9652_v40  ;;  %v9712_v2 = vadd.f32 %v3825_v34, %v9657_v23  ;;  %v3754_v25 = vpop.f32.mrb[105].mxu0  ;;  %v3827_v57 = vpop.f32.mrb[105].mxu1 }
 0x9bd   :  { %v9715_v59 = vadd.f32 %v3754_v25, %v9665_v63  ;;  %v9718_v52 = vadd.f32 %v3827_v57, %v9670_v35  ;;  %v3756_v12 = vpop.f32.mrb[106].mxu0  ;;  %v3829_v0 = vpop.f32.mrb[106].mxu1 }
 0x9be   :  { %11109 = vst [vmem:[#allocation22_spill] sm:$0xff] %v9709_v62  ;;  %11110 = vst [vmem:[#allocation23_spill] sm:$0xff] %v9712_v2  ;;  %v9721_v1 = vadd.f32 %v3756_v12, %v9652_v40  ;;  %v9724_v11 = vadd.f32 %v3829_v0, %v9657_v23  ;;  %v3758_v26 = vpop.f32.mrb[107].mxu0  ;;  %v3831_v62 = vpop.f32.mrb[107].mxu1 }
 0x9bf   :  { %11111 = vst [vmem:[#allocation24_spill] sm:$0xff] %v9715_v59  ;;  %11112 = vst [vmem:[#allocation25_spill] sm:$0xff] %v9718_v52  ;;  %v9727_v34 = vadd.f32 %v3758_v26, %v9665_v63  ;;  %v9730_v2 = vadd.f32 %v3831_v62, %v9670_v35 }
 0x9c0   :  { %11113 = vst [vmem:[#allocation26_spill] sm:$0xff] %v9721_v1  ;;  %11114 = vst [vmem:[#allocation27_spill] sm:$0xff] %v9724_v11 }
 0x9c1   :  { %11115 = vst [vmem:[#allocation28_spill] sm:$0xff] %v9727_v34  ;;  %11116 = vst [vmem:[#allocation29_spill] sm:$0xff] %v9730_v2 }
 0x9c3   :  { %v3762_v25 = vpop.f32.mrb[108].mxu0  ;;  %v3835_v59 = vpop.f32.mrb[108].mxu1 }
 0x9c4   :  { %v9733_v57 = vadd.f32 %v3762_v25, %v9652_v40  ;;  %v9736_v52 = vadd.f32 %v3835_v59, %v9657_v23  ;;  %v3764_v12 = vpop.f32.mrb[109].mxu0  ;;  %v3837_v1 = vpop.f32.mrb[109].mxu1 }
 0x9c5   :  { %v9739_v0 = vadd.f32 %v3764_v12, %v9665_v63  ;;  %v9742_v11 = vadd.f32 %v3837_v1, %v9670_v35  ;;  %v3766_v26 = vpop.f32.mrb[110].mxu0  ;;  %v3839_v34 = vpop.f32.mrb[110].mxu1  ;;  %v11125_v12 = vsub.s32 4, %v11093_v31 }
 0x9c6   :  { %11117 = vst [vmem:[#allocation30_spill] sm:$0xff] %v9733_v57  ;;  %11118 = vst [vmem:[#allocation31_spill] sm:$0xff] %v9736_v52  ;;  %v9745_v62 = vadd.f32 %v3766_v26, %v9652_v40  ;;  %v9748_v2 = vadd.f32 %v3839_v34, %v9657_v23  ;;  %v3768_v25 = vpop.f32.mrb[111].mxu0  ;;  %v3841_v57 = vpop.f32.mrb[111].mxu1  ;;  %v11127_v34 = vsub.s32 5, %v11093_v31 }
 0x9c7   :  { %11119 = vst [vmem:[#allocation32_spill] sm:$0xff] %v9739_v0  ;;  %11120 = vst [vmem:[#allocation33_spill] sm:$0xff] %v9742_v11  ;;  %v9751_v59 = vadd.f32 %v3768_v25, %v9665_v63  ;;  %v9754_v52 = vadd.f32 %v3841_v57, %v9670_v35  ;;  %v9759_v1 = vrot.slane %v9644_v14, %v11125_v12  ;;  %v11126_v11 = vsub.s32 6, %v11093_v31 }
 0x9c8   :  { %11121 = vst [vmem:[#allocation34_spill] sm:$0xff] %v9745_v62  ;;  %11122 = vst [vmem:[#allocation35_spill] sm:$0xff] %v9748_v2  ;;  %v9769_v2 = vrot.slane %v9644_v14, %v11127_v34  ;;  %v11128_v25 = vsub.s32 7, %v11093_v31 }
 0x9c9   :  { %11123 = vst [vmem:[#allocation36_spill] sm:$0xff] %v9751_v59  ;;  %11124 = vst [vmem:[#allocation37_spill] sm:$0xff] %v9754_v52  ;;  %v9764_v26 = vrot.slane %v9644_v14, %v11126_v11 }
 0x9ca   :  { %v9774_v57 = vrot.slane %v9644_v14, %v11128_v25 }
 0x9eb   :  { %v3878_v52 = vpop.f32.mrb[112].mxu0  ;;  %v3951_v59 = vpop.f32.mrb[112].mxu1 }
 0x9ec   :  { %v9777_v12 = vadd.f32 %v3878_v52, %v9759_v1  ;;  %v9780_v62 = vadd.f32 %v3951_v59, %v9764_v26  ;;  %v3880_v11 = vpop.f32.mrb[113].mxu0  ;;  %v3953_v0 = vpop.f32.mrb[113].mxu1 }
 0x9ed   :  { %v9783_v42 = vadd.f32 %v3880_v11, %v9769_v2  ;;  %v9786_v34 = vadd.f32 %v3953_v0, %v9774_v57  ;;  %v3882_v31 = vpop.f32.mrb[114].mxu0  ;;  %v3955_v6 = vpop.f32.mrb[114].mxu1 }
 0x9ee   :  { %11129 = vst [vmem:[#allocation38_spill] sm:$0xff] %v9777_v12  ;;  %11130 = vst [vmem:[#allocation39_spill] sm:$0xff] %v9780_v62  ;;  %v9789_v14 = vadd.f32 %v3882_v31, %v9759_v1  ;;  %v9792_v25 = vadd.f32 %v3955_v6, %v9764_v26  ;;  %v3884_v52 = vpop.f32.mrb[115].mxu0  ;;  %v3957_v12 = vpop.f32.mrb[115].mxu1 }
 0x9ef   :  { %11131 = vst [vmem:[#allocation40_spill] sm:$0xff] %v9783_v42  ;;  %11132 = vst [vmem:[#allocation71_spill] sm:$0xff] %v9786_v34  ;;  %v9795_v59 = vadd.f32 %v3884_v52, %v9769_v2  ;;  %v9798_v62 = vadd.f32 %v3957_v12, %v9774_v57 }
 0x9f0   :  { %11133 = vst [vmem:[#allocation73_spill] sm:$0xff] %v9789_v14  ;;  %11134 = vst [vmem:[#allocation72_spill] sm:$0xff] %v9792_v25 }
 0x9f1   :  { %11135 = vst [vmem:[#allocation75_spill] sm:$0xff] %v9795_v59  ;;  %11136 = vst [vmem:[#allocation82_spill] sm:$0xff] %v9798_v62 }
 0x9f3   :  { %v3888_v11 = vpop.f32.mrb[116].mxu0  ;;  %v3961_v42 = vpop.f32.mrb[116].mxu1 }
 0x9f4   :  { %v9801_v0 = vadd.f32 %v3888_v11, %v9759_v1  ;;  %v9804_v34 = vadd.f32 %v3961_v42, %v9764_v26  ;;  %v3890_v31 = vpop.f32.mrb[117].mxu0  ;;  %v3963_v14 = vpop.f32.mrb[117].mxu1 }
 0x9f5   :  { %v9807_v6 = vadd.f32 %v3890_v31, %v9769_v2  ;;  %v9810_v25 = vadd.f32 %v3963_v14, %v9774_v57  ;;  %v3892_v52 = vpop.f32.mrb[118].mxu0  ;;  %v3965_v59 = vpop.f32.mrb[118].mxu1 }
 0x9f6   :  { %11137 = vst [vmem:[#allocation85_spill] sm:$0xff] %v9801_v0  ;;  %11138 = vst [vmem:[#allocation84_spill] sm:$0xff] %v9804_v34  ;;  %v9813_v12 = vadd.f32 %v3892_v52, %v9759_v1  ;;  %v9816_v62 = vadd.f32 %v3965_v59, %v9764_v26  ;;  %v3894_v11 = vpop.f32.mrb[119].mxu0  ;;  %v3967_v0 = vpop.f32.mrb[119].mxu1 }
 0x9f7   :  { %11139 = vst [vmem:[#allocation86_spill] sm:$0xff] %v9807_v6  ;;  %11140 = vst [vmem:[#allocation74_spill] sm:$0xff] %v9810_v25  ;;  %v9819_v42 = vadd.f32 %v3894_v11, %v9769_v2  ;;  %v9822_v34 = vadd.f32 %v3967_v0, %v9774_v57 }
 0x9f8   :  { %11141 = vst [vmem:[#allocation77_spill] sm:$0xff] %v9813_v12  ;;  %11142 = vst [vmem:[#allocation76_spill] sm:$0xff] %v9816_v62 }
 0x9f9   :  { %11143 = vst [vmem:[#allocation78_spill] sm:$0xff] %v9819_v42  ;;  %11144 = vst [vmem:[#allocation79_spill] sm:$0xff] %v9822_v34 }
 0x9fb   :  { %v3898_v31 = vpop.f32.mrb[120].mxu0  ;;  %v3971_v6 = vpop.f32.mrb[120].mxu1 }
 0x9fc   :  { %v9825_v14 = vadd.f32 %v3898_v31, %v9759_v1  ;;  %v9828_v25 = vadd.f32 %v3971_v6, %v9764_v26  ;;  %v3900_v52 = vpop.f32.mrb[121].mxu0  ;;  %v3973_v12 = vpop.f32.mrb[121].mxu1 }
 0x9fd   :  { %v9831_v59 = vadd.f32 %v3900_v52, %v9769_v2  ;;  %v9834_v62 = vadd.f32 %v3973_v12, %v9774_v57  ;;  %v3902_v11 = vpop.f32.mrb[122].mxu0  ;;  %v3975_v42 = vpop.f32.mrb[122].mxu1 }
 0x9fe   :  { %11145 = vst [vmem:[#allocation81_spill] sm:$0xff] %v9825_v14  ;;  %11146 = vst [vmem:[#allocation80_spill] sm:$0xff] %v9828_v25  ;;  %v9837_v0 = vadd.f32 %v3902_v11, %v9759_v1  ;;  %v9840_v34 = vadd.f32 %v3975_v42, %v9764_v26  ;;  %v3904_v31 = vpop.f32.mrb[123].mxu0  ;;  %v3977_v14 = vpop.f32.mrb[123].mxu1 }
 0x9ff   :  { %11147 = vst [vmem:[#allocation83_spill] sm:$0xff] %v9831_v59  ;;  %11148 = vst [vmem:[#allocation41_spill] sm:$0xff] %v9834_v62  ;;  %v9843_v6 = vadd.f32 %v3904_v31, %v9769_v2  ;;  %v9846_v25 = vadd.f32 %v3977_v14, %v9774_v57 }
 0xa00   :  { %11149 = vst [vmem:[#allocation43_spill] sm:$0xff] %v9837_v0  ;;  %11150 = vst [vmem:[#allocation44_spill] sm:$0xff] %v9840_v34 }
 0xa01   :  { %11151 = vst [vmem:[#allocation42_spill] sm:$0xff] %v9843_v6  ;;  %11152 = vst [vmem:[#allocation48_spill] sm:$0xff] %v9846_v25 }
 0xa03   :  { %v3908_v52 = vpop.f32.mrb[124].mxu0  ;;  %v3981_v59 = vpop.f32.mrb[124].mxu1 }
 0xa04   :  { %v9849_v12 = vadd.f32 %v3908_v52, %v9759_v1  ;;  %v9852_v62 = vadd.f32 %v3981_v59, %v9764_v26  ;;  %v3910_v11 = vpop.f32.mrb[125].mxu0  ;;  %v3983_v0 = vpop.f32.mrb[125].mxu1  ;;  %v3806_v52 = vadd.f32 %v9648_v55, %v9657_v23  ;;  %v3735_v59 = vadd.f32 %v9659_v5, %v9665_v63 }
 0xa05   :  { %v9855_v42 = vadd.f32 %v3910_v11, %v9769_v2  ;;  %v9858_v34 = vadd.f32 %v3983_v0, %v9774_v57  ;;  %v3912_v31 = vpop.f32.mrb[126].mxu0  ;;  %v3985_v6 = vpop.f32.mrb[126].mxu1  ;;  %v3808_v11 = vadd.f32 %v9661_v51, %v9670_v35 }
 0xa06   :  { %11153 = vst [vmem:[#allocation107_spill] sm:$0xff] %v9849_v12  ;;  %11154 = vst [vmem:[#allocation108_spill] sm:$0xff] %v9852_v62  ;;  %v3914_v14 = vpop.f32.mrb[127].mxu0  ;;  %v3987_v25 = vpop.f32.mrb[127].mxu1 }
 0xa07   :  { %11155 = vst [vmem:[#allocation109_spill] sm:$0xff] %v9855_v42  ;;  %11156 = vst [vmem:[#allocation110_spill] sm:$0xff] %v9858_v34 }
 0xa0c   :  { %v4317_v42 = vpop.f32.mrb[128].mxu0  ;;  %v4358_v62 = vpop.f32.mrb[128].mxu1 }
 0xa0d   :  { %v4365_v0 = vadd.f32 %v4317_v42, %v3733_v32  ;;  %v4367_v34 = vadd.f32 %v4358_v62, %v3806_v52  ;;  %v4319_v12 = vpop.f32.mrb[129].mxu0  ;;  %v4360_v33 = vpop.f32.mrb[129].mxu1  ;;  %v3915_v42 = vadd.f32 %v3914_v14, %v9769_v2 }
 0xa0e   :  { %v4366_v41 = vadd.f32 %v4319_v12, %v3735_v59  ;;  %v4368_v24 = vadd.f32 %v4360_v33, %v3808_v11  ;;  %v4321_v56 = vpop.f32.mrb[130].mxu0  ;;  %v4362_v47 = vpop.f32.mrb[130].mxu1 }
 0xa0f   :  { %v7130_v61 = vmul.f32 -1.442695, %v4365_v0  ;;  %v4322_v40 = vpop.f32.mrb[131].mxu0  ;;  %v4363_v44 = vpop.f32.mrb[131].mxu1  ;;  %v7132_v63 = vmul.f32 -1.442695, %v4367_v34 }
 0xa10   :  { %v7131_v55 = vmul.f32 -1.442695, %v4366_v41  ;;  %v3913_v44 = vadd.f32 %v3912_v31, %v9759_v1  ;;  %v3986_v41 = vadd.f32 %v3985_v6, %v9764_v26 }
 0xa11   :  { %7622 = vpow2.f32 %v7130_v61 }
 0xa12   :  { %7624 = vpow2.f32 %v7131_v55 }
 0xa13   :  { %7626 = vtanh.f32 %v4368_v24  ;;  %v3988_v24 = vadd.f32 %v3987_v25, %v9774_v57 }
 0xa14   :  { %7628 = vpow2.f32 %v7132_v63 }
 0xa1b   :  { %v7623_v5 = vpop.eup %7622 }
 0xa1c   :  { %v4629_v23 = vadd.f32 1.0, %v7623_v5  ;;  %v7625_v35 = vpop.eup %7624 }
 0xa1d   :  { %v4630_v32 = vadd.f32 1.0, %v7625_v35  ;;  %v7627_v51 = vpop.eup %7626 }
 0xa1e   :  { %7630 = vrcp.f32 %v4629_v23  ;;  %v7629_v62 = vpop.eup %7628 }
 0xa1f   :  { %7632 = vrcp.f32 %v4630_v32  ;;  %v4631_v12 = vadd.f32 1.0, %v7629_v62 }
 0xa21   :  { %7634 = vrcp.f32 %v4631_v12 }
 0xa28   :  { %v7631_v33 = vpop.eup %7630 }
 0xa29   :  { %v4640_v56 = vmul.f32 %v7631_v33, %v7627_v51  ;;  %v7633_v47 = vpop.eup %7632 }
 0xa2a   :  { %v4639_v34 = vmul.f32 %v7633_v47, %v9328_v3 }
 0xa2b   :  { %v7635_v57 = vpop.eup %7634 }
 0xa2c   :  { %v4568_v52 = vpop.f32.mrb[132].mxu0  ;;  %v4609_v59 = vpop.f32.mrb[132].mxu1  ;;  %v9873_v11 = vadd.f32 %v4640_v56, %v4639_v34  ;;  %v11157_v56 = vld [vmem:[#allocation99_spill] sm:$0xff] }
 0xa2d   :  { %v4616_v0 = vadd.f32 %v4568_v52, %v3913_v44  ;;  %v4618_v61 = vadd.f32 %v4609_v59, %v3986_v41  ;;  %v4570_v40 = vpop.f32.mrb[133].mxu0  ;;  %v4611_v55 = vpop.f32.mrb[133].mxu1  ;;  %v11158_v44 = vld [vmem:[#allocation63_spill] sm:$0xff]  ;;  %v11159_v41 = vld [vmem:[#allocation65_spill] sm:$0xff] }
 0xa2e   :  { %v4617_v63 = vadd.f32 %v4570_v40, %v3915_v42  ;;  %v4619_v5 = vadd.f32 %v4611_v55, %v3988_v24  ;;  %v4572_v1 = vpop.f32.mrb[134].mxu0  ;;  %v4613_v31 = vpop.f32.mrb[134].mxu1  ;;  %7636 = vtanh.f32 %v9873_v11  ;;  %v11160_v42 = vld [vmem:[#allocation64_spill] sm:$0xff]  ;;  %v11161_v24 = vld [vmem:[#allocation67_spill] sm:$0xff]  ;;  %v11163_v55 = vld [vmem:[#allocation90_spill] sm:$0xff] }
 0xa2f   :  { %v7133_v3 = vmul.f32 -1.442695, %v4616_v0  ;;  %v4573_v26 = vpop.f32.mrb[135].mxu0  ;;  %v4614_v2 = vpop.f32.mrb[135].mxu1  ;;  %v7135_v14 = vmul.f32 -1.442695, %v4618_v61 }
 0xa30   :  { %v7134_v6 = vmul.f32 -1.442695, %v4617_v63  ;;  %v11162_v61 = vld [vmem:[#allocation45_spill] sm:$0xff]  ;;  %v11166_v1 = vld [vmem:[#allocation94_spill] sm:$0xff] }
 0xa31   :  { %7638 = vpow2.f32 %v7133_v3  ;;  %v11164_v63 = vld [vmem:[#allocation93_spill] sm:$0xff]  ;;  %v11167_v3 = vld [vmem:[#allocation66_spill] sm:$0xff] }
 0xa32   :  { %7640 = vpow2.f32 %v7134_v6  ;;  %v11168_v26 = vld [vmem:[#allocation69_spill] sm:$0xff] }
 0xa33   :  { %7642 = vtanh.f32 %v4619_v5  ;;  %v11165_v5 = vld [vmem:[#allocation92_spill] sm:$0xff] }
 0xa34   :  { %7644 = vpow2.f32 %v7135_v14  ;;  %v11169_v14 = vld [vmem:[#allocation51_spill] sm:$0xff] }
 0xa38   :  { %v7637_v25 = vpop.eup %7636 }
 0xa39   :  { %v4643_v23 = vmul.f32 %v7637_v25, %v7635_v57 }
 0xa3b   :  { %v7639_v35 = vpop.eup %7638  ;;  %4668 = vst [vmem:[%s10571_s13] sm:$0xff] %v4643_v23  ;;  %v4674_v51 = vpack.c.bf16 %v4643_v23, %v4643_v23  ;;  %v11170_v23 = vld [vmem:[#allocation53_spill] sm:$0xff] }
 0xa3c   :  { %v4653_v32 = vadd.f32 1.0, %v7639_v35  ;;  %v7641_v62 = vpop.eup %7640  ;;  %v11171_v35 = vld [vmem:[#allocation52_spill] sm:$0xff] }
 0xa3d   :  { %v4654_v33 = vadd.f32 1.0, %v7641_v62  ;;  %4708 = vmatmul.mubr.bf16.vlgmr.msra.gmra.mrb[136].mxu0 %v4674_v51  ;;  %4749 = vmatmul.mubr.bf16.vlgmr.msra.gmra.mrb[136].mxu1 %v4674_v51  ;;  %v7643_v47 = vpop.eup %7642  ;;  %v11173_v51 = vld [vmem:[#allocation103_spill] sm:$0xff]  ;;  %v11174_v62 = vld [vmem:[#allocation105_spill] sm:$0xff] }
 0xa3e   :  { %7646 = vrcp.f32 %v4653_v32  ;;  %4767 = vmatpush1.bf16.msra.mxu0 %v9499_v30  ;;  %4808 = vmatpush1.bf16.msra.mxu1 %v9501_v16  ;;  %v7645_v12 = vpop.eup %7644  ;;  %v11172_v32 = vld [vmem:[#allocation54_spill] sm:$0xff] }
 0xa3f   :  { %7648 = vrcp.f32 %v4654_v33  ;;  %4768 = vmatprep.subr.bf16.mxu0 %v9509_v21  ;;  %4809 = vmatprep.subr.bf16.mxu1 %v9511_v19  ;;  %v4655_v0 = vadd.f32 1.0, %v7645_v12  ;;  %v11175_v33 = vld [vmem:[#allocation104_spill] sm:$0xff]  ;;  %v11177_v12 = vld [vmem:[#allocation55_spill] sm:$0xff] }
 0xa40   :  { %4798 = vmatprep.mubr.bf16.mxu0 %v10767_v18  ;;  %4839 = vmatprep.mubr.bf16.mxu1 %v10767_v18 }
 0xa41   :  { %7650 = vrcp.f32 %v4655_v0  ;;  %v11181_v0 = vld [vmem:[#allocation98_spill] sm:$0xff] }
 0xa42   :  { %4769 = vmatpush1.bf16.msra.mxu0 %v9517_v7  ;;  %4810 = vmatpush1.bf16.msra.mxu1 %v9519_v45 }
 0xa43   :  { %4770 = vmatprep.subr.bf16.mxu0 %v9523_v17  ;;  %4811 = vmatprep.subr.bf16.mxu1 %v11157_v56 }
 0xa46   :  { %4771 = vmatpush1.bf16.msra.mxu0 %v11158_v44  ;;  %4812 = vmatpush1.bf16.msra.mxu1 %v11159_v41 }
 0xa47   :  { %4772 = vmatprep.subr.bf16.mxu0 %v11160_v42  ;;  %4813 = vmatprep.subr.bf16.mxu1 %v11161_v24 }
 0xa48   :  { %v7647_v34 = vpop.eup %7646 }
 0xa49   :  { %v4664_v52 = vmul.f32 %v7647_v34, %v7643_v47  ;;  %v7649_v59 = vpop.eup %7648  ;;  %v11176_v47 = vld [vmem:[#allocation106_spill] sm:$0xff]  ;;  %v11178_v34 = vld [vmem:[#allocation57_spill] sm:$0xff] }
 0xa4a   :  { %v4663_v40 = vmul.f32 %v7649_v59, %v11162_v61  ;;  %4773 = vmatpush1.bf16.msra.mxu0 %v11163_v55  ;;  %4814 = vmatpush1.bf16.msra.mxu1 %v11164_v63  ;;  %v11180_v59 = vld [vmem:[#allocation59_spill] sm:$0xff]  ;;  %v11182_v61 = vld [vmem:[#allocation101_spill] sm:$0xff] }
 0xa4b   :  { %4774 = vmatprep.subr.bf16.mxu0 %v11165_v5  ;;  %4815 = vmatprep.subr.bf16.mxu1 %v11166_v1  ;;  %v7651_v2 = vpop.eup %7650 }
 0xa4c   :  { %v9898_v31 = vadd.f32 %v4664_v52, %v4663_v40  ;;  %v11179_v52 = vld [vmem:[#allocation56_spill] sm:$0xff] }
 0xa4d   :  { %v11183_v40 = vld [vmem:[#allocation100_spill] sm:$0xff] }
 0xa4e   :  { %7652 = vtanh.f32 %v9898_v31  ;;  %4775 = vmatpush1.bf16.msra.mxu0 %v9555_v58  ;;  %4816 = vmatpush1.bf16.msra.mxu1 %v9557_v4 }
 0xa4f   :  { %4776 = vmatprep.subr.bf16.mxu0 %v9561_v9  ;;  %4817 = vmatprep.subr.bf16.mxu1 %v11167_v3 }
 0xa52   :  { %4777 = vmatpush1.bf16.msra.mxu0 %v11168_v26  ;;  %4818 = vmatpush1.bf16.msra.mxu1 %v9569_v22 }
 0xa53   :  { %4778 = vmatprep.subr.bf16.mxu0 %v9573_v36  ;;  %4819 = vmatprep.subr.bf16.mxu1 %v9575_v39 }
 0xa56   :  { %4779 = vmatpush1.bf16.msra.mxu0 %v9579_v37  ;;  %4820 = vmatpush1.bf16.msra.mxu1 %v9581_v13 }
 0xa57   :  { %4780 = vmatprep.subr.bf16.mxu0 %v9585_v46  ;;  %4821 = vmatprep.subr.bf16.mxu1 %v9587_v10 }
 0xa58   :  { %v7653_v6 = vpop.eup %7652 }
 0xa59   :  { %v4667_v57 = vmul.f32 %v7653_v6, %v7651_v2  ;;  %v11184_v2 = vld [vmem:[#allocation102_spill] sm:$0xff] }
 0xa5a   :  { %4781 = vmatpush1.bf16.msra.mxu0 %v9591_v20  ;;  %4822 = vmatpush1.bf16.msra.mxu1 %v9593_v29  ;;  %v11185_v6 = vld [vmem:[#allocation58_spill] sm:$0xff] }
 0xa5b   :  { %4669 = vst [vmem:[%s10571_s13 + $0x78] sm:$0xff] %v4667_v57  ;;  %v4765_v25 = vpack.c.bf16 %v4667_v57, %v4667_v57  ;;  %4907 = vmatprep.subr.bf16.mxu0 %v9383_v38  ;;  %4948 = vmatprep.subr.bf16.mxu1 %v9385_v48  ;;  %v11186_v57 = vld [vmem:[#allocation61_spill] sm:$0xff] }
 0xa5d   :  { %4799 = vmatmul.mubr.bf16.vlgmr.msra.gmra.mrb[140].mxu0 %v4765_v25  ;;  %4840 = vmatmul.mubr.bf16.vlgmr.msra.gmra.mrb[140].mxu1 %v4765_v25  ;;  %v11187_v25 = vld [vmem:[#allocation60_spill] sm:$0xff] }
 0xa5e   :  { %4908 = vmatpush1.bf16.msra.mxu0 %v9389_v50  ;;  %4949 = vmatpush1.bf16.msra.mxu1 %v9391_v53 }
 0xa5f   :  { %4909 = vmatprep.subr.bf16.mxu0 %v9393_v27  ;;  %4950 = vmatprep.subr.bf16.mxu1 %v9395_v54 }
 0xa60   :  { %4939 = vmatprep.mubr.bf16.mxu0 %v10767_v18  ;;  %4980 = vmatprep.mubr.bf16.mxu1 %v10767_v18 }
 0xa62   :  { %4910 = vmatpush1.bf16.msra.mxu0 %v9403_v60  ;;  %4951 = vmatpush1.bf16.msra.mxu1 %v9405_v28 }
 0xa63   :  { %4911 = vmatprep.subr.bf16.mxu0 %v9409_v49  ;;  %4952 = vmatprep.subr.bf16.mxu1 %v9411_v15 }
 0xa66   :  { %4912 = vmatpush1.bf16.msra.mxu0 %v9415_v43  ;;  %4953 = vmatpush1.bf16.msra.mxu1 %v9417_v8 }
 0xa67   :  { %4913 = vmatprep.subr.bf16.mxu0 %v11169_v14  ;;  %4954 = vmatprep.subr.bf16.mxu1 %v11170_v23 }
 0xa6a   :  { %4914 = vmatpush1.bf16.msra.mxu0 %v11171_v35  ;;  %4955 = vmatpush1.bf16.msra.mxu1 %v11172_v32  ;;  %v11194_v32 = vld [vmem:[#allocation88_spill] sm:$0xff] }
 0xa6b   :  { %4915 = vmatprep.subr.bf16.mxu0 %v11173_v51  ;;  %4956 = vmatprep.subr.bf16.mxu1 %v11174_v62  ;;  %v11193_v51 = vld [vmem:[#allocation89_spill] sm:$0xff] }
 0xa6e   :  { %4916 = vmatpush1.bf16.msra.mxu0 %v11175_v33  ;;  %4957 = vmatpush1.bf16.msra.mxu1 %v11176_v47  ;;  %v11191_v47 = vld [vmem:[#allocation70_spill] sm:$0xff]  ;;  %v11192_v33 = vld [vmem:[#allocation87_spill] sm:$0xff] }
 0xa6f   :  { %4917 = vmatprep.subr.bf16.mxu0 %v11177_v12  ;;  %4958 = vmatprep.subr.bf16.mxu1 %v11178_v34  ;;  %v11188_v12 = vld [vmem:[#allocation62_spill] sm:$0xff]  ;;  %v11189_v34 = vld [vmem:[#allocation95_spill] sm:$0xff] }
 0xa72   :  { %4918 = vmatpush1.bf16.msra.mxu0 %v11179_v52  ;;  %4959 = vmatpush1.bf16.msra.mxu1 %v11180_v59  ;;  %v11190_v52 = vld [vmem:[#allocation97_spill] sm:$0xff] }
 0xa73   :  { %4919 = vmatprep.subr.bf16.mxu0 %v11181_v0  ;;  %4960 = vmatprep.subr.bf16.mxu1 %v11182_v61 }
 0xa76   :  { %4920 = vmatpush1.bf16.msra.mxu0 %v11183_v40  ;;  %4961 = vmatpush1.bf16.msra.mxu1 %v11184_v2 }
 0xa77   :  { %4921 = vmatprep.subr.bf16.mxu0 %v11185_v6  ;;  %4962 = vmatprep.subr.bf16.mxu1 %v11186_v57 }
 0xa7a   :  { %4922 = vmatpush1.bf16.msra.mxu0 %v11187_v25  ;;  %4963 = vmatpush1.bf16.msra.mxu1 %v11188_v12 }
 0xa7b   :  { %4998 = vmatprep.subr.bf16.mxu0 %v11189_v34  ;;  %5039 = vmatprep.subr.bf16.mxu1 %v11190_v52 }
 0xb10   :  { %v4709_v59 = vpop.f32.mrb[136].mxu0  ;;  %v4750_v0 = vpop.f32.mrb[136].mxu1 }
 0xb11   :  { %v4757_v61 = vadd.f32 %v4709_v59, %v11191_v47  ;;  %v4759_v40 = vadd.f32 %v4750_v0, %v11192_v33  ;;  %v4711_v62 = vpop.f32.mrb[137].mxu0  ;;  %v4752_v2 = vpop.f32.mrb[137].mxu1 }
 0xb12   :  { %v4758_v6 = vadd.f32 %v4711_v62, %v11193_v51  ;;  %v4760_v57 = vadd.f32 %v4752_v2, %v11194_v32  ;;  %v4713_v35 = vpop.f32.mrb[138].mxu0  ;;  %v4754_v25 = vpop.f32.mrb[138].mxu1 }
 0xb13   :  { %v7136_v23 = vmul.f32 -1.442695, %v4757_v61  ;;  %v4714_v12 = vpop.f32.mrb[139].mxu0  ;;  %v4755_v14 = vpop.f32.mrb[139].mxu1  ;;  %v7138_v52 = vmul.f32 -1.442695, %v4759_v40 }
 0xb14   :  { %v7137_v34 = vmul.f32 -1.442695, %v4758_v6  ;;  %v11195_v61 = vld [vmem:[#allocation107_spill] sm:$0xff]  ;;  %v11196_v40 = vld [vmem:[#allocation108_spill] sm:$0xff]  ;;  %v11197_v6 = vld [vmem:[#allocation109_spill] sm:$0xff] }
 0xb15   :  { %7654 = vpow2.f32 %v7136_v23  ;;  %v11198_v25 = vld [vmem:[#allocation110_spill] sm:$0xff] }
 0xb16   :  { %7656 = vpow2.f32 %v7137_v34 }
 0xb17   :  { %7658 = vtanh.f32 %v4760_v57 }
 0xb18   :  { %7660 = vpow2.f32 %v7138_v52 }
 0xb1f   :  { %v7655_v8 = vpop.eup %7654 }
 0xb20   :  { %v4861_v43 = vadd.f32 1.0, %v7655_v8  ;;  %v7657_v47 = vpop.eup %7656 }
 0xb21   :  { %v4862_v33 = vadd.f32 1.0, %v7657_v47  ;;  %v7659_v51 = vpop.eup %7658 }
 0xb22   :  { %7662 = vrcp.f32 %v4861_v43  ;;  %v7661_v62 = vpop.eup %7660 }
 0xb23   :  { %7664 = vrcp.f32 %v4862_v33  ;;  %v4863_v0 = vadd.f32 1.0, %v7661_v62 }
 0xb25   :  { %7666 = vrcp.f32 %v4863_v0 }
 0xb2c   :  { %v7663_v32 = vpop.eup %7662 }
 0xb2d   :  { %v4872_v35 = vmul.f32 %v7663_v32, %v7659_v51  ;;  %v7665_v59 = vpop.eup %7664 }
 0xb2e   :  { %v4871_v14 = vmul.f32 %v7665_v59, %v9873_v11 }
 0xb2f   :  { %v7667_v59 = vpop.eup %7666 }
 0xb30   :  { %v4800_v12 = vpop.f32.mrb[140].mxu0  ;;  %v4841_v23 = vpop.f32.mrb[140].mxu1  ;;  %v9959_v34 = vadd.f32 %v4872_v35, %v4871_v14 }
 0xb31   :  { %v4848_v8 = vadd.f32 %v4800_v12, %v11195_v61  ;;  %v4850_v2 = vadd.f32 %v4841_v23, %v11196_v40  ;;  %v4802_v52 = vpop.f32.mrb[141].mxu0  ;;  %v4843_v43 = vpop.f32.mrb[141].mxu1 }
 0xb32   :  { %v4849_v57 = vadd.f32 %v4802_v52, %v11197_v6  ;;  %v4851_v47 = vadd.f32 %v4843_v43, %v11198_v25  ;;  %v4804_v33 = vpop.f32.mrb[142].mxu0  ;;  %v4845_v51 = vpop.f32.mrb[142].mxu1  ;;  %7668 = vtanh.f32 %v9959_v34 }
 0xb33   :  { %v7139_v11 = vmul.f32 -1.442695, %v4848_v8  ;;  %v4805_v62 = vpop.f32.mrb[143].mxu0  ;;  %v4846_v32 = vpop.f32.mrb[143].mxu1  ;;  %v7141_v12 = vmul.f32 -1.442695, %v4850_v2 }
 0xb34   :  { %v7140_v35 = vmul.f32 -1.442695, %v4849_v57 }
 0xb35   :  { %7670 = vpow2.f32 %v7139_v11 }
 0xb36   :  { %7672 = vpow2.f32 %v7140_v35  ;;  %v11199_v35 = vld [vmem:[#allocation46_spill] sm:$0xff] }
 0xb37   :  { %7674 = vtanh.f32 %v4851_v47 }
 0xb38   :  { %7676 = vpow2.f32 %v7141_v12  ;;  %v11202_v12 = vld [vmem:[#allocation53_spill] sm:$0xff] }
 0xb3c   :  { %v7669_v14 = vpop.eup %7668 }
 0xb3d   :  { %v4875_v23 = vmul.f32 %v7669_v14, %v7667_v59  ;;  %v11200_v59 = vld [vmem:[#allocation47_spill] sm:$0xff] }
 0xb3e   :  { %v11201_v14 = vld [vmem:[#allocation51_spill] sm:$0xff] }
 0xb3f   :  { %v7671_v61 = vpop.eup %7670  ;;  %4900 = vst [vmem:[%s10571_s13 + $0x10] sm:$0xff] %v4875_v23  ;;  %v4906_v40 = vpack.c.bf16 %v4875_v23, %v4875_v23  ;;  %v11203_v23 = vld [vmem:[#allocation52_spill] sm:$0xff] }
 0xb40   :  { %v4885_v0 = vadd.f32 1.0, %v7671_v61  ;;  %v7673_v52 = vpop.eup %7672  ;;  %v11204_v61 = vld [vmem:[#allocation54_spill] sm:$0xff] }
 0xb41   :  { %v4886_v8 = vadd.f32 1.0, %v7673_v52  ;;  %4940 = vmatmul.mubr.bf16.vlgmr.msra.gmra.mrb[144].mxu0 %v4906_v40  ;;  %4981 = vmatmul.mubr.bf16.vlgmr.msra.gmra.mrb[144].mxu1 %v4906_v40  ;;  %v7675_v2 = vpop.eup %7674  ;;  %v11206_v40 = vld [vmem:[#allocation105_spill] sm:$0xff]  ;;  %v11207_v52 = vld [vmem:[#allocation104_spill] sm:$0xff] }
 0xb42   :  { %7678 = vrcp.f32 %v4885_v0  ;;  %4999 = vmatpush1.bf16.msra.mxu0 %v9499_v30  ;;  %5040 = vmatpush1.bf16.msra.mxu1 %v9501_v16  ;;  %v7677_v43 = vpop.eup %7676  ;;  %v11205_v0 = vld [vmem:[#allocation103_spill] sm:$0xff] }
 0xb43   :  { %7680 = vrcp.f32 %v4886_v8  ;;  %5000 = vmatprep.subr.bf16.mxu0 %v9509_v21  ;;  %5041 = vmatprep.subr.bf16.mxu1 %v9511_v19  ;;  %v4887_v47 = vadd.f32 1.0, %v7677_v43  ;;  %v11208_v8 = vld [vmem:[#allocation106_spill] sm:$0xff]  ;;  %v11210_v43 = vld [vmem:[#allocation57_spill] sm:$0xff] }
 0xb44   :  { %5030 = vmatprep.mubr.bf16.mxu0 %v10767_v18  ;;  %5071 = vmatprep.mubr.bf16.mxu1 %v10767_v18 }
 0xb45   :  { %7682 = vrcp.f32 %v4887_v47  ;;  %v11214_v47 = vld [vmem:[#allocation101_spill] sm:$0xff] }
 0xb46   :  { %5001 = vmatpush1.bf16.msra.mxu0 %v9517_v7  ;;  %5042 = vmatpush1.bf16.msra.mxu1 %v9519_v45 }
 0xb47   :  { %5002 = vmatprep.subr.bf16.mxu0 %v9523_v17  ;;  %5043 = vmatprep.subr.bf16.mxu1 %v11157_v56 }
 0xb4a   :  { %5003 = vmatpush1.bf16.msra.mxu0 %v11158_v44  ;;  %5044 = vmatpush1.bf16.msra.mxu1 %v11159_v41 }
 0xb4b   :  { %5004 = vmatprep.subr.bf16.mxu0 %v11160_v42  ;;  %5045 = vmatprep.subr.bf16.mxu1 %v11161_v24 }
 0xb4c   :  { %v7679_v6 = vpop.eup %7678 }
 0xb4d   :  { %v4896_v57 = vmul.f32 %v7679_v6, %v7675_v2  ;;  %v7681_v25 = vpop.eup %7680  ;;  %v11209_v2 = vld [vmem:[#allocation55_spill] sm:$0xff]  ;;  %v11211_v6 = vld [vmem:[#allocation56_spill] sm:$0xff] }
 0xb4e   :  { %v4895_v33 = vmul.f32 %v7681_v25, %v9898_v31  ;;  %5005 = vmatpush1.bf16.msra.mxu0 %v11163_v55  ;;  %5046 = vmatpush1.bf16.msra.mxu1 %v11164_v63  ;;  %v11213_v25 = vld [vmem:[#allocation98_spill] sm:$0xff] }
 0xb4f   :  { %5006 = vmatprep.subr.bf16.mxu0 %v11165_v5  ;;  %5047 = vmatprep.subr.bf16.mxu1 %v11166_v1  ;;  %v7683_v31 = vpop.eup %7682 }
 0xb50   :  { %v9988_v51 = vadd.f32 %v4896_v57, %v4895_v33  ;;  %v11212_v57 = vld [vmem:[#allocation59_spill] sm:$0xff]  ;;  %v11215_v33 = vld [vmem:[#allocation100_spill] sm:$0xff] }
 0xb52   :  { %7684 = vtanh.f32 %v9988_v51  ;;  %5007 = vmatpush1.bf16.msra.mxu0 %v9555_v58  ;;  %5048 = vmatpush1.bf16.msra.mxu1 %v9557_v4 }
 0xb53   :  { %5008 = vmatprep.subr.bf16.mxu0 %v9561_v9  ;;  %5049 = vmatprep.subr.bf16.mxu1 %v11167_v3 }
 0xb56   :  { %5009 = vmatpush1.bf16.msra.mxu0 %v11168_v26  ;;  %5050 = vmatpush1.bf16.msra.mxu1 %v9569_v22 }
 0xb57   :  { %5010 = vmatprep.subr.bf16.mxu0 %v9573_v36  ;;  %5051 = vmatprep.subr.bf16.mxu1 %v9575_v39 }
 0xb5a   :  { %5011 = vmatpush1.bf16.msra.mxu0 %v9579_v37  ;;  %5052 = vmatpush1.bf16.msra.mxu1 %v9581_v13 }
 0xb5b   :  { %5012 = vmatprep.subr.bf16.mxu0 %v9585_v46  ;;  %5053 = vmatprep.subr.bf16.mxu1 %v9587_v10 }
 0xb5c   :  { %v7685_v11 = vpop.eup %7684 }
 0xb5d   :  { %v4899_v62 = vmul.f32 %v7685_v11, %v7683_v31  ;;  %v11216_v31 = vld [vmem:[#allocation102_spill] sm:$0xff] }
 0xb5e   :  { %5013 = vmatpush1.bf16.msra.mxu0 %v9591_v20  ;;  %5054 = vmatpush1.bf16.msra.mxu1 %v9593_v29  ;;  %v11217_v11 = vld [vmem:[#allocation58_spill] sm:$0xff] }
 0xb5f   :  { %4901 = vst [vmem:[%s10571_s13 + $0x68] sm:$0xff] %v4899_v62  ;;  %v4997_v32 = vpack.c.bf16 %v4899_v62, %v4899_v62  ;;  %5139 = vmatprep.subr.bf16.mxu0 %v9383_v38  ;;  %5180 = vmatprep.subr.bf16.mxu1 %v9385_v48  ;;  %v11218_v62 = vld [vmem:[#allocation61_spill] sm:$0xff] }
 0xb61   :  { %5031 = vmatmul.mubr.bf16.vlgmr.msra.gmra.mrb[148].mxu0 %v4997_v32  ;;  %5072 = vmatmul.mubr.bf16.vlgmr.msra.gmra.mrb[148].mxu1 %v4997_v32  ;;  %v11219_v32 = vld [vmem:[#allocation60_spill] sm:$0xff] }
 0xb62   :  { %5140 = vmatpush1.bf16.msra.mxu0 %v9389_v50  ;;  %5181 = vmatpush1.bf16.msra.mxu1 %v9391_v53 }
 0xb63   :  { %5141 = vmatprep.subr.bf16.mxu0 %v9393_v27  ;;  %5182 = vmatprep.subr.bf16.mxu1 %v9395_v54 }
 0xb64   :  { %5171 = vmatprep.mubr.bf16.mxu0 %v10767_v18  ;;  %5212 = vmatprep.mubr.bf16.mxu1 %v10767_v18 }
 0xb66   :  { %5142 = vmatpush1.bf16.msra.mxu0 %v9403_v60  ;;  %5183 = vmatpush1.bf16.msra.mxu1 %v9405_v28 }
 0xb67   :  { %5143 = vmatprep.subr.bf16.mxu0 %v9409_v49  ;;  %5184 = vmatprep.subr.bf16.mxu1 %v9411_v15 }
 0xb6a   :  { %5144 = vmatpush1.bf16.msra.mxu0 %v11199_v35  ;;  %5185 = vmatpush1.bf16.msra.mxu1 %v11200_v59 }
 0xb6b   :  { %5145 = vmatprep.subr.bf16.mxu0 %v11201_v14  ;;  %5186 = vmatprep.subr.bf16.mxu1 %v11202_v12 }
 0xb6e   :  { %5146 = vmatpush1.bf16.msra.mxu0 %v11203_v23  ;;  %5187 = vmatpush1.bf16.msra.mxu1 %v11204_v61  ;;  %v11226_v61 = vld [vmem:[#allocation17_spill] sm:$0xff] }
 0xb6f   :  { %5147 = vmatprep.subr.bf16.mxu0 %v11205_v0  ;;  %5188 = vmatprep.subr.bf16.mxu1 %v11206_v40  ;;  %v11225_v0 = vld [vmem:[#allocation16_spill] sm:$0xff] }
 0xb72   :  { %5148 = vmatpush1.bf16.msra.mxu0 %v11207_v52  ;;  %5189 = vmatpush1.bf16.msra.mxu1 %v11208_v8  ;;  %v11223_v8 = vld [vmem:[#allocation91_spill] sm:$0xff] }
 0xb73   :  { %5149 = vmatprep.subr.bf16.mxu0 %v11209_v2  ;;  %5190 = vmatprep.subr.bf16.mxu1 %v11210_v43  ;;  %v11220_v2 = vld [vmem:[#allocation62_spill] sm:$0xff]  ;;  %v11221_v43 = vld [vmem:[#allocation95_spill] sm:$0xff] }
 0xb74   :  { %v11224_v52 = vld [vmem:[#allocation15_spill] sm:$0xff] }
 0xb76   :  { %5150 = vmatpush1.bf16.msra.mxu0 %v11211_v6  ;;  %5191 = vmatpush1.bf16.msra.mxu1 %v11212_v57  ;;  %v11222_v6 = vld [vmem:[#allocation97_spill] sm:$0xff] }
 0xb77   :  { %5151 = vmatprep.subr.bf16.mxu0 %v11213_v25  ;;  %5192 = vmatprep.subr.bf16.mxu1 %v11214_v47 }
 0xb7a   :  { %5152 = vmatpush1.bf16.msra.mxu0 %v11215_v33  ;;  %5193 = vmatpush1.bf16.msra.mxu1 %v11216_v31 }
 0xb7b   :  { %5153 = vmatprep.subr.bf16.mxu0 %v11217_v11  ;;  %5194 = vmatprep.subr.bf16.mxu1 %v11218_v62 }
 0xb7e   :  { %5154 = vmatpush1.bf16.msra.mxu0 %v11219_v32  ;;  %5195 = vmatpush1.bf16.msra.mxu1 %v11220_v2 }
 0xb7f   :  { %5230 = vmatprep.subr.bf16.mxu0 %v11221_v43  ;;  %5271 = vmatprep.subr.bf16.mxu1 %v11222_v6 }
 0xc14   :  { %v4941_v57 = vpop.f32.mrb[144].mxu0  ;;  %v4982_v25 = vpop.f32.mrb[144].mxu1 }
 0xc15   :  { %v4989_v47 = vadd.f32 %v4941_v57, %v11223_v8  ;;  %v4991_v33 = vadd.f32 %v4982_v25, %v11224_v52  ;;  %v4943_v40 = vpop.f32.mrb[145].mxu0  ;;  %v4984_v31 = vpop.f32.mrb[145].mxu1 }
 0xc16   :  { %v4990_v11 = vadd.f32 %v4943_v40, %v11225_v0  ;;  %v4992_v62 = vadd.f32 %v4984_v31, %v11226_v61  ;;  %v4945_v23 = vpop.f32.mrb[146].mxu0  ;;  %v4986_v32 = vpop.f32.mrb[146].mxu1 }
 0xc17   :  { %v7142_v12 = vmul.f32 -1.442695, %v4989_v47  ;;  %v4946_v2 = vpop.f32.mrb[147].mxu0  ;;  %v4987_v14 = vpop.f32.mrb[147].mxu1  ;;  %v7144_v6 = vmul.f32 -1.442695, %v4991_v33 }
 0xc18   :  { %v7143_v43 = vmul.f32 -1.442695, %v4990_v11  ;;  %v11227_v47 = vld [vmem:[#allocation43_spill] sm:$0xff]  ;;  %v11228_v33 = vld [vmem:[#allocation44_spill] sm:$0xff]  ;;  %v11229_v11 = vld [vmem:[#allocation42_spill] sm:$0xff] }
 0xc19   :  { %7686 = vpow2.f32 %v7142_v12  ;;  %v11230_v32 = vld [vmem:[#allocation48_spill] sm:$0xff] }
 0xc1a   :  { %7688 = vpow2.f32 %v7143_v43 }
 0xc1b   :  { %7690 = vtanh.f32 %v4992_v62 }
 0xc1c   :  { %7692 = vpow2.f32 %v7144_v6 }
 0xc23   :  { %v7687_v59 = vpop.eup %7686 }
 0xc24   :  { %v5093_v35 = vadd.f32 1.0, %v7687_v59  ;;  %v7689_v8 = vpop.eup %7688 }
 0xc25   :  { %v5094_v52 = vadd.f32 1.0, %v7689_v8  ;;  %v7691_v0 = vpop.eup %7690 }
 0xc26   :  { %7694 = vrcp.f32 %v5093_v35  ;;  %v7693_v40 = vpop.eup %7692 }
 0xc27   :  { %7696 = vrcp.f32 %v5094_v52  ;;  %v5095_v25 = vadd.f32 1.0, %v7693_v40 }
 0xc29   :  { %7698 = vrcp.f32 %v5095_v25 }
 0xc30   :  { %v7695_v61 = vpop.eup %7694 }
 0xc31   :  { %v5104_v23 = vmul.f32 %v7695_v61, %v7691_v0  ;;  %v7697_v57 = vpop.eup %7696 }
 0xc32   :  { %v5103_v14 = vmul.f32 %v7697_v57, %v9959_v34 }
 0xc33   :  { %v7699_v57 = vpop.eup %7698 }
 0xc34   :  { %v5032_v2 = vpop.f32.mrb[148].mxu0  ;;  %v5073_v12 = vpop.f32.mrb[148].mxu1  ;;  %v10049_v43 = vadd.f32 %v5104_v23, %v5103_v14 }
 0xc35   :  { %v5080_v59 = vadd.f32 %v5032_v2, %v11227_v47  ;;  %v5082_v31 = vadd.f32 %v5073_v12, %v11228_v33  ;;  %v5034_v6 = vpop.f32.mrb[149].mxu0  ;;  %v5075_v35 = vpop.f32.mrb[149].mxu1 }
 0xc36   :  { %v5081_v62 = vadd.f32 %v5034_v6, %v11229_v11  ;;  %v5083_v8 = vadd.f32 %v5075_v35, %v11230_v32  ;;  %v5036_v52 = vpop.f32.mrb[150].mxu0  ;;  %v5077_v0 = vpop.f32.mrb[150].mxu1  ;;  %7700 = vtanh.f32 %v10049_v43 }
 0xc37   :  { %v7145_v34 = vmul.f32 -1.442695, %v5080_v59  ;;  %v5037_v40 = vpop.f32.mrb[151].mxu0  ;;  %v5078_v61 = vpop.f32.mrb[151].mxu1  ;;  %v7147_v2 = vmul.f32 -1.442695, %v5082_v31 }
 0xc38   :  { %v7146_v23 = vmul.f32 -1.442695, %v5081_v62 }
 0xc39   :  { %7702 = vpow2.f32 %v7145_v34 }
 0xc3a   :  { %7704 = vpow2.f32 %v7146_v23  ;;  %v11231_v23 = vld [vmem:[#allocation46_spill] sm:$0xff] }
 0xc3b   :  { %7706 = vtanh.f32 %v5083_v8 }
 0xc3c   :  { %7708 = vpow2.f32 %v7147_v2  ;;  %v11234_v2 = vld [vmem:[#allocation53_spill] sm:$0xff] }
 0xc40   :  { %v7701_v14 = vpop.eup %7700 }
 0xc41   :  { %v5107_v12 = vmul.f32 %v7701_v14, %v7699_v57  ;;  %v11232_v57 = vld [vmem:[#allocation47_spill] sm:$0xff] }
 0xc42   :  { %v11233_v14 = vld [vmem:[#allocation51_spill] sm:$0xff] }
 0xc43   :  { %v7703_v47 = vpop.eup %7702  ;;  %5132 = vst [vmem:[%s10571_s13 + $0x20] sm:$0xff] %v5107_v12  ;;  %v5138_v33 = vpack.c.bf16 %v5107_v12, %v5107_v12  ;;  %v11235_v12 = vld [vmem:[#allocation52_spill] sm:$0xff] }
 0xc44   :  { %v5117_v25 = vadd.f32 1.0, %v7703_v47  ;;  %v7705_v6 = vpop.eup %7704  ;;  %v11236_v47 = vld [vmem:[#allocation54_spill] sm:$0xff] }
 0xc45   :  { %v5118_v59 = vadd.f32 1.0, %v7705_v6  ;;  %5172 = vmatmul.mubr.bf16.vlgmr.msra.gmra.mrb[152].mxu0 %v5138_v33  ;;  %5213 = vmatmul.mubr.bf16.vlgmr.msra.gmra.mrb[152].mxu1 %v5138_v33  ;;  %v7707_v31 = vpop.eup %7706  ;;  %v11238_v33 = vld [vmem:[#allocation105_spill] sm:$0xff]  ;;  %v11239_v6 = vld [vmem:[#allocation104_spill] sm:$0xff] }
 0xc46   :  { %7710 = vrcp.f32 %v5117_v25  ;;  %5231 = vmatpush1.bf16.msra.mxu0 %v9499_v30  ;;  %5272 = vmatpush1.bf16.msra.mxu1 %v9501_v16  ;;  %v7709_v35 = vpop.eup %7708  ;;  %v11237_v25 = vld [vmem:[#allocation103_spill] sm:$0xff] }
 0xc47   :  { %7712 = vrcp.f32 %v5118_v59  ;;  %5232 = vmatprep.subr.bf16.mxu0 %v9509_v21  ;;  %5273 = vmatprep.subr.bf16.mxu1 %v9511_v19  ;;  %v5119_v8 = vadd.f32 1.0, %v7709_v35  ;;  %v11240_v59 = vld [vmem:[#allocation106_spill] sm:$0xff]  ;;  %v11242_v35 = vld [vmem:[#allocation57_spill] sm:$0xff] }
 0xc48   :  { %5262 = vmatprep.mubr.bf16.mxu0 %v10767_v18  ;;  %5303 = vmatprep.mubr.bf16.mxu1 %v10767_v18 }
 0xc49   :  { %7714 = vrcp.f32 %v5119_v8  ;;  %v11246_v8 = vld [vmem:[#allocation101_spill] sm:$0xff] }
 0xc4a   :  { %5233 = vmatpush1.bf16.msra.mxu0 %v9517_v7  ;;  %5274 = vmatpush1.bf16.msra.mxu1 %v9519_v45 }
 0xc4b   :  { %5234 = vmatprep.subr.bf16.mxu0 %v9523_v17  ;;  %5275 = vmatprep.subr.bf16.mxu1 %v11157_v56 }
 0xc4e   :  { %5235 = vmatpush1.bf16.msra.mxu0 %v11158_v44  ;;  %5276 = vmatpush1.bf16.msra.mxu1 %v11159_v41 }
 0xc4f   :  { %5236 = vmatprep.subr.bf16.mxu0 %v11160_v42  ;;  %5277 = vmatprep.subr.bf16.mxu1 %v11161_v24 }
 0xc50   :  { %v7711_v11 = vpop.eup %7710 }
 0xc51   :  { %v5128_v62 = vmul.f32 %v7711_v11, %v7707_v31  ;;  %v7713_v32 = vpop.eup %7712  ;;  %v11241_v31 = vld [vmem:[#allocation55_spill] sm:$0xff]  ;;  %v11243_v11 = vld [vmem:[#allocation56_spill] sm:$0xff] }
 0xc52   :  { %v5127_v52 = vmul.f32 %v7713_v32, %v9988_v51  ;;  %5237 = vmatpush1.bf16.msra.mxu0 %v11163_v55  ;;  %5278 = vmatpush1.bf16.msra.mxu1 %v11164_v63  ;;  %v11245_v32 = vld [vmem:[#allocation98_spill] sm:$0xff] }
 0xc53   :  { %5238 = vmatprep.subr.bf16.mxu0 %v11165_v5  ;;  %5279 = vmatprep.subr.bf16.mxu1 %v11166_v1  ;;  %v7715_v51 = vpop.eup %7714 }
 0xc54   :  { %v10078_v0 = vadd.f32 %v5128_v62, %v5127_v52  ;;  %v11244_v62 = vld [vmem:[#allocation59_spill] sm:$0xff]  ;;  %v11247_v52 = vld [vmem:[#allocation100_spill] sm:$0xff] }
 0xc56   :  { %7716 = vtanh.f32 %v10078_v0  ;;  %5239 = vmatpush1.bf16.msra.mxu0 %v9555_v58  ;;  %5280 = vmatpush1.bf16.msra.mxu1 %v9557_v4 }
 0xc57   :  { %5240 = vmatprep.subr.bf16.mxu0 %v9561_v9  ;;  %5281 = vmatprep.subr.bf16.mxu1 %v11167_v3 }
 0xc5a   :  { %5241 = vmatpush1.bf16.msra.mxu0 %v11168_v26  ;;  %5282 = vmatpush1.bf16.msra.mxu1 %v9569_v22 }
 0xc5b   :  { %5242 = vmatprep.subr.bf16.mxu0 %v9573_v36  ;;  %5283 = vmatprep.subr.bf16.mxu1 %v9575_v39 }
 0xc5e   :  { %5243 = vmatpush1.bf16.msra.mxu0 %v9579_v37  ;;  %5284 = vmatpush1.bf16.msra.mxu1 %v9581_v13 }
 0xc5f   :  { %5244 = vmatprep.subr.bf16.mxu0 %v9585_v46  ;;  %5285 = vmatprep.subr.bf16.mxu1 %v9587_v10 }
 0xc60   :  { %v7717_v34 = vpop.eup %7716 }
 0xc61   :  { %v5131_v40 = vmul.f32 %v7717_v34, %v7715_v51  ;;  %v11248_v51 = vld [vmem:[#allocation102_spill] sm:$0xff] }
 0xc62   :  { %5245 = vmatpush1.bf16.msra.mxu0 %v9591_v20  ;;  %5286 = vmatpush1.bf16.msra.mxu1 %v9593_v29  ;;  %v11249_v34 = vld [vmem:[#allocation58_spill] sm:$0xff] }
 0xc63   :  { %5133 = vst [vmem:[%s10571_s13 + $0x58] sm:$0xff] %v5131_v40  ;;  %v5229_v61 = vpack.c.bf16 %v5131_v40, %v5131_v40  ;;  %5371 = vmatprep.subr.bf16.mxu0 %v9383_v38  ;;  %5412 = vmatprep.subr.bf16.mxu1 %v9385_v48  ;;  %v11250_v40 = vld [vmem:[#allocation61_spill] sm:$0xff] }
 0xc65   :  { %5263 = vmatmul.mubr.bf16.vlgmr.msra.gmra.mrb[156].mxu0 %v5229_v61  ;;  %5304 = vmatmul.mubr.bf16.vlgmr.msra.gmra.mrb[156].mxu1 %v5229_v61  ;;  %v11251_v61 = vld [vmem:[#allocation60_spill] sm:$0xff] }
 0xc66   :  { %5372 = vmatpush1.bf16.msra.mxu0 %v9389_v50  ;;  %5413 = vmatpush1.bf16.msra.mxu1 %v9391_v53 }
 0xc67   :  { %5373 = vmatprep.subr.bf16.mxu0 %v9393_v27  ;;  %5414 = vmatprep.subr.bf16.mxu1 %v9395_v54 }
 0xc68   :  { %5403 = vmatprep.mubr.bf16.mxu0 %v10767_v18  ;;  %5444 = vmatprep.mubr.bf16.mxu1 %v10767_v18 }
 0xc6a   :  { %5374 = vmatpush1.bf16.msra.mxu0 %v9403_v60  ;;  %5415 = vmatpush1.bf16.msra.mxu1 %v9405_v28 }
 0xc6b   :  { %5375 = vmatprep.subr.bf16.mxu0 %v9409_v49  ;;  %5416 = vmatprep.subr.bf16.mxu1 %v9411_v15 }
 0xc6e   :  { %5376 = vmatpush1.bf16.msra.mxu0 %v11231_v23  ;;  %5417 = vmatpush1.bf16.msra.mxu1 %v11232_v57 }
 0xc6f   :  { %5377 = vmatprep.subr.bf16.mxu0 %v11233_v14  ;;  %5418 = vmatprep.subr.bf16.mxu1 %v11234_v2 }
 0xc72   :  { %5378 = vmatpush1.bf16.msra.mxu0 %v11235_v12  ;;  %5419 = vmatpush1.bf16.msra.mxu1 %v11236_v47  ;;  %v11258_v47 = vld [vmem:[#allocation21_spill] sm:$0xff] }
 0xc73   :  { %5379 = vmatprep.subr.bf16.mxu0 %v11237_v25  ;;  %5420 = vmatprep.subr.bf16.mxu1 %v11238_v33  ;;  %v11257_v25 = vld [vmem:[#allocation20_spill] sm:$0xff] }
 0xc76   :  { %5380 = vmatpush1.bf16.msra.mxu0 %v11239_v6  ;;  %5421 = vmatpush1.bf16.msra.mxu1 %v11240_v59  ;;  %v11255_v59 = vld [vmem:[#allocation18_spill] sm:$0xff]  ;;  %v11256_v6 = vld [vmem:[#allocation19_spill] sm:$0xff] }
 0xc77   :  { %5381 = vmatprep.subr.bf16.mxu0 %v11241_v31  ;;  %5422 = vmatprep.subr.bf16.mxu1 %v11242_v35  ;;  %v11252_v31 = vld [vmem:[#allocation62_spill] sm:$0xff]  ;;  %v11253_v35 = vld [vmem:[#allocation95_spill] sm:$0xff] }
 0xc7a   :  { %5382 = vmatpush1.bf16.msra.mxu0 %v11243_v11  ;;  %5423 = vmatpush1.bf16.msra.mxu1 %v11244_v62  ;;  %v11254_v11 = vld [vmem:[#allocation97_spill] sm:$0xff] }
 0xc7b   :  { %5383 = vmatprep.subr.bf16.mxu0 %v11245_v32  ;;  %5424 = vmatprep.subr.bf16.mxu1 %v11246_v8 }
 0xc7e   :  { %5384 = vmatpush1.bf16.msra.mxu0 %v11247_v52  ;;  %5425 = vmatpush1.bf16.msra.mxu1 %v11248_v51 }
 0xc7f   :  { %5385 = vmatprep.subr.bf16.mxu0 %v11249_v34  ;;  %5426 = vmatprep.subr.bf16.mxu1 %v11250_v40 }
 0xc82   :  { %5386 = vmatpush1.bf16.msra.mxu0 %v11251_v61  ;;  %5427 = vmatpush1.bf16.msra.mxu1 %v11252_v31 }
 0xc83   :  { %5462 = vmatprep.subr.bf16.mxu0 %v11253_v35  ;;  %5503 = vmatprep.subr.bf16.mxu1 %v11254_v11 }
 0xd18   :  { %v5173_v62 = vpop.f32.mrb[152].mxu0  ;;  %v5214_v32 = vpop.f32.mrb[152].mxu1 }
 0xd19   :  { %v5221_v8 = vadd.f32 %v5173_v62, %v11255_v59  ;;  %v5223_v52 = vadd.f32 %v5214_v32, %v11256_v6  ;;  %v5175_v33 = vpop.f32.mrb[153].mxu0  ;;  %v5216_v51 = vpop.f32.mrb[153].mxu1 }
 0xd1a   :  { %v5222_v34 = vadd.f32 %v5175_v33, %v11257_v25  ;;  %v5224_v40 = vadd.f32 %v5216_v51, %v11258_v47  ;;  %v5177_v12 = vpop.f32.mrb[154].mxu0  ;;  %v5218_v61 = vpop.f32.mrb[154].mxu1 }
 0xd1b   :  { %v7148_v2 = vmul.f32 -1.442695, %v5221_v8  ;;  %v5178_v31 = vpop.f32.mrb[155].mxu0  ;;  %v5219_v14 = vpop.f32.mrb[155].mxu1  ;;  %v7150_v11 = vmul.f32 -1.442695, %v5223_v52 }
 0xd1c   :  { %v7149_v35 = vmul.f32 -1.442695, %v5222_v34  ;;  %v11259_v8 = vld [vmem:[#allocation81_spill] sm:$0xff]  ;;  %v11260_v52 = vld [vmem:[#allocation80_spill] sm:$0xff]  ;;  %v11261_v34 = vld [vmem:[#allocation83_spill] sm:$0xff] }
 0xd1d   :  { %7718 = vpow2.f32 %v7148_v2  ;;  %v11262_v61 = vld [vmem:[#allocation41_spill] sm:$0xff] }
 0xd1e   :  { %7720 = vpow2.f32 %v7149_v35 }
 0xd1f   :  { %7722 = vtanh.f32 %v5224_v40 }
 0xd20   :  { %7724 = vpow2.f32 %v7150_v11 }
 0xd27   :  { %v7719_v57 = vpop.eup %7718 }
 0xd28   :  { %v5325_v23 = vadd.f32 1.0, %v7719_v57  ;;  %v7721_v59 = vpop.eup %7720 }
 0xd29   :  { %v5326_v6 = vadd.f32 1.0, %v7721_v59  ;;  %v7723_v25 = vpop.eup %7722 }
 0xd2a   :  { %7726 = vrcp.f32 %v5325_v23  ;;  %v7725_v33 = vpop.eup %7724 }
 0xd2b   :  { %7728 = vrcp.f32 %v5326_v6  ;;  %v5327_v32 = vadd.f32 1.0, %v7725_v33 }
 0xd2d   :  { %7730 = vrcp.f32 %v5327_v32 }
 0xd34   :  { %v7727_v47 = vpop.eup %7726 }
 0xd35   :  { %v5336_v12 = vmul.f32 %v7727_v47, %v7723_v25  ;;  %v7729_v62 = vpop.eup %7728 }
 0xd36   :  { %v5335_v14 = vmul.f32 %v7729_v62, %v10049_v43 }
 0xd37   :  { %v7731_v62 = vpop.eup %7730 }
 0xd38   :  { %v5264_v31 = vpop.f32.mrb[156].mxu0  ;;  %v5305_v2 = vpop.f32.mrb[156].mxu1  ;;  %v10139_v35 = vadd.f32 %v5336_v12, %v5335_v14 }
 0xd39   :  { %v5312_v57 = vadd.f32 %v5264_v31, %v11259_v8  ;;  %v5314_v51 = vadd.f32 %v5305_v2, %v11260_v52  ;;  %v5266_v11 = vpop.f32.mrb[157].mxu0  ;;  %v5307_v23 = vpop.f32.mrb[157].mxu1 }
 0xd3a   :  { %v5313_v40 = vadd.f32 %v5266_v11, %v11261_v34  ;;  %v5315_v59 = vadd.f32 %v5307_v23, %v11262_v61  ;;  %v5268_v6 = vpop.f32.mrb[158].mxu0  ;;  %v5309_v25 = vpop.f32.mrb[158].mxu1  ;;  %7732 = vtanh.f32 %v10139_v35 }
 0xd3b   :  { %v7151_v43 = vmul.f32 -1.442695, %v5312_v57  ;;  %v5269_v33 = vpop.f32.mrb[159].mxu0  ;;  %v5310_v47 = vpop.f32.mrb[159].mxu1  ;;  %v7153_v31 = vmul.f32 -1.442695, %v5314_v51 }
 0xd3c   :  { %v7152_v12 = vmul.f32 -1.442695, %v5313_v40 }
 0xd3d   :  { %7734 = vpow2.f32 %v7151_v43 }
 0xd3e   :  { %7736 = vpow2.f32 %v7152_v12  ;;  %v11263_v12 = vld [vmem:[#allocation46_spill] sm:$0xff] }
 0xd3f   :  { %7738 = vtanh.f32 %v5315_v59 }
 0xd40   :  { %7740 = vpow2.f32 %v7153_v31  ;;  %v11266_v31 = vld [vmem:[#allocation53_spill] sm:$0xff] }
 0xd44   :  { %v7733_v14 = vpop.eup %7732 }
 0xd45   :  { %v5339_v2 = vmul.f32 %v7733_v14, %v7731_v62  ;;  %v11264_v62 = vld [vmem:[#allocation47_spill] sm:$0xff] }
 0xd46   :  { %v11265_v14 = vld [vmem:[#allocation51_spill] sm:$0xff] }
 0xd47   :  { %v7735_v8 = vpop.eup %7734  ;;  %5364 = vst [vmem:[%s10571_s13 + $0x30] sm:$0xff] %v5339_v2  ;;  %v5370_v52 = vpack.c.bf16 %v5339_v2, %v5339_v2  ;;  %v11267_v2 = vld [vmem:[#allocation52_spill] sm:$0xff] }
 0xd48   :  { %v5349_v32 = vadd.f32 1.0, %v7735_v8  ;;  %v7737_v11 = vpop.eup %7736  ;;  %v11268_v8 = vld [vmem:[#allocation54_spill] sm:$0xff] }
 0xd49   :  { %v5350_v57 = vadd.f32 1.0, %v7737_v11  ;;  %5404 = vmatmul.mubr.bf16.vlgmr.msra.gmra.mrb[160].mxu0 %v5370_v52  ;;  %5445 = vmatmul.mubr.bf16.vlgmr.msra.gmra.mrb[160].mxu1 %v5370_v52  ;;  %v7739_v51 = vpop.eup %7738  ;;  %v11270_v52 = vld [vmem:[#allocation105_spill] sm:$0xff]  ;;  %v11271_v11 = vld [vmem:[#allocation104_spill] sm:$0xff] }
 0xd4a   :  { %7742 = vrcp.f32 %v5349_v32  ;;  %5463 = vmatpush1.bf16.msra.mxu0 %v9499_v30  ;;  %5504 = vmatpush1.bf16.msra.mxu1 %v9501_v16  ;;  %v7741_v23 = vpop.eup %7740  ;;  %v11269_v32 = vld [vmem:[#allocation103_spill] sm:$0xff] }
 0xd4b   :  { %7744 = vrcp.f32 %v5350_v57  ;;  %5464 = vmatprep.subr.bf16.mxu0 %v9509_v21  ;;  %5505 = vmatprep.subr.bf16.mxu1 %v9511_v19  ;;  %v5351_v59 = vadd.f32 1.0, %v7741_v23  ;;  %v11272_v57 = vld [vmem:[#allocation106_spill] sm:$0xff]  ;;  %v11274_v23 = vld [vmem:[#allocation57_spill] sm:$0xff] }
 0xd4c   :  { %5494 = vmatprep.mubr.bf16.mxu0 %v10767_v18  ;;  %5535 = vmatprep.mubr.bf16.mxu1 %v10767_v18 }
 0xd4d   :  { %7746 = vrcp.f32 %v5351_v59  ;;  %v11278_v59 = vld [vmem:[#allocation101_spill] sm:$0xff] }
 0xd4e   :  { %5465 = vmatpush1.bf16.msra.mxu0 %v9517_v7  ;;  %5506 = vmatpush1.bf16.msra.mxu1 %v9519_v45 }
 0xd4f   :  { %5466 = vmatprep.subr.bf16.mxu0 %v9523_v17  ;;  %5507 = vmatprep.subr.bf16.mxu1 %v11157_v56 }
 0xd52   :  { %5467 = vmatpush1.bf16.msra.mxu0 %v11158_v44  ;;  %5508 = vmatpush1.bf16.msra.mxu1 %v11159_v41 }
 0xd53   :  { %5468 = vmatprep.subr.bf16.mxu0 %v11160_v42  ;;  %5509 = vmatprep.subr.bf16.mxu1 %v11161_v24 }
 0xd54   :  { %v7743_v34 = vpop.eup %7742 }
 0xd55   :  { %v5360_v40 = vmul.f32 %v7743_v34, %v7739_v51  ;;  %v7745_v61 = vpop.eup %7744  ;;  %v11273_v51 = vld [vmem:[#allocation55_spill] sm:$0xff]  ;;  %v11275_v34 = vld [vmem:[#allocation56_spill] sm:$0xff] }
 0xd56   :  { %v5359_v6 = vmul.f32 %v7745_v61, %v10078_v0  ;;  %5469 = vmatpush1.bf16.msra.mxu0 %v11163_v55  ;;  %5510 = vmatpush1.bf16.msra.mxu1 %v11164_v63  ;;  %v11277_v61 = vld [vmem:[#allocation98_spill] sm:$0xff] }
 0xd57   :  { %5470 = vmatprep.subr.bf16.mxu0 %v11165_v5  ;;  %5511 = vmatprep.subr.bf16.mxu1 %v11166_v1  ;;  %v7747_v0 = vpop.eup %7746 }
 0xd58   :  { %v10168_v25 = vadd.f32 %v5360_v40, %v5359_v6  ;;  %v11276_v40 = vld [vmem:[#allocation59_spill] sm:$0xff]  ;;  %v11279_v6 = vld [vmem:[#allocation100_spill] sm:$0xff] }
 0xd5a   :  { %7748 = vtanh.f32 %v10168_v25  ;;  %5471 = vmatpush1.bf16.msra.mxu0 %v9555_v58  ;;  %5512 = vmatpush1.bf16.msra.mxu1 %v9557_v4 }
 0xd5b   :  { %5472 = vmatprep.subr.bf16.mxu0 %v9561_v9  ;;  %5513 = vmatprep.subr.bf16.mxu1 %v11167_v3 }
 0xd5e   :  { %5473 = vmatpush1.bf16.msra.mxu0 %v11168_v26  ;;  %5514 = vmatpush1.bf16.msra.mxu1 %v9569_v22 }
 0xd5f   :  { %5474 = vmatprep.subr.bf16.mxu0 %v9573_v36  ;;  %5515 = vmatprep.subr.bf16.mxu1 %v9575_v39 }
 0xd62   :  { %5475 = vmatpush1.bf16.msra.mxu0 %v9579_v37  ;;  %5516 = vmatpush1.bf16.msra.mxu1 %v9581_v13 }
 0xd63   :  { %5476 = vmatprep.subr.bf16.mxu0 %v9585_v46  ;;  %5517 = vmatprep.subr.bf16.mxu1 %v9587_v10 }
 0xd64   :  { %v7749_v43 = vpop.eup %7748 }
 0xd65   :  { %v5363_v33 = vmul.f32 %v7749_v43, %v7747_v0  ;;  %v11280_v0 = vld [vmem:[#allocation102_spill] sm:$0xff] }
 0xd66   :  { %5477 = vmatpush1.bf16.msra.mxu0 %v9591_v20  ;;  %5518 = vmatpush1.bf16.msra.mxu1 %v9593_v29  ;;  %v11281_v43 = vld [vmem:[#allocation58_spill] sm:$0xff] }
 0xd67   :  { %5365 = vst [vmem:[%s10571_s13 + $0x48] sm:$0xff] %v5363_v33  ;;  %v5461_v47 = vpack.c.bf16 %v5363_v33, %v5363_v33  ;;  %5603 = vmatprep.subr.bf16.mxu0 %v9383_v38  ;;  %5644 = vmatprep.subr.bf16.mxu1 %v9385_v48  ;;  %v11282_v33 = vld [vmem:[#allocation61_spill] sm:$0xff] }
 0xd69   :  { %5495 = vmatmul.mubr.bf16.vlgmr.msra.gmra.mrb[164].mxu0 %v5461_v47  ;;  %5536 = vmatmul.mubr.bf16.vlgmr.msra.gmra.mrb[164].mxu1 %v5461_v47  ;;  %v11283_v47 = vld [vmem:[#allocation60_spill] sm:$0xff] }
 0xd6a   :  { %5604 = vmatpush1.bf16.msra.mxu0 %v9389_v50  ;;  %5645 = vmatpush1.bf16.msra.mxu1 %v9391_v53 }
 0xd6b   :  { %5605 = vmatprep.subr.bf16.mxu0 %v9393_v27  ;;  %5646 = vmatprep.subr.bf16.mxu1 %v9395_v54 }
 0xd6c   :  { %5635 = vmatprep.mubr.bf16.mxu0 %v10767_v18  ;;  %5676 = vmatprep.mubr.bf16.mxu1 %v10767_v18 }
 0xd6e   :  { %5606 = vmatpush1.bf16.msra.mxu0 %v9403_v60  ;;  %5647 = vmatpush1.bf16.msra.mxu1 %v9405_v28 }
 0xd6f   :  { %5607 = vmatprep.subr.bf16.mxu0 %v9409_v49  ;;  %5648 = vmatprep.subr.bf16.mxu1 %v9411_v15 }
 0xd72   :  { %5608 = vmatpush1.bf16.msra.mxu0 %v11263_v12  ;;  %5649 = vmatpush1.bf16.msra.mxu1 %v11264_v62 }
 0xd73   :  { %5609 = vmatprep.subr.bf16.mxu0 %v11265_v14  ;;  %5650 = vmatprep.subr.bf16.mxu1 %v11266_v31 }
 0xd76   :  { %5610 = vmatpush1.bf16.msra.mxu0 %v11267_v2  ;;  %5651 = vmatpush1.bf16.msra.mxu1 %v11268_v8  ;;  %v11290_v8 = vld [vmem:[#allocation25_spill] sm:$0xff] }
 0xd77   :  { %5611 = vmatprep.subr.bf16.mxu0 %v11269_v32  ;;  %5652 = vmatprep.subr.bf16.mxu1 %v11270_v52  ;;  %v11289_v32 = vld [vmem:[#allocation24_spill] sm:$0xff] }
 0xd7a   :  { %5612 = vmatpush1.bf16.msra.mxu0 %v11271_v11  ;;  %5653 = vmatpush1.bf16.msra.mxu1 %v11272_v57  ;;  %v11287_v57 = vld [vmem:[#allocation22_spill] sm:$0xff]  ;;  %v11288_v11 = vld [vmem:[#allocation23_spill] sm:$0xff] }
 0xd7b   :  { %5613 = vmatprep.subr.bf16.mxu0 %v11273_v51  ;;  %5654 = vmatprep.subr.bf16.mxu1 %v11274_v23  ;;  %v11284_v51 = vld [vmem:[#allocation62_spill] sm:$0xff]  ;;  %v11285_v23 = vld [vmem:[#allocation95_spill] sm:$0xff] }
 0xd7e   :  { %5614 = vmatpush1.bf16.msra.mxu0 %v11275_v34  ;;  %5655 = vmatpush1.bf16.msra.mxu1 %v11276_v40  ;;  %v11286_v34 = vld [vmem:[#allocation97_spill] sm:$0xff] }
 0xd7f   :  { %5615 = vmatprep.subr.bf16.mxu0 %v11277_v61  ;;  %5656 = vmatprep.subr.bf16.mxu1 %v11278_v59 }
 0xd82   :  { %5616 = vmatpush1.bf16.msra.mxu0 %v11279_v6  ;;  %5657 = vmatpush1.bf16.msra.mxu1 %v11280_v0 }
 0xd83   :  { %5617 = vmatprep.subr.bf16.mxu0 %v11281_v43  ;;  %5658 = vmatprep.subr.bf16.mxu1 %v11282_v33 }
 0xd86   :  { %5618 = vmatpush1.bf16.msra.mxu0 %v11283_v47  ;;  %5659 = vmatpush1.bf16.msra.mxu1 %v11284_v51 }
 0xd87   :  { %5694 = vmatprep.subr.bf16.mxu0 %v11285_v23  ;;  %5735 = vmatprep.subr.bf16.mxu1 %v11286_v34 }
 0xe1c   :  { %v5405_v40 = vpop.f32.mrb[160].mxu0  ;;  %v5446_v61 = vpop.f32.mrb[160].mxu1 }
 0xe1d   :  { %v5453_v59 = vadd.f32 %v5405_v40, %v11287_v57  ;;  %v5455_v6 = vadd.f32 %v5446_v61, %v11288_v11  ;;  %v5407_v52 = vpop.f32.mrb[161].mxu0  ;;  %v5448_v0 = vpop.f32.mrb[161].mxu1 }
 0xe1e   :  { %v5454_v43 = vadd.f32 %v5407_v52, %v11289_v32  ;;  %v5456_v33 = vadd.f32 %v5448_v0, %v11290_v8  ;;  %v5409_v2 = vpop.f32.mrb[162].mxu0  ;;  %v5450_v47 = vpop.f32.mrb[162].mxu1 }
 0xe1f   :  { %v7154_v31 = vmul.f32 -1.442695, %v5453_v59  ;;  %v5410_v51 = vpop.f32.mrb[163].mxu0  ;;  %v5451_v14 = vpop.f32.mrb[163].mxu1  ;;  %v7156_v34 = vmul.f32 -1.442695, %v5455_v6 }
 0xe20   :  { %v7155_v23 = vmul.f32 -1.442695, %v5454_v43  ;;  %v11291_v59 = vld [vmem:[#allocation77_spill] sm:$0xff]  ;;  %v11292_v6 = vld [vmem:[#allocation76_spill] sm:$0xff]  ;;  %v11293_v43 = vld [vmem:[#allocation78_spill] sm:$0xff] }
 0xe21   :  { %7750 = vpow2.f32 %v7154_v31  ;;  %v11294_v47 = vld [vmem:[#allocation79_spill] sm:$0xff] }
 0xe22   :  { %7752 = vpow2.f32 %v7155_v23 }
 0xe23   :  { %7754 = vtanh.f32 %v5456_v33 }
 0xe24   :  { %7756 = vpow2.f32 %v7156_v34 }
 0xe2b   :  { %v7751_v62 = vpop.eup %7750 }
 0xe2c   :  { %v5557_v12 = vadd.f32 1.0, %v7751_v62  ;;  %v7753_v57 = vpop.eup %7752 }
 0xe2d   :  { %v5558_v11 = vadd.f32 1.0, %v7753_v57  ;;  %v7755_v32 = vpop.eup %7754 }
 0xe2e   :  { %7758 = vrcp.f32 %v5557_v12  ;;  %v7757_v52 = vpop.eup %7756 }
 0xe2f   :  { %7760 = vrcp.f32 %v5558_v11  ;;  %v5559_v61 = vadd.f32 1.0, %v7757_v52 }
 0xe31   :  { %7762 = vrcp.f32 %v5559_v61 }
 0xe38   :  { %v7759_v8 = vpop.eup %7758 }
 0xe39   :  { %v5568_v2 = vmul.f32 %v7759_v8, %v7755_v32  ;;  %v7761_v40 = vpop.eup %7760 }
 0xe3a   :  { %v5567_v14 = vmul.f32 %v7761_v40, %v10139_v35 }
 0xe3b   :  { %v7763_v40 = vpop.eup %7762 }
 0xe3c   :  { %v5496_v51 = vpop.f32.mrb[164].mxu0  ;;  %v5537_v31 = vpop.f32.mrb[164].mxu1  ;;  %v10229_v23 = vadd.f32 %v5568_v2, %v5567_v14 }
 0xe3d   :  { %v5544_v62 = vadd.f32 %v5496_v51, %v11291_v59  ;;  %v5546_v0 = vadd.f32 %v5537_v31, %v11292_v6  ;;  %v5498_v34 = vpop.f32.mrb[165].mxu0  ;;  %v5539_v12 = vpop.f32.mrb[165].mxu1 }
 0xe3e   :  { %v5545_v33 = vadd.f32 %v5498_v34, %v11293_v43  ;;  %v5547_v57 = vadd.f32 %v5539_v12, %v11294_v47  ;;  %v5500_v11 = vpop.f32.mrb[166].mxu0  ;;  %v5541_v32 = vpop.f32.mrb[166].mxu1  ;;  %7764 = vtanh.f32 %v10229_v23 }
 0xe3f   :  { %v7157_v35 = vmul.f32 -1.442695, %v5544_v62  ;;  %v5501_v52 = vpop.f32.mrb[167].mxu0  ;;  %v5542_v8 = vpop.f32.mrb[167].mxu1  ;;  %v7159_v51 = vmul.f32 -1.442695, %v5546_v0 }
 0xe40   :  { %v7158_v2 = vmul.f32 -1.442695, %v5545_v33 }
 0xe41   :  { %7766 = vpow2.f32 %v7157_v35 }
 0xe42   :  { %7768 = vpow2.f32 %v7158_v2  ;;  %v11295_v2 = vld [vmem:[#allocation46_spill] sm:$0xff] }
 0xe43   :  { %7770 = vtanh.f32 %v5547_v57 }
 0xe44   :  { %7772 = vpow2.f32 %v7159_v51  ;;  %v11298_v51 = vld [vmem:[#allocation53_spill] sm:$0xff] }
 0xe48   :  { %v7765_v14 = vpop.eup %7764 }
 0xe49   :  { %v5571_v31 = vmul.f32 %v7765_v14, %v7763_v40  ;;  %v11296_v40 = vld [vmem:[#allocation47_spill] sm:$0xff] }
 0xe4a   :  { %v11297_v14 = vld [vmem:[#allocation51_spill] sm:$0xff] }
 0xe4b   :  { %v7767_v59 = vpop.eup %7766  ;;  %5596 = vst [vmem:[%s10571_s13 + $0x40] sm:$0xff] %v5571_v31  ;;  %v5602_v6 = vpack.c.bf16 %v5571_v31, %v5571_v31  ;;  %v11299_v31 = vld [vmem:[#allocation52_spill] sm:$0xff] }
 0xe4c   :  { %v5581_v61 = vadd.f32 1.0, %v7767_v59  ;;  %v7769_v34 = vpop.eup %7768  ;;  %v11300_v59 = vld [vmem:[#allocation54_spill] sm:$0xff] }
 0xe4d   :  { %v5582_v62 = vadd.f32 1.0, %v7769_v34  ;;  %5636 = vmatmul.mubr.bf16.vlgmr.msra.gmra.mrb[168].mxu0 %v5602_v6  ;;  %5677 = vmatmul.mubr.bf16.vlgmr.msra.gmra.mrb[168].mxu1 %v5602_v6  ;;  %v7771_v0 = vpop.eup %7770  ;;  %v11302_v6 = vld [vmem:[#allocation105_spill] sm:$0xff]  ;;  %v11303_v34 = vld [vmem:[#allocation104_spill] sm:$0xff] }
 0xe4e   :  { %7774 = vrcp.f32 %v5581_v61  ;;  %5695 = vmatpush1.bf16.msra.mxu0 %v9499_v30  ;;  %5736 = vmatpush1.bf16.msra.mxu1 %v9501_v16  ;;  %v7773_v12 = vpop.eup %7772  ;;  %v11301_v61 = vld [vmem:[#allocation103_spill] sm:$0xff] }
 0xe4f   :  { %7776 = vrcp.f32 %v5582_v62  ;;  %5696 = vmatprep.subr.bf16.mxu0 %v9509_v21  ;;  %5737 = vmatprep.subr.bf16.mxu1 %v9511_v19  ;;  %v5583_v57 = vadd.f32 1.0, %v7773_v12  ;;  %v11304_v62 = vld [vmem:[#allocation106_spill] sm:$0xff]  ;;  %v11306_v12 = vld [vmem:[#allocation57_spill] sm:$0xff] }
 0xe50   :  { %5726 = vmatprep.mubr.bf16.mxu0 %v10767_v18  ;;  %5767 = vmatprep.mubr.bf16.mxu1 %v10767_v18 }
 0xe51   :  { %7778 = vrcp.f32 %v5583_v57  ;;  %v11310_v57 = vld [vmem:[#allocation101_spill] sm:$0xff] }
 0xe52   :  { %5697 = vmatpush1.bf16.msra.mxu0 %v9517_v7  ;;  %5738 = vmatpush1.bf16.msra.mxu1 %v9519_v45 }
 0xe53   :  { %5698 = vmatprep.subr.bf16.mxu0 %v9523_v17  ;;  %5739 = vmatprep.subr.bf16.mxu1 %v11157_v56 }
 0xe56   :  { %5699 = vmatpush1.bf16.msra.mxu0 %v11158_v44  ;;  %5740 = vmatpush1.bf16.msra.mxu1 %v11159_v41 }
 0xe57   :  { %5700 = vmatprep.subr.bf16.mxu0 %v11160_v42  ;;  %5741 = vmatprep.subr.bf16.mxu1 %v11161_v24 }
 0xe58   :  { %v7775_v43 = vpop.eup %7774 }
 0xe59   :  { %v5592_v33 = vmul.f32 %v7775_v43, %v7771_v0  ;;  %v7777_v47 = vpop.eup %7776  ;;  %v11305_v0 = vld [vmem:[#allocation55_spill] sm:$0xff]  ;;  %v11307_v43 = vld [vmem:[#allocation56_spill] sm:$0xff] }
 0xe5a   :  { %v5591_v11 = vmul.f32 %v7777_v47, %v10168_v25  ;;  %5701 = vmatpush1.bf16.msra.mxu0 %v11163_v55  ;;  %5742 = vmatpush1.bf16.msra.mxu1 %v11164_v63  ;;  %v11309_v47 = vld [vmem:[#allocation98_spill] sm:$0xff] }
 0xe5b   :  { %5702 = vmatprep.subr.bf16.mxu0 %v11165_v5  ;;  %5743 = vmatprep.subr.bf16.mxu1 %v11166_v1  ;;  %v7779_v25 = vpop.eup %7778 }
 0xe5c   :  { %v10258_v32 = vadd.f32 %v5592_v33, %v5591_v11  ;;  %v11308_v33 = vld [vmem:[#allocation59_spill] sm:$0xff]  ;;  %v11311_v11 = vld [vmem:[#allocation100_spill] sm:$0xff] }
 0xe5e   :  { %7780 = vtanh.f32 %v10258_v32  ;;  %5703 = vmatpush1.bf16.msra.mxu0 %v9555_v58  ;;  %5744 = vmatpush1.bf16.msra.mxu1 %v9557_v4 }
 0xe5f   :  { %5704 = vmatprep.subr.bf16.mxu0 %v9561_v9  ;;  %5745 = vmatprep.subr.bf16.mxu1 %v11167_v3 }
 0xe62   :  { %5705 = vmatpush1.bf16.msra.mxu0 %v11168_v26  ;;  %5746 = vmatpush1.bf16.msra.mxu1 %v9569_v22 }
 0xe63   :  { %5706 = vmatprep.subr.bf16.mxu0 %v9573_v36  ;;  %5747 = vmatprep.subr.bf16.mxu1 %v9575_v39 }
 0xe66   :  { %5707 = vmatpush1.bf16.msra.mxu0 %v9579_v37  ;;  %5748 = vmatpush1.bf16.msra.mxu1 %v9581_v13 }
 0xe67   :  { %5708 = vmatprep.subr.bf16.mxu0 %v9585_v46  ;;  %5749 = vmatprep.subr.bf16.mxu1 %v9587_v10 }
 0xe68   :  { %v7781_v35 = vpop.eup %7780 }
 0xe69   :  { %v5595_v52 = vmul.f32 %v7781_v35, %v7779_v25  ;;  %v11312_v25 = vld [vmem:[#allocation102_spill] sm:$0xff] }
 0xe6a   :  { %5709 = vmatpush1.bf16.msra.mxu0 %v9591_v20  ;;  %5750 = vmatpush1.bf16.msra.mxu1 %v9593_v29  ;;  %v11313_v35 = vld [vmem:[#allocation58_spill] sm:$0xff] }
 0xe6b   :  { %5597 = vst [vmem:[%s10571_s13 + $0x38] sm:$0xff] %v5595_v52  ;;  %v5693_v8 = vpack.c.bf16 %v5595_v52, %v5595_v52  ;;  %5835 = vmatprep.subr.bf16.mxu0 %v9383_v38  ;;  %5876 = vmatprep.subr.bf16.mxu1 %v9385_v48  ;;  %v11314_v52 = vld [vmem:[#allocation61_spill] sm:$0xff] }
 0xe6d   :  { %5727 = vmatmul.mubr.bf16.vlgmr.msra.gmra.mrb[172].mxu0 %v5693_v8  ;;  %5768 = vmatmul.mubr.bf16.vlgmr.msra.gmra.mrb[172].mxu1 %v5693_v8  ;;  %v11315_v8 = vld [vmem:[#allocation60_spill] sm:$0xff] }
 0xe6e   :  { %5836 = vmatpush1.bf16.msra.mxu0 %v9389_v50  ;;  %5877 = vmatpush1.bf16.msra.mxu1 %v9391_v53 }
 0xe6f   :  { %5837 = vmatprep.subr.bf16.mxu0 %v9393_v27  ;;  %5878 = vmatprep.subr.bf16.mxu1 %v9395_v54 }
 0xe70   :  { %5867 = vmatprep.mubr.bf16.mxu0 %v10767_v18  ;;  %5908 = vmatprep.mubr.bf16.mxu1 %v10767_v18 }
 0xe72   :  { %5838 = vmatpush1.bf16.msra.mxu0 %v9403_v60  ;;  %5879 = vmatpush1.bf16.msra.mxu1 %v9405_v28 }
 0xe73   :  { %5839 = vmatprep.subr.bf16.mxu0 %v9409_v49  ;;  %5880 = vmatprep.subr.bf16.mxu1 %v9411_v15 }
 0xe76   :  { %5840 = vmatpush1.bf16.msra.mxu0 %v11295_v2  ;;  %5881 = vmatpush1.bf16.msra.mxu1 %v11296_v40 }
 0xe77   :  { %5841 = vmatprep.subr.bf16.mxu0 %v11297_v14  ;;  %5882 = vmatprep.subr.bf16.mxu1 %v11298_v51 }
 0xe7a   :  { %5842 = vmatpush1.bf16.msra.mxu0 %v11299_v31  ;;  %5883 = vmatpush1.bf16.msra.mxu1 %v11300_v59  ;;  %v11322_v59 = vld [vmem:[#allocation29_spill] sm:$0xff] }
 0xe7b   :  { %5843 = vmatprep.subr.bf16.mxu0 %v11301_v61  ;;  %5884 = vmatprep.subr.bf16.mxu1 %v11302_v6  ;;  %v11321_v61 = vld [vmem:[#allocation28_spill] sm:$0xff] }
 0xe7e   :  { %5844 = vmatpush1.bf16.msra.mxu0 %v11303_v34  ;;  %5885 = vmatpush1.bf16.msra.mxu1 %v11304_v62  ;;  %v11319_v62 = vld [vmem:[#allocation26_spill] sm:$0xff]  ;;  %v11320_v34 = vld [vmem:[#allocation27_spill] sm:$0xff] }
 0xe7f   :  { %5845 = vmatprep.subr.bf16.mxu0 %v11305_v0  ;;  %5886 = vmatprep.subr.bf16.mxu1 %v11306_v12  ;;  %v11316_v0 = vld [vmem:[#allocation62_spill] sm:$0xff]  ;;  %v11317_v12 = vld [vmem:[#allocation95_spill] sm:$0xff] }
 0xe82   :  { %5846 = vmatpush1.bf16.msra.mxu0 %v11307_v43  ;;  %5887 = vmatpush1.bf16.msra.mxu1 %v11308_v33  ;;  %v11318_v43 = vld [vmem:[#allocation97_spill] sm:$0xff] }
 0xe83   :  { %5847 = vmatprep.subr.bf16.mxu0 %v11309_v47  ;;  %5888 = vmatprep.subr.bf16.mxu1 %v11310_v57 }
 0xe86   :  { %5848 = vmatpush1.bf16.msra.mxu0 %v11311_v11  ;;  %5889 = vmatpush1.bf16.msra.mxu1 %v11312_v25 }
 0xe87   :  { %5849 = vmatprep.subr.bf16.mxu0 %v11313_v35  ;;  %5890 = vmatprep.subr.bf16.mxu1 %v11314_v52 }
 0xe8a   :  { %5850 = vmatpush1.bf16.msra.mxu0 %v11315_v8  ;;  %5891 = vmatpush1.bf16.msra.mxu1 %v11316_v0 }
 0xe8b   :  { %5926 = vmatprep.subr.bf16.mxu0 %v11317_v12  ;;  %5967 = vmatprep.subr.bf16.mxu1 %v11318_v43 }
 0xf20   :  { %v5637_v33 = vpop.f32.mrb[168].mxu0  ;;  %v5678_v47 = vpop.f32.mrb[168].mxu1 }
 0xf21   :  { %v5685_v57 = vadd.f32 %v5637_v33, %v11319_v62  ;;  %v5687_v11 = vadd.f32 %v5678_v47, %v11320_v34  ;;  %v5639_v6 = vpop.f32.mrb[169].mxu0  ;;  %v5680_v25 = vpop.f32.mrb[169].mxu1 }
 0xf22   :  { %v5686_v35 = vadd.f32 %v5639_v6, %v11321_v61  ;;  %v5688_v52 = vadd.f32 %v5680_v25, %v11322_v59  ;;  %v5641_v31 = vpop.f32.mrb[170].mxu0  ;;  %v5682_v8 = vpop.f32.mrb[170].mxu1 }
 0xf23   :  { %v7160_v51 = vmul.f32 -1.442695, %v5685_v57  ;;  %v5642_v0 = vpop.f32.mrb[171].mxu0  ;;  %v5683_v14 = vpop.f32.mrb[171].mxu1  ;;  %v7162_v43 = vmul.f32 -1.442695, %v5687_v11 }
 0xf24   :  { %v7161_v12 = vmul.f32 -1.442695, %v5686_v35  ;;  %v11323_v57 = vld [vmem:[#allocation85_spill] sm:$0xff]  ;;  %v11324_v11 = vld [vmem:[#allocation84_spill] sm:$0xff]  ;;  %v11325_v35 = vld [vmem:[#allocation86_spill] sm:$0xff] }
 0xf25   :  { %7782 = vpow2.f32 %v7160_v51  ;;  %v11326_v8 = vld [vmem:[#allocation74_spill] sm:$0xff] }
 0xf26   :  { %7784 = vpow2.f32 %v7161_v12 }
 0xf27   :  { %7786 = vtanh.f32 %v5688_v52 }
 0xf28   :  { %7788 = vpow2.f32 %v7162_v43 }
 0xf2f   :  { %v7783_v40 = vpop.eup %7782 }
 0xf30   :  { %v5789_v2 = vadd.f32 1.0, %v7783_v40  ;;  %v7785_v62 = vpop.eup %7784 }
 0xf31   :  { %v5790_v34 = vadd.f32 1.0, %v7785_v62  ;;  %v7787_v61 = vpop.eup %7786 }
 0xf32   :  { %7790 = vrcp.f32 %v5789_v2  ;;  %v7789_v6 = vpop.eup %7788 }
 0xf33   :  { %7792 = vrcp.f32 %v5790_v34  ;;  %v5791_v47 = vadd.f32 1.0, %v7789_v6 }
 0xf35   :  { %7794 = vrcp.f32 %v5791_v47 }
 0xf3c   :  { %v7791_v59 = vpop.eup %7790 }
 0xf3d   :  { %v5800_v31 = vmul.f32 %v7791_v59, %v7787_v61  ;;  %v7793_v33 = vpop.eup %7792 }
 0xf3e   :  { %v5799_v14 = vmul.f32 %v7793_v33, %v10229_v23 }
 0xf3f   :  { %v7795_v33 = vpop.eup %7794 }
 0xf40   :  { %v5728_v0 = vpop.f32.mrb[172].mxu0  ;;  %v5769_v51 = vpop.f32.mrb[172].mxu1  ;;  %v10319_v12 = vadd.f32 %v5800_v31, %v5799_v14 }
 0xf41   :  { %v5776_v40 = vadd.f32 %v5728_v0, %v11323_v57  ;;  %v5778_v25 = vadd.f32 %v5769_v51, %v11324_v11  ;;  %v5730_v43 = vpop.f32.mrb[173].mxu0  ;;  %v5771_v2 = vpop.f32.mrb[173].mxu1 }
 0xf42   :  { %v5777_v52 = vadd.f32 %v5730_v43, %v11325_v35  ;;  %v5779_v62 = vadd.f32 %v5771_v2, %v11326_v8  ;;  %v5732_v34 = vpop.f32.mrb[174].mxu0  ;;  %v5773_v61 = vpop.f32.mrb[174].mxu1  ;;  %7796 = vtanh.f32 %v10319_v12 }
 0xf43   :  { %v7163_v23 = vmul.f32 -1.442695, %v5776_v40  ;;  %v5733_v6 = vpop.f32.mrb[175].mxu0  ;;  %v5774_v59 = vpop.f32.mrb[175].mxu1  ;;  %v7165_v0 = vmul.f32 -1.442695, %v5778_v25 }
 0xf44   :  { %v7164_v31 = vmul.f32 -1.442695, %v5777_v52 }
 0xf45   :  { %7798 = vpow2.f32 %v7163_v23 }
 0xf46   :  { %7800 = vpow2.f32 %v7164_v31  ;;  %v11333_v31 = vld [vmem:[#allocation103_spill] sm:$0xff] }
 0xf47   :  { %7802 = vtanh.f32 %v5779_v62 }
 0xf48   :  { %7804 = vpow2.f32 %v7165_v0  ;;  %v11340_v0 = vld [vmem:[#allocation59_spill] sm:$0xff] }
 0xf4c   :  { %v7797_v14 = vpop.eup %7796 }
 0xf4d   :  { %v5803_v51 = vmul.f32 %v7797_v14, %v7795_v33  ;;  %v11338_v33 = vld [vmem:[#allocation57_spill] sm:$0xff]  ;;  %v11339_v14 = vld [vmem:[#allocation56_spill] sm:$0xff] }
 0xf4f   :  { %v7799_v57 = vpop.eup %7798  ;;  %5828 = vst [vmem:[%s10571_s13 + $0x50] sm:$0xff] %v5803_v51  ;;  %v5834_v11 = vpack.c.bf16 %v5803_v51, %v5803_v51  ;;  %v11341_v51 = vld [vmem:[#allocation98_spill] sm:$0xff] }
 0xf50   :  { %v5813_v47 = vadd.f32 1.0, %v7799_v57  ;;  %v7801_v43 = vpop.eup %7800  ;;  %v11342_v57 = vld [vmem:[#allocation101_spill] sm:$0xff] }
 0xf51   :  { %v5814_v40 = vadd.f32 1.0, %v7801_v43  ;;  %5868 = vmatmul.mubr.bf16.vlgmr.msra.gmra.mrb[176].mxu0 %v5834_v11  ;;  %5909 = vmatmul.mubr.bf16.vlgmr.msra.gmra.mrb[176].mxu1 %v5834_v11  ;;  %v7803_v25 = vpop.eup %7802  ;;  %v11344_v11 = vld [vmem:[#allocation102_spill] sm:$0xff] }
 0xf52   :  { %7806 = vrcp.f32 %v5813_v47  ;;  %5927 = vmatpush1.bf16.msra.mxu0 %v9499_v30  ;;  %5968 = vmatpush1.bf16.msra.mxu1 %v9501_v16  ;;  %v7805_v2 = vpop.eup %7804  ;;  %v11343_v47 = vld [vmem:[#allocation100_spill] sm:$0xff]  ;;  %v11345_v43 = vld [vmem:[#allocation58_spill] sm:$0xff] }
 0xf53   :  { %7808 = vrcp.f32 %v5814_v40  ;;  %5928 = vmatprep.subr.bf16.mxu0 %v9509_v21  ;;  %5969 = vmatprep.subr.bf16.mxu1 %v9511_v19  ;;  %v5815_v62 = vadd.f32 1.0, %v7805_v2  ;;  %v11346_v40 = vld [vmem:[#allocation61_spill] sm:$0xff]  ;;  %v11348_v2 = vld [vmem:[#allocation62_spill] sm:$0xff] }
 0xf54   :  { %5958 = vmatprep.mubr.bf16.mxu0 %v10767_v18  ;;  %5999 = vmatprep.mubr.bf16.mxu1 %v10767_v18 }
 0xf55   :  { %7810 = vrcp.f32 %v5815_v62 }
 0xf56   :  { %5929 = vmatpush1.bf16.msra.mxu0 %v9517_v7  ;;  %5970 = vmatpush1.bf16.msra.mxu1 %v9519_v45 }
 0xf57   :  { %5930 = vmatprep.subr.bf16.mxu0 %v9523_v17  ;;  %5971 = vmatprep.subr.bf16.mxu1 %v11157_v56 }
 0xf5a   :  { %5931 = vmatpush1.bf16.msra.mxu0 %v11158_v44  ;;  %5972 = vmatpush1.bf16.msra.mxu1 %v11159_v41 }
 0xf5b   :  { %5932 = vmatprep.subr.bf16.mxu0 %v11160_v42  ;;  %5973 = vmatprep.subr.bf16.mxu1 %v11161_v24 }
 0xf5c   :  { %v7807_v35 = vpop.eup %7806 }
 0xf5d   :  { %v5824_v52 = vmul.f32 %v7807_v35, %v7803_v25  ;;  %v7809_v8 = vpop.eup %7808  ;;  %v11347_v25 = vld [vmem:[#allocation60_spill] sm:$0xff]  ;;  %v11349_v35 = vld [vmem:[#allocation95_spill] sm:$0xff] }
 0xf5e   :  { %v5823_v34 = vmul.f32 %v7809_v8, %v10258_v32  ;;  %5933 = vmatpush1.bf16.msra.mxu0 %v11163_v55  ;;  %5974 = vmatpush1.bf16.msra.mxu1 %v11164_v63 }
 0xf5f   :  { %5934 = vmatprep.subr.bf16.mxu0 %v11165_v5  ;;  %5975 = vmatprep.subr.bf16.mxu1 %v11166_v1  ;;  %v7811_v32 = vpop.eup %7810 }
 0xf60   :  { %v10348_v61 = vadd.f32 %v5824_v52, %v5823_v34  ;;  %v11350_v52 = vld [vmem:[#allocation97_spill] sm:$0xff]  ;;  %v11351_v34 = vld [vmem:[#allocation30_spill] sm:$0xff] }
 0xf62   :  { %7812 = vtanh.f32 %v10348_v61  ;;  %5935 = vmatpush1.bf16.msra.mxu0 %v9555_v58  ;;  %5976 = vmatpush1.bf16.msra.mxu1 %v9557_v4 }
 0xf63   :  { %5936 = vmatprep.subr.bf16.mxu0 %v9561_v9  ;;  %5977 = vmatprep.subr.bf16.mxu1 %v11167_v3 }
 0xf66   :  { %5937 = vmatpush1.bf16.msra.mxu0 %v11168_v26  ;;  %5978 = vmatpush1.bf16.msra.mxu1 %v9569_v22 }
 0xf67   :  { %5938 = vmatprep.subr.bf16.mxu0 %v9573_v36  ;;  %5979 = vmatprep.subr.bf16.mxu1 %v9575_v39 }
 0xf6a   :  { %5939 = vmatpush1.bf16.msra.mxu0 %v9579_v37  ;;  %5980 = vmatpush1.bf16.msra.mxu1 %v9581_v13 }
 0xf6b   :  { %5940 = vmatprep.subr.bf16.mxu0 %v9585_v46  ;;  %5981 = vmatprep.subr.bf16.mxu1 %v9587_v10 }
 0xf6c   :  { %v7813_v23 = vpop.eup %7812 }
 0xf6d   :  { %v5827_v6 = vmul.f32 %v7813_v23, %v7811_v32  ;;  %v11352_v23 = vld [vmem:[#allocation31_spill] sm:$0xff] }
 0xf6e   :  { %5941 = vmatpush1.bf16.msra.mxu0 %v9591_v20  ;;  %5982 = vmatpush1.bf16.msra.mxu1 %v9593_v29 }
 0xf6f   :  { %5829 = vst [vmem:[%s10571_s13 + $0x28] sm:$0xff] %v5827_v6  ;;  %v5925_v59 = vpack.c.bf16 %v5827_v6, %v5827_v6  ;;  %6067 = vmatprep.subr.bf16.mxu0 %v9383_v38  ;;  %6108 = vmatprep.subr.bf16.mxu1 %v9385_v48  ;;  %v11327_v38 = vld [vmem:[#allocation46_spill] sm:$0xff]  ;;  %v11328_v48 = vld [vmem:[#allocation47_spill] sm:$0xff] }
 0xf71   :  { %5959 = vmatmul.mubr.bf16.vlgmr.msra.gmra.mrb[180].mxu0 %v5925_v59  ;;  %6000 = vmatmul.mubr.bf16.vlgmr.msra.gmra.mrb[180].mxu1 %v5925_v59 }
 0xf72   :  { %6068 = vmatpush1.bf16.msra.mxu0 %v9389_v50  ;;  %6109 = vmatpush1.bf16.msra.mxu1 %v9391_v53  ;;  %v11329_v50 = vld [vmem:[#allocation51_spill] sm:$0xff]  ;;  %v11330_v53 = vld [vmem:[#allocation53_spill] sm:$0xff] }
 0xf73   :  { %6069 = vmatprep.subr.bf16.mxu0 %v9393_v27  ;;  %6110 = vmatprep.subr.bf16.mxu1 %v9395_v54  ;;  %v11331_v27 = vld [vmem:[#allocation52_spill] sm:$0xff]  ;;  %v11332_v54 = vld [vmem:[#allocation54_spill] sm:$0xff] }
 0xf74   :  { %6099 = vmatprep.mubr.bf16.mxu0 %v10767_v18  ;;  %6140 = vmatprep.mubr.bf16.mxu1 %v10767_v18 }
 0xf76   :  { %6070 = vmatpush1.bf16.msra.mxu0 %v9403_v60  ;;  %6111 = vmatpush1.bf16.msra.mxu1 %v9405_v28  ;;  %v11334_v60 = vld [vmem:[#allocation105_spill] sm:$0xff]  ;;  %v11335_v28 = vld [vmem:[#allocation104_spill] sm:$0xff] }
 0xf77   :  { %6071 = vmatprep.subr.bf16.mxu0 %v9409_v49  ;;  %6112 = vmatprep.subr.bf16.mxu1 %v9411_v15  ;;  %v11336_v49 = vld [vmem:[#allocation106_spill] sm:$0xff]  ;;  %v11337_v15 = vld [vmem:[#allocation55_spill] sm:$0xff] }
 0xf7a   :  { %6072 = vmatpush1.bf16.msra.mxu0 %v11327_v38  ;;  %6113 = vmatpush1.bf16.msra.mxu1 %v11328_v48  ;;  %v11353_v48 = vld [vmem:[#allocation32_spill] sm:$0xff] }
 0xf7b   :  { %6073 = vmatprep.subr.bf16.mxu0 %v11329_v50  ;;  %6114 = vmatprep.subr.bf16.mxu1 %v11330_v53  ;;  %v11354_v53 = vld [vmem:[#allocation33_spill] sm:$0xff] }
 0xf7e   :  { %6074 = vmatpush1.bf16.msra.mxu0 %v11331_v27  ;;  %6115 = vmatpush1.bf16.msra.mxu1 %v11332_v54 }
 0xf7f   :  { %6075 = vmatprep.subr.bf16.mxu0 %v11333_v31  ;;  %6116 = vmatprep.subr.bf16.mxu1 %v11334_v60 }
 0xf82   :  { %6076 = vmatpush1.bf16.msra.mxu0 %v11335_v28  ;;  %6117 = vmatpush1.bf16.msra.mxu1 %v11336_v49 }
 0xf83   :  { %6077 = vmatprep.subr.bf16.mxu0 %v11337_v15  ;;  %6118 = vmatprep.subr.bf16.mxu1 %v11338_v33 }
 0xf86   :  { %6078 = vmatpush1.bf16.msra.mxu0 %v11339_v14  ;;  %6119 = vmatpush1.bf16.msra.mxu1 %v11340_v0 }
 0xf87   :  { %6079 = vmatprep.subr.bf16.mxu0 %v11341_v51  ;;  %6120 = vmatprep.subr.bf16.mxu1 %v11342_v57 }
 0xf8a   :  { %6080 = vmatpush1.bf16.msra.mxu0 %v11343_v47  ;;  %6121 = vmatpush1.bf16.msra.mxu1 %v11344_v11 }
 0xf8b   :  { %6081 = vmatprep.subr.bf16.mxu0 %v11345_v43  ;;  %6122 = vmatprep.subr.bf16.mxu1 %v11346_v40 }
 0xf8e   :  { %6082 = vmatpush1.bf16.msra.mxu0 %v11347_v25  ;;  %6123 = vmatpush1.bf16.msra.mxu1 %v11348_v2 }
 0xf8f   :  { %6158 = vmatprep.subr.bf16.mxu0 %v11349_v35  ;;  %6199 = vmatprep.subr.bf16.mxu1 %v11350_v52 }
0x1024   :  { %v5869_v8 = vpop.f32.mrb[176].mxu0  ;;  %v5910_v62 = vpop.f32.mrb[176].mxu1 }
0x1025   :  { %v5917_v32 = vadd.f32 %v5869_v8, %v11351_v34  ;;  %v5919_v6 = vadd.f32 %v5910_v62, %v11352_v23  ;;  %v5871_v59 = vpop.f32.mrb[177].mxu0  ;;  %v5912_v38 = vpop.f32.mrb[177].mxu1  ;;  %v11355_v34 = vld [vmem:[#allocation73_spill] sm:$0xff]  ;;  %v11356_v23 = vld [vmem:[#allocation72_spill] sm:$0xff] }
0x1026   :  { %v5918_v50 = vadd.f32 %v5871_v59, %v11353_v48  ;;  %v5920_v27 = vadd.f32 %v5912_v38, %v11354_v53  ;;  %v5873_v54 = vpop.f32.mrb[178].mxu0  ;;  %v5914_v31 = vpop.f32.mrb[178].mxu1  ;;  %v11357_v48 = vld [vmem:[#allocation75_spill] sm:$0xff]  ;;  %v11358_v53 = vld [vmem:[#allocation82_spill] sm:$0xff] }
0x1027   :  { %v7166_v60 = vmul.f32 -1.442695, %v5917_v32  ;;  %v5874_v28 = vpop.f32.mrb[179].mxu0  ;;  %v5915_v49 = vpop.f32.mrb[179].mxu1  ;;  %v7168_v33 = vmul.f32 -1.442695, %v5919_v6 }
0x1028   :  { %v7167_v15 = vmul.f32 -1.442695, %v5918_v50 }
0x1029   :  { %7814 = vpow2.f32 %v7166_v60 }
0x102a   :  { %7816 = vpow2.f32 %v7167_v15 }
0x102b   :  { %7818 = vtanh.f32 %v5920_v27 }
0x102c   :  { %7820 = vpow2.f32 %v7168_v33 }
0x1033   :  { %v7815_v14 = vpop.eup %7814 }
0x1034   :  { %v6021_v0 = vadd.f32 1.0, %v7815_v14  ;;  %v7817_v51 = vpop.eup %7816 }
0x1035   :  { %v6022_v57 = vadd.f32 1.0, %v7817_v51  ;;  %v7819_v47 = vpop.eup %7818 }
0x1036   :  { %7822 = vrcp.f32 %v6021_v0  ;;  %v7821_v11 = vpop.eup %7820 }
0x1037   :  { %7824 = vrcp.f32 %v6022_v57  ;;  %v6023_v2 = vadd.f32 1.0, %v7821_v11 }
0x1039   :  { %7826 = vrcp.f32 %v6023_v2  ;;  %v7332_v2 = vld [vmem:[#allocation10 + $0xa0] ss:$8 sps:$4 sm:$0xff]  }
0x1040   :  { %v7823_v43 = vpop.eup %7822 }
0x1041   :  { %v6032_v40 = vmul.f32 %v7823_v43, %v7819_v47  ;;  %v7825_v25 = vpop.eup %7824 }
0x1042   :  { %v6031_v35 = vmul.f32 %v7825_v25, %v10319_v12  ;;  %v7334_v25 = vld [vmem:[#allocation10 + $0xa4] ss:$8 sps:$4 sm:$0xff]  }
0x1043   :  { %v7827_v15 = vpop.eup %7826 }
0x1044   :  { %v5960_v52 = vpop.f32.mrb[180].mxu0  ;;  %v6001_v8 = vpop.f32.mrb[180].mxu1  ;;  %v10409_v62 = vadd.f32 %v6032_v40, %v6031_v35  ;;  %v7337_v35 = vld [vmem:[#allocation10 + $0xb4] ss:$8 sps:$4 sm:$0xff]  }
0x1045   :  { %v6008_v32 = vadd.f32 %v5960_v52, %v11355_v34  ;;  %v6010_v6 = vadd.f32 %v6001_v8, %v11356_v23  ;;  %v5962_v59 = vpop.f32.mrb[181].mxu0  ;;  %v6003_v38 = vpop.f32.mrb[181].mxu1  ;;  %v7335_v52 = vld [vmem:[#allocation10 + $0xb0] ss:$8 sps:$4 sm:$0xff]   ;;  %v7340_v8 = vld [vmem:[#allocation10 + $0xc4] ss:$8 sps:$4 sm:$0xff]  }
0x1046   :  { %v6009_v50 = vadd.f32 %v5962_v59, %v11357_v48  ;;  %v6011_v27 = vadd.f32 %v6003_v38, %v11358_v53  ;;  %v5964_v54 = vpop.f32.mrb[182].mxu0  ;;  %v6005_v31 = vpop.f32.mrb[182].mxu1  ;;  %7828 = vtanh.f32 %v10409_v62  ;;  %v7338_v34 = vld [vmem:[#allocation10 + $0xc0] ss:$8 sps:$4 sm:$0xff]   ;;  %v7341_v23 = vld [vmem:[#allocation10 + $0xd0] ss:$8 sps:$4 sm:$0xff]  }
0x1047   :  { %v7169_v12 = vmul.f32 -1.442695, %v6008_v32  ;;  %v5965_v60 = vpop.f32.mrb[183].mxu0  ;;  %v6006_v28 = vpop.f32.mrb[183].mxu1  ;;  %v7171_v14 = vmul.f32 -1.442695, %v6010_v6 }
0x1048   :  { %v7170_v49 = vmul.f32 -1.442695, %v6009_v50  ;;  %v7343_v32 = vld [vmem:[#allocation10 + $0xd4] ss:$8 sps:$4 sm:$0xff]   ;;  %v7346_v6 = vld [vmem:[#allocation10 + $0xe4] ss:$8 sps:$4 sm:$0xff]  }
0x1049   :  { %7830 = vpow2.f32 %v7169_v12  ;;  %v7344_v59 = vld [vmem:[#allocation10 + $0xe0] ss:$8 sps:$4 sm:$0xff]   ;;  %v7349_v38 = vld [vmem:[#allocation10 + $0xf4] ss:$8 sps:$4 sm:$0xff]   ;;  %v7347_v48 = vld [vmem:[#allocation10 + $0xf0] ss:$8 sps:$4 sm:$0xff]  }
0x104a   :  { %7832 = vpow2.f32 %v7170_v49  ;;  %v11360_v50 = vld [vmem:[#allocation96_spill] sm:$0xff]  ;;  %v7350_v53 = vld [vmem:[%s10567_s9] sm:$0xff]   ;;  %v7353_v12 = vld [vmem:[%s10567_s9 + $0x18] sm:$0xff]  }
0x104b   :  { %7834 = vtanh.f32 %v6011_v27  ;;  %v7985_v27 = vmov 0.0   ;;  %v7351_v54 = vld [vmem:[%s10567_s9 + $0x8] sm:$0xff]   ;;  %v7352_v31 = vld [vmem:[%s10567_s9 + $0x10] sm:$0xff]   ;;  %v7354_v60 = vld [vmem:[%s10567_s9 + $0x20] sm:$0xff]  }
0x104c   :  { %7836 = vpow2.f32 %v7171_v14  ;;  %v7355_v28 = vld [vmem:[%s10567_s9 + $0x28] sm:$0xff]   ;;  %v7356_v49 = vld [vmem:[%s10567_s9 + $0x30] sm:$0xff]  }
0x1050   :  { %v7829_v33 = vpop.eup %7828 }
0x1051   :  { %v6035_v0 = vmul.f32 %v7829_v33, %v7827_v15  ;;  %v7357_v15 = vld [vmem:[%s10567_s9 + $0x38] sm:$0xff]  }
0x1053   :  { %v7831_v51 = vpop.eup %7830  ;;  %6060 = vst [vmem:[%s10571_s13 + $0x60] sm:$0xff] %v6035_v0  ;;  %v6066_v47 = vpack.c.bf16 %v6035_v0, %v6035_v0  ;;  %v11361_v0 = vld [vmem:[#allocation34_spill] sm:$0xff] }
0x1054   :  { %v6045_v57 = vadd.f32 1.0, %v7831_v51  ;;  %v7833_v11 = vpop.eup %7832 }
0x1055   :  { %v6046_v43 = vadd.f32 1.0, %v7833_v11  ;;  %6100 = vmatmul.mubr.bf16.vlgmr.msra.gmra.mrb[184].mxu0 %v6066_v47  ;;  %6141 = vmatmul.mubr.bf16.vlgmr.msra.gmra.mrb[184].mxu1 %v6066_v47 }
0x1056   :  { %7838 = vrcp.f32 %v6045_v57  ;;  %6159 = vmatpush1.bf16.msra.mxu0 %v9499_v30  ;;  %6200 = vmatpush1.bf16.msra.mxu1 %v9501_v16  ;;  %v7835_v30 = vpop.eup %7834  ;;  %v11362_v57 = vld [vmem:[#allocation35_spill] sm:$0xff] }
0x1057   :  { %7840 = vrcp.f32 %v6046_v43  ;;  %6160 = vmatprep.subr.bf16.mxu0 %v9509_v21  ;;  %6201 = vmatprep.subr.bf16.mxu1 %v9511_v19  ;;  %v7837_v40 = vpop.eup %7836 }
0x1058   :  { %6190 = vmatprep.mubr.bf16.mxu0 %v10767_v18  ;;  %6231 = vmatprep.mubr.bf16.mxu1 %v10767_v18  ;;  %v6047_v19 = vadd.f32 1.0, %v7837_v40 }
0x105a   :  { %6161 = vmatpush1.bf16.msra.mxu0 %v9517_v7  ;;  %6202 = vmatpush1.bf16.msra.mxu1 %v9519_v45  ;;  %7842 = vrcp.f32 %v6047_v19 }
0x105b   :  { %6162 = vmatprep.subr.bf16.mxu0 %v9523_v17  ;;  %6203 = vmatprep.subr.bf16.mxu1 %v11157_v56  ;;  %v7316_v56 = vld [vmem:[#allocation10 + $0x44] ss:$8 sps:$4 sm:$0xff]  }
0x105e   :  { %6163 = vmatpush1.bf16.msra.mxu0 %v11158_v44  ;;  %6204 = vmatpush1.bf16.msra.mxu1 %v11159_v41  ;;  %v7314_v44 = vld [vmem:[#allocation10 + $0x40] ss:$8 sps:$4 sm:$0xff]   ;;  %v7319_v41 = vld [vmem:[#allocation10 + $0x54] ss:$8 sps:$4 sm:$0xff]  }
0x105f   :  { %6164 = vmatprep.subr.bf16.mxu0 %v11160_v42  ;;  %6205 = vmatprep.subr.bf16.mxu1 %v11161_v24  ;;  %v7317_v42 = vld [vmem:[#allocation10 + $0x50] ss:$8 sps:$4 sm:$0xff]   ;;  %v7322_v24 = vld [vmem:[#allocation10 + $0x64] ss:$8 sps:$4 sm:$0xff]  }
0x1060   :  { %v7839_v16 = vpop.eup %7838 }
0x1061   :  { %v6056_v18 = vmul.f32 %v7839_v16, %v7835_v30  ;;  %v7841_v21 = vpop.eup %7840  ;;  %v11363_v30 = vld [vmem:[#allocation36_spill] sm:$0xff]  ;;  %v11364_v16 = vld [vmem:[#allocation37_spill] sm:$0xff] }
0x1062   :  { %v6055_v7 = vmul.f32 %v7841_v21, %v10348_v61  ;;  %6165 = vmatpush1.bf16.msra.mxu0 %v11163_v55  ;;  %6206 = vmatpush1.bf16.msra.mxu1 %v11164_v63  ;;  %v7320_v55 = vld [vmem:[#allocation10 + $0x60] ss:$8 sps:$4 sm:$0xff]   ;;  %v7325_v63 = vld [vmem:[#allocation10 + $0x74] ss:$8 sps:$4 sm:$0xff]   ;;  %v7329_v61 = vld [vmem:[#allocation10 + $0x90] ss:$8 sps:$4 sm:$0xff]  }
0x1063   :  { %6166 = vmatprep.subr.bf16.mxu0 %v11165_v5  ;;  %6207 = vmatprep.subr.bf16.mxu1 %v11166_v1  ;;  %v7323_v5 = vld [vmem:[#allocation10 + $0x70] ss:$8 sps:$4 sm:$0xff]   ;;  %v7328_v1 = vld [vmem:[#allocation10 + $0x84] ss:$8 sps:$4 sm:$0xff]  }
0x1064   :  { %v10438_v45 = vadd.f32 %v6056_v18, %v6055_v7  ;;  %v7843_v17 = vpop.eup %7842 }
0x1066   :  { %7844 = vtanh.f32 %v10438_v45  ;;  %6167 = vmatpush1.bf16.msra.mxu0 %v9555_v58  ;;  %6208 = vmatpush1.bf16.msra.mxu1 %v9557_v4  ;;  %v7304_v58 = vld [vmem:[#allocation10 + $0x4] ss:$8 sps:$4 sm:$0xff]  }
0x1067   :  { %6168 = vmatprep.subr.bf16.mxu0 %v9561_v9  ;;  %6209 = vmatprep.subr.bf16.mxu1 %v11167_v3  ;;  %v7326_v3 = vld [vmem:[#allocation10 + $0x80] ss:$8 sps:$4 sm:$0xff]  }
0x106a   :  { %6169 = vmatpush1.bf16.msra.mxu0 %v11168_v26  ;;  %6210 = vmatpush1.bf16.msra.mxu1 %v9569_v22  ;;  %v7302_v22 = vld [vmem:[#allocation10] ss:$8 sps:$4 sm:$0xff]   ;;  %v7331_v26 = vld [vmem:[#allocation10 + $0x94] ss:$8 sps:$4 sm:$0xff]  }
0x106b   :  { %6170 = vmatprep.subr.bf16.mxu0 %v9573_v36  ;;  %6211 = vmatprep.subr.bf16.mxu1 %v9575_v39  ;;  %v7307_v39 = vld [vmem:[#allocation10 + $0x14] ss:$8 sps:$4 sm:$0xff]  }
0x106e   :  { %6171 = vmatpush1.bf16.msra.mxu0 %v9579_v37  ;;  %6212 = vmatpush1.bf16.msra.mxu1 %v9581_v13  ;;  %v11359_v37 = vld [vmem:[#allocation68_spill] sm:$0xff]  ;;  %v7305_v13 = vld [vmem:[#allocation10 + $0x10] ss:$8 sps:$4 sm:$0xff]  }
0x106f   :  { %6172 = vmatprep.subr.bf16.mxu0 %v9585_v46  ;;  %6213 = vmatprep.subr.bf16.mxu1 %v9587_v10  ;;  %v7310_v46 = vld [vmem:[#allocation10 + $0x24] ss:$8 sps:$4 sm:$0xff]   ;;  %v7311_v10 = vld [vmem:[#allocation10 + $0x30] ss:$8 sps:$4 sm:$0xff]  }
0x1070   :  { %v7845_v4 = vpop.eup %7844 }
0x1071   :  { %v6059_v9 = vmul.f32 %v7845_v4, %v7843_v17 }
0x1072   :  { %6173 = vmatpush1.bf16.msra.mxu0 %v9591_v20  ;;  %6214 = vmatpush1.bf16.msra.mxu1 %v9593_v29  ;;  %v7308_v20 = vld [vmem:[#allocation10 + $0x20] ss:$8 sps:$4 sm:$0xff]   ;;  %v7313_v29 = vld [vmem:[#allocation10 + $0x34] ss:$8 sps:$4 sm:$0xff]  }
0x1073   :  { %6500 = vmatprep.subr.bf16.mxu0 %v7304_v58  ;;  %6061 = vst [vmem:[%s10571_s13 + $0x18] sm:$0xff] %v6059_v9  ;;  %v6157_v36 = vpack.c.bf16 %v6059_v9, %v6059_v9  ;;  %7247 = vmatprep.subr.bf16.mxu1 %v7985_v27 }
0x1075   :  { %6191 = vmatmul.mubr.bf16.vlgmr.msra.gmra.mrb[188].mxu0 %v6157_v36  ;;  %6232 = vmatmul.mubr.bf16.vlgmr.msra.gmra.mrb[188].mxu1 %v6157_v36 }
0x1076   :  { %6501 = vmatpush1.bf16.msra.mxu0 %v7302_v22  ;;  %6532 = vmatprep.mubr.bf16.mxu0 %v11359_v37 }
0x1077   :  { %6502 = vmatprep.subr.bf16.mxu0 %v7307_v39  ;;  %7248 = vmatpush3.bf16.msra.mxu1 %v7350_v53 }
0x1078   :  { %7249 = vmatprep.subr.bf16.mxu1 %v7985_v27  ;;  %7263 = vmatprep.mubr.msk.bf16.mxu1 %vm7986_vm2, %v7985_v27 }
0x107a   :  { %6503 = vmatpush1.bf16.msra.mxu0 %v7305_v13 }
0x107b   :  { %6504 = vmatprep.subr.bf16.mxu0 %v7310_v46  ;;  %7250 = vmatpush3.bf16.msra.mxu1 %v7351_v54 }
0x107c   :  { %7251 = vmatprep.subr.bf16.mxu1 %v7985_v27 }
0x107e   :  { %6505 = vmatpush1.bf16.msra.mxu0 %v7308_v20 }
0x107f   :  { %6506 = vmatprep.subr.bf16.mxu0 %v7313_v29  ;;  %7252 = vmatpush3.bf16.msra.mxu1 %v7352_v31 }
0x1080   :  { %7253 = vmatprep.subr.bf16.mxu1 %v7985_v27 }
0x1082   :  { %6507 = vmatpush1.bf16.msra.mxu0 %v7311_v10 }
0x1083   :  { %6508 = vmatprep.subr.bf16.mxu0 %v7316_v56  ;;  %7254 = vmatpush3.bf16.msra.mxu1 %v7353_v12 }
0x1084   :  { %7255 = vmatprep.subr.bf16.mxu1 %v7985_v27 }
0x1086   :  { %6509 = vmatpush1.bf16.msra.mxu0 %v7314_v44 }
0x1087   :  { %6510 = vmatprep.subr.bf16.mxu0 %v7319_v41  ;;  %7256 = vmatpush3.bf16.msra.mxu1 %v7354_v60 }
0x1088   :  { %7257 = vmatprep.subr.bf16.mxu1 %v7985_v27 }
0x108a   :  { %6511 = vmatpush1.bf16.msra.mxu0 %v7317_v42 }
0x108b   :  { %6512 = vmatprep.subr.bf16.mxu0 %v7322_v24  ;;  %7258 = vmatpush3.bf16.msra.mxu1 %v7355_v28 }
0x108c   :  { %7259 = vmatprep.subr.bf16.mxu1 %v7985_v27 }
0x108e   :  { %6513 = vmatpush1.bf16.msra.mxu0 %v7320_v55  ;;  %v11365_v55 = vld [vmem:[#allocation38_spill] sm:$0xff] }
0x108f   :  { %6514 = vmatprep.subr.bf16.mxu0 %v7325_v63  ;;  %7260 = vmatpush3.bf16.msra.mxu1 %v7356_v49 }
0x1090   :  { %7261 = vmatprep.subr.bf16.mxu1 %v7985_v27 }
0x1092   :  { %6515 = vmatpush1.bf16.msra.mxu0 %v7323_v5  ;;  %v11366_v5 = vld [vmem:[#allocation39_spill] sm:$0xff] }
0x1093   :  { %6516 = vmatprep.subr.bf16.mxu0 %v7328_v1  ;;  %7262 = vmatpush3.bf16.msra.mxu1 %v7357_v15 }
0x1094   :  { %7267 = vmatprep.subr.bf16.mxu1 %v7985_v27 }
0x1096   :  { %6517 = vmatpush1.bf16.msra.mxu0 %v7326_v3 }
0x1097   :  { %6518 = vmatprep.subr.bf16.mxu0 %v7331_v26 }
0x109a   :  { %6519 = vmatpush1.bf16.msra.mxu0 %v7329_v61  ;;  %v11367_v61 = vld [vmem:[#allocation40_spill] sm:$0xff] }
0x109b   :  { %6520 = vmatprep.subr.bf16.mxu0 %v7334_v25 }
0x109e   :  { %6521 = vmatpush1.bf16.msra.mxu0 %v7332_v2  ;;  %v11368_v2 = vld [vmem:[#allocation71_spill] sm:$0xff] }
0x109f   :  { %6522 = vmatprep.subr.bf16.mxu0 %v7337_v35 }
0x10a2   :  { %6523 = vmatpush1.bf16.msra.mxu0 %v7335_v52 }
0x10a3   :  { %6524 = vmatprep.subr.bf16.mxu0 %v7340_v8 }
0x10a6   :  { %6525 = vmatpush1.bf16.msra.mxu0 %v7338_v34 }
0x10a7   :  { %6526 = vmatprep.subr.bf16.mxu0 %v7343_v32 }
0x10aa   :  { %6527 = vmatpush1.bf16.msra.mxu0 %v7341_v23 }
0x10ab   :  { %6528 = vmatprep.subr.bf16.mxu0 %v7346_v6 }
0x10ae   :  { %6529 = vmatpush1.bf16.msra.mxu0 %v7344_v59 }
0x10af   :  { %6530 = vmatprep.subr.bf16.mxu0 %v7349_v38 }
0x10b2   :  { %6531 = vmatpush1.bf16.msra.mxu0 %v7347_v48 }
0x10b5   :  { %6533 = vmatmul.mubr.bf16.vlgmr.msra.gmra.mrb[192].mxu0 %v11360_v50 }
0x1128   :  { %v6101_v33 = vpop.f32.mrb[184].mxu0  ;;  %v6142_v14 = vpop.f32.mrb[184].mxu1 }
0x1129   :  { %v6149_v51 = vadd.f32 %v6101_v33, %v11361_v0  ;;  %v6151_v47 = vadd.f32 %v6142_v14, %v11362_v57  ;;  %v6103_v11 = vpop.f32.mrb[185].mxu0  ;;  %v6144_v43 = vpop.f32.mrb[185].mxu1 }
0x112a   :  { %v6150_v40 = vadd.f32 %v6103_v11, %v11363_v30  ;;  %v6152_v18 = vadd.f32 %v6144_v43, %v11364_v16  ;;  %v6105_v21 = vpop.f32.mrb[186].mxu0  ;;  %v6146_v19 = vpop.f32.mrb[186].mxu1  ;;  %v6328_v11 = vld [vmem:[%s10566_s8] sm:$0x3]  ;;  %v11369_v43 = vld [vmem:[#allocation49_spill] sm:$0xff] }
0x112b   :  { %v7172_v7 = vmul.f32 -1.442695, %v6149_v51  ;;  %v6106_v17 = vpop.f32.mrb[187].mxu0  ;;  %v6147_v58 = vpop.f32.mrb[187].mxu1  ;;  %v7174_v9 = vmul.f32 -1.442695, %v6151_v47  ;;  %v6333_v30 = vrot.slane %v6328_v11, %v11369_v43 }
0x112c   :  { %v7173_v4 = vmul.f32 -1.442695, %v6150_v40  ;;  %v7358_v21 = vld [vmem:[%s10569_s11] sm:$0xff]   ;;  %v7359_v17 = vld [vmem:[%s10569_s11 + $0x8] sm:$0xff]   ;;  %v7360_v58 = vld [vmem:[%s10569_s11 + $0x10] sm:$0xff]  }
0x112d   :  { %7846 = vpow2.f32 %v7172_v7 }
0x112e   :  { %7848 = vpow2.f32 %v7173_v4  ;;  %v7361_v4 = vld [vmem:[%s10569_s11 + $0x18] sm:$0xff]  }
0x112f   :  { %7850 = vtanh.f32 %v6152_v18 }
0x1130   :  { %7852 = vpow2.f32 %v7174_v9  ;;  %v7362_v9 = vld [vmem:[%s10569_s11 + $0x20] sm:$0xff]  }
0x1137   :  { %v7847_v22 = vpop.eup %7846 }
0x1138   :  { %v6253_v36 = vadd.f32 1.0, %v7847_v22  ;;  %v7849_v39 = vpop.eup %7848  ;;  %v7363_v22 = vld [vmem:[%s10569_s11 + $0x28] sm:$0xff]  }
0x1139   :  { %v6254_v37 = vadd.f32 1.0, %v7849_v39  ;;  %v7851_v13 = vpop.eup %7850  ;;  %v11370_v39 = vld [vmem:[#allocation50_spill] sm:$0xff] }
0x113a   :  { %7854 = vrcp.f32 %v6253_v36  ;;  %v7853_v46 = vpop.eup %7852  ;;  %v7364_v36 = vld [vmem:[%s10569_s11 + $0x30] sm:$0xff]  }
0x113b   :  { %7856 = vrcp.f32 %v6254_v37  ;;  %v6255_v56 = vadd.f32 1.0, %v7853_v46  ;;  %v6337_v37 = vrot.slane %v6328_v11, %v11370_v39 }
0x113d   :  { %7858 = vrcp.f32 %v6255_v56 }
0x1144   :  { %v7855_v20 = vpop.eup %7854 }
0x1145   :  { %v6264_v29 = vmul.f32 %v7855_v20, %v7851_v13  ;;  %v7857_v10 = vpop.eup %7856  ;;  %v7365_v13 = vld [vmem:[%s10569_s11 + $0x38] sm:$0xff]  }
0x1146   :  { %v6263_v44 = vmul.f32 %v7857_v10, %v10409_v62 }
0x1147   :  { %v7859_v6 = vpop.eup %7858 }
0x1148   :  { %v6192_v41 = vpop.f32.mrb[188].mxu0  ;;  %v6233_v42 = vpop.f32.mrb[188].mxu1  ;;  %v6265_v24 = vadd.f32 %v6264_v29, %v6263_v44  ;;  %v7210_v29 = vld [vmem:[%s10568_s10] ss:$0 sm:$0xff] }
0x1149   :  { %v6240_v63 = vadd.f32 %v6192_v41, %v11365_v55  ;;  %v6242_v1 = vadd.f32 %v6233_v42, %v11366_v5  ;;  %v6194_v3 = vpop.f32.mrb[189].mxu0  ;;  %v6235_v26 = vpop.f32.mrb[189].mxu1 }
0x114a   :  { %v6241_v25 = vadd.f32 %v6194_v3, %v11367_v61  ;;  %v6243_v35 = vadd.f32 %v6235_v26, %v11368_v2  ;;  %v6196_v52 = vpop.f32.mrb[190].mxu0  ;;  %v6237_v8 = vpop.f32.mrb[190].mxu1  ;;  %7860 = vtanh.f32 %v6265_v24 }
0x114b   :  { %v7175_v34 = vmul.f32 -1.442695, %v6240_v63  ;;  %v6197_v32 = vpop.f32.mrb[191].mxu0  ;;  %v6238_v62 = vpop.f32.mrb[191].mxu1  ;;  %v7177_v38 = vmul.f32 -1.442695, %v6242_v1 }
0x114c   :  { %v7176_v23 = vmul.f32 -1.442695, %v6241_v25 }
0x114d   :  { %7862 = vpow2.f32 %v7175_v34 }
0x114e   :  { %7864 = vpow2.f32 %v7176_v23 }
0x114f   :  { %7866 = vtanh.f32 %v6243_v35 }
0x1150   :  { %7868 = vpow2.f32 %v7177_v38 }
0x1154   :  { %v7861_v59 = vpop.eup %7860 }
0x1155   :  { %v6267_v48 = vmul.f32 %v7861_v59, %v7859_v6 }
0x1157   :  { %v7863_v50 = vpop.eup %7862  ;;  %6292 = vst [vmem:[%s10571_s13 + $0x70] sm:$0xff] %v6267_v48 }
0x1158   :  { %v6277_v53 = vadd.f32 1.0, %v7863_v50  ;;  %v7865_v54 = vpop.eup %7864 }
0x1159   :  { %v6278_v31 = vadd.f32 1.0, %v7865_v54  ;;  %v7867_v12 = vpop.eup %7866 }
0x115a   :  { %7870 = vrcp.f32 %v6277_v53  ;;  %v7869_v60 = vpop.eup %7868 }
0x115b   :  { %7872 = vrcp.f32 %v6278_v31  ;;  %v6279_v33 = vadd.f32 1.0, %v7869_v60 }
0x115d   :  { %7874 = vrcp.f32 %v6279_v33 }
0x1164   :  { %v7871_v28 = vpop.eup %7870 }
0x1165   :  { %v6288_v49 = vmul.f32 %v7871_v28, %v7867_v12  ;;  %v7873_v15 = vpop.eup %7872 }
0x1166   :  { %v6287_v14 = vmul.f32 %v7873_v15, %v10438_v45 }
0x1167   :  { %v7875_v51 = vpop.eup %7874 }
0x1168   :  { %v6289_v0 = vadd.f32 %v6288_v49, %v6287_v14 }
0x116a   :  { %7876 = vtanh.f32 %v6289_v0 }
0x1174   :  { %v7877_v57 = vpop.eup %7876 }
0x1175   :  { %v6291_v47 = vmul.f32 %v7877_v57, %v7875_v51 }
0x1177   :  { %6293 = vst [vmem:[%s10571_s13 + $0x8] sm:$0xff] %v6291_v47 }
0x1188   :  { %v6534_v40 = vpop.f32.mrb[192].mxu0 }
0x1189   :  { %v6535_v16 = vadd.f32 %v6534_v40, %v6333_v30  ;;  %v6536_v18 = vpop.f32.mrb[193].mxu0 }
0x118a   :  { %v6538_v45 = vpop.f32.mrb[194].mxu0  ;;  %v6537_v46 = vadd.f32 %v6536_v18, %v6337_v37 }
0x118b   :  { %v6541_v19 = vpack.c.bf16 %v6535_v16, %v6535_v16  ;;  %v6539_v7 = vpop.f32.mrb[195].mxu0 }
0x118c   :  { %v6542_v20 = vpack.c.bf16 %v6537_v46, %v6537_v46 }
0x118d   :  { %7264 = vmatmul.mubr.bf16.vlgmr.msra.gmra.mrb[192].mxu1 %v6541_v19 }
0x118e   :  { %7268 = vmatpush3.bf16.msra.mxu1 %v7358_v21  ;;  %7283 = vmatprep.mubr.msk.bf16.mxu1 %vm7986_vm2, %v7985_v27 }
0x118f   :  { %7269 = vmatprep.subr.bf16.mxu1 %v7985_v27 }
0x1192   :  { %7270 = vmatpush3.bf16.msra.mxu1 %v7359_v17 }
0x1193   :  { %7271 = vmatprep.subr.bf16.mxu1 %v7985_v27 }
0x1196   :  { %7272 = vmatpush3.bf16.msra.mxu1 %v7360_v58 }
0x1197   :  { %7273 = vmatprep.subr.bf16.mxu1 %v7985_v27 }
0x119a   :  { %7274 = vmatpush3.bf16.msra.mxu1 %v7361_v4 }
0x119b   :  { %7275 = vmatprep.subr.bf16.mxu1 %v7985_v27 }
0x119e   :  { %7276 = vmatpush3.bf16.msra.mxu1 %v7362_v9 }
0x119f   :  { %7277 = vmatprep.subr.bf16.mxu1 %v7985_v27 }
0x11a2   :  { %7278 = vmatpush3.bf16.msra.mxu1 %v7363_v22 }
0x11a3   :  { %7279 = vmatprep.subr.bf16.mxu1 %v7985_v27 }
0x11a6   :  { %7280 = vmatpush3.bf16.msra.mxu1 %v7364_v36 }
0x11a7   :  { %7281 = vmatprep.subr.bf16.mxu1 %v7985_v27  ;;  %v7220_v27 = vld [vmem:[#allocation4] ss:$0 sm:$0xff] }
0x11aa   :  { %7282 = vmatpush3.bf16.msra.mxu1 %v7365_v13 }
0x11ad   :  { %7284 = vmatmul.mubr.bf16.vlgmr.msra.gmra.mrb[196].mxu1 %v6542_v20 }
0x1260   :  { %v6648_v10 = vpop.f32.mrb[192].mxu1 }
0x1261   :  { %v6649_v56 = vadd.f32 %v7210_v29, %v6648_v10  ;;  %v7265_v44 = vpop.f32.mrb[193].mxu1 }
0x1262   :  { %v6651_v41 = vpop.f32.mrb[194].mxu1 }
0x1263   :  { %v7219_v42 = vmul.f32 -1.442695, %v6649_v56  ;;  %v7266_v24 = vpop.f32.mrb[195].mxu1 }
0x1265   :  { %7878 = vpow2.f32 %v7219_v42 }
0x126f   :  { %v7879_v55 = vpop.eup %7878 }
0x1270   :  { %v6657_v63 = vadd.f32 1.0, %v7879_v55 }
0x1272   :  { %7880 = vrcp.f32 %v6657_v63 }
0x127c   :  { %v7881_v5 = vpop.eup %7880 }
0x127d   :  { %6661 = vst.msk [vmem:[%s10573_s15] sm:$0xff] %vm6660_vm3, %v7881_v5 }
0x1280   :  { %v6767_v1 = vpop.f32.mrb[196].mxu1 }
0x1281   :  { %v6768_v3 = vadd.f32 %v7220_v27, %v6767_v1  ;;  %v7285_v26 = vpop.f32.mrb[197].mxu1 }
0x1282   :  { %v6770_v61 = vpop.f32.mrb[198].mxu1 }
0x1283   :  { %6774 = vst.msk [vmem:[%s10574_s16] sm:$0xff] %vm6773_vm4, %v6768_v3  ;;  %v7286_v25 = vpop.f32.mrb[199].mxu1 }
0x1284   :  { %6791 = vsyncpa [#allocation6], 1 }
0x1285   :  { %6792 = vsyncpa [#allocation8], 1 }
0x1286   :  { %6793 = vsyncpa [#allocation11], 1 }

</bundles_post_ra>
